<compile_context>
chip_gen: v7x
topology: tpu7x:2x2x1
jax: 0.10.0
libtpu: 0.0.40
codegen_flags: <defaults>
</compile_context>

<pallas_src>
import functools

import jax
import jax.numpy as jnp
from jax import lax
from jax.experimental import pallas as pl
from jax.experimental.pallas import tpu as pltpu

# ---- module constants (small-shape instantiation) ----
N_EMBD = 192
NUM_HEADS = 6
HEAD_SIZE = N_EMBD // NUM_HEADS   # 32
BATCH = 2
SEQ = 64                          # T <= block_size (128)

NEG_INF = -1e30                   # plain Python float -> jaxpr literal


def _mha_kernel(x_ref, wqkv_ref, wp_ref, bp_ref, o_ref, qkv_ref, attn_ref,
                *, num_heads, head_size, seq_len, n_embd, batches_per_block):
    """Fused QKV -> per-(batch,head) masked softmax attention -> one output proj."""
    H, hs, T, C, nb = num_heads, head_size, seq_len, n_embd, batches_per_block
    M = nb * T

    # ---- fused QKV projection: one lane-dense (M,C)@(C,3*H*hs) MXU launch ----
    x2d = x_ref[...].reshape(M, C)
    qkv_ref[...] = jnp.dot(x2d, wqkv_ref[...], preferred_element_type=jnp.float32)

    # Additive causal mask, built once and hoisted out of the head loop.
    row = lax.broadcasted_iota(jnp.int32, (T, T), 0)   # query index i
    col = lax.broadcasted_iota(jnp.int32, (T, T), 1)   # key   index j
    neg_mask = jnp.where(col > row, NEG_INF, 0.0).astype(jnp.float32)

    k_off = H * hs
    v_off = 2 * H * hs

    for b in range(nb):                      # static unroll (nb <= B = 2)
        r0 = b * T
        for h in range(H):                   # static unroll (H = 6)
            c0 = h * hs
            # Per-head loads from the VMEM scratch (bounded live ranges; the
            # load path absorbs the 32-lane offsets).
            q_h = qkv_ref[pl.ds(r0, T), pl.ds(c0, hs)]           # scale pre-folded
            k_h = qkv_ref[pl.ds(r0, T), pl.ds(k_off + c0, hs)]
            v_h = qkv_ref[pl.ds(r0, T), pl.ds(v_off + c0, hs)]

            # q @ k^T without an explicit transpose (contract last dims).
            s = lax.dot_general(q_h, k_h, (((1,), (1,)), ((), ())),
                                preferred_element_type=jnp.float32)   # (T, T)
            s = s + neg_mask

            # F.softmax(..., dim=1): the *query* axis == axis 0 of (T_q, T_k).
            m = jnp.max(s, axis=0, keepdims=True)
            e = jnp.exp(s - m)
            p = e * pl.reciprocal(jnp.sum(e, axis=0, keepdims=True), approx=False)

            # Store this head's output at its static lane offset; the lane
            # concat happens in VMEM, not in registers.
            attn_ref[pl.ds(r0, T), pl.ds(c0, hs)] = jnp.dot(
                p, v_h, preferred_element_type=jnp.float32)

    # ---- single lane-dense K=192 output projection + bias ----
    out = jnp.dot(attn_ref[...], wp_ref[...], preferred_element_type=jnp.float32)
    out = out + bp_ref[...]                                  # (M,C) + (1,C)
    o_ref[...] = out.reshape(nb, T, C).astype(o_ref.dtype)


def _num_tensorcores_per_chip():
    """Best-effort detection: v7x has 2 TCs/chip; v5e/v6e have 1."""
    try:
        kind = jax.devices()[0].device_kind.lower()
        if "v7" in kind or "tpu7" in kind:
            return 2
    except Exception:
        pass
    return 1


def multihead_attention(x, wq, wk, wv, wp, bp, *, fuse_batch=None):
    """x: (B, T, C); wq/wk/wv: (H, C, hs); wp: (C, C); bp: (1, C)."""
    B, T, C = x.shape
    H, _, hs = wq.shape

    if fuse_batch is None:
        # Single-TC chips: one grid step over the whole batch (M = B*T rows).
        # Multi-TC (v7x): grid=(B,) parallel -> one batch element per core.
        fuse_batch = (_num_tensorcores_per_chip() == 1) or (B == 1)

    # Layout plumbing (one-off, outside the kernel): fuse per-head projection
    # weights into a single (C, 3*H*hs) matrix, folding the softmax scale
    # (C**-0.5, faithful to the module) into the Q columns for free.
    scale = float(C) ** -0.5
    def _flat(w):                            # (H, C, hs) -> (C, H*hs)
        return jnp.transpose(w, (1, 0, 2)).reshape(C, H * hs)
    w_qkv = jnp.concatenate([_flat(wq) * scale, _flat(wk), _flat(wv)], axis=1)

    nb = B if fuse_batch else 1
    rows = nb * T

    kernel = functools.partial(_mha_kernel, num_heads=H, head_size=hs,
                               seq_len=T, n_embd=C, batches_per_block=nb)

    return pl.pallas_call(
        kernel,
        out_shape=jax.ShapeDtypeStruct((B, T, C), x.dtype),
        grid_spec=pltpu.PrefetchScalarGridSpec(
            num_scalar_prefetch=0,
            grid=(B // nb,),
            in_specs=[
                pl.BlockSpec((nb, T, C), lambda b: (b, 0, 0)),     # x
                pl.BlockSpec(w_qkv.shape, lambda b: (0, 0)),       # fused W_qkv
                pl.BlockSpec(wp.shape, lambda b: (0, 0)),          # W_proj (C,C)
                pl.BlockSpec(bp.shape, lambda b: (0, 0)),          # bias   (1,C)
            ],
            out_specs=pl.BlockSpec((nb, T, C), lambda b: (b, 0, 0)),
            scratch_shapes=[
                pltpu.VMEM((rows, 3 * H * hs), jnp.float32),   # qkv result
                pltpu.VMEM((rows, H * hs), jnp.float32),       # head outputs
            ],
        ),
        compiler_params=pltpu.CompilerParams(
            dimension_semantics=("arbitrary",) if fuse_batch else ("parallel",)),
    )(x, w_qkv, wp, bp)


def multihead_reference(x, wq, wk, wv, wp, bp):
    """Pure-JAX reference mirroring the PyTorch forward."""
    B, T, C = x.shape
    H = wq.shape[0]
    scale = C ** -0.5
    tril = jnp.tril(jnp.ones((T, T)))
    outs = []
    for h in range(H):
        q = x @ wq[h]
        k = x @ wk[h]
        v = x @ wv[h]
        w = jnp.einsum('btd,bsd->bts', q, k) * scale
        w = jnp.where(tril[None, :, :] == 0, -jnp.inf, w)
        w = jax.nn.softmax(w, axis=1)          # dim=1, matching the module
        outs.append(jnp.einsum('bts,bsd->btd', w, v))
    cat = jnp.concatenate(outs, axis=-1)
    return cat @ wp + bp[0]


if __name__ == "__main__":
    key = jax.random.PRNGKey(0)
    kx, kq, kk, kv, kp, kb = jax.random.split(key, 6)

    x = jax.random.normal(kx, (BATCH, SEQ, N_EMBD), dtype=jnp.float32)
    wq = 0.02 * jax.random.normal(kq, (NUM_HEADS, N_EMBD, HEAD_SIZE), jnp.float32)
    wk = 0.02 * jax.random.normal(kk, (NUM_HEADS, N_EMBD, HEAD_SIZE), jnp.float32)
    wv = 0.02 * jax.random.normal(kv, (NUM_HEADS, N_EMBD, HEAD_SIZE), jnp.float32)
    wp = 0.02 * jax.random.normal(kp, (N_EMBD, N_EMBD), jnp.float32)
    bp = 0.02 * jax.random.normal(kb, (1, N_EMBD), jnp.float32)

    out = multihead_attention(x, wq, wk, wv, wp, bp)
    out = jax.block_until_ready(out)

    ref = multihead_reference(x, wq, wk, wv, wp, bp)
    assert out.shape == (BATCH, SEQ, N_EMBD)
    assert jnp.allclose(out, ref, atol=1e-4, rtol=1e-4), "mismatch vs reference"

    print("KERNEL_OK")
</pallas_src>

<mosaic_0001>
module attributes {stable_mosaic.version = 11 : i64} {
  func.func @_mha_kernel(%arg0: i32, %arg1: memref<2x64x192xf32, #tpu.memory_space<vmem>>, %arg2: memref<192x576xf32, #tpu.memory_space<vmem>>, %arg3: memref<192x192xf32, #tpu.memory_space<vmem>>, %arg4: memref<1x192xf32, #tpu.memory_space<vmem>>, %arg5: memref<2x64x192xf32, #tpu.memory_space<vmem>>, %arg6: memref<128x576xf32, #tpu.memory_space<vmem>>, %arg7: memref<128x192xf32, #tpu.memory_space<vmem>>) attributes {dimension_semantics = [#tpu.dimension_semantics<arbitrary>], iteration_bounds = array<i64: 1>, scalar_prefetch = 0 : i64, scratch_operands = 2 : i64, tpu.core_type = #tpu.core_type<tc>, window_params = [{transform_indices = @transform_0, window_bounds = array<i64: 2, 64, 192>}, {pipeline_mode = #tpu.pipeline_mode<synchronous>, transform_indices = @transform_1, window_bounds = array<i64: 192, 576>}, {pipeline_mode = #tpu.pipeline_mode<synchronous>, transform_indices = @transform_2, window_bounds = array<i64: 192, 192>}, {pipeline_mode = #tpu.pipeline_mode<synchronous>, transform_indices = @transform_3, window_bounds = array<i64: 1, 192>}, {transform_indices = @transform_4, window_bounds = array<i64: 2, 64, 192>}]} {
    %c0 = arith.constant 0 : index
    %c0_0 = arith.constant 0 : index
    %c0_1 = arith.constant 0 : index
    %0 = vector.load %arg1[%c0, %c0_0, %c0_1] : memref<2x64x192xf32, #tpu.memory_space<vmem>>, vector<2x64x192xf32>
    %1 = vector.shape_cast %0 : vector<2x64x192xf32> to vector<128x192xf32>
    %c0_2 = arith.constant 0 : index
    %c0_3 = arith.constant 0 : index
    %2 = vector.load %arg2[%c0_2, %c0_3] : memref<192x576xf32, #tpu.memory_space<vmem>>, vector<192x576xf32>
    %cst = arith.constant dense<0.000000e+00> : vector<128x576xf32>
    %3 = tpu.matmul %1, %2, %cst {dimension_numbers = #tpu.dot_dimension_numbers<[1], [0], [0], [1], [0, 0, 1, 1], [], []>} : vector<128x192xf32>, vector<192x576xf32>, vector<128x576xf32> -> vector<128x576xf32>
    %c0_4 = arith.constant 0 : index
    %c0_5 = arith.constant 0 : index
    %4 = vector.load %arg6[%c0_4, %c0_5] : memref<128x576xf32, #tpu.memory_space<vmem>>, vector<128x576xf32>
    tpu.vector_store %arg6[%c0_4, %c0_5], %3 {strides = array<i32>} : memref<128x576xf32, #tpu.memory_space<vmem>>, vector<128x576xf32>,
    %5 = tpu.iota {dimensions = array<i32: 0>} : vector<64x64xi32>
    %6 = tpu.iota {dimensions = array<i32: 1>} : vector<64x64xi32>
    %7 = arith.cmpi sgt, %6, %5 : vector<64x64xi32>
    %cst_6 = arith.constant -1.000000e+30 : f32
    %cst_7 = arith.constant 0.000000e+00 : f32
    %8 = vector.broadcast %cst_6 : f32 to vector<64x64xf32>
    %9 = vector.broadcast %cst_7 : f32 to vector<64x64xf32>
    %10 = arith.select %7, %8, %9 : vector<64x64xi1>, vector<64x64xf32>
    %c0_8 = arith.constant 0 : index
    %c0_9 = arith.constant 0 : index
    %11 = vector.load %arg6[%c0_8, %c0_9] : memref<128x576xf32, #tpu.memory_space<vmem>>, vector<64x32xf32>
    %c0_10 = arith.constant 0 : index
    %c192 = arith.constant 192 : index
    %12 = vector.load %arg6[%c0_10, %c192] : memref<128x576xf32, #tpu.memory_space<vmem>>, vector<64x32xf32>
    %c0_11 = arith.constant 0 : index
    %c384 = arith.constant 384 : index
    %13 = vector.load %arg6[%c0_11, %c384] : memref<128x576xf32, #tpu.memory_space<vmem>>, vector<64x32xf32>
    %cst_12 = arith.constant dense<0.000000e+00> : vector<64x64xf32>
    %14 = tpu.matmul %11, %12, %cst_12 {dimension_numbers = #tpu.dot_dimension_numbers<[1], [1], [0], [0], [0, 0, 1, 0], [], []>} : vector<64x32xf32>, vector<64x32xf32>, vector<64x64xf32> -> vector<64x64xf32>
    %15 = arith.addf %14, %10 : vector<64x64xf32>
    %cst_13 = arith.constant dense<0xFF800000> : vector<64xf32>
    %16 = vector.multi_reduction <maximumf>, %15, %cst_13 [0] : vector<64x64xf32> to vector<64xf32>
    %17 = vector.shape_cast %16 : vector<64xf32> to vector<1x64xf32>
    %18 = vector.broadcast %17 : vector<1x64xf32> to vector<64x64xf32>
    %19 = arith.subf %15, %18 : vector<64x64xf32>
    %20 = math.exp %19 : vector<64x64xf32>
    %cst_14 = arith.constant dense<0.000000e+00> : vector<64xf32>
    %21 = vector.multi_reduction <add>, %20, %cst_14 [0] : vector<64x64xf32> to vector<64xf32>
    %22 = vector.shape_cast %21 : vector<64xf32> to vector<1x64xf32>
    %23 = tpu.reciprocal %22 : vector<1x64xf32> -> vector<1x64xf32>
    %24 = vector.broadcast %23 : vector<1x64xf32> to vector<64x64xf32>
    %25 = arith.mulf %20, %24 : vector<64x64xf32>
    %cst_15 = arith.constant dense<0.000000e+00> : vector<64x32xf32>
    %26 = tpu.matmul %25, %13, %cst_15 {dimension_numbers = #tpu.dot_dimension_numbers<[1], [0], [0], [1], [0, 0, 1, 1], [], []>} : vector<64x64xf32>, vector<64x32xf32>, vector<64x32xf32> -> vector<64x32xf32>
    %c0_16 = arith.constant 0 : index
    %c0_17 = arith.constant 0 : index
    %27 = vector.load %arg7[%c0_16, %c0_17] : memref<128x192xf32, #tpu.memory_space<vmem>>, vector<64x32xf32>
    tpu.vector_store %arg7[%c0_16, %c0_17], %26 {strides = array<i32>} : memref<128x192xf32, #tpu.memory_space<vmem>>, vector<64x32xf32>,
    %c0_18 = arith.constant 0 : index
    %c32 = arith.constant 32 : index
    %28 = vector.load %arg6[%c0_18, %c32] : memref<128x576xf32, #tpu.memory_space<vmem>>, vector<64x32xf32>
    %c0_19 = arith.constant 0 : index
    %c224 = arith.constant 224 : index
    %29 = vector.load %arg6[%c0_19, %c224] : memref<128x576xf32, #tpu.memory_space<vmem>>, vector<64x32xf32>
    %c0_20 = arith.constant 0 : index
    %c416 = arith.constant 416 : index
    %30 = vector.load %arg6[%c0_20, %c416] : memref<128x576xf32, #tpu.memory_space<vmem>>, vector<64x32xf32>
    %cst_21 = arith.constant dense<0.000000e+00> : vector<64x64xf32>
    %31 = tpu.matmul %28, %29, %cst_21 {dimension_numbers = #tpu.dot_dimension_numbers<[1], [1], [0], [0], [0, 0, 1, 0], [], []>} : vector<64x32xf32>, vector<64x32xf32>, vector<64x64xf32> -> vector<64x64xf32>
    %32 = arith.addf %31, %10 : vector<64x64xf32>
    %cst_22 = arith.constant dense<0xFF800000> : vector<64xf32>
    %33 = vector.multi_reduction <maximumf>, %32, %cst_22 [0] : vector<64x64xf32> to vector<64xf32>
    %34 = vector.shape_cast %33 : vector<64xf32> to vector<1x64xf32>
    %35 = vector.broadcast %34 : vector<1x64xf32> to vector<64x64xf32>
    %36 = arith.subf %32, %35 : vector<64x64xf32>
    %37 = math.exp %36 : vector<64x64xf32>
    %cst_23 = arith.constant dense<0.000000e+00> : vector<64xf32>
    %38 = vector.multi_reduction <add>, %37, %cst_23 [0] : vector<64x64xf32> to vector<64xf32>
    %39 = vector.shape_cast %38 : vector<64xf32> to vector<1x64xf32>
    %40 = tpu.reciprocal %39 : vector<1x64xf32> -> vector<1x64xf32>
    %41 = vector.broadcast %40 : vector<1x64xf32> to vector<64x64xf32>
    %42 = arith.mulf %37, %41 : vector<64x64xf32>
    %cst_24 = arith.constant dense<0.000000e+00> : vector<64x32xf32>
    %43 = tpu.matmul %42, %30, %cst_24 {dimension_numbers = #tpu.dot_dimension_numbers<[1], [0], [0], [1], [0, 0, 1, 1], [], []>} : vector<64x64xf32>, vector<64x32xf32>, vector<64x32xf32> -> vector<64x32xf32>
    %c0_25 = arith.constant 0 : index
    %c32_26 = arith.constant 32 : index
    %44 = vector.load %arg7[%c0_25, %c32_26] : memref<128x192xf32, #tpu.memory_space<vmem>>, vector<64x32xf32>
    tpu.vector_store %arg7[%c0_25, %c32_26], %43 {strides = array<i32>} : memref<128x192xf32, #tpu.memory_space<vmem>>, vector<64x32xf32>,
    %c0_27 = arith.constant 0 : index
    %c64 = arith.constant 64 : index
    %45 = vector.load %arg6[%c0_27, %c64] : memref<128x576xf32, #tpu.memory_space<vmem>>, vector<64x32xf32>
    %c0_28 = arith.constant 0 : index
    %c256 = arith.constant 256 : index
    %46 = vector.load %arg6[%c0_28, %c256] : memref<128x576xf32, #tpu.memory_space<vmem>>, vector<64x32xf32>
    %c0_29 = arith.constant 0 : index
    %c448 = arith.constant 448 : index
    %47 = vector.load %arg6[%c0_29, %c448] : memref<128x576xf32, #tpu.memory_space<vmem>>, vector<64x32xf32>
    %cst_30 = arith.constant dense<0.000000e+00> : vector<64x64xf32>
    %48 = tpu.matmul %45, %46, %cst_30 {dimension_numbers = #tpu.dot_dimension_numbers<[1], [1], [0], [0], [0, 0, 1, 0], [], []>} : vector<64x32xf32>, vector<64x32xf32>, vector<64x64xf32> -> vector<64x64xf32>
    %49 = arith.addf %48, %10 : vector<64x64xf32>
    %cst_31 = arith.constant dense<0xFF800000> : vector<64xf32>
    %50 = vector.multi_reduction <maximumf>, %49, %cst_31 [0] : vector<64x64xf32> to vector<64xf32>
    %51 = vector.shape_cast %50 : vector<64xf32> to vector<1x64xf32>
    %52 = vector.broadcast %51 : vector<1x64xf32> to vector<64x64xf32>
    %53 = arith.subf %49, %52 : vector<64x64xf32>
    %54 = math.exp %53 : vector<64x64xf32>
    %cst_32 = arith.constant dense<0.000000e+00> : vector<64xf32>
    %55 = vector.multi_reduction <add>, %54, %cst_32 [0] : vector<64x64xf32> to vector<64xf32>
    %56 = vector.shape_cast %55 : vector<64xf32> to vector<1x64xf32>
    %57 = tpu.reciprocal %56 : vector<1x64xf32> -> vector<1x64xf32>
    %58 = vector.broadcast %57 : vector<1x64xf32> to vector<64x64xf32>
    %59 = arith.mulf %54, %58 : vector<64x64xf32>
    %cst_33 = arith.constant dense<0.000000e+00> : vector<64x32xf32>
    %60 = tpu.matmul %59, %47, %cst_33 {dimension_numbers = #tpu.dot_dimension_numbers<[1], [0], [0], [1], [0, 0, 1, 1], [], []>} : vector<64x64xf32>, vector<64x32xf32>, vector<64x32xf32> -> vector<64x32xf32>
    %c0_34 = arith.constant 0 : index
    %c64_35 = arith.constant 64 : index
    %61 = vector.load %arg7[%c0_34, %c64_35] : memref<128x192xf32, #tpu.memory_space<vmem>>, vector<64x32xf32>
    tpu.vector_store %arg7[%c0_34, %c64_35], %60 {strides = array<i32>} : memref<128x192xf32, #tpu.memory_space<vmem>>, vector<64x32xf32>,
    %c0_36 = arith.constant 0 : index
    %c96 = arith.constant 96 : index
    %62 = vector.load %arg6[%c0_36, %c96] : memref<128x576xf32, #tpu.memory_space<vmem>>, vector<64x32xf32>
    %c0_37 = arith.constant 0 : index
    %c288 = arith.constant 288 : index
    %63 = vector.load %arg6[%c0_37, %c288] : memref<128x576xf32, #tpu.memory_space<vmem>>, vector<64x32xf32>
    %c0_38 = arith.constant 0 : index
    %c480 = arith.constant 480 : index
    %64 = vector.load %arg6[%c0_38, %c480] : memref<128x576xf32, #tpu.memory_space<vmem>>, vector<64x32xf32>
    %cst_39 = arith.constant dense<0.000000e+00> : vector<64x64xf32>
    %65 = tpu.matmul %62, %63, %cst_39 {dimension_numbers = #tpu.dot_dimension_numbers<[1], [1], [0], [0], [0, 0, 1, 0], [], []>} : vector<64x32xf32>, vector<64x32xf32>, vector<64x64xf32> -> vector<64x64xf32>
    %66 = arith.addf %65, %10 : vector<64x64xf32>
    %cst_40 = arith.constant dense<0xFF800000> : vector<64xf32>
    %67 = vector.multi_reduction <maximumf>, %66, %cst_40 [0] : vector<64x64xf32> to vector<64xf32>
    %68 = vector.shape_cast %67 : vector<64xf32> to vector<1x64xf32>
    %69 = vector.broadcast %68 : vector<1x64xf32> to vector<64x64xf32>
    %70 = arith.subf %66, %69 : vector<64x64xf32>
    %71 = math.exp %70 : vector<64x64xf32>
    %cst_41 = arith.constant dense<0.000000e+00> : vector<64xf32>
    %72 = vector.multi_reduction <add>, %71, %cst_41 [0] : vector<64x64xf32> to vector<64xf32>
    %73 = vector.shape_cast %72 : vector<64xf32> to vector<1x64xf32>
    %74 = tpu.reciprocal %73 : vector<1x64xf32> -> vector<1x64xf32>
    %75 = vector.broadcast %74 : vector<1x64xf32> to vector<64x64xf32>
    %76 = arith.mulf %71, %75 : vector<64x64xf32>
    %cst_42 = arith.constant dense<0.000000e+00> : vector<64x32xf32>
    %77 = tpu.matmul %76, %64, %cst_42 {dimension_numbers = #tpu.dot_dimension_numbers<[1], [0], [0], [1], [0, 0, 1, 1], [], []>} : vector<64x64xf32>, vector<64x32xf32>, vector<64x32xf32> -> vector<64x32xf32>
    %c0_43 = arith.constant 0 : index
    %c96_44 = arith.constant 96 : index
    %78 = vector.load %arg7[%c0_43, %c96_44] : memref<128x192xf32, #tpu.memory_space<vmem>>, vector<64x32xf32>
    tpu.vector_store %arg7[%c0_43, %c96_44], %77 {strides = array<i32>} : memref<128x192xf32, #tpu.memory_space<vmem>>, vector<64x32xf32>,
    %c0_45 = arith.constant 0 : index
    %c128 = arith.constant 128 : index
    %79 = vector.load %arg6[%c0_45, %c128] : memref<128x576xf32, #tpu.memory_space<vmem>>, vector<64x32xf32>
    %c0_46 = arith.constant 0 : index
    %c320 = arith.constant 320 : index
    %80 = vector.load %arg6[%c0_46, %c320] : memref<128x576xf32, #tpu.memory_space<vmem>>, vector<64x32xf32>
    %c0_47 = arith.constant 0 : index
    %c512 = arith.constant 512 : index
    %81 = vector.load %arg6[%c0_47, %c512] : memref<128x576xf32, #tpu.memory_space<vmem>>, vector<64x32xf32>
    %cst_48 = arith.constant dense<0.000000e+00> : vector<64x64xf32>
    %82 = tpu.matmul %79, %80, %cst_48 {dimension_numbers = #tpu.dot_dimension_numbers<[1], [1], [0], [0], [0, 0, 1, 0], [], []>} : vector<64x32xf32>, vector<64x32xf32>, vector<64x64xf32> -> vector<64x64xf32>
    %83 = arith.addf %82, %10 : vector<64x64xf32>
    %cst_49 = arith.constant dense<0xFF800000> : vector<64xf32>
    %84 = vector.multi_reduction <maximumf>, %83, %cst_49 [0] : vector<64x64xf32> to vector<64xf32>
    %85 = vector.shape_cast %84 : vector<64xf32> to vector<1x64xf32>
    %86 = vector.broadcast %85 : vector<1x64xf32> to vector<64x64xf32>
    %87 = arith.subf %83, %86 : vector<64x64xf32>
    %88 = math.exp %87 : vector<64x64xf32>
    %cst_50 = arith.constant dense<0.000000e+00> : vector<64xf32>
    %89 = vector.multi_reduction <add>, %88, %cst_50 [0] : vector<64x64xf32> to vector<64xf32>
    %90 = vector.shape_cast %89 : vector<64xf32> to vector<1x64xf32>
    %91 = tpu.reciprocal %90 : vector<1x64xf32> -> vector<1x64xf32>
    %92 = vector.broadcast %91 : vector<1x64xf32> to vector<64x64xf32>
    %93 = arith.mulf %88, %92 : vector<64x64xf32>
    %cst_51 = arith.constant dense<0.000000e+00> : vector<64x32xf32>
    %94 = tpu.matmul %93, %81, %cst_51 {dimension_numbers = #tpu.dot_dimension_numbers<[1], [0], [0], [1], [0, 0, 1, 1], [], []>} : vector<64x64xf32>, vector<64x32xf32>, vector<64x32xf32> -> vector<64x32xf32>
    %c0_52 = arith.constant 0 : index
    %c128_53 = arith.constant 128 : index
    %95 = vector.load %arg7[%c0_52, %c128_53] : memref<128x192xf32, #tpu.memory_space<vmem>>, vector<64x32xf32>
    tpu.vector_store %arg7[%c0_52, %c128_53], %94 {strides = array<i32>} : memref<128x192xf32, #tpu.memory_space<vmem>>, vector<64x32xf32>,
    %c0_54 = arith.constant 0 : index
    %c160 = arith.constant 160 : index
    %96 = vector.load %arg6[%c0_54, %c160] : memref<128x576xf32, #tpu.memory_space<vmem>>, vector<64x32xf32>
    %c0_55 = arith.constant 0 : index
    %c352 = arith.constant 352 : index
    %97 = vector.load %arg6[%c0_55, %c352] : memref<128x576xf32, #tpu.memory_space<vmem>>, vector<64x32xf32>
    %c0_56 = arith.constant 0 : index
    %c544 = arith.constant 544 : index
    %98 = vector.load %arg6[%c0_56, %c544] : memref<128x576xf32, #tpu.memory_space<vmem>>, vector<64x32xf32>
    %cst_57 = arith.constant dense<0.000000e+00> : vector<64x64xf32>
    %99 = tpu.matmul %96, %97, %cst_57 {dimension_numbers = #tpu.dot_dimension_numbers<[1], [1], [0], [0], [0, 0, 1, 0], [], []>} : vector<64x32xf32>, vector<64x32xf32>, vector<64x64xf32> -> vector<64x64xf32>
    %100 = arith.addf %99, %10 : vector<64x64xf32>
    %cst_58 = arith.constant dense<0xFF800000> : vector<64xf32>
    %101 = vector.multi_reduction <maximumf>, %100, %cst_58 [0] : vector<64x64xf32> to vector<64xf32>
    %102 = vector.shape_cast %101 : vector<64xf32> to vector<1x64xf32>
    %103 = vector.broadcast %102 : vector<1x64xf32> to vector<64x64xf32>
    %104 = arith.subf %100, %103 : vector<64x64xf32>
    %105 = math.exp %104 : vector<64x64xf32>
    %cst_59 = arith.constant dense<0.000000e+00> : vector<64xf32>
    %106 = vector.multi_reduction <add>, %105, %cst_59 [0] : vector<64x64xf32> to vector<64xf32>
    %107 = vector.shape_cast %106 : vector<64xf32> to vector<1x64xf32>
    %108 = tpu.reciprocal %107 : vector<1x64xf32> -> vector<1x64xf32>
    %109 = vector.broadcast %108 : vector<1x64xf32> to vector<64x64xf32>
    %110 = arith.mulf %105, %109 : vector<64x64xf32>
    %cst_60 = arith.constant dense<0.000000e+00> : vector<64x32xf32>
    %111 = tpu.matmul %110, %98, %cst_60 {dimension_numbers = #tpu.dot_dimension_numbers<[1], [0], [0], [1], [0, 0, 1, 1], [], []>} : vector<64x64xf32>, vector<64x32xf32>, vector<64x32xf32> -> vector<64x32xf32>
    %c0_61 = arith.constant 0 : index
    %c160_62 = arith.constant 160 : index
    %112 = vector.load %arg7[%c0_61, %c160_62] : memref<128x192xf32, #tpu.memory_space<vmem>>, vector<64x32xf32>
    tpu.vector_store %arg7[%c0_61, %c160_62], %111 {strides = array<i32>} : memref<128x192xf32, #tpu.memory_space<vmem>>, vector<64x32xf32>,
    %c64_63 = arith.constant 64 : index
    %c0_64 = arith.constant 0 : index
    %113 = vector.load %arg6[%c64_63, %c0_64] : memref<128x576xf32, #tpu.memory_space<vmem>>, vector<64x32xf32>
    %c64_65 = arith.constant 64 : index
    %c192_66 = arith.constant 192 : index
    %114 = vector.load %arg6[%c64_65, %c192_66] : memref<128x576xf32, #tpu.memory_space<vmem>>, vector<64x32xf32>
    %c64_67 = arith.constant 64 : index
    %c384_68 = arith.constant 384 : index
    %115 = vector.load %arg6[%c64_67, %c384_68] : memref<128x576xf32, #tpu.memory_space<vmem>>, vector<64x32xf32>
    %cst_69 = arith.constant dense<0.000000e+00> : vector<64x64xf32>
    %116 = tpu.matmul %113, %114, %cst_69 {dimension_numbers = #tpu.dot_dimension_numbers<[1], [1], [0], [0], [0, 0, 1, 0], [], []>} : vector<64x32xf32>, vector<64x32xf32>, vector<64x64xf32> -> vector<64x64xf32>
    %117 = arith.addf %116, %10 : vector<64x64xf32>
    %cst_70 = arith.constant dense<0xFF800000> : vector<64xf32>
    %118 = vector.multi_reduction <maximumf>, %117, %cst_70 [0] : vector<64x64xf32> to vector<64xf32>
    %119 = vector.shape_cast %118 : vector<64xf32> to vector<1x64xf32>
    %120 = vector.broadcast %119 : vector<1x64xf32> to vector<64x64xf32>
    %121 = arith.subf %117, %120 : vector<64x64xf32>
    %122 = math.exp %121 : vector<64x64xf32>
    %cst_71 = arith.constant dense<0.000000e+00> : vector<64xf32>
    %123 = vector.multi_reduction <add>, %122, %cst_71 [0] : vector<64x64xf32> to vector<64xf32>
    %124 = vector.shape_cast %123 : vector<64xf32> to vector<1x64xf32>
    %125 = tpu.reciprocal %124 : vector<1x64xf32> -> vector<1x64xf32>
    %126 = vector.broadcast %125 : vector<1x64xf32> to vector<64x64xf32>
    %127 = arith.mulf %122, %126 : vector<64x64xf32>
    %cst_72 = arith.constant dense<0.000000e+00> : vector<64x32xf32>
    %128 = tpu.matmul %127, %115, %cst_72 {dimension_numbers = #tpu.dot_dimension_numbers<[1], [0], [0], [1], [0, 0, 1, 1], [], []>} : vector<64x64xf32>, vector<64x32xf32>, vector<64x32xf32> -> vector<64x32xf32>
    %c64_73 = arith.constant 64 : index
    %c0_74 = arith.constant 0 : index
    %129 = vector.load %arg7[%c64_73, %c0_74] : memref<128x192xf32, #tpu.memory_space<vmem>>, vector<64x32xf32>
    tpu.vector_store %arg7[%c64_73, %c0_74], %128 {strides = array<i32>} : memref<128x192xf32, #tpu.memory_space<vmem>>, vector<64x32xf32>,
    %c64_75 = arith.constant 64 : index
    %c32_76 = arith.constant 32 : index
    %130 = vector.load %arg6[%c64_75, %c32_76] : memref<128x576xf32, #tpu.memory_space<vmem>>, vector<64x32xf32>
    %c64_77 = arith.constant 64 : index
    %c224_78 = arith.constant 224 : index
    %131 = vector.load %arg6[%c64_77, %c224_78] : memref<128x576xf32, #tpu.memory_space<vmem>>, vector<64x32xf32>
    %c64_79 = arith.constant 64 : index
    %c416_80 = arith.constant 416 : index
    %132 = vector.load %arg6[%c64_79, %c416_80] : memref<128x576xf32, #tpu.memory_space<vmem>>, vector<64x32xf32>
    %cst_81 = arith.constant dense<0.000000e+00> : vector<64x64xf32>
    %133 = tpu.matmul %130, %131, %cst_81 {dimension_numbers = #tpu.dot_dimension_numbers<[1], [1], [0], [0], [0, 0, 1, 0], [], []>} : vector<64x32xf32>, vector<64x32xf32>, vector<64x64xf32> -> vector<64x64xf32>
    %134 = arith.addf %133, %10 : vector<64x64xf32>
    %cst_82 = arith.constant dense<0xFF800000> : vector<64xf32>
    %135 = vector.multi_reduction <maximumf>, %134, %cst_82 [0] : vector<64x64xf32> to vector<64xf32>
    %136 = vector.shape_cast %135 : vector<64xf32> to vector<1x64xf32>
    %137 = vector.broadcast %136 : vector<1x64xf32> to vector<64x64xf32>
    %138 = arith.subf %134, %137 : vector<64x64xf32>
    %139 = math.exp %138 : vector<64x64xf32>
    %cst_83 = arith.constant dense<0.000000e+00> : vector<64xf32>
    %140 = vector.multi_reduction <add>, %139, %cst_83 [0] : vector<64x64xf32> to vector<64xf32>
    %141 = vector.shape_cast %140 : vector<64xf32> to vector<1x64xf32>
    %142 = tpu.reciprocal %141 : vector<1x64xf32> -> vector<1x64xf32>
    %143 = vector.broadcast %142 : vector<1x64xf32> to vector<64x64xf32>
    %144 = arith.mulf %139, %143 : vector<64x64xf32>
    %cst_84 = arith.constant dense<0.000000e+00> : vector<64x32xf32>
    %145 = tpu.matmul %144, %132, %cst_84 {dimension_numbers = #tpu.dot_dimension_numbers<[1], [0], [0], [1], [0, 0, 1, 1], [], []>} : vector<64x64xf32>, vector<64x32xf32>, vector<64x32xf32> -> vector<64x32xf32>
    %c64_85 = arith.constant 64 : index
    %c32_86 = arith.constant 32 : index
    %146 = vector.load %arg7[%c64_85, %c32_86] : memref<128x192xf32, #tpu.memory_space<vmem>>, vector<64x32xf32>
    tpu.vector_store %arg7[%c64_85, %c32_86], %145 {strides = array<i32>} : memref<128x192xf32, #tpu.memory_space<vmem>>, vector<64x32xf32>,
    %c64_87 = arith.constant 64 : index
    %c64_88 = arith.constant 64 : index
    %147 = vector.load %arg6[%c64_87, %c64_88] : memref<128x576xf32, #tpu.memory_space<vmem>>, vector<64x32xf32>
    %c64_89 = arith.constant 64 : index
    %c256_90 = arith.constant 256 : index
    %148 = vector.load %arg6[%c64_89, %c256_90] : memref<128x576xf32, #tpu.memory_space<vmem>>, vector<64x32xf32>
    %c64_91 = arith.constant 64 : index
    %c448_92 = arith.constant 448 : index
    %149 = vector.load %arg6[%c64_91, %c448_92] : memref<128x576xf32, #tpu.memory_space<vmem>>, vector<64x32xf32>
    %cst_93 = arith.constant dense<0.000000e+00> : vector<64x64xf32>
    %150 = tpu.matmul %147, %148, %cst_93 {dimension_numbers = #tpu.dot_dimension_numbers<[1], [1], [0], [0], [0, 0, 1, 0], [], []>} : vector<64x32xf32>, vector<64x32xf32>, vector<64x64xf32> -> vector<64x64xf32>
    %151 = arith.addf %150, %10 : vector<64x64xf32>
    %cst_94 = arith.constant dense<0xFF800000> : vector<64xf32>
    %152 = vector.multi_reduction <maximumf>, %151, %cst_94 [0] : vector<64x64xf32> to vector<64xf32>
    %153 = vector.shape_cast %152 : vector<64xf32> to vector<1x64xf32>
    %154 = vector.broadcast %153 : vector<1x64xf32> to vector<64x64xf32>
    %155 = arith.subf %151, %154 : vector<64x64xf32>
    %156 = math.exp %155 : vector<64x64xf32>
    %cst_95 = arith.constant dense<0.000000e+00> : vector<64xf32>
    %157 = vector.multi_reduction <add>, %156, %cst_95 [0] : vector<64x64xf32> to vector<64xf32>
    %158 = vector.shape_cast %157 : vector<64xf32> to vector<1x64xf32>
    %159 = tpu.reciprocal %158 : vector<1x64xf32> -> vector<1x64xf32>
    %160 = vector.broadcast %159 : vector<1x64xf32> to vector<64x64xf32>
    %161 = arith.mulf %156, %160 : vector<64x64xf32>
    %cst_96 = arith.constant dense<0.000000e+00> : vector<64x32xf32>
    %162 = tpu.matmul %161, %149, %cst_96 {dimension_numbers = #tpu.dot_dimension_numbers<[1], [0], [0], [1], [0, 0, 1, 1], [], []>} : vector<64x64xf32>, vector<64x32xf32>, vector<64x32xf32> -> vector<64x32xf32>
    %c64_97 = arith.constant 64 : index
    %c64_98 = arith.constant 64 : index
    %163 = vector.load %arg7[%c64_97, %c64_98] : memref<128x192xf32, #tpu.memory_space<vmem>>, vector<64x32xf32>
    tpu.vector_store %arg7[%c64_97, %c64_98], %162 {strides = array<i32>} : memref<128x192xf32, #tpu.memory_space<vmem>>, vector<64x32xf32>,
    %c64_99 = arith.constant 64 : index
    %c96_100 = arith.constant 96 : index
    %164 = vector.load %arg6[%c64_99, %c96_100] : memref<128x576xf32, #tpu.memory_space<vmem>>, vector<64x32xf32>
    %c64_101 = arith.constant 64 : index
    %c288_102 = arith.constant 288 : index
    %165 = vector.load %arg6[%c64_101, %c288_102] : memref<128x576xf32, #tpu.memory_space<vmem>>, vector<64x32xf32>
    %c64_103 = arith.constant 64 : index
    %c480_104 = arith.constant 480 : index
    %166 = vector.load %arg6[%c64_103, %c480_104] : memref<128x576xf32, #tpu.memory_space<vmem>>, vector<64x32xf32>
    %cst_105 = arith.constant dense<0.000000e+00> : vector<64x64xf32>
    %167 = tpu.matmul %164, %165, %cst_105 {dimension_numbers = #tpu.dot_dimension_numbers<[1], [1], [0], [0], [0, 0, 1, 0], [], []>} : vector<64x32xf32>, vector<64x32xf32>, vector<64x64xf32> -> vector<64x64xf32>
    %168 = arith.addf %167, %10 : vector<64x64xf32>
    %cst_106 = arith.constant dense<0xFF800000> : vector<64xf32>
    %169 = vector.multi_reduction <maximumf>, %168, %cst_106 [0] : vector<64x64xf32> to vector<64xf32>
    %170 = vector.shape_cast %169 : vector<64xf32> to vector<1x64xf32>
    %171 = vector.broadcast %170 : vector<1x64xf32> to vector<64x64xf32>
    %172 = arith.subf %168, %171 : vector<64x64xf32>
    %173 = math.exp %172 : vector<64x64xf32>
    %cst_107 = arith.constant dense<0.000000e+00> : vector<64xf32>
    %174 = vector.multi_reduction <add>, %173, %cst_107 [0] : vector<64x64xf32> to vector<64xf32>
    %175 = vector.shape_cast %174 : vector<64xf32> to vector<1x64xf32>
    %176 = tpu.reciprocal %175 : vector<1x64xf32> -> vector<1x64xf32>
    %177 = vector.broadcast %176 : vector<1x64xf32> to vector<64x64xf32>
    %178 = arith.mulf %173, %177 : vector<64x64xf32>
    %cst_108 = arith.constant dense<0.000000e+00> : vector<64x32xf32>
    %179 = tpu.matmul %178, %166, %cst_108 {dimension_numbers = #tpu.dot_dimension_numbers<[1], [0], [0], [1], [0, 0, 1, 1], [], []>} : vector<64x64xf32>, vector<64x32xf32>, vector<64x32xf32> -> vector<64x32xf32>
    %c64_109 = arith.constant 64 : index
    %c96_110 = arith.constant 96 : index
    %180 = vector.load %arg7[%c64_109, %c96_110] : memref<128x192xf32, #tpu.memory_space<vmem>>, vector<64x32xf32>
    tpu.vector_store %arg7[%c64_109, %c96_110], %179 {strides = array<i32>} : memref<128x192xf32, #tpu.memory_space<vmem>>, vector<64x32xf32>,
    %c64_111 = arith.constant 64 : index
    %c128_112 = arith.constant 128 : index
    %181 = vector.load %arg6[%c64_111, %c128_112] : memref<128x576xf32, #tpu.memory_space<vmem>>, vector<64x32xf32>
    %c64_113 = arith.constant 64 : index
    %c320_114 = arith.constant 320 : index
    %182 = vector.load %arg6[%c64_113, %c320_114] : memref<128x576xf32, #tpu.memory_space<vmem>>, vector<64x32xf32>
    %c64_115 = arith.constant 64 : index
    %c512_116 = arith.constant 512 : index
    %183 = vector.load %arg6[%c64_115, %c512_116] : memref<128x576xf32, #tpu.memory_space<vmem>>, vector<64x32xf32>
    %cst_117 = arith.constant dense<0.000000e+00> : vector<64x64xf32>
    %184 = tpu.matmul %181, %182, %cst_117 {dimension_numbers = #tpu.dot_dimension_numbers<[1], [1], [0], [0], [0, 0, 1, 0], [], []>} : vector<64x32xf32>, vector<64x32xf32>, vector<64x64xf32> -> vector<64x64xf32>
    %185 = arith.addf %184, %10 : vector<64x64xf32>
    %cst_118 = arith.constant dense<0xFF800000> : vector<64xf32>
    %186 = vector.multi_reduction <maximumf>, %185, %cst_118 [0] : vector<64x64xf32> to vector<64xf32>
    %187 = vector.shape_cast %186 : vector<64xf32> to vector<1x64xf32>
    %188 = vector.broadcast %187 : vector<1x64xf32> to vector<64x64xf32>
    %189 = arith.subf %185, %188 : vector<64x64xf32>
    %190 = math.exp %189 : vector<64x64xf32>
    %cst_119 = arith.constant dense<0.000000e+00> : vector<64xf32>
    %191 = vector.multi_reduction <add>, %190, %cst_119 [0] : vector<64x64xf32> to vector<64xf32>
    %192 = vector.shape_cast %191 : vector<64xf32> to vector<1x64xf32>
    %193 = tpu.reciprocal %192 : vector<1x64xf32> -> vector<1x64xf32>
    %194 = vector.broadcast %193 : vector<1x64xf32> to vector<64x64xf32>
    %195 = arith.mulf %190, %194 : vector<64x64xf32>
    %cst_120 = arith.constant dense<0.000000e+00> : vector<64x32xf32>
    %196 = tpu.matmul %195, %183, %cst_120 {dimension_numbers = #tpu.dot_dimension_numbers<[1], [0], [0], [1], [0, 0, 1, 1], [], []>} : vector<64x64xf32>, vector<64x32xf32>, vector<64x32xf32> -> vector<64x32xf32>
    %c64_121 = arith.constant 64 : index
    %c128_122 = arith.constant 128 : index
    %197 = vector.load %arg7[%c64_121, %c128_122] : memref<128x192xf32, #tpu.memory_space<vmem>>, vector<64x32xf32>
    tpu.vector_store %arg7[%c64_121, %c128_122], %196 {strides = array<i32>} : memref<128x192xf32, #tpu.memory_space<vmem>>, vector<64x32xf32>,
    %c64_123 = arith.constant 64 : index
    %c160_124 = arith.constant 160 : index
    %198 = vector.load %arg6[%c64_123, %c160_124] : memref<128x576xf32, #tpu.memory_space<vmem>>, vector<64x32xf32>
    %c64_125 = arith.constant 64 : index
    %c352_126 = arith.constant 352 : index
    %199 = vector.load %arg6[%c64_125, %c352_126] : memref<128x576xf32, #tpu.memory_space<vmem>>, vector<64x32xf32>
    %c64_127 = arith.constant 64 : index
    %c544_128 = arith.constant 544 : index
    %200 = vector.load %arg6[%c64_127, %c544_128] : memref<128x576xf32, #tpu.memory_space<vmem>>, vector<64x32xf32>
    %cst_129 = arith.constant dense<0.000000e+00> : vector<64x64xf32>
    %201 = tpu.matmul %198, %199, %cst_129 {dimension_numbers = #tpu.dot_dimension_numbers<[1], [1], [0], [0], [0, 0, 1, 0], [], []>} : vector<64x32xf32>, vector<64x32xf32>, vector<64x64xf32> -> vector<64x64xf32>
    %202 = arith.addf %201, %10 : vector<64x64xf32>
    %cst_130 = arith.constant dense<0xFF800000> : vector<64xf32>
    %203 = vector.multi_reduction <maximumf>, %202, %cst_130 [0] : vector<64x64xf32> to vector<64xf32>
    %204 = vector.shape_cast %203 : vector<64xf32> to vector<1x64xf32>
    %205 = vector.broadcast %204 : vector<1x64xf32> to vector<64x64xf32>
    %206 = arith.subf %202, %205 : vector<64x64xf32>
    %207 = math.exp %206 : vector<64x64xf32>
    %cst_131 = arith.constant dense<0.000000e+00> : vector<64xf32>
    %208 = vector.multi_reduction <add>, %207, %cst_131 [0] : vector<64x64xf32> to vector<64xf32>
    %209 = vector.shape_cast %208 : vector<64xf32> to vector<1x64xf32>
    %210 = tpu.reciprocal %209 : vector<1x64xf32> -> vector<1x64xf32>
    %211 = vector.broadcast %210 : vector<1x64xf32> to vector<64x64xf32>
    %212 = arith.mulf %207, %211 : vector<64x64xf32>
    %cst_132 = arith.constant dense<0.000000e+00> : vector<64x32xf32>
    %213 = tpu.matmul %212, %200, %cst_132 {dimension_numbers = #tpu.dot_dimension_numbers<[1], [0], [0], [1], [0, 0, 1, 1], [], []>} : vector<64x64xf32>, vector<64x32xf32>, vector<64x32xf32> -> vector<64x32xf32>
    %c64_133 = arith.constant 64 : index
    %c160_134 = arith.constant 160 : index
    %214 = vector.load %arg7[%c64_133, %c160_134] : memref<128x192xf32, #tpu.memory_space<vmem>>, vector<64x32xf32>
    tpu.vector_store %arg7[%c64_133, %c160_134], %213 {strides = array<i32>} : memref<128x192xf32, #tpu.memory_space<vmem>>, vector<64x32xf32>,
    %c0_135 = arith.constant 0 : index
    %c0_136 = arith.constant 0 : index
    %215 = vector.load %arg7[%c0_135, %c0_136] : memref<128x192xf32, #tpu.memory_space<vmem>>, vector<128x192xf32>
    %c0_137 = arith.constant 0 : index
    %c0_138 = arith.constant 0 : index
    %216 = vector.load %arg3[%c0_137, %c0_138] : memref<192x192xf32, #tpu.memory_space<vmem>>, vector<192x192xf32>
    %cst_139 = arith.constant dense<0.000000e+00> : vector<128x192xf32>
    %217 = tpu.matmul %215, %216, %cst_139 {dimension_numbers = #tpu.dot_dimension_numbers<[1], [0], [0], [1], [0, 0, 1, 1], [], []>} : vector<128x192xf32>, vector<192x192xf32>, vector<128x192xf32> -> vector<128x192xf32>
    %c0_140 = arith.constant 0 : index
    %c0_141 = arith.constant 0 : index
    %218 = vector.load %arg4[%c0_140, %c0_141] : memref<1x192xf32, #tpu.memory_space<vmem>>, vector<1x192xf32>
    %219 = vector.broadcast %218 : vector<1x192xf32> to vector<128x192xf32>
    %220 = arith.addf %217, %219 : vector<128x192xf32>
    %221 = vector.shape_cast %220 : vector<128x192xf32> to vector<2x64x192xf32>
    %c0_142 = arith.constant 0 : index
    %c0_143 = arith.constant 0 : index
    %c0_144 = arith.constant 0 : index
    %222 = vector.load %arg5[%c0_142, %c0_143, %c0_144] : memref<2x64x192xf32, #tpu.memory_space<vmem>>, vector<2x64x192xf32>
    tpu.vector_store %arg5[%c0_142, %c0_143, %c0_144], %221 {strides = array<i32>} : memref<2x64x192xf32, #tpu.memory_space<vmem>>, vector<2x64x192xf32>,
    return
  }
  func.func @transform_0(%arg0: i32) -> (i32, i32, i32) {
    %c0_i32 = arith.constant 0 : i32
    %c0_i32_0 = arith.constant 0 : i32
    %c0_i32_1 = arith.constant 0 : i32
    return %arg0, %c0_i32, %c0_i32_0 : i32, i32, i32
  }
  func.func @transform_1(%arg0: i32) -> (i32, i32) {
    %c0_i32 = arith.constant 0 : i32
    %c0_i32_0 = arith.constant 0 : i32
    %c0_i32_1 = arith.constant 0 : i32
    return %c0_i32, %c0_i32_0 : i32, i32
  }
  func.func @transform_2(%arg0: i32) -> (i32, i32) {
    %c0_i32 = arith.constant 0 : i32
    %c0_i32_0 = arith.constant 0 : i32
    %c0_i32_1 = arith.constant 0 : i32
    return %c0_i32, %c0_i32_0 : i32, i32
  }
  func.func @transform_3(%arg0: i32) -> (i32, i32) {
    %c0_i32 = arith.constant 0 : i32
    %c0_i32_0 = arith.constant 0 : i32
    %c0_i32_1 = arith.constant 0 : i32
    return %c0_i32, %c0_i32_0 : i32, i32
  }
  func.func @transform_4(%arg0: i32) -> (i32, i32, i32) {
    %c0_i32 = arith.constant 0 : i32
    %c0_i32_0 = arith.constant 0 : i32
    %c0_i32_1 = arith.constant 0 : i32
    return %arg0, %c0_i32, %c0_i32_0 : i32, i32, i32
  }
}

</mosaic_0001>

<bundles_post_ra>
// kernel: tpu_custom_call.1
= control target key start
LH: loop header
LB: loop body
LE: loop exit
PB: predicated region body
PF: predicated region fallthrough
CT: control target
= control target key end

     0   :  { %9 = vsyncpa [#allocation5], 0  ;;  %s11790_s0 = inlined_call_operand.hbm [shape: f32[2,64,192], index: 0, kind: input, shape index: {}]   ;;  %s11791_s1 = inlined_call_operand.hbm [shape: f32[192,576], index: 1, kind: input, shape index: {}]   ;;  %s11792_s2 = inlined_call_operand.hbm [shape: f32[192,192], index: 2, kind: input, shape index: {}]   ;;  %s11793_s3 = inlined_call_operand.vmem [shape: f32[1,192], index: 3, kind: input, shape index: {}]   ;;  %s11794_s4 = inlined_call_operand.hbm [shape: f32[2,64,192], index: 4, kind: output, shape index: {}]  }
   0x1   :  { %10 = vsyncpa [#allocation8], 0 }
   0x2   :  { %11 = vsyncpa [#allocation6], 0  ;;  %s9432_s15 = smov [#allocation7]   ;;  %s9338_s19 = scalar_lea.hbm %s11791_s1, 15360 }
   0x3   :  { %s29_s16 = sshll.u32 %s9432_s15, 4  ;;  %p9339_p0 = scmp.ne.s32.totalorder %s11791_s1, %s9338_s19  ;;  %s30_s16 = int_to_ptr.vmem [resolvable:$true] %s29_s16 }
   0x4   :  { %p9342_p1 = scmp.lt.u32.totalorder %s9338_s19, %s11791_s1 }
   0x6   :  { %p9344_p2 = pnand %p9342_p1, %p9339_p0 }
   0x8   :  { %9347 = shalt.err (!%p9344_p2)
}
   0x9   :  { %s9348_s24 = scalar_lea.vmem %s30_s16, 15360  ;;  %p9353_p4 = scmp.lt.s32.totalorder %s30_s16, %s30_s16 }
   0xa   :  { %p9349_p3 = scmp.ne.s32.totalorder %s30_s16, %s9348_s24  ;;  %p9354_p5 = scmp.lt.s32.totalorder %s9348_s24, %s9348_s24 }
   0xc   :  { %p9355_p6 = por %p9354_p5, %p9353_p4 }
   0xe   :  { %p9356_p7 = pnand %p9355_p6, %p9349_p3 }
  0x10   :  { %9359 = shalt.err (!%p9356_p7)
}
  0x11   :  { %s9433_s25 = smov 640   ;;  %s9434_s26 = smov 40  }
  0x12   :  { %35 = dma.hbm_to_vmem [thread:$0]  %s11791_s1, 15360, %s30_s16, [#allocation8], %s9433_s25, %s9433_s25, %s9434_s26  }
  0x13   :  { %s9435_s29 = smov [#allocation4]   ;;  %s9360_s7 = scalar_lea.hbm %s11790_s0, 4096 }
  0x14   :  { %s17_s30 = sshll.u32 %s9435_s29, 4  ;;  %p9361_p8 = scmp.ne.s32.totalorder %s11790_s0, %s9360_s7  ;;  %s18_s30 = int_to_ptr.vmem [resolvable:$true] %s17_s30 }
  0x15   :  { %p9364_p9 = scmp.lt.u32.totalorder %s9360_s7, %s11790_s0 }
  0x17   :  { %p9366_p10 = pnand %p9364_p9, %p9361_p8 }
  0x19   :  { %9369 = shalt.err (!%p9366_p10)
}
  0x1a   :  { %s9370_s12 = scalar_lea.vmem %s18_s30, 4096  ;;  %p9375_p12 = scmp.lt.s32.totalorder %s18_s30, %s18_s30 }
  0x1b   :  { %p9371_p11 = scmp.ne.s32.totalorder %s18_s30, %s9370_s12  ;;  %p9376_p13 = scmp.lt.s32.totalorder %s9370_s12, %s9370_s12 }
  0x1d   :  { %p9377_p0 = por %p9376_p13, %p9375_p12 }
  0x1f   :  { %p9378_p1 = pnand %p9377_p0, %p9371_p11 }
  0x21   :  { %9381 = shalt.err (!%p9378_p1)
}
  0x22   :  { %s9436_s1 = smov 256   ;;  %s9437_s13 = smov 16  }
  0x23   :  { %23 = dma.hbm_to_vmem [thread:$0]  %s11790_s0, 4096, %s18_s30, [#allocation5], %s9436_s1, %s9436_s1, %s9437_s13  }
  0x24   :  { %s9438_s16 = smov [#allocation9]   ;;  %s9382_s20 = scalar_lea.hbm %s11792_s2, 6144 }
  0x25   :  { %s41_s17 = sshll.u32 %s9438_s16, 4  ;;  %p9383_p2 = scmp.ne.s32.totalorder %s11792_s2, %s9382_s20  ;;  %s42_s17 = int_to_ptr.vmem [resolvable:$true] %s41_s17 }
  0x26   :  { %p9386_p3 = scmp.lt.u32.totalorder %s9382_s20, %s11792_s2 }
  0x28   :  { %p9388_p4 = pnand %p9386_p3, %p9383_p2 }
  0x2a   :  { %9391 = shalt.err (!%p9388_p4)
}
  0x2b   :  { %s9392_s25 = scalar_lea.vmem %s42_s17, 6144  ;;  %p9397_p6 = scmp.lt.s32.totalorder %s42_s17, %s42_s17 }
  0x2c   :  { %p9393_p5 = scmp.ne.s32.totalorder %s42_s17, %s9392_s25  ;;  %p9398_p7 = scmp.lt.s32.totalorder %s9392_s25, %s9392_s25 }
  0x2e   :  { %p9399_p8 = por %p9398_p7, %p9397_p6 }
  0x30   :  { %p9400_p9 = pnand %p9399_p8, %p9393_p5 }
  0x32   :  { %9403 = shalt.err (!%p9400_p9)
}
  0x33   :  { %47 = dma.hbm_to_vmem [thread:$0]  %s11792_s2, 6144, %s42_s17, [#allocation8], %s9436_s1, %s9436_s1, %s9437_s13  }
  0x34   :  { %9426 = dma.done.wait [#allocation5], 4096  }
  0x35   :  { %9427 = vsyncadd [#allocation5], 4294963200 }
  0x36   :  { %9428 = dma.done.wait [#allocation8], 21504  }
  0x37   :  { %9429 = vsyncadd [#allocation8], 4294945792  ;;  %v92_v0 = vld [vmem:[#allocation7 + $0x8] sm:$0xff]  ;;  %v97_v1 = vld [vmem:[#allocation7 + $0x30] sm:$0xff]  ;;  %vm211_vm0 = vcmask 523264   ;;  %vm882_vm1 = vcmask 261120  }
  0x38   :  { %v91_v2 = vld [vmem:[#allocation7] sm:$0xff]  ;;  %v8065_v3 = vpack.c.bf16 %v97_v1, %v92_v0  ;;  %v96_v4 = vld [vmem:[#allocation7 + $0x28] sm:$0xff]  ;;  %v102_v5 = vld [vmem:[#allocation7 + $0x58] sm:$0xff]  ;;  %s9440_s2 = smov 64   ;;  %s9441_s27 = smov 32   ;;  %vm1717_vm11 = vcmask 523520  }
  0x39   :  { %v107_v6 = vld [vmem:[#allocation7 + $0x80] sm:$0xff]  ;;  %v8067_v7 = vpack.c.bf16 %v96_v4, %v91_v2  ;;  %v101_v9 = vld [vmem:[#allocation7 + $0x50] sm:$0xff]  ;;  %v106_v10 = vld [vmem:[#allocation7 + $0x78] sm:$0xff]  ;;  %s9442_s28 = smov 96   ;;  %vm2187_vm12 = vcmask 785920   ;;  %vm2673_vm13 = vcmask 1048320  }
  0x3a   :  { %v8069_v8 = vpack.c.bf16 %v107_v6, %v102_v5  ;;  %v112_v11 = vld [vmem:[#allocation7 + $0xa8] sm:$0xff]  ;;  %8066 = vmatprep.subr.bf16.mxu0 %v8065_v3  ;;  %v117_v12 = vld [vmem:[#allocation7 + $0xd0] sm:$0xff]  ;;  %v8071_v13 = vpack.c.bf16 %v106_v10, %v101_v9  ;;  %v111_v15 = vld [vmem:[#allocation7 + $0xa0] sm:$0xff] }
  0x3b   :  { %8068 = vmatpush1.bf16.msra.mxu0 %v8067_v7  ;;  %v8073_v14 = vpack.c.bf16 %v117_v12, %v112_v11  ;;  %v116_v16 = vld [vmem:[#allocation7 + $0xc8] sm:$0xff]  ;;  %v122_v17 = vld [vmem:[#allocation7 + $0xf8] sm:$0xff]  ;;  %v127_v18 = vld [vmem:[#allocation7 + $0x120] sm:$0xff] }
  0x3c   :  { %8070 = vmatprep.subr.bf16.mxu0 %v8069_v8  ;;  %v8075_v19 = vpack.c.bf16 %v116_v16, %v111_v15  ;;  %v8077_v20 = vpack.c.bf16 %v127_v18, %v122_v17  ;;  %v121_v21 = vld [vmem:[#allocation7 + $0xf0] sm:$0xff]  ;;  %v126_v22 = vld [vmem:[#allocation7 + $0x118] sm:$0xff]  ;;  %v132_v23 = vld [vmem:[#allocation7 + $0x148] sm:$0xff] }
  0x3d   :  { %v137_v24 = vld [vmem:[#allocation7 + $0x170] sm:$0xff]  ;;  %v8079_v25 = vpack.c.bf16 %v126_v22, %v121_v21  ;;  %v131_v27 = vld [vmem:[#allocation7 + $0x140] sm:$0xff]  ;;  %v136_v28 = vld [vmem:[#allocation7 + $0x168] sm:$0xff] }
  0x3e   :  { %v8081_v26 = vpack.c.bf16 %v137_v24, %v132_v23  ;;  %v142_v29 = vld [vmem:[#allocation7 + $0x198] sm:$0xff]  ;;  %v147_v30 = vld [vmem:[#allocation7 + $0x1c0] sm:$0xff]  ;;  %v8083_v31 = vpack.c.bf16 %v136_v28, %v131_v27  ;;  %v9512_v32 = vld [vmem:[#allocation4 + $0x8] sm:$0xff] }
  0x3f   :  { %8072 = vmatpush1.bf16.msra.mxu0 %v8071_v13  ;;  %v8085_v33 = vpack.c.bf16 %v147_v30, %v142_v29  ;;  %v141_v34 = vld [vmem:[#allocation7 + $0x190] sm:$0xff]  ;;  %v146_v35 = vld [vmem:[#allocation7 + $0x1b8] sm:$0xff]  ;;  %6657 = vmatprep.mubr.msk.f32.mxu0 %vm211_vm0, %v9512_v32  ;;  %v152_v36 = vld [vmem:[#allocation7 + $0x1e8] sm:$0xff] }
  0x40   :  { %8074 = vmatprep.subr.bf16.mxu0 %v8073_v14  ;;  %v157_v37 = vld [vmem:[#allocation7 + $0x210] sm:$0xff]  ;;  %v151_v38 = vld [vmem:[#allocation7 + $0x1e0] sm:$0xff]  ;;  %v94_v39 = vld [vmem:[#allocation7 + $0x18] sm:$0xff]  ;;  %v8087_v41 = vpack.c.bf16 %v146_v35, %v141_v34 }
  0x41   :  { %v99_v40 = vld [vmem:[#allocation7 + $0x40] sm:$0xff]  ;;  %v156_v42 = vld [vmem:[#allocation7 + $0x208] sm:$0xff]  ;;  %v93_v44 = vld [vmem:[#allocation7 + $0x10] sm:$0xff]  ;;  %v8089_v46 = vpack.c.bf16 %v157_v37, %v152_v36 }
  0x42   :  { %v9516_v43 = vpack.c.bf16 %v99_v40, %v94_v39  ;;  %v98_v45 = vld [vmem:[#allocation7 + $0x38] sm:$0xff]  ;;  %v104_v49 = vld [vmem:[#allocation7 + $0x68] sm:$0xff]  ;;  %v109_v50 = vld [vmem:[#allocation7 + $0x90] sm:$0xff]  ;;  %v8091_v57 = vpack.c.bf16 %v156_v42, %v151_v38 }
  0x43   :  { %8076 = vmatpush1.bf16.msra.mxu0 %v8075_v19  ;;  %v162_v47 = vld [vmem:[#allocation7 + $0x238] sm:$0xff]  ;;  %v9518_v48 = vpack.c.bf16 %v98_v45, %v93_v44  ;;  %v167_v51 = vld [vmem:[#allocation7 + $0x260] sm:$0xff]  ;;  %v9520_v52 = vpack.c.bf16 %v109_v50, %v104_v49  ;;  %v108_v54 = vld [vmem:[#allocation7 + $0x88] sm:$0xff] }
  0x44   :  { %8078 = vmatprep.subr.bf16.mxu0 %v8077_v20  ;;  %v103_v53 = vld [vmem:[#allocation7 + $0x60] sm:$0xff]  ;;  %8725 = vmatprep.subr.bf16.mxu1 %v9516_v43  ;;  %v114_v55 = vld [vmem:[#allocation7 + $0xb8] sm:$0xff]  ;;  %v161_v58 = vld [vmem:[#allocation7 + $0x230] sm:$0xff]  ;;  %v8093_v59 = vpack.c.bf16 %v167_v51, %v162_v47 }
  0x45   :  { %v119_v56 = vld [vmem:[#allocation7 + $0xe0] sm:$0xff]  ;;  %8737 = vmatpush1.bf16.msra.mxu1 %v9518_v48  ;;  %v166_v60 = vld [vmem:[#allocation7 + $0x258] sm:$0xff]  ;;  %v172_v61 = vld [vmem:[#allocation7 + $0x288] sm:$0xff]  ;;  %v9525_v63 = vpack.c.bf16 %v108_v54, %v103_v53 }
  0x46   :  { %8726 = vmatprep.subr.bf16.mxu1 %v9520_v52  ;;  %v177_v62 = vld [vmem:[#allocation7 + $0x2b0] sm:$0xff]  ;;  %v9527_v0 = vpack.c.bf16 %v119_v56, %v114_v55  ;;  %v118_v2 = vld [vmem:[#allocation7 + $0xd8] sm:$0xff]  ;;  %v9529_v3 = vld [vmem:[#allocation4 + $0x88] sm:$0xff]  ;;  %v8095_v6 = vpack.c.bf16 %v166_v60, %v161_v58 }
  0x47   :  { %8080 = vmatpush1.bf16.msra.mxu0 %v8079_v25  ;;  %v113_v1 = vld [vmem:[#allocation7 + $0xb0] sm:$0xff]  ;;  %v124_v4 = vld [vmem:[#allocation7 + $0x108] sm:$0xff]  ;;  %6681 = vmatprep.mubr.msk.f32.mxu1 %vm211_vm0, %v9529_v3  ;;  %v8097_v7 = vpack.c.bf16 %v177_v62, %v172_v61  ;;  %v171_v8 = vld [vmem:[#allocation7 + $0x280] sm:$0xff] }
  0x48   :  { %8082 = vmatprep.subr.bf16.mxu0 %v8081_v26  ;;  %v129_v5 = vld [vmem:[#allocation7 + $0x130] sm:$0xff]  ;;  %v176_v9 = vld [vmem:[#allocation7 + $0x2a8] sm:$0xff]  ;;  %v182_v10 = vld [vmem:[#allocation7 + $0x2d8] sm:$0xff]  ;;  %v9535_v11 = vpack.c.bf16 %v118_v2, %v113_v1 }
  0x49   :  { %8738 = vmatpush1.bf16.msra.mxu1 %v9525_v63  ;;  %v187_v12 = vld [vmem:[#allocation7 + $0x300] sm:$0xff]  ;;  %v9537_v13 = vpack.c.bf16 %v129_v5, %v124_v4  ;;  %v128_v15 = vld [vmem:[#allocation7 + $0x128] sm:$0xff]  ;;  %v134_v16 = vld [vmem:[#allocation7 + $0x158] sm:$0xff]  ;;  %v8099_v18 = vpack.c.bf16 %v176_v9, %v171_v8 }
  0x4a   :  { %8727 = vmatprep.subr.bf16.mxu1 %v9527_v0  ;;  %v123_v14 = vld [vmem:[#allocation7 + $0x100] sm:$0xff]  ;;  %v8101_v19 = vpack.c.bf16 %v187_v12, %v182_v10  ;;  %v181_v20 = vld [vmem:[#allocation7 + $0x2d0] sm:$0xff]  ;;  %v186_v21 = vld [vmem:[#allocation7 + $0x2f8] sm:$0xff] }
  0x4b   :  { %8084 = vmatpush1.bf16.msra.mxu0 %v8083_v31  ;;  %v139_v17 = vld [vmem:[#allocation7 + $0x180] sm:$0xff]  ;;  %v192_v22 = vld [vmem:[#allocation7 + $0x328] sm:$0xff]  ;;  %v9541_v23 = vpack.c.bf16 %v128_v15, %v123_v14  ;;  %v197_v24 = vld [vmem:[#allocation7 + $0x350] sm:$0xff]  ;;  %v8103_v30 = vpack.c.bf16 %v186_v21, %v181_v20 }
  0x4c   :  { %8086 = vmatprep.subr.bf16.mxu0 %v8085_v33  ;;  %v9543_v25 = vpack.c.bf16 %v139_v17, %v134_v16  ;;  %v133_v26 = vld [vmem:[#allocation7 + $0x150] sm:$0xff]  ;;  %v138_v27 = vld [vmem:[#allocation7 + $0x178] sm:$0xff]  ;;  %v144_v28 = vld [vmem:[#allocation7 + $0x1a8] sm:$0xff]  ;;  %v8105_v31 = vpack.c.bf16 %v197_v24, %v192_v22 }
  0x4d   :  { %8739 = vmatpush1.bf16.msra.mxu1 %v9535_v11  ;;  %v149_v29 = vld [vmem:[#allocation7 + $0x1d0] sm:$0xff]  ;;  %v191_v33 = vld [vmem:[#allocation7 + $0x320] sm:$0xff]  ;;  %v196_v34 = vld [vmem:[#allocation7 + $0x348] sm:$0xff]  ;;  %v9547_v36 = vpack.c.bf16 %v138_v27, %v133_v26 }
  0x4e   :  { %8728 = vmatprep.subr.bf16.mxu1 %v9537_v13  ;;  %v202_v35 = vld [vmem:[#allocation7 + $0x378] sm:$0xff]  ;;  %v207_v37 = vld [vmem:[#allocation7 + $0x3a0] sm:$0xff]  ;;  %v9549_v38 = vpack.c.bf16 %v149_v29, %v144_v28  ;;  %v148_v40 = vld [vmem:[#allocation7 + $0x1c8] sm:$0xff]  ;;  %v8107_v44 = vpack.c.bf16 %v196_v34, %v191_v33 }
  0x4f   :  { %8088 = vmatpush1.bf16.msra.mxu0 %v8087_v41  ;;  %v143_v39 = vld [vmem:[#allocation7 + $0x1a0] sm:$0xff]  ;;  %v154_v41 = vld [vmem:[#allocation7 + $0x1f8] sm:$0xff]  ;;  %v8109_v45 = vpack.c.bf16 %v207_v37, %v202_v35  ;;  %v153_v51 = vld [vmem:[#allocation7 + $0x1f0] sm:$0xff] }
  0x50   :  { %8090 = vmatprep.subr.bf16.mxu0 %v8089_v46  ;;  %v159_v42 = vld [vmem:[#allocation7 + $0x220] sm:$0xff]  ;;  %v201_v46 = vld [vmem:[#allocation7 + $0x370] sm:$0xff]  ;;  %v206_v47 = vld [vmem:[#allocation7 + $0x398] sm:$0xff]  ;;  %v9553_v49 = vpack.c.bf16 %v148_v40, %v143_v39 }
  0x51   :  { %8740 = vmatpush1.bf16.msra.mxu1 %v9541_v23  ;;  %v9555_v50 = vpack.c.bf16 %v159_v42, %v154_v41  ;;  %v158_v53 = vld [vmem:[#allocation7 + $0x218] sm:$0xff]  ;;  %v164_v54 = vld [vmem:[#allocation7 + $0x248] sm:$0xff]  ;;  %v169_v55 = vld [vmem:[#allocation7 + $0x270] sm:$0xff]  ;;  %v8111_v56 = vpack.c.bf16 %v206_v47, %v201_v46 }
  0x52   :  { %8729 = vmatprep.subr.bf16.mxu1 %v9543_v25  ;;  %v9561_v58 = vpack.c.bf16 %v169_v55, %v164_v54  ;;  %v168_v60 = vld [vmem:[#allocation7 + $0x268] sm:$0xff]  ;;  %v9564_v61 = vld [vmem:[#allocation4] sm:$0xff]  ;;  %v174_v62 = vld [vmem:[#allocation7 + $0x298] sm:$0xff]  ;;  %v9439_v54 = vmov 0.0|0.0  }
  0x53   :  { %8092 = vmatpush1.bf16.msra.mxu0 %v8091_v57  ;;  %v9559_v57 = vpack.c.bf16 %v158_v53, %v153_v51  ;;  %v179_v1 = vld [vmem:[#allocation7 + $0x2c0] sm:$0xff]  ;;  %v9567_v2 = vld [vmem:[#allocation4 + $0x18] sm:$0xff]  ;;  %v173_v5 = vld [vmem:[#allocation7 + $0x290] sm:$0xff] }
  0x54   :  { %8094 = vmatprep.subr.bf16.mxu0 %v8093_v59  ;;  %v163_v59 = vld [vmem:[#allocation7 + $0x240] sm:$0xff]  ;;  %v9578_v8 = vld [vmem:[#allocation4 + $0x10] sm:$0xff]  ;;  %v184_v9 = vld [vmem:[#allocation7 + $0x2e8] sm:$0xff] }
  0x55   :  { %8741 = vmatpush1.bf16.msra.mxu1 %v9547_v36  ;;  %v9570_v4 = vpack.c.bf16 %v168_v60, %v163_v59  ;;  %v189_v10 = vld [vmem:[#allocation7 + $0x310] sm:$0xff]  ;;  %v183_v14 = vld [vmem:[#allocation7 + $0x2e0] sm:$0xff]  ;;  %v188_v15 = vld [vmem:[#allocation7 + $0x308] sm:$0xff] }
  0x56   :  { %8730 = vmatprep.subr.bf16.mxu1 %v9549_v38  ;;  %v9588_v16 = vpack.c.bf16 %v189_v10, %v184_v9  ;;  %v199_v17 = vld [vmem:[#allocation7 + $0x360] sm:$0xff]  ;;  %v193_v20 = vld [vmem:[#allocation7 + $0x330] sm:$0xff]  ;;  %v198_v21 = vld [vmem:[#allocation7 + $0x358] sm:$0xff] }
  0x57   :  { %8096 = vmatpush1.bf16.msra.mxu0 %v8095_v6  ;;  %v178_v6 = vld [vmem:[#allocation7 + $0x2b8] sm:$0xff]  ;;  %v209_v24 = vld [vmem:[#allocation7 + $0x3b0] sm:$0xff]  ;;  %v9611_v26 = vld [vmem:[#allocation4 + $0x48] sm:$0xff]  ;;  %v9614_v27 = vpack.c.bf16 %v198_v21, %v193_v20 }
  0x58   :  { %8098 = vmatprep.subr.bf16.mxu0 %v8097_v7  ;;  %v9573_v7 = vpack.c.bf16 %v179_v1, %v174_v62  ;;  %v9584_v12 = vpack.c.bf16 %v178_v6, %v173_v5  ;;  %v203_v28 = vld [vmem:[#allocation7 + $0x380] sm:$0xff]  ;;  %v208_v29 = vld [vmem:[#allocation7 + $0x3a8] sm:$0xff]  ;;  %v9636_v33 = vld [vmem:[#allocation4 + $0x50] sm:$0xff] }
  0x59   :  { %8742 = vmatpush1.bf16.msra.mxu1 %v9553_v49  ;;  %v9641_v34 = vld [vmem:[#allocation4 + $0x80] sm:$0xff]  ;;  %v9657_v37 = vld [vmem:[#allocation4 + $0x90] sm:$0xff]  ;;  %v9674_v41 = vld [vmem:[#allocation4 + $0xb8] sm:$0xff] }
  0x5a   :  { %8731 = vmatprep.subr.bf16.mxu1 %v9555_v50  ;;  %v9652_v35 = vld [vmem:[#allocation4 + $0x60] sm:$0xff]  ;;  %v9668_v39 = vld [vmem:[#allocation4 + $0x70] sm:$0xff]  ;;  %v9698_v46 = vld [vmem:[#allocation4 + $0xd8] sm:$0xff] }
  0x5b   :  { %8100 = vmatpush1.bf16.msra.mxu0 %v8099_v18  ;;  %v9596_v18 = vld [vmem:[#allocation4 + $0x38] sm:$0xff]  ;;  %v9671_v40 = vld [vmem:[#allocation4 + $0xa0] sm:$0xff]  ;;  %v9683_v42 = vld [vmem:[#allocation4 + $0xb0] sm:$0xff] }
  0x5c   :  { %8102 = vmatprep.subr.bf16.mxu0 %v8101_v19  ;;  %v9599_v19 = vpack.c.bf16 %v188_v15, %v183_v14  ;;  %v9707_v47 = vld [vmem:[#allocation4 + $0xd0] sm:$0xff]  ;;  %v9722_v51 = vld [vmem:[#allocation4 + $0xf8] sm:$0xff]  ;;  %v95_v55 = vld [vmem:[#allocation7 + $0x20] sm:$0xff] }
  0x5d   :  { %8743 = vmatpush1.bf16.msra.mxu1 %v9559_v57  ;;  %v9731_v53 = vld [vmem:[#allocation4 + $0xf0] sm:$0xff]  ;;  %v110_v59 = vld [vmem:[#allocation7 + $0x98] sm:$0xff]  ;;  %v115_v62 = vld [vmem:[#allocation7 + $0xc0] sm:$0xff] }
  0x5e   :  { %8732 = vmatprep.subr.bf16.mxu1 %v9561_v58  ;;  %v120_v1 = vld [vmem:[#allocation7 + $0xe8] sm:$0xff]  ;;  %v125_v5 = vld [vmem:[#allocation7 + $0x110] sm:$0xff]  ;;  %v130_v6 = vld [vmem:[#allocation7 + $0x138] sm:$0xff] }
  0x5f   :  { %8104 = vmatpush1.bf16.msra.mxu0 %v8103_v30  ;;  %v135_v9 = vld [vmem:[#allocation7 + $0x160] sm:$0xff]  ;;  %v140_v10 = vld [vmem:[#allocation7 + $0x188] sm:$0xff]  ;;  %v145_v14 = vld [vmem:[#allocation7 + $0x1b0] sm:$0xff] }
  0x60   :  { %8106 = vmatprep.subr.bf16.mxu0 %v8105_v31  ;;  %v9629_v31 = vpack.c.bf16 %v208_v29, %v203_v28  ;;  %v150_v15 = vld [vmem:[#allocation7 + $0x1d8] sm:$0xff]  ;;  %v165_v20 = vld [vmem:[#allocation7 + $0x250] sm:$0xff]  ;;  %vm10047_vm2 = vmpackc.low %vm882_vm1, %vm882_vm1 }
  0x61   :  { %8744 = vmatpush1.bf16.msra.mxu1 %v9570_v4  ;;  %v170_v21 = vld [vmem:[#allocation7 + $0x278] sm:$0xff]  ;;  %v185_v28 = vld [vmem:[#allocation7 + $0x2f0] sm:$0xff] }
  0x62   :  { %8733 = vmatprep.subr.bf16.mxu1 %v9573_v7  ;;  %v190_v29 = vld [vmem:[#allocation7 + $0x318] sm:$0xff] }
  0x63   :  { %8108 = vmatpush1.bf16.msra.mxu0 %v8107_v44  ;;  %v9686_v44 = vld [vmem:[#allocation4 + $0xc8] sm:$0xff] }
  0x64   :  { %8110 = vmatprep.subr.bf16.mxu0 %v8109_v45  ;;  %v9695_v45 = vld [vmem:[#allocation4 + $0xc0] sm:$0xff] }
  0x65   :  { %8745 = vmatpush1.bf16.msra.mxu1 %v9584_v12 }
  0x66   :  { %8734 = vmatprep.subr.bf16.mxu1 %v9588_v16 }
  0x67   :  { %8112 = vmatpush1.bf16.msra.mxu0 %v8111_v56  ;;  %v100_v56 = vld [vmem:[#allocation7 + $0x48] sm:$0xff] }
  0x68   :  { %8114 = vmatprep.subr.bf16.mxu0 %v9516_v43  ;;  %v9581_v43 = vld [vmem:[#allocation4 + $0x28] sm:$0xff] }
  0x69   :  { %8746 = vmatpush1.bf16.msra.mxu1 %v9599_v19 }
  0x6a   :  { %325 = vmatmul.mubr.f32.vlgmr.msra.gmra.mrb[0].mxu0 %v9564_v61 }
  0x6b   :  { %6658 = vmatprep.mubr.msk.f32.mxu0 %vm211_vm0, %v9567_v2  ;;  %8116 = vmatpush1.bf16.msra.mxu0 %v9518_v48  ;;  %v9593_v48 = vld [vmem:[#allocation4 + $0x20] sm:$0xff] }
  0x6c   :  { %8118 = vmatprep.subr.bf16.mxu0 %v9520_v52  ;;  %v194_v52 = vld [vmem:[#allocation7 + $0x338] sm:$0xff] }
  0x6d   :  { %v9603_v22 = vpack.c.bf16 %v199_v17, %v194_v52  ;;  %v155_v52 = vld [vmem:[#allocation7 + $0x200] sm:$0xff]  ;;  %v160_v17 = vld [vmem:[#allocation7 + $0x228] sm:$0xff] }
  0x6e   :  { %331 = vmatmul.mubr.f32.gmra.mrb[2].mxu0 %v9578_v8 }
  0x6f   :  { %6659 = vmatprep.mubr.msk.f32.mxu0 %vm211_vm0, %v9581_v43  ;;  %8120 = vmatpush1.bf16.msra.mxu0 %v9525_v63  ;;  %v9608_v63 = vld [vmem:[#allocation4 + $0x30] sm:$0xff] }
  0x70   :  { %8122 = vmatprep.subr.bf16.mxu0 %v9527_v0  ;;  %v204_v0 = vld [vmem:[#allocation7 + $0x388] sm:$0xff]  ;;  %8735 = vmatprep.subr.bf16.mxu1 %v9603_v22 }
  0x71   :  { %v9618_v30 = vpack.c.bf16 %v209_v24, %v204_v0  ;;  %8747 = vmatpush1.bf16.msra.mxu1 %v9614_v27  ;;  %v175_v0 = vld [vmem:[#allocation7 + $0x2a0] sm:$0xff]  ;;  %v180_v24 = vld [vmem:[#allocation7 + $0x2c8] sm:$0xff] }
  0x72   :  { %337 = vmatmul.mubr.f32.gmra.mrb[4].mxu0 %v9593_v48 }
  0x73   :  { %6660 = vmatprep.mubr.msk.f32.mxu0 %vm211_vm0, %v9596_v18  ;;  %8124 = vmatpush1.bf16.msra.mxu0 %v9535_v11  ;;  %v9623_v11 = vld [vmem:[#allocation4 + $0x40] sm:$0xff] }
  0x74   :  { %8126 = vmatprep.subr.bf16.mxu0 %v9537_v13  ;;  %v9626_v13 = vld [vmem:[#allocation4 + $0x58] sm:$0xff]  ;;  %8736 = vmatprep.subr.bf16.mxu1 %v9618_v30 }
  0x75   :  { %8748 = vmatpush1.bf16.msra.mxu1 %v9629_v31 }
  0x76   :  { %343 = vmatmul.mubr.f32.gmra.mrb[6].mxu0 %v9608_v63 }
  0x77   :  { %6661 = vmatprep.mubr.msk.f32.mxu0 %vm211_vm0, %v9611_v26  ;;  %8128 = vmatpush1.bf16.msra.mxu0 %v9541_v23  ;;  %v9639_v23 = vld [vmem:[#allocation4 + $0x68] sm:$0xff] }
  0x78   :  { %8130 = vmatprep.subr.bf16.mxu0 %v9543_v25  ;;  %v9644_v25 = vld [vmem:[#allocation4 + $0x98] sm:$0xff]  ;;  %534 = vmatmul.mubr.f32.vlgmr.msra.gmra.mrb[0].mxu1 %v9641_v34 }
  0x79   :  { %6682 = vmatprep.mubr.msk.f32.mxu1 %vm211_vm0, %v9644_v25 }
  0x7a   :  { %349 = vmatmul.mubr.f32.gmra.mrb[8].mxu0 %v9623_v11 }
  0x7b   :  { %6662 = vmatprep.mubr.msk.f32.mxu0 %vm211_vm0, %v9626_v13  ;;  %8132 = vmatpush1.bf16.msra.mxu0 %v9547_v36  ;;  %v9655_v36 = vld [vmem:[#allocation4 + $0x78] sm:$0xff] }
  0x7c   :  { %8134 = vmatprep.subr.bf16.mxu0 %v9549_v38  ;;  %v9660_v38 = vld [vmem:[#allocation4 + $0xa8] sm:$0xff]  ;;  %540 = vmatmul.mubr.f32.gmra.mrb[2].mxu1 %v9657_v37 }
  0x7d   :  { %6683 = vmatprep.mubr.msk.f32.mxu1 %vm211_vm0, %v9660_v38 }
  0x7e   :  { %355 = vmatmul.mubr.f32.gmra.mrb[10].mxu0 %v9636_v33 }
  0x7f   :  { %6663 = vmatprep.mubr.msk.f32.mxu0 %vm211_vm0, %v9639_v23  ;;  %8136 = vmatpush1.bf16.msra.mxu0 %v9553_v49  ;;  %v9710_v49 = vld [vmem:[#allocation4 + $0xe8] sm:$0xff] }
  0x80   :  { %8138 = vmatprep.subr.bf16.mxu0 %v9555_v50  ;;  %546 = vmatmul.mubr.f32.gmra.mrb[4].mxu1 %v9671_v40  ;;  %v9719_v50 = vld [vmem:[#allocation4 + $0xe0] sm:$0xff] }
  0x81   :  { %6684 = vmatprep.mubr.msk.f32.mxu1 %vm211_vm0, %v9674_v41 }
  0x82   :  { %361 = vmatmul.mubr.f32.gmra.mrb[12].mxu0 %v9652_v35 }
  0x83   :  { %6664 = vmatprep.mubr.msk.f32.mxu0 %vm211_vm0, %v9655_v36  ;;  %8140 = vmatpush1.bf16.msra.mxu0 %v9559_v57  ;;  %v8162_v57 = vpack.c.bf16 %v100_v56, %v95_v55  ;;  %v200_v55 = vld [vmem:[#allocation7 + $0x368] sm:$0xff] }
  0x84   :  { %8142 = vmatprep.subr.bf16.mxu0 %v9561_v58  ;;  %552 = vmatmul.mubr.f32.gmra.mrb[6].mxu1 %v9683_v42  ;;  %v105_v58 = vld [vmem:[#allocation7 + $0x70] sm:$0xff] }
  0x85   :  { %6685 = vmatprep.mubr.msk.f32.mxu1 %vm211_vm0, %v9686_v44  ;;  %v8165_v60 = vpack.c.bf16 %v110_v59, %v105_v58  ;;  %v210_v58 = vld [vmem:[#allocation7 + $0x3b8] sm:$0xff] }
  0x86   :  { %367 = vmatmul.mubr.f32.gmra.mrb[14].mxu0 %v9668_v39 }
  0x87   :  { %6665 = vmatprep.mubr.msk.f32.mxu0 %vm211_vm0, %v9529_v3  ;;  %8144 = vmatpush1.bf16.msra.mxu0 %v9570_v4  ;;  %v8168_v4 = vpack.c.bf16 %v120_v1, %v115_v62 }
  0x88   :  { %8146 = vmatprep.subr.bf16.mxu0 %v9573_v7  ;;  %558 = vmatmul.mubr.f32.gmra.mrb[8].mxu1 %v9695_v45  ;;  %v8171_v7 = vpack.c.bf16 %v130_v6, %v125_v5 }
  0x89   :  { %6686 = vmatprep.mubr.msk.f32.mxu1 %vm211_vm0, %v9698_v46 }
  0x8a   :  { %373 = vmatmul.mubr.f32.gmra.mrb[16].mxu0 %v9641_v34 }
  0x8b   :  { %6666 = vmatprep.mubr.msk.f32.mxu0 %vm211_vm0, %v9644_v25  ;;  %8148 = vmatpush1.bf16.msra.mxu0 %v9584_v12  ;;  %v8174_v12 = vpack.c.bf16 %v140_v10, %v135_v9 }
  0x8c   :  { %8150 = vmatprep.subr.bf16.mxu0 %v9588_v16  ;;  %564 = vmatmul.mubr.f32.gmra.mrb[10].mxu1 %v9707_v47  ;;  %v8177_v16 = vpack.c.bf16 %v150_v15, %v145_v14 }
  0x8d   :  { %6687 = vmatprep.mubr.msk.f32.mxu1 %vm211_vm0, %v9710_v49 }
  0x8e   :  { %379 = vmatmul.mubr.f32.gmra.mrb[18].mxu0 %v9657_v37 }
  0x8f   :  { %6667 = vmatprep.mubr.msk.f32.mxu0 %vm211_vm0, %v9660_v38  ;;  %8152 = vmatpush1.bf16.msra.mxu0 %v9599_v19  ;;  %v8180_v19 = vpack.c.bf16 %v160_v17, %v155_v52 }
  0x90   :  { %8154 = vmatprep.subr.bf16.mxu0 %v9603_v22  ;;  %570 = vmatmul.mubr.f32.gmra.mrb[12].mxu1 %v9719_v50  ;;  %v8183_v22 = vpack.c.bf16 %v170_v21, %v165_v20 }
  0x91   :  { %6688 = vmatprep.mubr.msk.f32.mxu1 %vm211_vm0, %v9722_v51 }
  0x92   :  { %385 = vmatmul.mubr.f32.gmra.mrb[20].mxu0 %v9671_v40 }
  0x93   :  { %6668 = vmatprep.mubr.msk.f32.mxu0 %vm211_vm0, %v9674_v41  ;;  %8156 = vmatpush1.bf16.msra.mxu0 %v9614_v27  ;;  %v8186_v27 = vpack.c.bf16 %v180_v24, %v175_v0 }
  0x94   :  { %8158 = vmatprep.subr.bf16.mxu0 %v9618_v30  ;;  %576 = vmatmul.mubr.f32.gmra.mrb[14].mxu1 %v9731_v53  ;;  %v8189_v30 = vpack.c.bf16 %v190_v29, %v185_v28 }
  0x96   :  { %391 = vmatmul.mubr.f32.gmra.mrb[22].mxu0 %v9683_v42 }
  0x97   :  { %6669 = vmatprep.mubr.msk.f32.mxu0 %vm211_vm0, %v9686_v44  ;;  %8160 = vmatpush1.bf16.msra.mxu0 %v9629_v31  ;;  %v195_v31 = vld [vmem:[#allocation7 + $0x340] sm:$0xff] }
  0x98   :  { %8161 = vmatprep.subr.bf16.mxu0 %v9439_v54  ;;  %v8192_v56 = vpack.c.bf16 %v200_v55, %v195_v31 }
  0x9a   :  { %397 = vmatmul.mubr.f32.gmra.mrb[24].mxu0 %v9695_v45 }
  0x9b   :  { %6670 = vmatprep.mubr.msk.f32.mxu0 %vm211_vm0, %v9698_v46 }
  0x9e   :  { %403 = vmatmul.mubr.f32.gmra.mrb[26].mxu0 %v9707_v47 }
  0x9f   :  { %6671 = vmatprep.mubr.msk.f32.mxu0 %vm211_vm0, %v9710_v49 }
  0xa2   :  { %409 = vmatmul.mubr.f32.gmra.mrb[28].mxu0 %v9719_v50 }
  0xa3   :  { %6672 = vmatprep.mubr.msk.f32.mxu0 %vm211_vm0, %v9722_v51 }
  0xa6   :  { %415 = vmatmul.mubr.f32.gmra.mrb[30].mxu0 %v9731_v53 }
  0xa7   :  { %6673 = vmatprep.mubr.msk.f32.mxu0 %vm211_vm0, %v9512_v32 }
  0xaa   :  { %486 = vmatmul.mubr.f32.vlgmr.msra.gmra.mrb[32].mxu0 %v9564_v61 }
  0xab   :  { %6674 = vmatprep.mubr.msk.f32.mxu0 %vm211_vm0, %v9567_v2  ;;  %8163 = vmatpush1.bf16.msra.mxu0 %v8162_v57  ;;  %v205_v57 = vld [vmem:[#allocation7 + $0x390] sm:$0xff] }
  0xac   :  { %8164 = vmatprep.subr.bf16.mxu0 %v9439_v54  ;;  %v8195_v59 = vpack.c.bf16 %v210_v58, %v205_v57 }
  0xae   :  { %492 = vmatmul.mubr.f32.gmra.mrb[34].mxu0 %v9578_v8 }
  0xaf   :  { %6675 = vmatprep.mubr.msk.f32.mxu0 %vm211_vm0, %v9581_v43  ;;  %8166 = vmatpush1.bf16.msra.mxu0 %v8165_v60 }
  0xb0   :  { %8167 = vmatprep.subr.bf16.mxu0 %v9439_v54 }
  0xb2   :  { %498 = vmatmul.mubr.f32.gmra.mrb[36].mxu0 %v9593_v48 }
  0xb3   :  { %6676 = vmatprep.mubr.msk.f32.mxu0 %vm211_vm0, %v9596_v18  ;;  %8169 = vmatpush1.bf16.msra.mxu0 %v8168_v4 }
  0xb4   :  { %8170 = vmatprep.subr.bf16.mxu0 %v9439_v54 }
  0xb6   :  { %504 = vmatmul.mubr.f32.gmra.mrb[38].mxu0 %v9608_v63 }
  0xb7   :  { %6677 = vmatprep.mubr.msk.f32.mxu0 %vm211_vm0, %v9611_v26  ;;  %8172 = vmatpush1.bf16.msra.mxu0 %v8171_v7 }
  0xb8   :  { %8173 = vmatprep.subr.bf16.mxu0 %v9439_v54 }
  0xba   :  { %510 = vmatmul.mubr.f32.gmra.mrb[40].mxu0 %v9623_v11 }
  0xbb   :  { %6678 = vmatprep.mubr.msk.f32.mxu0 %vm211_vm0, %v9626_v13  ;;  %8175 = vmatpush1.bf16.msra.mxu0 %v8174_v12 }
  0xbc   :  { %8176 = vmatprep.subr.bf16.mxu0 %v9439_v54 }
  0xbe   :  { %516 = vmatmul.mubr.f32.gmra.mrb[42].mxu0 %v9636_v33 }
  0xbf   :  { %6679 = vmatprep.mubr.msk.f32.mxu0 %vm211_vm0, %v9639_v23  ;;  %8178 = vmatpush1.bf16.msra.mxu0 %v8177_v16 }
  0xc0   :  { %8179 = vmatprep.subr.bf16.mxu0 %v9439_v54 }
  0xc2   :  { %522 = vmatmul.mubr.f32.gmra.mrb[44].mxu0 %v9652_v35 }
  0xc3   :  { %6680 = vmatprep.mubr.msk.f32.mxu0 %vm211_vm0, %v9655_v36  ;;  %8181 = vmatpush1.bf16.msra.mxu0 %v8180_v19 }
  0xc4   :  { %8182 = vmatprep.subr.bf16.mxu0 %v9439_v54 }
  0xc6   :  { %528 = vmatmul.mubr.f32.gmra.mrb[46].mxu0 %v9668_v39 }
  0xc7   :  { %8184 = vmatpush1.bf16.msra.mxu0 %v8183_v22  ;;  %6689 = vmatprep.mubr.msk.f32.mxu0 %vm211_vm0, %v9512_v32 }
  0xc8   :  { %8185 = vmatprep.subr.bf16.mxu0 %v9439_v54 }
  0xcb   :  { %8187 = vmatpush1.bf16.msra.mxu0 %v8186_v27 }
  0xcc   :  { %8188 = vmatprep.subr.bf16.mxu0 %v9439_v54 }
  0xcf   :  { %8190 = vmatpush1.bf16.msra.mxu0 %v8189_v30 }
  0xd0   :  { %8191 = vmatprep.subr.bf16.mxu0 %v9439_v54 }
  0xd3   :  { %8193 = vmatpush1.bf16.msra.mxu0 %v8192_v56 }
  0xd4   :  { %8194 = vmatprep.subr.bf16.mxu0 %v9439_v54 }
  0xd7   :  { %8196 = vmatpush1.bf16.msra.mxu0 %v8195_v59 }
  0xda   :  { %647 = vmatmul.mubr.f32.vlgmr.msra.gmra.mrb[48].mxu0 %v9564_v61 }
  0xdb   :  { %6690 = vmatprep.mubr.msk.f32.mxu0 %vm211_vm0, %v9567_v2 }
  0xde   :  { %652 = vmatmul.mubr.f32.gmra.mrb[50].mxu0 %v9578_v8 }
  0xdf   :  { %6691 = vmatprep.mubr.msk.f32.mxu0 %vm211_vm0, %v9581_v43 }
  0xe2   :  { %657 = vmatmul.mubr.f32.gmra.mrb[52].mxu0 %v9593_v48 }
  0xe3   :  { %6692 = vmatprep.mubr.msk.f32.mxu0 %vm211_vm0, %v9596_v18 }
  0xe6   :  { %662 = vmatmul.mubr.f32.gmra.mrb[54].mxu0 %v9608_v63 }
  0xe7   :  { %6693 = vmatprep.mubr.msk.f32.mxu0 %vm211_vm0, %v9611_v26 }
  0xea   :  { %667 = vmatmul.mubr.f32.gmra.mrb[56].mxu0 %v9623_v11 }
  0xeb   :  { %6694 = vmatprep.mubr.msk.f32.mxu0 %vm211_vm0, %v9626_v13 }
  0xee   :  { %672 = vmatmul.mubr.f32.gmra.mrb[58].mxu0 %v9636_v33 }
  0xef   :  { %6695 = vmatprep.mubr.msk.f32.mxu0 %vm211_vm0, %v9639_v23 }
  0xf2   :  { %677 = vmatmul.mubr.f32.gmra.mrb[60].mxu0 %v9652_v35 }
  0xf3   :  { %6696 = vmatprep.mubr.msk.f32.mxu0 %vm211_vm0, %v9655_v36 }
  0xf6   :  { %682 = vmatmul.mubr.f32.gmra.mrb[62].mxu0 %v9668_v39 }
  0xf7   :  { %6697 = vmatprep.mubr.msk.f32.mxu0 %vm211_vm0, %v9529_v3 }
  0xfa   :  { %687 = vmatmul.mubr.f32.gmra.mrb[64].mxu0 %v9641_v34 }
  0xfb   :  { %6698 = vmatprep.mubr.msk.f32.mxu0 %vm211_vm0, %v9644_v25 }
  0xfe   :  { %692 = vmatmul.mubr.f32.gmra.mrb[66].mxu0 %v9657_v37 }
  0xff   :  { %6699 = vmatprep.mubr.msk.f32.mxu0 %vm211_vm0, %v9660_v38 }
 0x102   :  { %697 = vmatmul.mubr.f32.gmra.mrb[68].mxu0 %v9671_v40 }
 0x103   :  { %6700 = vmatprep.mubr.msk.f32.mxu0 %vm211_vm0, %v9674_v41 }
 0x106   :  { %702 = vmatmul.mubr.f32.gmra.mrb[70].mxu0 %v9683_v42 }
 0x107   :  { %6701 = vmatprep.mubr.msk.f32.mxu0 %vm211_vm0, %v9686_v44 }
 0x10a   :  { %707 = vmatmul.mubr.f32.gmra.mrb[72].mxu0 %v9695_v45 }
 0x10b   :  { %6702 = vmatprep.mubr.msk.f32.mxu0 %vm211_vm0, %v9698_v46 }
 0x10e   :  { %712 = vmatmul.mubr.f32.gmra.mrb[74].mxu0 %v9707_v47 }
 0x10f   :  { %6703 = vmatprep.mubr.msk.f32.mxu0 %vm211_vm0, %v9710_v49 }
 0x112   :  { %717 = vmatmul.mubr.f32.gmra.mrb[76].mxu0 %v9719_v50 }
 0x113   :  { %6704 = vmatprep.mubr.msk.f32.mxu0 %vm211_vm0, %v9722_v51 }
 0x116   :  { %722 = vmatmul.mubr.f32.gmra.mrb[78].mxu0 %v9731_v53 }
 0x13d   :  { %v9828_v32 = vpop.f32.mrb[0].mxu0 }
 0x13e   :  { %v9830_v3 = vpop.f32.mrb[1].mxu0  ;;  %7409 = vmatprep.mubr.msk.f32.mxu1 %vm882_vm1, %v9828_v32 }
 0x13f   :  { %728 = vst [vmem:[#allocation2 + $0x8] sm:$0xff] %v9830_v3 }
 0x141   :  { %v9835_v61 = vpop.f32.mrb[2].mxu0 }
 0x142   :  { %v9837_v2 = vpop.f32.mrb[3].mxu0 }
 0x143   :  { %733 = vst [vmem:[#allocation2 + $0x30] sm:$0xff] %v9837_v2  ;;  %v8762_v8 = vpack.i.bf16 %v9837_v2, %v9830_v3 }
 0x145   :  { %v9842_v43 = vpop.f32.mrb[4].mxu0  ;;  %8763 = vrot.lane.b32.xlu0 %v8762_v8, %s9440_s2 }
 0x146   :  { %v9845_v48 = vpop.f32.mrb[5].mxu0 }
 0x147   :  { %738 = vst [vmem:[#allocation2 + $0x58] sm:$0xff] %v9845_v48 }
 0x149   :  { %v9848_v18 = vpop.f32.mrb[6].mxu0 }
 0x14a   :  { %v9850_v63 = vpop.f32.mrb[7].mxu0 }
 0x14b   :  { %743 = vst [vmem:[#allocation2 + $0x80] sm:$0xff] %v9850_v63  ;;  %v8767_v26 = vpack.i.bf16 %v9850_v63, %v9845_v48 }
 0x14d   :  { %v9855_v11 = vpop.f32.mrb[8].mxu0  ;;  %8768 = vrot.lane.b32.xlu0 %v8767_v26, %s9440_s2 }
 0x14e   :  { %v9858_v13 = vpop.f32.mrb[9].mxu0 }
 0x14f   :  { %748 = vst [vmem:[#allocation2 + $0xa8] sm:$0xff] %v9858_v13 }
 0x151   :  { %v9861_v33 = vpop.f32.mrb[10].mxu0  ;;  %8783 = vrot.lane.b32.xlu0 %v8762_v8, %s9441_s27 }
 0x152   :  { %v9864_v23 = vpop.f32.mrb[11].mxu0 }
 0x153   :  { %753 = vst [vmem:[#allocation2 + $0xd0] sm:$0xff] %v9864_v23  ;;  %v8792_v34 = vpack.i.bf16 %v9864_v23, %v9858_v13 }
 0x155   :  { %v9869_v25 = vpop.f32.mrb[12].mxu0  ;;  %8793 = vrot.lane.b32.xlu0 %v8792_v34, %s9441_s27  ;;  %8773 = vrot.lane.b32.xlu1 %v8792_v34, %s9440_s2 }
 0x156   :  { %v9873_v35 = vpop.f32.mrb[13].mxu0 }
 0x157   :  { %758 = vst [vmem:[#allocation2 + $0xf8] sm:$0xff] %v9873_v35 }
 0x159   :  { %v9876_v36 = vpop.f32.mrb[14].mxu0  ;;  %1272 = vrot.lane.b32.xlu0 %v9828_v32, %s9442_s28 }
 0x15a   :  { %v9880_v37 = vpop.f32.mrb[15].mxu0 }
 0x15b   :  { %763 = vst [vmem:[#allocation2 + $0x120] sm:$0xff] %v9880_v37  ;;  %v8777_v38 = vpack.i.bf16 %v9880_v37, %v9873_v35 }
 0x15d   :  { %1276 = vrot.lane.b32.xlu0 %v9842_v43, %s9442_s28  ;;  %8778 = vrot.lane.b32.xlu1 %v8777_v38, %s9440_s2  ;;  %v9888_v39 = vpop.f32.mrb[16].mxu0 }
 0x15e   :  { %767 = vst [vmem:[#allocation2 + $0x140] sm:$0xff] %v9888_v39  ;;  %v9891_v40 = vpop.f32.mrb[17].mxu0 }
 0x15f   :  { %768 = vst [vmem:[#allocation2 + $0x148] sm:$0xff] %v9891_v40 }
 0x161   :  { %1280 = vrot.lane.b32.xlu0 %v9855_v11, %s9442_s28  ;;  %8788 = vrot.lane.b32.xlu1 %v8767_v26, %s9441_s27  ;;  %v9897_v41 = vpop.f32.mrb[18].mxu0 }
 0x162   :  { %772 = vst [vmem:[#allocation2 + $0x168] sm:$0xff] %v9897_v41  ;;  %v9900_v42 = vpop.f32.mrb[19].mxu0 }
 0x163   :  { %773 = vst [vmem:[#allocation2 + $0x170] sm:$0xff] %v9900_v42  ;;  %v10012_v8 = vpack.i.bf16 %v9900_v42, %v9891_v40 }
 0x165   :  { %1284 = vrot.lane.b32.xlu0 %v9869_v25, %s9442_s28  ;;  %8798 = vrot.lane.b32.xlu1 %v8777_v38, %s9441_s27  ;;  %v9906_v44 = vpop.f32.mrb[20].mxu0 }
 0x166   :  { %777 = vst [vmem:[#allocation2 + $0x190] sm:$0xff] %v9906_v44  ;;  %v9909_v45 = vpop.f32.mrb[21].mxu0 }
 0x167   :  { %778 = vst [vmem:[#allocation2 + $0x198] sm:$0xff] %v9909_v45 }
 0x169   :  { %1758 = vrot.lane.b32.xlu0 %v9828_v32, %s9440_s2  ;;  %1274 = vrot.lane.b32.xlu1 %v9835_v61, %s9442_s28  ;;  %v9916_v46 = vpop.f32.mrb[22].mxu0 }
 0x16a   :  { %782 = vst [vmem:[#allocation2 + $0x1b8] sm:$0xff] %v9916_v46  ;;  %v9919_v47 = vpop.f32.mrb[23].mxu0 }
 0x16b   :  { %783 = vst [vmem:[#allocation2 + $0x1c0] sm:$0xff] %v9919_v47  ;;  %v10029_v40 = vpack.i.bf16 %v9919_v47, %v9909_v45 }
 0x16d   :  { %1762 = vrot.lane.b32.xlu0 %v9842_v43, %s9440_s2  ;;  %1278 = vrot.lane.b32.xlu1 %v9848_v18, %s9442_s28  ;;  %v9926_v49 = vpop.f32.mrb[24].mxu0 }
 0x16e   :  { %787 = vst [vmem:[#allocation2 + $0x1e0] sm:$0xff] %v9926_v49  ;;  %v9929_v50 = vpop.f32.mrb[25].mxu0 }
 0x16f   :  { %788 = vst [vmem:[#allocation2 + $0x1e8] sm:$0xff] %v9929_v50 }
 0x171   :  { %1766 = vrot.lane.b32.xlu0 %v9855_v11, %s9440_s2  ;;  %1282 = vrot.lane.b32.xlu1 %v9861_v33, %s9442_s28  ;;  %v9936_v51 = vpop.f32.mrb[26].mxu0 }
 0x172   :  { %792 = vst [vmem:[#allocation2 + $0x208] sm:$0xff] %v9936_v51  ;;  %v9939_v53 = vpop.f32.mrb[27].mxu0 }
 0x173   :  { %793 = vst [vmem:[#allocation2 + $0x210] sm:$0xff] %v9939_v53  ;;  %v10020_v34 = vpack.i.bf16 %v9939_v53, %v9929_v50 }
 0x175   :  { %1770 = vrot.lane.b32.xlu0 %v9869_v25, %s9440_s2  ;;  %1286 = vrot.lane.b32.xlu1 %v9876_v36, %s9442_s28  ;;  %v9946_v54 = vpop.f32.mrb[28].mxu0 }
 0x176   :  { %797 = vst [vmem:[#allocation2 + $0x230] sm:$0xff] %v9946_v54  ;;  %v9949_v60 = vpop.f32.mrb[29].mxu0 }
 0x177   :  { %798 = vst [vmem:[#allocation2 + $0x238] sm:$0xff] %v9949_v60 }
 0x179   :  { %1760 = vrot.lane.b32.xlu1 %v9835_v61, %s9440_s2  ;;  %v9954_v62 = vpop.f32.mrb[30].mxu0 }
 0x17a   :  { %802 = vst [vmem:[#allocation2 + $0x258] sm:$0xff] %v9954_v62  ;;  %v9957_v1 = vpop.f32.mrb[31].mxu0 }
 0x17b   :  { %803 = vst [vmem:[#allocation2 + $0x260] sm:$0xff] %v9957_v1  ;;  %v10038_v53 = vpack.i.bf16 %v9957_v1, %v9949_v60 }
 0x17d   :  { %1764 = vrot.lane.b32.xlu1 %v9848_v18, %s9440_s2  ;;  %v487_v4 = vpop.f32.mrb[32].mxu0 }
 0x17e   :  { %729 = vst [vmem:[#allocation2 + $0x10] sm:$0xff] %v487_v4  ;;  %v489_v5 = vpop.f32.mrb[33].mxu0 }
 0x181   :  { %1768 = vrot.lane.b32.xlu1 %v9861_v33, %s9440_s2  ;;  %v493_v6 = vpop.f32.mrb[34].mxu0 }
 0x182   :  { %734 = vst [vmem:[#allocation2 + $0x38] sm:$0xff] %v493_v6  ;;  %v495_v7 = vpop.f32.mrb[35].mxu0  ;;  %v9964_v9 = vpack.i.bf16 %v493_v6, %v487_v4 }
 0x183   :  { %v9966_v10 = vpack.i.bf16 %v495_v7, %v489_v5  ;;  %v9968_v12 = vpack.c.bf16 %v495_v7, %v489_v5 }
 0x185   :  { %v499_v14 = vpop.f32.mrb[36].mxu0  ;;  %1772 = vrot.lane.b32.xlu1 %v9876_v36, %s9440_s2  ;;  %8803 = vrot.lane.b32.xlu0 %v9966_v10, %s9442_s28 }
 0x186   :  { %739 = vst [vmem:[#allocation2 + $0x60] sm:$0xff] %v499_v14  ;;  %v501_v15 = vpop.f32.mrb[37].mxu0 }
 0x189   :  { %v505_v16 = vpop.f32.mrb[38].mxu0 }
 0x18a   :  { %744 = vst [vmem:[#allocation2 + $0x88] sm:$0xff] %v505_v16  ;;  %v507_v52 = vpop.f32.mrb[39].mxu0  ;;  %v9974_v17 = vpack.i.bf16 %v505_v16, %v499_v14 }
 0x18b   :  { %v9976_v19 = vpack.i.bf16 %v507_v52, %v501_v15  ;;  %v9978_v20 = vpack.c.bf16 %v507_v52, %v501_v15 }
 0x18d   :  { %v511_v21 = vpop.f32.mrb[40].mxu0  ;;  %8808 = vrot.lane.b32.xlu1 %v9976_v19, %s9442_s28 }
 0x18e   :  { %749 = vst [vmem:[#allocation2 + $0xb0] sm:$0xff] %v511_v21  ;;  %v513_v22 = vpop.f32.mrb[41].mxu0 }
 0x191   :  { %v517_v0 = vpop.f32.mrb[42].mxu0 }
 0x192   :  { %754 = vst [vmem:[#allocation2 + $0xd8] sm:$0xff] %v517_v0  ;;  %v519_v24 = vpop.f32.mrb[43].mxu0  ;;  %v9982_v27 = vpack.i.bf16 %v517_v0, %v511_v21 }
 0x193   :  { %v8812_v28 = vpack.i.bf16 %v519_v24, %v513_v22  ;;  %v9984_v29 = vpack.c.bf16 %v519_v24, %v513_v22  ;;  %v10062_v22 = vpop.f32.mrb[0].mxu1 }
 0x194   :  { %769 = vst [vmem:[#allocation2 + $0x150] sm:$0xff] %v10062_v22 }
 0x195   :  { %v523_v30 = vpop.f32.mrb[44].mxu0  ;;  %8813 = vrot.lane.b32.xlu0 %v8812_v28, %s9442_s28 }
 0x196   :  { %759 = vst [vmem:[#allocation2 + $0x100] sm:$0xff] %v523_v30  ;;  %v525_v31 = vpop.f32.mrb[45].mxu0 }
 0x199   :  { %v529_v55 = vpop.f32.mrb[46].mxu0  ;;  %8823 = vrot.lane.b32.xlu0 %v9966_v10, %s9440_s2 }
 0x19a   :  { %764 = vst [vmem:[#allocation2 + $0x128] sm:$0xff] %v529_v55  ;;  %v531_v56 = vpop.f32.mrb[47].mxu0  ;;  %v9989_v57 = vpack.i.bf16 %v529_v55, %v523_v30 }
 0x19b   :  { %v9991_v58 = vpack.i.bf16 %v531_v56, %v525_v31  ;;  %v9993_v59 = vpack.c.bf16 %v531_v56, %v525_v31 }
 0x19d   :  { %8833 = vrot.lane.b32.xlu0 %v8812_v28, %s9440_s2  ;;  %8818 = vrot.lane.b32.xlu1 %v9991_v58, %s9442_s28 }
 0x1a1   :  { %8843 = vrot.lane.b32.xlu0 %v9964_v9, %s9442_s28  ;;  %8828 = vrot.lane.b32.xlu1 %v9976_v19, %s9440_s2 }
 0x1a5   :  { %8853 = vrot.lane.b32.xlu0 %v9982_v27, %s9442_s28  ;;  %8838 = vrot.lane.b32.xlu1 %v9991_v58, %s9440_s2 }
 0x1a9   :  { %2228 = vrot.lane.b32.xlu0 %v9828_v32, %s9441_s27  ;;  %8848 = vrot.lane.b32.xlu1 %v9974_v17, %s9442_s28 }
 0x1ad   :  { %2232 = vrot.lane.b32.xlu0 %v9842_v43, %s9441_s27  ;;  %8858 = vrot.lane.b32.xlu1 %v9989_v57, %s9442_s28  ;;  %v648_v26 = vpop.f32.mrb[48].mxu0 }
 0x1ae   :  { %731 = vst.msk [vmem:[#allocation2 + $0x20] sm:$0xff] %vm211_vm0, %v648_v26  ;;  %v650_v32 = vpop.f32.mrb[49].mxu0 }
 0x1b1   :  { %2236 = vrot.lane.b32.xlu0 %v9855_v11, %s9441_s27  ;;  %2230 = vrot.lane.b32.xlu1 %v9835_v61, %s9441_s27  ;;  %v653_v38 = vpop.f32.mrb[50].mxu0 }
 0x1b2   :  { %736 = vst.msk [vmem:[#allocation2 + $0x48] sm:$0xff] %vm211_vm0, %v653_v38  ;;  %v655_v42 = vpop.f32.mrb[51].mxu0 }
 0x1b5   :  { %2240 = vrot.lane.b32.xlu0 %v9869_v25, %s9441_s27  ;;  %2234 = vrot.lane.b32.xlu1 %v9848_v18, %s9441_s27  ;;  %v658_v50 = vpop.f32.mrb[52].mxu0 }
 0x1b6   :  { %741 = vst.msk [vmem:[#allocation2 + $0x70] sm:$0xff] %vm211_vm0, %v658_v50  ;;  %v660_v4 = vpop.f32.mrb[53].mxu0 }
 0x1b7   :  { %v8764_v5 = vpop.permute.xlu0 %8763 }
 0x1b8   :  { %v8766_v45 = vunpack.i.h.bf16 %v8764_v5  ;;  %v8765_v47 = vunpack.i.l.bf16 %v8764_v5 }
 0x1b9   :  { %8863 = vrot.lane.b32.xlu0 %v9966_v10, %s9441_s27  ;;  %2238 = vrot.lane.b32.xlu1 %v9861_v33, %s9441_s27  ;;  %v663_v60 = vpop.f32.mrb[54].mxu0 }
 0x1ba   :  { %v8197_v1 = vpack.c.bf16 %v8766_v45, %v8765_v47  ;;  %746 = vst.msk [vmem:[#allocation2 + $0x98] sm:$0xff] %vm211_vm0, %v663_v60  ;;  %v665_v7 = vpop.f32.mrb[55].mxu0 }
 0x1bc   :  { %8199 = vmatprep.subr.msk.bf16.mxu1 %vm10047_vm2, %v8197_v1 }
 0x1bd   :  { %8202 = vmatpush3.bf16.xpose.msk.msra.mxu1 %vm10047_vm2, %v8197_v1  ;;  %8873 = vrot.lane.b32.xlu0 %v8812_v28, %s9441_s27  ;;  %v668_v10 = vpop.f32.mrb[56].mxu0  ;;  %v537_v28 = vpop.f32.mrb[1].mxu1 }
 0x1be   :  { %2242 = vrot.lane.b32.xlu1 %v9876_v36, %s9441_s27  ;;  %751 = vst.msk [vmem:[#allocation2 + $0xc0] sm:$0xff] %vm211_vm0, %v668_v10  ;;  %v670_v14 = vpop.f32.mrb[57].mxu0  ;;  %770 = vst [vmem:[#allocation2 + $0x158] sm:$0xff] %v537_v28  ;;  %v10068_v30 = vpop.f32.mrb[2].mxu1 }
 0x1bf   :  { %v8769_v15 = vpop.permute.xlu0 %8768  ;;  %774 = vst [vmem:[#allocation2 + $0x178] sm:$0xff] %v10068_v30  ;;  %v543_v31 = vpop.f32.mrb[3].mxu1 }
 0x1c0   :  { %v8771_v16 = vunpack.i.h.bf16 %v8769_v15  ;;  %v8770_v52 = vunpack.i.l.bf16 %v8769_v15  ;;  %775 = vst [vmem:[#allocation2 + $0x180] sm:$0xff] %v543_v31  ;;  %v547_v55 = vpop.f32.mrb[4].mxu1  ;;  %v10082_v45 = vpack.i.bf16 %v543_v31, %v537_v28 }
 0x1c1   :  { %8883 = vrot.lane.b32.xlu0 %v9964_v9, %s9440_s2  ;;  %v673_v21 = vpop.f32.mrb[58].mxu0  ;;  %779 = vst [vmem:[#allocation2 + $0x1a0] sm:$0xff] %v547_v55  ;;  %v549_v26 = vpop.f32.mrb[5].mxu1 }
 0x1c2   :  { %v8203_v0 = vpack.c.bf16 %v8771_v16, %v8770_v52  ;;  %8868 = vrot.lane.b32.xlu1 %v9976_v19, %s9441_s27  ;;  %756 = vst.msk [vmem:[#allocation2 + $0xe8] sm:$0xff] %vm211_vm0, %v673_v21  ;;  %v675_v24 = vpop.f32.mrb[59].mxu0  ;;  %780 = vst [vmem:[#allocation2 + $0x1a8] sm:$0xff] %v549_v26  ;;  %v553_v50 = vpop.f32.mrb[6].mxu1 }
 0x1c3   :  { %784 = vst [vmem:[#allocation2 + $0x1c8] sm:$0xff] %v553_v50  ;;  %v555_v5 = vpop.f32.mrb[7].mxu1 }
 0x1c4   :  { %8205 = vmatprep.subr.msk.bf16.mxu1 %vm10047_vm2, %v8203_v0  ;;  %785 = vst [vmem:[#allocation2 + $0x1d0] sm:$0xff] %v555_v5 }
 0x1c5   :  { %8208 = vmatpush3.bf16.xpose.msk.msra.mxu1 %vm10047_vm2, %v8203_v0  ;;  %8893 = vrot.lane.b32.xlu0 %v9982_v27, %s9440_s2  ;;  %v678_v19 = vpop.f32.mrb[60].mxu0  ;;  %v10099_v0 = vpack.i.bf16 %v555_v5, %v549_v26 }
 0x1c6   :  { %8878 = vrot.lane.b32.xlu1 %v9991_v58, %s9441_s27  ;;  %761 = vst.msk [vmem:[#allocation2 + $0x110] sm:$0xff] %vm211_vm0, %v678_v19  ;;  %v680_v56 = vpop.f32.mrb[61].mxu0  ;;  %v559_v58 = vpop.f32.mrb[8].mxu1  ;;  %v10122_v19 = vpack.i.bf16 %v553_v50, %v547_v55 }
 0x1c7   :  { %v8774_v32 = vpop.permute.xlu1 %8773  ;;  %789 = vst [vmem:[#allocation2 + $0x1f0] sm:$0xff] %v559_v58  ;;  %v561_v1 = vpop.f32.mrb[9].mxu1  ;;  %v3104_v56 = vld [vmem:[#allocation2 + $0x48] sm:$0xff] }
 0x1c8   :  { %v8776_v38 = vunpack.i.h.bf16 %v8774_v32  ;;  %v8775_v42 = vunpack.i.l.bf16 %v8774_v32  ;;  %790 = vst [vmem:[#allocation2 + $0x1f8] sm:$0xff] %v561_v1  ;;  %v4937_v32 = vld [vmem:[#allocation2 + $0x230] sm:$0xff] }
 0x1c9   :  { %8903 = vrot.lane.b32.xlu0 %v9964_v9, %s9441_s27  ;;  %v683_v4 = vpop.f32.mrb[62].mxu0  ;;  %v565_v9 = vpop.f32.mrb[10].mxu1 }
 0x1ca   :  { %v8209_v47 = vpack.c.bf16 %v8776_v38, %v8775_v42  ;;  %8888 = vrot.lane.b32.xlu1 %v9974_v17, %s9440_s2  ;;  %766 = vst.msk [vmem:[#allocation2 + $0x138] sm:$0xff] %vm211_vm0, %v683_v4  ;;  %v685_v60 = vpop.f32.mrb[63].mxu0  ;;  %794 = vst [vmem:[#allocation2 + $0x218] sm:$0xff] %v565_v9  ;;  %v567_v7 = vpop.f32.mrb[11].mxu1  ;;  %v10118_v31 = vpack.i.bf16 %v565_v9, %v559_v58  ;;  %v5821_v9 = vld [vmem:[#allocation2 + $0x148] sm:$0xff] }
 0x1cb   :  { %795 = vst [vmem:[#allocation2 + $0x220] sm:$0xff] %v567_v7  ;;  %v10095_v10 = vpack.i.bf16 %v567_v7, %v561_v1  ;;  %v571_v52 = vpop.f32.mrb[12].mxu1 }
 0x1cc   :  { %8211 = vmatprep.subr.msk.bf16.mxu1 %vm10047_vm2, %v8209_v47  ;;  %799 = vst [vmem:[#allocation2 + $0x240] sm:$0xff] %v571_v52  ;;  %v573_v21 = vpop.f32.mrb[13].mxu1 }
 0x1cd   :  { %8214 = vmatpush3.bf16.xpose.msk.msra.mxu1 %vm10047_vm2, %v8209_v47  ;;  %8913 = vrot.lane.b32.xlu0 %v9982_v27, %s9441_s27  ;;  %800 = vst [vmem:[#allocation2 + $0x248] sm:$0xff] %v573_v21  ;;  %v577_v24 = vpop.f32.mrb[14].mxu1 }
 0x1ce   :  { %8898 = vrot.lane.b32.xlu1 %v9989_v57, %s9440_s2  ;;  %804 = vst [vmem:[#allocation2 + $0x268] sm:$0xff] %v577_v24  ;;  %v579_v28 = vpop.f32.mrb[15].mxu1 }
 0x1cf   :  { %v8779_v14 = vpop.permute.xlu1 %8778  ;;  %805 = vst [vmem:[#allocation2 + $0x270] sm:$0xff] %v579_v28 }
 0x1d0   :  { %v8781_v15 = vunpack.i.h.bf16 %v8779_v14  ;;  %v8780_v16 = vunpack.i.l.bf16 %v8779_v14  ;;  %v5823_v14 = vld [vmem:[#allocation2 + $0x198] sm:$0xff] }
 0x1d1   :  { %3119 = vrot.lane.b32.xlu0 %v9830_v3, %s9442_s28  ;;  %v10109_v3 = vpack.i.bf16 %v579_v28, %v573_v21 }
 0x1d2   :  { %v8215_v27 = vpack.c.bf16 %v8781_v15, %v8780_v16  ;;  %8908 = vrot.lane.b32.xlu1 %v9974_v17, %s9441_s27  ;;  %v10116_v17 = vpack.i.bf16 %v10068_v30, %v10062_v22  ;;  %v8784_v22 = vpop.permute.xlu0 %8783  ;;  %v5822_v15 = vld [vmem:[#allocation2 + $0x170] sm:$0xff]  ;;  %v5825_v16 = vld [vmem:[#allocation2 + $0x1e8] sm:$0xff] }
 0x1d4   :  { %8217 = vmatprep.subr.msk.bf16.mxu1 %vm10047_vm2, %v8215_v27 }
 0x1d5   :  { %8220 = vmatpush3.bf16.xpose.msk.msra.mxu1 %vm10047_vm2, %v8215_v27  ;;  %3123 = vrot.lane.b32.xlu0 %v9845_v48, %s9442_s28  ;;  %v10124_v48 = vpack.i.bf16 %v577_v24, %v571_v52  ;;  %v5826_v27 = vld [vmem:[#allocation2 + $0x210] sm:$0xff]  ;;  %v5827_v24 = vld [vmem:[#allocation2 + $0x238] sm:$0xff] }
 0x1d6   :  { %8918 = vrot.lane.b32.xlu1 %v9989_v57, %s9441_s27  ;;  %8222 = vmatprep.subr.bf16.mxu1 %v9968_v12  ;;  %v3103_v57 = vld [vmem:[#allocation2 + $0x20] sm:$0xff] }
 0x1d9   :  { %3127 = vrot.lane.b32.xlu0 %v9858_v13, %s9442_s28  ;;  %v8922_v13 = vpack.i.bf16 %v3104_v56, %v3103_v57 }
 0x1da   :  { %3121 = vrot.lane.b32.xlu1 %v9837_v2, %s9442_s28  ;;  %v3108_v2 = vld [vmem:[#allocation2 + $0xe8] sm:$0xff] }
 0x1dc   :  { %7410 = vmatmul.mubr.msk.f32.vlgmr.msra.gmra.mrb[16].mxu1 %vm882_vm1, %v9835_v61  ;;  %v3107_v61 = vld [vmem:[#allocation2 + $0xc0] sm:$0xff] }
 0x1dd   :  { %7412 = vmatprep.mubr.msk.f32.mxu1 %vm882_vm1, %v9842_v43  ;;  %8224 = vmatpush3.bf16.msra.mxu1 %v9968_v12  ;;  %v8932_v43 = vpack.i.bf16 %v3108_v2, %v3107_v61  ;;  %v8786_v12 = vunpack.i.h.bf16 %v8784_v22 }
 0x1de   :  { %3131 = vrot.lane.b32.xlu0 %v9873_v35, %s9442_s28  ;;  %3125 = vrot.lane.b32.xlu1 %v9850_v63, %s9442_s28  ;;  %v3105_v63 = vld [vmem:[#allocation2 + $0x70] sm:$0xff]  ;;  %v3106_v35 = vld [vmem:[#allocation2 + $0x98] sm:$0xff] }
 0x1df   :  { %8226 = vmatprep.subr.bf16.mxu1 %v9978_v20 }
 0x1e0   :  { %7413 = vmatmul.mubr.msk.f32.gmra.mrb[18].mxu1 %vm882_vm1, %v9848_v18  ;;  %v8785_v18 = vunpack.i.l.bf16 %v8784_v22 }
 0x1e1   :  { %7415 = vmatprep.mubr.msk.f32.mxu1 %vm882_vm1, %v9855_v11  ;;  %8228 = vmatpush3.bf16.msra.mxu1 %v9978_v20  ;;  %v8927_v11 = vpack.i.bf16 %v3106_v35, %v3105_v63  ;;  %v3110_v20 = vld [vmem:[#allocation2 + $0x138] sm:$0xff] }
 0x1e2   :  { %3129 = vrot.lane.b32.xlu1 %v9864_v23, %s9442_s28  ;;  %8230 = vmatprep.subr.bf16.mxu1 %v9984_v29  ;;  %v3109_v23 = vld [vmem:[#allocation2 + $0x110] sm:$0xff]  ;;  %v10156_v30 = vpack.c.bf16 %v8786_v12, %v8785_v18  ;;  %v9443_v12 = vmov 0.0  }
 0x1e3   :  { %8923 = vrot.lane.b32.xlu0 %v8922_v13, %s9442_s28 }
 0x1e4   :  { %7416 = vmatmul.mubr.msk.f32.gmra.mrb[20].mxu1 %vm882_vm1, %v9861_v33  ;;  %v8937_v33 = vpack.i.bf16 %v3110_v20, %v3109_v23 }
 0x1e5   :  { %7418 = vmatprep.mubr.msk.f32.mxu1 %vm882_vm1, %v9869_v25  ;;  %8232 = vmatpush3.bf16.msra.mxu1 %v9984_v29  ;;  %v4462_v25 = vld [vmem:[#allocation2 + $0x140] sm:$0xff]  ;;  %v4469_v29 = vld [vmem:[#allocation2 + $0x258] sm:$0xff] }
 0x1e6   :  { %3133 = vrot.lane.b32.xlu1 %v9880_v37, %s9442_s28  ;;  %8234 = vmatprep.subr.bf16.mxu1 %v9993_v59  ;;  %v4463_v37 = vld [vmem:[#allocation2 + $0x168] sm:$0xff] }
 0x1e7   :  { %8933 = vrot.lane.b32.xlu0 %v8932_v43, %s9442_s28 }
 0x1e8   :  { %7419 = vmatmul.mubr.msk.f32.gmra.mrb[22].mxu1 %vm882_vm1, %v9876_v36  ;;  %v4464_v36 = vld [vmem:[#allocation2 + $0x190] sm:$0xff] }
 0x1e9   :  { %8236 = vmatpush3.bf16.msra.mxu1 %v9993_v59 }
 0x1ea   :  { %8239 = vmatprep.subr.msk.bf16.mxu1 %vm10047_vm2, %v10156_v30  ;;  %8928 = vrot.lane.b32.xlu1 %v8927_v11, %s9442_s28 }
 0x1eb   :  { %8943 = vrot.lane.b32.xlu0 %v10012_v8, %s9440_s2 }
 0x1ee   :  { %8938 = vrot.lane.b32.xlu1 %v8937_v33, %s9442_s28 }
 0x1ef   :  { %8953 = vrot.lane.b32.xlu0 %v10020_v34, %s9440_s2 }
 0x1f2   :  { %8948 = vrot.lane.b32.xlu1 %v10029_v40, %s9440_s2 }
 0x1f3   :  { %8963 = vrot.lane.b32.xlu0 %v10012_v8, %s9441_s27 }
 0x1f6   :  { %8958 = vrot.lane.b32.xlu1 %v10038_v53, %s9440_s2 }
 0x1f7   :  { %8973 = vrot.lane.b32.xlu0 %v10020_v34, %s9441_s27 }
 0x1fa   :  { %8968 = vrot.lane.b32.xlu1 %v10029_v40, %s9441_s27 }
 0x1fb   :  { %4009 = vrot.lane.b32.xlu0 %v9888_v39, %s9442_s28  ;;  %v4466_v39 = vld [vmem:[#allocation2 + $0x1e0] sm:$0xff] }
 0x1fe   :  { %8978 = vrot.lane.b32.xlu1 %v10038_v53, %s9441_s27 }
 0x1ff   :  { %4013 = vrot.lane.b32.xlu0 %v9906_v44, %s9442_s28  ;;  %v10210_v44 = vpop.permute.xlu0 %8793 }
 0x202   :  { %4011 = vrot.lane.b32.xlu1 %v9897_v41, %s9442_s28  ;;  %v4465_v41 = vld [vmem:[#allocation2 + $0x1b8] sm:$0xff] }
 0x203   :  { %4017 = vrot.lane.b32.xlu0 %v9926_v49, %s9442_s28  ;;  %v4467_v49 = vld [vmem:[#allocation2 + $0x208] sm:$0xff] }
 0x206   :  { %4015 = vrot.lane.b32.xlu1 %v9916_v46, %s9442_s28  ;;  %v10212_v46 = vpop.permute.xlu1 %8788 }
 0x207   :  { %4021 = vrot.lane.b32.xlu0 %v9946_v54, %s9442_s28 }
 0x20a   :  { %4019 = vrot.lane.b32.xlu1 %v9936_v51, %s9442_s28  ;;  %v10217_v51 = vpop.permute.xlu0 %1272 }
 0x20b   :  { %8983 = vrot.lane.b32.xlu0 %v10082_v45, %s9442_s28 }
 0x20e   :  { %4023 = vrot.lane.b32.xlu1 %v9954_v62, %s9442_s28  ;;  %v10219_v62 = vpop.permute.xlu1 %8798  ;;  %v10227_v59 = vpop.permute.xlu0 %1276 }
 0x20f   :  { %8993 = vrot.lane.b32.xlu0 %v10095_v10, %s9442_s28 }
 0x212   :  { %8988 = vrot.lane.b32.xlu1 %v10099_v0, %s9442_s28  ;;  %v10229_v8 = vpop.permute.xlu1 %1274 }
 0x213   :  { %4494 = vrot.lane.b32.xlu0 %v4462_v25, %s9440_s2 }
 0x216   :  { %8998 = vrot.lane.b32.xlu1 %v10109_v3, %s9442_s28  ;;  %v10237_v34 = vpop.permute.xlu1 %1278 }
 0x217   :  { %4498 = vrot.lane.b32.xlu0 %v4464_v36, %s9440_s2 }
 0x21a   :  { %4496 = vrot.lane.b32.xlu1 %v4463_v37, %s9440_s2  ;;  %v10248_v53 = vpop.permute.xlu1 %1282 }
 0x21b   :  { %4502 = vrot.lane.b32.xlu0 %v4466_v39, %s9440_s2 }
 0x21e   :  { %4500 = vrot.lane.b32.xlu1 %v4465_v41, %s9440_s2  ;;  %v10255_v26 = vpop.permute.xlu1 %1286 }
 0x21f   :  { %4506 = vrot.lane.b32.xlu0 %v9946_v54, %s9440_s2  ;;  %v10235_v54 = vpop.permute.xlu0 %1280 }
 0x222   :  { %4504 = vrot.lane.b32.xlu1 %v4467_v49, %s9440_s2  ;;  %v10263_v42 = vpop.permute.xlu1 %1760 }
 0x223   :  { %9003 = vrot.lane.b32.xlu0 %v10082_v45, %s9440_s2  ;;  %v10246_v40 = vpop.permute.xlu0 %1284 }
 0x226   :  { %4508 = vrot.lane.b32.xlu1 %v4469_v29, %s9440_s2  ;;  %v10270_v4 = vpop.permute.xlu1 %1764 }
 0x227   :  { %9013 = vrot.lane.b32.xlu0 %v10095_v10, %s9440_s2  ;;  %v10253_v55 = vpop.permute.xlu0 %1758 }
 0x22a   :  { %9008 = vrot.lane.b32.xlu1 %v10099_v0, %s9440_s2  ;;  %v10281_v47 = vpop.permute.xlu1 %1768 }
 0x22b   :  { %9023 = vrot.lane.b32.xlu0 %v10116_v17, %s9442_s28  ;;  %v10261_v38 = vpop.permute.xlu0 %1762 }
 0x22e   :  { %9018 = vrot.lane.b32.xlu1 %v10109_v3, %s9440_s2  ;;  %v10289_v58 = vpop.permute.xlu1 %1772 }
 0x22f   :  { %9033 = vrot.lane.b32.xlu0 %v10118_v31, %s9442_s28  ;;  %v10268_v50 = vpop.permute.xlu0 %1766 }
 0x232   :  { %9028 = vrot.lane.b32.xlu1 %v10122_v19, %s9442_s28  ;;  %v10297_v1 = vpop.permute.xlu1 %8808 }
 0x233   :  { %4963 = vrot.lane.b32.xlu0 %v4462_v25, %s9441_s27  ;;  %v10279_v5 = vpop.permute.xlu0 %1770 }
 0x236   :  { %9038 = vrot.lane.b32.xlu1 %v10124_v48, %s9442_s28 }
 0x237   :  { %4967 = vrot.lane.b32.xlu0 %v4464_v36, %s9441_s27 }
 0x23a   :  { %4965 = vrot.lane.b32.xlu1 %v4463_v37, %s9441_s27 }
 0x23b   :  { %4971 = vrot.lane.b32.xlu0 %v4466_v39, %s9441_s27 }
 0x23e   :  { %4969 = vrot.lane.b32.xlu1 %v4465_v41, %s9441_s27 }
 0x23f   :  { %4975 = vrot.lane.b32.xlu0 %v4937_v32, %s9441_s27 }
 0x242   :  { %4973 = vrot.lane.b32.xlu1 %v4467_v49, %s9441_s27 }
 0x243   :  { %9043 = vrot.lane.b32.xlu0 %v10082_v45, %s9441_s27  ;;  %v10287_v45 = vpop.permute.xlu0 %8803 }
 0x246   :  { %4977 = vrot.lane.b32.xlu1 %v4469_v29, %s9441_s27 }
 0x247   :  { %9053 = vrot.lane.b32.xlu0 %v10095_v10, %s9441_s27  ;;  %v10295_v60 = vpop.permute.xlu0 %8813  ;;  %v10308_v10 = vpop.permute.xlu1 %8818 }
 0x24a   :  { %9048 = vrot.lane.b32.xlu1 %v10099_v0, %s9441_s27  ;;  %v5824_v0 = vld [vmem:[#allocation2 + $0x1c0] sm:$0xff] }
 0x24b   :  { %9063 = vrot.lane.b32.xlu0 %v10116_v17, %s9440_s2  ;;  %v10306_v7 = vpop.permute.xlu0 %8823  ;;  %v10315_v21 = vpop.permute.xlu1 %8828 }
 0x24e   :  { %9058 = vrot.lane.b32.xlu1 %v10109_v3, %s9441_s27 }
 0x24f   :  { %9073 = vrot.lane.b32.xlu0 %v10118_v31, %s9440_s2  ;;  %v10313_v52 = vpop.permute.xlu0 %8833  ;;  %v10322_v3 = vpop.permute.xlu1 %8838 }
 0x252   :  { %9068 = vrot.lane.b32.xlu1 %v10122_v19, %s9440_s2 }
 0x253   :  { %9083 = vrot.lane.b32.xlu0 %v10116_v17, %s9441_s27  ;;  %v10320_v28 = vpop.permute.xlu0 %8843  ;;  %v5828_v17 = vld [vmem:[#allocation2 + $0x260] sm:$0xff] }
 0x254   :  { %11826 = vst [vmem:[#allocation14_spill] sm:$0xff] %v10320_v28 }
 0x256   :  { %9078 = vrot.lane.b32.xlu1 %v10124_v48, %s9440_s2 }
 0x257   :  { %9093 = vrot.lane.b32.xlu0 %v10118_v31, %s9441_s27  ;;  %v10326_v31 = vpop.permute.xlu1 %8848 }
 0x258   :  { %11827 = vst [vmem:[#allocation15_spill] sm:$0xff] %v10326_v31 }
 0x25a   :  { %9088 = vrot.lane.b32.xlu1 %v10122_v19, %s9441_s27  ;;  %v807_v19 = vlaneseq }
 0x25b   :  { %5853 = vrot.lane.b32.xlu0 %v5821_v9, %s9442_s28 }
 0x25c   :  { %v817_v56 = vand.u32 127, %v807_v19 }
 0x25e   :  { %9098 = vrot.lane.b32.xlu1 %v10124_v48, %s9441_s27  ;;  %v10329_v48 = vshrl.u32 %v807_v19, 7 }
 0x25f   :  { %5857 = vrot.lane.b32.xlu0 %v5823_v14, %s9442_s28 }
 0x260   :  { %11828 = vst [vmem:[#allocation16_spill] sm:$0xff] %v10329_v48  ;;  %v809_v57 = vadd.s32 8, %v10329_v48  ;;  %v813_v13 = vadd.s32 40, %v10329_v48  ;;  %v812_v2 = vadd.s32 32, %v10329_v48  ;;  %v811_v43 = vadd.s32 24, %v10329_v48 }
 0x261   :  { %vm818_vm4 = vcmp.gt.s32.totalorder %v817_v56, %v10329_v48  ;;  %v810_v63 = vadd.s32 16, %v10329_v48  ;;  %v815_v35 = vadd.s32 56, %v10329_v48  ;;  %v814_v23 = vadd.s32 48, %v10329_v48 }
 0x262   :  { %5855 = vrot.lane.b32.xlu1 %v5822_v15, %s9442_s28  ;;  %vm819_vm3 = vcmp.gt.s32.totalorder %v817_v56, %v809_v57  ;;  %vm823_vm5 = vcmp.gt.s32.totalorder %v817_v56, %v813_v13  ;;  %vm822_vm6 = vcmp.gt.s32.totalorder %v817_v56, %v812_v2  ;;  %v10341_v20 = vsel %vm818_vm4, -1e+30, %v9443_v12 }
 0x263   :  { %5861 = vrot.lane.b32.xlu0 %v5825_v16, %s9442_s28  ;;  %v10338_v18 = vsel %vm819_vm3, -1e+30, %v9443_v12  ;;  %vm821_vm7 = vcmp.gt.s32.totalorder %v817_v56, %v811_v43  ;;  %vm820_vm8 = vcmp.gt.s32.totalorder %v817_v56, %v810_v63  ;;  %v10343_v25 = vsel %vm823_vm5, -1e+30, %v9443_v12 }
 0x264   :  { %v10348_v37 = vsel %vm822_vm6, -1e+30, %v9443_v12  ;;  %vm825_vm9 = vcmp.gt.s32.totalorder %v817_v56, %v815_v35  ;;  %v10351_v41 = vsel %vm821_vm7, -1e+30, %v9443_v12  ;;  %vm824_vm10 = vcmp.gt.s32.totalorder %v817_v56, %v814_v23 }
 0x265   :  { %v10353_v29 = vsel %vm820_vm8, -1e+30, %v9443_v12  ;;  %v10359_v15 = vsel %vm825_vm9, -1e+30, %v9443_v12  ;;  %v8811_v48 = vunpack.i.h.bf16 %v10297_v1 }
 0x266   :  { %5859 = vrot.lane.b32.xlu1 %v5824_v0, %s9442_s28 }
 0x267   :  { %5865 = vrot.lane.b32.xlu0 %v5827_v24, %s9442_s28  ;;  %v10366_v24 = vsel %vm824_vm10, -1e+30, %v9443_v12 }
 0x26a   :  { %5863 = vrot.lane.b32.xlu1 %v5826_v27, %s9442_s28 }
 0x26e   :  { %5867 = vrot.lane.b32.xlu1 %v5828_v17, %s9442_s28 }
 0x2af   :  { %v7411_v61 = vpop.f32.mrb[16].mxu1 }
 0x2b0   :  { %v989_v22 = vpop.f32.mrb[17].mxu1  ;;  %v10346_v36 = vadd.f32 %v7411_v61, %v10338_v18 }
 0x2b1   :  { %v990_v39 = vadd.f32 %v989_v22, %v10341_v20 }
 0x2b2   :  { %v1029_v16 = vsel %vm211_vm0, %v10346_v36, -inf }
 0x2b3   :  { %v7414_v11 = vpop.f32.mrb[18].mxu1  ;;  %v1028_v17 = vsel %vm211_vm0, %v990_v39, -inf }
 0x2b4   :  { %v999_v33 = vpop.f32.mrb[19].mxu1  ;;  %v1005_v0 = vadd.f32 %v7414_v11, %v10351_v41 }
 0x2b5   :  { %v1000_v19 = vadd.f32 %v999_v33, %v10353_v29 }
 0x2b6   :  { %v1031_v63 = vsel %vm211_vm0, %v1005_v0, -inf }
 0x2b7   :  { %v7417_v49 = vpop.f32.mrb[20].mxu1  ;;  %v1030_v11 = vsel %vm211_vm0, %v1000_v19, -inf }
 0x2b8   :  { %v10356_v32 = vadd.f32 %v7417_v49, %v10343_v25  ;;  %v1009_v9 = vpop.f32.mrb[21].mxu1 }
 0x2b9   :  { %v1010_v14 = vadd.f32 %v1009_v9, %v10348_v37 }
 0x2ba   :  { %v1034_v27 = vsel %vm211_vm0, %v10356_v32, -inf }
 0x2bb   :  { %v1035_v57 = vmax.f32 %v1029_v16, %v1034_v27  ;;  %v1032_v56 = vsel %vm211_vm0, %v1010_v14, -inf  ;;  %v7420_v13 = vpop.f32.mrb[22].mxu1 }
 0x2bc   :  { %v1033_v61 = vmax.f32 %v1028_v17, %v1032_v56  ;;  %v1025_v2 = vadd.f32 %v7420_v13, %v10359_v15  ;;  %v1019_v22 = vpop.f32.mrb[23].mxu1  ;;  %v8806_v17 = vunpack.i.h.bf16 %v10287_v45  ;;  %v8805_v56 = vunpack.i.l.bf16 %v10287_v45 }
 0x2bd   :  { %v1020_v43 = vadd.f32 %v1019_v22, %v10366_v24  ;;  %v8820_v45 = vunpack.i.l.bf16 %v10308_v10 }
 0x2be   :  { %v1040_v35 = vmax.f32 %v1033_v61, %v1035_v57  ;;  %v1038_v12 = vsel %vm211_vm0, %v1025_v2, -inf  ;;  %v8810_v57 = vunpack.i.l.bf16 %v10297_v1  ;;  %v8261_v31 = vpack.c.bf16 %v8806_v17, %v8805_v56 }
 0x2bf   :  { %v1039_v23 = vmax.f32 %v1031_v63, %v1038_v12  ;;  %v1036_v33 = vsel %vm211_vm0, %v1020_v43, -inf }
 0x2c0   :  { %v1037_v49 = vmax.f32 %v1030_v11, %v1036_v33  ;;  %8262 = vmatprep.subr.bf16.mxu0 %v8261_v31  ;;  %v8265_v12 = vpack.c.bf16 %v8811_v48, %v8810_v57  ;;  %v8815_v11 = vunpack.i.l.bf16 %v10295_v60 }
 0x2c1   :  { %8264 = vmatpush3.bf16.msra.mxu0 %v8261_v31 }
 0x2c2   :  { %v1041_v9 = vmax.f32 %v1037_v49, %v1039_v23  ;;  %v8821_v23 = vunpack.i.h.bf16 %v10308_v10  ;;  %8266 = vmatprep.subr.bf16.mxu0 %v8265_v12  ;;  %v8825_v10 = vunpack.i.l.bf16 %v10306_v7 }
 0x2c4   :  { %v1042_v16 = vmax.f32 %v1040_v35, %v1041_v9  ;;  %v8816_v35 = vunpack.i.h.bf16 %v10295_v60 }
 0x2c5   :  { %8268 = vmatpush3.bf16.msra.mxu0 %v8265_v12 }
 0x2c6   :  { %v1043_v27 = vrot.slane %v1042_v16, 4 }
 0x2c8   :  { %v1044_v13 = vmax.f32 %v1042_v16, %v1043_v27 }
 0x2ca   :  { %v1045_v22 = vrot.slane %v1044_v13, 2 }
 0x2cc   :  { %v1046_v61 = vmax.f32 %v1044_v13, %v1045_v22  ;;  %v8826_v13 = vunpack.i.h.bf16 %v10306_v7 }
 0x2ce   :  { %v1047_v28 = vrot.slane %v1046_v61, 1 }
 0x2d0   :  { %v1048_v63 = vmax.f32 %v1046_v61, %v1047_v28 }
 0x2d2   :  { %v1049_v33 = vsub.f32 %v990_v39, %v1048_v63  ;;  %v1050_v49 = vsub.f32 %v10346_v36, %v1048_v63  ;;  %v1051_v9 = vsub.f32 %v1000_v19, %v1048_v63  ;;  %v1052_v1 = vsub.f32 %v1005_v0, %v1048_v63 }
 0x2d3   :  { %v1053_v16 = vsub.f32 %v1010_v14, %v1048_v63  ;;  %v1054_v27 = vsub.f32 %v10356_v32, %v1048_v63  ;;  %v1055_v31 = vsub.f32 %v1020_v43, %v1048_v63  ;;  %v1056_v28 = vsub.f32 %v1025_v2, %v1048_v63 }
 0x2d4   :  { %v1057_v48 = vmul.f32 1.442695, %v1049_v33  ;;  %v1059_v17 = vmul.f32 1.442695, %v1050_v49  ;;  %v1061_v56 = vmul.f32 1.442695, %v1051_v9  ;;  %v8269_v39 = vpack.c.bf16 %v8816_v35, %v8815_v11 }
 0x2d5   :  { %v1063_v60 = vmul.f32 1.442695, %v1052_v1  ;;  %v1065_v36 = vmul.f32 1.442695, %v1053_v16  ;;  %v8273_v0 = vpack.c.bf16 %v8821_v23, %v8820_v45  ;;  %v1067_v32 = vmul.f32 1.442695, %v1054_v27 }
 0x2d6   :  { %9122 = vpow2.f32 %v1057_v48  ;;  %8270 = vmatprep.subr.bf16.mxu0 %v8269_v39  ;;  %v10389_v14 = vpack.c.bf16 %v8826_v13, %v8825_v10  ;;  %v1069_v19 = vmul.f32 1.442695, %v1055_v31  ;;  %v1071_v2 = vmul.f32 1.442695, %v1056_v28 }
 0x2d7   :  { %9124 = vpow2.f32 %v1059_v17  ;;  %8272 = vmatpush3.bf16.msra.mxu0 %v8269_v39 }
 0x2d8   :  { %9126 = vpow2.f32 %v1061_v56  ;;  %8274 = vmatprep.subr.bf16.mxu0 %v8273_v0 }
 0x2d9   :  { %9128 = vpow2.f32 %v1063_v60 }
 0x2da   :  { %9130 = vpow2.f32 %v1065_v36 }
 0x2db   :  { %9132 = vpow2.f32 %v1067_v32  ;;  %8276 = vmatpush3.bf16.msra.mxu0 %v8273_v0 }
 0x2dc   :  { %8302 = vmatprep.subr.bf16.mxu0 %v10389_v14  ;;  %9134 = vpow2.f32 %v1069_v19 }
 0x2dd   :  { %9136 = vpow2.f32 %v1071_v2  ;;  %v8791_v2 = vunpack.i.h.bf16 %v10212_v46 }
 0x2e0   :  { %v9123_v7 = vpop.eup %9122 }
 0x2e1   :  { %v9125_v43 = vpop.eup %9124  ;;  %v1073_v22 = vsel %vm211_vm0, %v9123_v7, 0.0 }
 0x2e2   :  { %v9127_v57 = vpop.eup %9126  ;;  %v1074_v61 = vsel %vm211_vm0, %v9125_v43, 0.0 }
 0x2e3   :  { %v9129_v63 = vpop.eup %9128  ;;  %v1075_v12 = vadd.f32 %v1074_v61, %v1073_v22  ;;  %v1076_v35 = vsel %vm211_vm0, %v9127_v57, 0.0  ;;  %v8790_v22 = vunpack.i.l.bf16 %v10212_v46  ;;  %v8796_v46 = vunpack.i.h.bf16 %v10210_v44 }
 0x2e4   :  { %v9131_v11 = vpop.eup %9130  ;;  %v1078_v45 = vsel %vm211_vm0, %v9129_v63, 0.0 }
 0x2e5   :  { %v1077_v23 = vadd.f32 %v1076_v35, %v1075_v12  ;;  %v9133_v33 = vpop.eup %9132  ;;  %v1080_v9 = vsel %vm211_vm0, %v9131_v11, 0.0 }
 0x2e6   :  { %v9135_v1 = vpop.eup %9134  ;;  %v1082_v27 = vsel %vm211_vm0, %v9133_v33, 0.0 }
 0x2e7   :  { %v1079_v49 = vadd.f32 %v1078_v45, %v1077_v23  ;;  %v9137_v31 = vpop.eup %9136  ;;  %v1084_v48 = vsel %vm211_vm0, %v9135_v1, 0.0 }
 0x2e8   :  { %v1086_v56 = vsel %vm211_vm0, %v9137_v31, 0.0 }
 0x2e9   :  { %v1081_v16 = vadd.f32 %v1080_v9, %v1079_v49 }
 0x2eb   :  { %v1083_v28 = vadd.f32 %v1082_v27, %v1081_v16  ;;  %v8243_v27 = vpack.c.bf16 %v8791_v2, %v8790_v22 }
 0x2ed   :  { %v1085_v17 = vadd.f32 %v1084_v48, %v1083_v28  ;;  %v1737_v28 = vld [vmem:[#allocation2 + $0x88] sm:$0xff] }
 0x2ef   :  { %v1087_v60 = vadd.f32 %v1086_v56, %v1085_v17 }
 0x2f1   :  { %v1088_v13 = vrot.slane %v1087_v60, 4 }
 0x2f3   :  { %v1089_v10 = vadd.f32 %v1088_v13, %v1087_v60  ;;  %v1739_v13 = vld [vmem:[#allocation2 + $0xd8] sm:$0xff] }
 0x2f5   :  { %v1090_v39 = vrot.slane %v1089_v10, 2 }
 0x2f7   :  { %v1091_v36 = vadd.f32 %v1090_v39, %v1089_v10  ;;  %v1741_v39 = vld [vmem:[#allocation2 + $0x128] sm:$0xff] }
 0x2f9   :  { %v1092_v0 = vrot.slane %v1091_v36, 1 }
 0x2fb   :  { %v1093_v32 = vadd.f32 %v1092_v0, %v1091_v36 }
 0x2fd   :  { %9138 = vrcp.f32 %v1093_v32 }
 0x307   :  { %v9139_v19 = vpop.eup %9138 }
 0x308   :  { %v1095_v61 = vmul.f32 %v9139_v19, %v9123_v7  ;;  %v1096_v12 = vmul.f32 %v9139_v19, %v9125_v43  ;;  %v1097_v35 = vmul.f32 %v9139_v19, %v9127_v57  ;;  %v1098_v23 = vmul.f32 %v9139_v19, %v9129_v63  ;;  %v10429_v63 = vpop.permute.xlu0 %8853 }
 0x309   :  { %v1099_v45 = vmul.f32 %v9139_v19, %v9131_v11  ;;  %v1100_v49 = vmul.f32 %v9139_v19, %v9133_v33  ;;  %v1101_v9 = vmul.f32 %v9139_v19, %v9135_v1  ;;  %v1102_v16 = vmul.f32 %v9139_v19, %v9137_v31  ;;  %v1734_v11 = vld [vmem:[#allocation2 + $0x10] sm:$0xff]  ;;  %v1735_v33 = vld [vmem:[#allocation2 + $0x38] sm:$0xff] }
 0x30a   :  { %7437 = vmatprep.mubr.msk.f32.mxu1 %vm211_vm0, %v1095_v61  ;;  %v8795_v7 = vunpack.i.l.bf16 %v10210_v44  ;;  %v8800_v57 = vunpack.i.l.bf16 %v10219_v62  ;;  %v8277_v1 = vpack.c.bf16 %v1735_v33, %v1734_v11 }
 0x30b   :  { %7438 = vmatmul.mubr.msk.f32.vlgmr.msra.gmra.mrb[24].mxu1 %vm211_vm0, %v1096_v12 }
 0x30c   :  { %8242 = vmatpush3.bf16.xpose.msk.msra.mxu1 %vm10047_vm2, %v10156_v30  ;;  %7440 = vmatprep.mubr.msk.f32.mxu1 %vm211_vm0, %v1097_v35  ;;  %v8249_v43 = vpack.c.bf16 %v8796_v46, %v8795_v7  ;;  %v8801_v30 = vunpack.i.h.bf16 %v10219_v62  ;;  %v10431_v31 = vpop.permute.xlu0 %2228  ;;  %v1736_v62 = vld [vmem:[#allocation2 + $0x60] sm:$0xff] }
 0x30d   :  { %8245 = vmatprep.subr.msk.bf16.mxu1 %vm10047_vm2, %v8243_v27  ;;  %v8283_v17 = vpack.c.bf16 %v1737_v28, %v1736_v62 }
 0x30e   :  { %v8255_v44 = vpack.c.bf16 %v8801_v30, %v8800_v57 }
 0x30f   :  { %7441 = vmatmul.mubr.msk.f32.gmra.mrb[26].mxu1 %vm211_vm0, %v1098_v23 }
 0x310   :  { %7443 = vmatprep.mubr.msk.f32.mxu1 %vm211_vm0, %v1099_v45  ;;  %v10439_v48 = vpop.permute.xlu0 %2232 }
 0x313   :  { %7444 = vmatmul.mubr.msk.f32.gmra.mrb[28].mxu1 %vm211_vm0, %v1100_v49 }
 0x314   :  { %8248 = vmatpush3.bf16.xpose.msk.msra.mxu1 %vm10047_vm2, %v8243_v27  ;;  %7446 = vmatprep.mubr.msk.f32.mxu1 %vm211_vm0, %v1101_v9  ;;  %v10453_v60 = vpop.permute.xlu0 %2236 }
 0x315   :  { %8251 = vmatprep.subr.msk.bf16.mxu1 %vm10047_vm2, %v8249_v43 }
 0x317   :  { %7447 = vmatmul.mubr.msk.f32.gmra.mrb[30].mxu1 %vm211_vm0, %v1102_v16 }
 0x318   :  { %7465 = vmatprep.mubr.msk.f32.mxu1 %vm882_vm1, %v10217_v51  ;;  %v10437_v51 = vpop.permute.xlu1 %8858 }
 0x31c   :  { %8254 = vmatpush3.bf16.xpose.msk.msra.mxu1 %vm10047_vm2, %v8249_v43  ;;  %v10443_v56 = vpop.permute.xlu1 %2230 }
 0x31d   :  { %8257 = vmatprep.subr.msk.bf16.mxu1 %vm10047_vm2, %v8255_v44 }
 0x320   :  { %v10457_v10 = vpop.permute.xlu1 %2234 }
 0x324   :  { %8260 = vmatpush3.bf16.xpose.msk.msra.mxu1 %vm10047_vm2, %v8255_v44 }
 0x325   :  { %8279 = vmatprep.subr.msk.bf16.mxu1 %vm10047_vm2, %v8277_v1 }
 0x32b   :  { %7466 = vmatmul.mubr.msk.f32.vlgmr.msra.gmra.mrb[32].mxu1 %vm882_vm1, %v10229_v8  ;;  %v1738_v8 = vld [vmem:[#allocation2 + $0xb0] sm:$0xff] }
 0x32c   :  { %7468 = vmatprep.mubr.msk.f32.mxu1 %vm882_vm1, %v10227_v59  ;;  %8282 = vmatpush3.bf16.xpose.msk.msra.mxu1 %vm10047_vm2, %v8277_v1  ;;  %v8289_v59 = vpack.c.bf16 %v1739_v13, %v1738_v8 }
 0x32d   :  { %8285 = vmatprep.subr.msk.bf16.mxu1 %vm10047_vm2, %v8283_v17 }
 0x32f   :  { %7469 = vmatmul.mubr.msk.f32.gmra.mrb[34].mxu1 %vm882_vm1, %v10237_v34  ;;  %v10467_v34 = vpop.permute.xlu0 %2240 }
 0x330   :  { %7471 = vmatprep.mubr.msk.f32.mxu1 %vm882_vm1, %v10235_v54  ;;  %v10471_v54 = vpop.permute.xlu1 %2238 }
 0x333   :  { %7472 = vmatmul.mubr.msk.f32.gmra.mrb[36].mxu1 %vm882_vm1, %v10248_v53  ;;  %v1740_v53 = vld [vmem:[#allocation2 + $0x100] sm:$0xff] }
 0x334   :  { %7474 = vmatprep.mubr.msk.f32.mxu1 %vm882_vm1, %v10246_v40  ;;  %8288 = vmatpush3.bf16.xpose.msk.msra.mxu1 %vm10047_vm2, %v8283_v17  ;;  %v8295_v36 = vpack.c.bf16 %v1741_v39, %v1740_v53  ;;  %v8864_v40 = vpop.permute.xlu0 %8863  ;;  %v10479_v19 = vpop.permute.xlu1 %2242 }
 0x335   :  { %8291 = vmatprep.subr.msk.bf16.mxu1 %vm10047_vm2, %v8289_v59  ;;  %v8866_v0 = vunpack.i.h.bf16 %v8864_v40  ;;  %v8865_v32 = vunpack.i.l.bf16 %v8864_v40 }
 0x337   :  { %7475 = vmatmul.mubr.msk.f32.gmra.mrb[38].mxu1 %vm882_vm1, %v10255_v26  ;;  %v8341_v26 = vpack.c.bf16 %v8866_v0, %v8865_v32 }
 0x338   :  { %7521 = vmatprep.mubr.msk.f32.mxu1 %vm882_vm1, %v10253_v55  ;;  %v8869_v2 = vpop.permute.xlu1 %8868  ;;  %v8874_v61 = vpop.permute.xlu0 %8873 }
 0x339   :  { %v8871_v55 = vunpack.i.h.bf16 %v8869_v2  ;;  %v8870_v22 = vunpack.i.l.bf16 %v8869_v2  ;;  %v8876_v12 = vunpack.i.h.bf16 %v8874_v61  ;;  %v8875_v35 = vunpack.i.l.bf16 %v8874_v61 }
 0x33b   :  { %v8345_v23 = vpack.c.bf16 %v8871_v55, %v8870_v22  ;;  %v8349_v16 = vpack.c.bf16 %v8876_v12, %v8875_v35 }
 0x33c   :  { %8294 = vmatpush3.bf16.xpose.msk.msra.mxu1 %vm10047_vm2, %v8289_v59  ;;  %v8879_v45 = vpop.permute.xlu1 %8878  ;;  %v8884_v27 = vpop.permute.xlu0 %8883 }
 0x33d   :  { %8297 = vmatprep.subr.msk.bf16.mxu1 %vm10047_vm2, %v8295_v36  ;;  %v8881_v49 = vunpack.i.h.bf16 %v8879_v45  ;;  %v8880_v9 = vunpack.i.l.bf16 %v8879_v45  ;;  %v8886_v46 = vunpack.i.h.bf16 %v8884_v27  ;;  %v8885_v7 = vunpack.i.l.bf16 %v8884_v27 }
 0x344   :  { %8300 = vmatpush3.bf16.xpose.msk.msra.mxu1 %vm10047_vm2, %v8295_v36 }
 0x345   :  { %8342 = vmatprep.subr.bf16.mxu1 %v8341_v26 }
 0x34b   :  { %7522 = vmatmul.mubr.msk.f32.vlgmr.msra.gmra.mrb[40].mxu1 %vm882_vm1, %v10263_v42  ;;  %v8353_v42 = vpack.c.bf16 %v8881_v49, %v8880_v9 }
 0x34c   :  { %7524 = vmatprep.mubr.msk.f32.mxu1 %vm882_vm1, %v10261_v38  ;;  %8344 = vmatpush3.bf16.msra.mxu1 %v8341_v26  ;;  %v10495_v38 = vpack.c.bf16 %v8886_v46, %v8885_v7 }
 0x34d   :  { %8346 = vmatprep.subr.bf16.mxu1 %v8345_v23 }
 0x34f   :  { %7525 = vmatmul.mubr.msk.f32.gmra.mrb[42].mxu1 %vm882_vm1, %v10270_v4 }
 0x350   :  { %7527 = vmatprep.mubr.msk.f32.mxu1 %vm882_vm1, %v10268_v50  ;;  %8348 = vmatpush3.bf16.msra.mxu1 %v8345_v23 }
 0x351   :  { %8350 = vmatprep.subr.bf16.mxu1 %v8349_v16 }
 0x353   :  { %7528 = vmatmul.mubr.msk.f32.gmra.mrb[44].mxu1 %vm882_vm1, %v10281_v47 }
 0x354   :  { %7530 = vmatprep.mubr.msk.f32.mxu1 %vm882_vm1, %v10279_v5  ;;  %8352 = vmatpush3.bf16.msra.mxu1 %v8349_v16 }
 0x355   :  { %8354 = vmatprep.subr.bf16.mxu1 %v8353_v42 }
 0x357   :  { %7531 = vmatmul.mubr.msk.f32.gmra.mrb[46].mxu1 %vm882_vm1, %v10289_v58 }
 0x358   :  { %8356 = vmatpush3.bf16.msra.mxu1 %v8353_v42 }
 0x359   :  { %8359 = vmatprep.subr.msk.bf16.mxu1 %vm10047_vm2, %v10495_v38 }
 0x3de   :  { %v7439_v50 = vpop.f32.mrb[24].mxu1 }
 0x3df   :  { %1233 = vst.msk [vmem:[#allocation3 + $0x10] sm:$0xff] %vm882_vm1, %v7439_v50  ;;  %v1193_v4 = vpop.f32.mrb[25].mxu1 }
 0x3e0   :  { %1232 = vst.msk [vmem:[#allocation3] sm:$0xff] %vm882_vm1, %v1193_v4 }
 0x3e2   :  { %v7442_v47 = vpop.f32.mrb[26].mxu1 }
 0x3e3   :  { %1235 = vst.msk [vmem:[#allocation3 + $0x30] sm:$0xff] %vm882_vm1, %v7442_v47  ;;  %v1203_v5 = vpop.f32.mrb[27].mxu1 }
 0x3e4   :  { %1234 = vst.msk [vmem:[#allocation3 + $0x20] sm:$0xff] %vm882_vm1, %v1203_v5 }
 0x3e6   :  { %v7445_v43 = vpop.f32.mrb[28].mxu1 }
 0x3e7   :  { %1237 = vst.msk [vmem:[#allocation3 + $0x50] sm:$0xff] %vm882_vm1, %v7445_v43  ;;  %v1213_v58 = vpop.f32.mrb[29].mxu1 }
 0x3e8   :  { %1236 = vst.msk [vmem:[#allocation3 + $0x40] sm:$0xff] %vm882_vm1, %v1213_v58 }
 0x3ea   :  { %v7448_v30 = vpop.f32.mrb[30].mxu1 }
 0x3eb   :  { %1239 = vst.msk [vmem:[#allocation3 + $0x70] sm:$0xff] %vm882_vm1, %v7448_v30  ;;  %v1223_v57 = vpop.f32.mrb[31].mxu1 }
 0x3ec   :  { %1238 = vst.msk [vmem:[#allocation3 + $0x60] sm:$0xff] %vm882_vm1, %v1223_v57 }
 0x3fe   :  { %v7467_v44 = vpop.f32.mrb[32].mxu1 }
 0x3ff   :  { %v1410_v11 = vpop.f32.mrb[33].mxu1  ;;  %v1416_v62 = vadd.f32 %v7467_v44, %v10338_v18 }
 0x400   :  { %v1411_v28 = vadd.f32 %v1410_v11, %v10341_v20 }
 0x401   :  { %v1450_v53 = vsel %vm211_vm0, %v1416_v62, -inf }
 0x402   :  { %v7470_v33 = vpop.f32.mrb[34].mxu1  ;;  %v1449_v40 = vsel %vm211_vm0, %v1411_v28, -inf }
 0x403   :  { %v1420_v1 = vpop.f32.mrb[35].mxu1  ;;  %v1426_v39 = vadd.f32 %v7470_v33, %v10351_v41 }
 0x404   :  { %v1421_v0 = vadd.f32 %v1420_v1, %v10353_v29 }
 0x405   :  { %v1452_v35 = vsel %vm211_vm0, %v1426_v39, -inf }
 0x406   :  { %v7473_v17 = vpop.f32.mrb[36].mxu1  ;;  %v1451_v49 = vsel %vm211_vm0, %v1421_v0, -inf }
 0x407   :  { %v1436_v8 = vadd.f32 %v7473_v17, %v10343_v25  ;;  %v1430_v13 = vpop.f32.mrb[37].mxu1 }
 0x408   :  { %v1431_v59 = vadd.f32 %v1430_v13, %v10348_v37 }
 0x409   :  { %v1455_v36 = vsel %vm211_vm0, %v1436_v8, -inf }
 0x40a   :  { %v1456_v32 = vmax.f32 %v1450_v53, %v1455_v36  ;;  %v1453_v26 = vsel %vm211_vm0, %v1431_v59, -inf  ;;  %v7476_v2 = vpop.f32.mrb[38].mxu1 }
 0x40b   :  { %v1454_v55 = vmax.f32 %v1449_v40, %v1453_v26  ;;  %v10521_v22 = vadd.f32 %v7476_v2, %v10359_v15  ;;  %v1440_v61 = vpop.f32.mrb[39].mxu1 }
 0x40c   :  { %v1441_v12 = vadd.f32 %v1440_v61, %v10366_v24 }
 0x40d   :  { %v1461_v23 = vmax.f32 %v1454_v55, %v1456_v32  ;;  %v1459_v45 = vsel %vm211_vm0, %v10521_v22, -inf }
 0x40e   :  { %v1460_v9 = vmax.f32 %v1452_v35, %v1459_v45  ;;  %v1457_v16 = vsel %vm211_vm0, %v1441_v12, -inf  ;;  %v688_v35 = vpop.f32.mrb[64].mxu0 }
 0x40f   :  { %v1458_v27 = vmax.f32 %v1451_v49, %v1457_v16  ;;  %771 = vst.msk [vmem:[#allocation2 + $0x160] sm:$0xff] %vm211_vm0, %v688_v35  ;;  %v690_v16 = vpop.f32.mrb[65].mxu0 }
 0x411   :  { %v1462_v46 = vmax.f32 %v1458_v27, %v1460_v9 }
 0x413   :  { %v1463_v7 = vmax.f32 %v1461_v23, %v1462_v46 }
 0x415   :  { %v1464_v42 = vrot.slane %v1463_v7, 4 }
 0x417   :  { %v1465_v50 = vmax.f32 %v1463_v7, %v1464_v42 }
 0x419   :  { %v1466_v4 = vrot.slane %v1465_v50, 2 }
 0x41b   :  { %v1467_v47 = vmax.f32 %v1465_v50, %v1466_v4  ;;  %v693_v50 = vpop.f32.mrb[66].mxu0 }
 0x41c   :  { %776 = vst.msk [vmem:[#allocation2 + $0x188] sm:$0xff] %vm211_vm0, %v693_v50 }
 0x41d   :  { %v1468_v5 = vrot.slane %v1467_v47, 1 }
 0x41e   :  { %v7523_v43 = vpop.f32.mrb[40].mxu1 }
 0x41f   :  { %v1469_v58 = vmax.f32 %v1467_v47, %v1468_v5  ;;  %v1880_v30 = vpop.f32.mrb[41].mxu1  ;;  %v10531_v55 = vadd.f32 %v7523_v43, %v10338_v18  ;;  %v695_v43 = vpop.f32.mrb[67].mxu0 }
 0x420   :  { %v10534_v61 = vadd.f32 %v1880_v30, %v10341_v20 }
 0x421   :  { %v1470_v57 = vsub.f32 %v1411_v28, %v1469_v58  ;;  %v1471_v44 = vsub.f32 %v1416_v62, %v1469_v58  ;;  %v1472_v11 = vsub.f32 %v1421_v0, %v1469_v58  ;;  %v1473_v33 = vsub.f32 %v1426_v39, %v1469_v58 }
 0x422   :  { %v1474_v1 = vsub.f32 %v1431_v59, %v1469_v58  ;;  %v1475_v17 = vsub.f32 %v1436_v8, %v1469_v58  ;;  %v1476_v13 = vsub.f32 %v1441_v12, %v1469_v58  ;;  %v1477_v53 = vsub.f32 %v10521_v22, %v1469_v58  ;;  %v7526_v36 = vpop.f32.mrb[42].mxu1 }
 0x423   :  { %v1478_v40 = vmul.f32 1.442695, %v1470_v57  ;;  %v1480_v32 = vmul.f32 1.442695, %v1471_v44  ;;  %v1482_v26 = vmul.f32 1.442695, %v1472_v11  ;;  %v10540_v22 = vadd.f32 %v7526_v36, %v10351_v41 }
 0x424   :  { %v1484_v2 = vmul.f32 1.442695, %v1473_v33  ;;  %v1890_v62 = vpop.f32.mrb[43].mxu1  ;;  %v1486_v28 = vmul.f32 1.442695, %v1474_v1  ;;  %v1920_v45 = vsel %vm211_vm0, %v10531_v55, -inf }
 0x425   :  { %9140 = vpow2.f32 %v1478_v40  ;;  %v1488_v0 = vmul.f32 1.442695, %v1475_v17  ;;  %v1490_v23 = vmul.f32 1.442695, %v1476_v13  ;;  %v1919_v49 = vsel %vm211_vm0, %v10534_v61, -inf  ;;  %v698_v57 = vpop.f32.mrb[68].mxu0 }
 0x426   :  { %9142 = vpow2.f32 %v1480_v32  ;;  %v7529_v59 = vpop.f32.mrb[44].mxu1  ;;  %v10553_v27 = vadd.f32 %v1890_v62, %v10353_v29  ;;  %v1492_v58 = vmul.f32 1.442695, %v1477_v53  ;;  %v1922_v44 = vsel %vm211_vm0, %v10540_v22, -inf  ;;  %781 = vst.msk [vmem:[#allocation2 + $0x1b0] sm:$0xff] %vm211_vm0, %v698_v57  ;;  %v700_v1 = vpop.f32.mrb[69].mxu0 }
 0x427   :  { %9144 = vpow2.f32 %v1482_v26  ;;  %v10537_v8 = vadd.f32 %v7529_v59, %v10343_v25  ;;  %v1900_v39 = vpop.f32.mrb[45].mxu1  ;;  %v703_v36 = vpop.f32.mrb[70].mxu0  ;;  %v5837_v59 = vld [vmem:[#allocation2 + $0x160] sm:$0xff]  ;;  %v5838_v16 = vld [vmem:[#allocation2 + $0x188] sm:$0xff] }
 0x428   :  { %9146 = vpow2.f32 %v1484_v2  ;;  %v10543_v12 = vadd.f32 %v1900_v39, %v10348_v37  ;;  %v1921_v17 = vsel %vm211_vm0, %v10553_v27, -inf  ;;  %786 = vst.msk [vmem:[#allocation2 + $0x1d8] sm:$0xff] %vm211_vm0, %v703_v36  ;;  %v705_v26 = vpop.f32.mrb[71].mxu0 }
 0x429   :  { %v1925_v9 = vsel %vm211_vm0, %v10537_v8, -inf  ;;  %9148 = vpow2.f32 %v1486_v28  ;;  %v708_v28 = vpop.f32.mrb[72].mxu0 }
 0x42a   :  { %v1926_v46 = vmax.f32 %v1920_v45, %v1925_v9  ;;  %v1923_v7 = vsel %vm211_vm0, %v10543_v12, -inf  ;;  %v7532_v42 = vpop.f32.mrb[46].mxu1  ;;  %9150 = vpow2.f32 %v1488_v0  ;;  %791 = vst.msk [vmem:[#allocation2 + $0x200] sm:$0xff] %vm211_vm0, %v708_v28 }
 0x42b   :  { %v1924_v4 = vmax.f32 %v1919_v49, %v1923_v7  ;;  %v10558_v47 = vadd.f32 %v7532_v42, %v10359_v15  ;;  %v1910_v5 = vpop.f32.mrb[47].mxu1  ;;  %9152 = vpow2.f32 %v1490_v23  ;;  %v710_v23 = vpop.f32.mrb[73].mxu0  ;;  %v9102_v42 = vpack.i.bf16 %v5838_v16, %v5837_v59 }
 0x42c   :  { %v10562_v30 = vadd.f32 %v1910_v5, %v10366_v24  ;;  %9154 = vpow2.f32 %v1492_v58  ;;  %v713_v9 = vpop.f32.mrb[74].mxu0 }
 0x42d   :  { %v1931_v11 = vmax.f32 %v1924_v4, %v1926_v46  ;;  %v1929_v33 = vsel %vm211_vm0, %v10558_v47, -inf  ;;  %796 = vst.msk [vmem:[#allocation2 + $0x228] sm:$0xff] %vm211_vm0, %v713_v9  ;;  %v715_v50 = vpop.f32.mrb[75].mxu0  ;;  %v5839_v58 = vld [vmem:[#allocation2 + $0x1b0] sm:$0xff]  ;;  %9103 = vrot.lane.b32.xlu0 %v9102_v42, %s9442_s28 }
 0x42e   :  { %v1930_v13 = vmax.f32 %v1922_v44, %v1929_v33  ;;  %v1927_v53 = vsel %vm211_vm0, %v10562_v30, -inf  ;;  %v718_v43 = vpop.f32.mrb[76].mxu0 }
 0x42f   :  { %v10573_v40 = vpop.eup %9140  ;;  %v1928_v32 = vmax.f32 %v1921_v17, %v1927_v53  ;;  %801 = vst.msk [vmem:[#allocation2 + $0x250] sm:$0xff] %vm211_vm0, %v718_v43  ;;  %v720_v33 = vpop.f32.mrb[77].mxu0 }
 0x430   :  { %v10576_v2 = vpop.eup %9142  ;;  %v1494_v62 = vsel %vm211_vm0, %v10573_v40, 0.0  ;;  %v723_v17 = vpop.f32.mrb[78].mxu0 }
 0x431   :  { %v10580_v39 = vpop.eup %9144  ;;  %v1495_v0 = vsel %vm211_vm0, %v10576_v2, 0.0  ;;  %v1932_v35 = vmax.f32 %v1928_v32, %v1930_v13  ;;  %v5840_v13 = vld [vmem:[#allocation2 + $0x1d8] sm:$0xff]  ;;  %806 = vst.msk [vmem:[#allocation2 + $0x278] sm:$0xff] %vm211_vm0, %v723_v17  ;;  %v725_v26 = vpop.f32.mrb[79].mxu0  ;;  %v5841_v59 = vld [vmem:[#allocation2 + $0x200] sm:$0xff] }
 0x432   :  { %v10585_v45 = vpop.eup %9146  ;;  %v1496_v49 = vadd.f32 %v1495_v0, %v1494_v62  ;;  %v1497_v46 = vsel %vm211_vm0, %v10580_v39, 0.0  ;;  %v9107_v32 = vpack.i.bf16 %v5840_v13, %v5839_v58 }
 0x433   :  { %v1933_v7 = vmax.f32 %v1931_v11, %v1932_v35  ;;  %v10590_v4 = vpop.eup %9148  ;;  %v1499_v57 = vsel %vm211_vm0, %v10585_v45, 0.0 }
 0x434   :  { %v1498_v5 = vadd.f32 %v1497_v46, %v1496_v49  ;;  %v10596_v1 = vpop.eup %9150  ;;  %v1501_v53 = vsel %vm211_vm0, %v10590_v4, 0.0  ;;  %9108 = vrot.lane.b32.xlu1 %v9107_v32, %s9442_s28  ;;  %v5842_v9 = vld [vmem:[#allocation2 + $0x228] sm:$0xff] }
 0x435   :  { %v1934_v44 = vrot.slane %v1933_v7, 4  ;;  %v10601_v62 = vpop.eup %9152  ;;  %v1503_v0 = vsel %vm211_vm0, %v10596_v1, 0.0 }
 0x436   :  { %v1500_v11 = vadd.f32 %v1499_v57, %v1498_v5  ;;  %v10606_v23 = vpop.eup %9154  ;;  %v1505_v16 = vsel %vm211_vm0, %v10601_v62, 0.0 }
 0x437   :  { %v1935_v36 = vmax.f32 %v1933_v7, %v1934_v44  ;;  %v9112_v7 = vpack.i.bf16 %v5842_v9, %v5841_v59  ;;  %v1507_v50 = vsel %vm211_vm0, %v10606_v23, 0.0 }
 0x438   :  { %v1502_v28 = vadd.f32 %v1501_v53, %v1500_v11 }
 0x439   :  { %v1936_v35 = vrot.slane %v1935_v36, 2  ;;  %9113 = vrot.lane.b32.xlu0 %v9112_v7, %s9442_s28 }
 0x43a   :  { %v1504_v49 = vadd.f32 %v1503_v0, %v1502_v28 }
 0x43b   :  { %v1937_v46 = vmax.f32 %v1935_v36, %v1936_v35 }
 0x43c   :  { %v1506_v42 = vadd.f32 %v1505_v16, %v1504_v49 }
 0x43d   :  { %v1938_v5 = vrot.slane %v1937_v46, 1 }
 0x43e   :  { %v1508_v43 = vadd.f32 %v1507_v50, %v1506_v42 }
 0x43f   :  { %v1939_v58 = vmax.f32 %v1937_v46, %v1938_v5 }
 0x440   :  { %v1509_v57 = vrot.slane %v1508_v43, 4 }
 0x441   :  { %v1940_v44 = vsub.f32 %v10534_v61, %v1939_v58  ;;  %v1941_v33 = vsub.f32 %v10531_v55, %v1939_v58  ;;  %v1942_v11 = vsub.f32 %v10553_v27, %v1939_v58  ;;  %v1943_v17 = vsub.f32 %v10540_v22, %v1939_v58 }
 0x442   :  { %v1510_v13 = vadd.f32 %v1509_v57, %v1508_v43  ;;  %v1944_v53 = vsub.f32 %v10543_v12, %v1939_v58  ;;  %v1945_v36 = vsub.f32 %v10537_v8, %v1939_v58  ;;  %v1946_v32 = vsub.f32 %v10562_v30, %v1939_v58 }
 0x443   :  { %v1947_v26 = vsub.f32 %v10558_v47, %v1939_v58  ;;  %v1948_v28 = vmul.f32 1.442695, %v1940_v44  ;;  %v1950_v59 = vmul.f32 1.442695, %v1941_v33  ;;  %v1952_v0 = vmul.f32 1.442695, %v1942_v11 }
 0x444   :  { %v1511_v35 = vrot.slane %v1510_v13, 2  ;;  %v1954_v61 = vmul.f32 1.442695, %v1943_v17  ;;  %v1956_v55 = vmul.f32 1.442695, %v1944_v53  ;;  %v8831_v11 = vunpack.i.h.bf16 %v10315_v21 }
 0x445   :  { %9156 = vpow2.f32 %v1948_v28  ;;  %v1958_v22 = vmul.f32 1.442695, %v1945_v36  ;;  %v1960_v8 = vmul.f32 1.442695, %v1946_v32  ;;  %v1962_v30 = vmul.f32 1.442695, %v1947_v26 }
 0x446   :  { %v1512_v49 = vadd.f32 %v1511_v35, %v1510_v13  ;;  %9158 = vpow2.f32 %v1950_v59  ;;  %v8830_v17 = vunpack.i.l.bf16 %v10315_v21 }
 0x447   :  { %9160 = vpow2.f32 %v1952_v0 }
 0x448   :  { %v1513_v27 = vrot.slane %v1512_v49, 1  ;;  %9162 = vpow2.f32 %v1954_v61 }
 0x449   :  { %9164 = vpow2.f32 %v1956_v55 }
 0x44a   :  { %v1514_v12 = vadd.f32 %v1513_v27, %v1512_v49  ;;  %9166 = vpow2.f32 %v1958_v22  ;;  %v8840_v27 = vunpack.i.l.bf16 %v10322_v3 }
 0x44c   :  { %9168 = vrcp.f32 %v1514_v12 }
 0x44d   :  { %9170 = vpow2.f32 %v1960_v8 }
 0x44e   :  { %9172 = vpow2.f32 %v1962_v30 }
 0x44f   :  { %v10621_v47 = vpop.eup %9156 }
 0x450   :  { %v10623_v9 = vpop.eup %9158  ;;  %v1964_v16 = vsel %vm211_vm0, %v10621_v47, 0.0 }
 0x451   :  { %v10627_v46 = vpop.eup %9160  ;;  %v1965_v7 = vsel %vm211_vm0, %v10623_v9, 0.0 }
 0x452   :  { %v10631_v42 = vpop.eup %9162  ;;  %v1966_v50 = vadd.f32 %v1965_v7, %v1964_v16  ;;  %v1967_v43 = vsel %vm211_vm0, %v10627_v46, 0.0 }
 0x453   :  { %v10633_v5 = vpop.eup %9164  ;;  %v1969_v44 = vsel %vm211_vm0, %v10631_v42, 0.0 }
 0x454   :  { %v1968_v58 = vadd.f32 %v1967_v43, %v1966_v50  ;;  %v10637_v57 = vpop.eup %9166  ;;  %v1971_v53 = vsel %vm211_vm0, %v10633_v5, 0.0 }
 0x455   :  { %v1973_v21 = vsel %vm211_vm0, %v10637_v57, 0.0 }
 0x456   :  { %v9169_v33 = vpop.eup %9168  ;;  %v1970_v13 = vadd.f32 %v1969_v44, %v1968_v58 }
 0x457   :  { %v1516_v36 = vmul.f32 %v9169_v33, %v10573_v40  ;;  %v1517_v32 = vmul.f32 %v9169_v33, %v10576_v2  ;;  %v1518_v26 = vmul.f32 %v9169_v33, %v10580_v39  ;;  %v1519_v28 = vmul.f32 %v9169_v33, %v10585_v45  ;;  %v9171_v59 = vpop.eup %9170 }
 0x458   :  { %v1972_v0 = vadd.f32 %v1971_v53, %v1970_v13  ;;  %v1520_v35 = vmul.f32 %v9169_v33, %v10590_v4  ;;  %v1521_v61 = vmul.f32 %v9169_v33, %v10596_v1  ;;  %v1522_v55 = vmul.f32 %v9169_v33, %v10601_v62  ;;  %v9173_v2 = vpop.eup %9172 }
 0x459   :  { %7493 = vmatprep.mubr.msk.f32.mxu0 %vm211_vm0, %v1516_v36  ;;  %v1523_v40 = vmul.f32 %v9169_v33, %v10606_v23  ;;  %v8836_v39 = vunpack.i.h.bf16 %v10313_v52  ;;  %v8835_v45 = vunpack.i.l.bf16 %v10313_v52  ;;  %v8305_v4 = vpack.c.bf16 %v8831_v11, %v8830_v17  ;;  %v11830_v17 = vld [vmem:[#allocation15_spill] sm:$0xff] }
 0x45a   :  { %v1974_v49 = vadd.f32 %v1973_v21, %v1972_v0  ;;  %7494 = vmatmul.mubr.msk.f32.vlgmr.msra.gmra.mrb[80].mxu0 %vm211_vm0, %v1517_v32  ;;  %v1975_v1 = vsel %vm211_vm0, %v9171_v59, 0.0  ;;  %v1977_v62 = vsel %vm211_vm0, %v9173_v2, 0.0  ;;  %v8841_v23 = vunpack.i.h.bf16 %v10322_v3 }
 0x45b   :  { %8304 = vmatpush3.bf16.msra.mxu0 %v10389_v14  ;;  %7496 = vmatprep.mubr.msk.f32.mxu0 %vm211_vm0, %v1518_v26  ;;  %v8309_v52 = vpack.c.bf16 %v8836_v39, %v8835_v45  ;;  %v11829_v14 = vld [vmem:[#allocation14_spill] sm:$0xff]  ;;  %v8851_v13 = vunpack.i.h.bf16 %v11830_v17  ;;  %v8850_v53 = vunpack.i.l.bf16 %v11830_v17 }
 0x45c   :  { %v1976_v22 = vadd.f32 %v1975_v1, %v1974_v49  ;;  %8306 = vmatprep.subr.bf16.mxu0 %v8305_v4  ;;  %v8846_v30 = vunpack.i.h.bf16 %v11829_v14  ;;  %v8845_v16 = vunpack.i.l.bf16 %v11829_v14  ;;  %v8313_v50 = vpack.c.bf16 %v8841_v23, %v8840_v27  ;;  %v2702_v45 = vld [vmem:[#allocation2 + $0xc0] sm:$0xff]  ;;  %v2703_v49 = vld [vmem:[#allocation2 + $0xe8] sm:$0xff]  ;;  %v2704_v1 = vld [vmem:[#allocation2 + $0x110] sm:$0xff] }
 0x45e   :  { %v1978_v12 = vadd.f32 %v1977_v62, %v1976_v22  ;;  %7497 = vmatmul.mubr.msk.f32.gmra.mrb[82].mxu0 %vm211_vm0, %v1519_v28  ;;  %v8317_v43 = vpack.c.bf16 %v8846_v30, %v8845_v16  ;;  %v2705_v22 = vld [vmem:[#allocation2 + $0x138] sm:$0xff] }
 0x45f   :  { %8308 = vmatpush3.bf16.msra.mxu0 %v8305_v4  ;;  %7499 = vmatprep.mubr.msk.f32.mxu0 %vm211_vm0, %v1520_v35  ;;  %v8389_v4 = vpack.c.bf16 %v2703_v49, %v2702_v45  ;;  %v8393_v62 = vpack.c.bf16 %v2705_v22, %v2704_v1 }
 0x460   :  { %v1979_v8 = vrot.slane %v1978_v12, 4  ;;  %8310 = vmatprep.subr.bf16.mxu0 %v8309_v52 }
 0x462   :  { %v1980_v7 = vadd.f32 %v1979_v8, %v1978_v12  ;;  %7500 = vmatmul.mubr.msk.f32.gmra.mrb[84].mxu0 %vm211_vm0, %v1521_v61  ;;  %v5844_v12 = vld [vmem:[#allocation2 + $0x278] sm:$0xff]  ;;  %v10738_v8 = vpop.permute.xlu1 %8888 }
 0x463   :  { %8312 = vmatpush3.bf16.msra.mxu0 %v8309_v52  ;;  %7502 = vmatprep.mubr.msk.f32.mxu0 %vm211_vm0, %v1522_v55  ;;  %v8323_v55 = vpack.c.bf16 %v8851_v13, %v8850_v53 }
 0x464   :  { %v1981_v3 = vrot.slane %v1980_v7, 2  ;;  %8314 = vmatprep.subr.bf16.mxu0 %v8313_v50 }
 0x466   :  { %v1982_v58 = vadd.f32 %v1981_v3, %v1980_v7  ;;  %7503 = vmatmul.mubr.msk.f32.gmra.mrb[86].mxu0 %vm211_vm0, %v1523_v40 }
 0x467   :  { %8316 = vmatpush3.bf16.msra.mxu0 %v8313_v50 }
 0x468   :  { %v1983_v44 = vrot.slane %v1982_v58, 1  ;;  %8319 = vmatprep.subr.msk.bf16.mxu0 %vm10047_vm2, %v8317_v43 }
 0x46a   :  { %v1984_v33 = vadd.f32 %v1983_v44, %v1982_v58 }
 0x46c   :  { %9174 = vrcp.f32 %v1984_v33 }
 0x476   :  { %v9175_v11 = vpop.eup %9174 }
 0x477   :  { %v1986_v36 = vmul.f32 %v9175_v11, %v10621_v47  ;;  %v1987_v32 = vmul.f32 %v9175_v11, %v10623_v9  ;;  %v1988_v26 = vmul.f32 %v9175_v11, %v10627_v46  ;;  %v1989_v28 = vmul.f32 %v9175_v11, %v10631_v42 }
 0x478   :  { %v1990_v0 = vmul.f32 %v9175_v11, %v10633_v5  ;;  %v1991_v35 = vmul.f32 %v9175_v11, %v10637_v57  ;;  %v1992_v61 = vmul.f32 %v9175_v11, %v9171_v59  ;;  %v1993_v21 = vmul.f32 %v9175_v11, %v9173_v2  ;;  %v2698_v57 = vld [vmem:[#allocation2 + $0x20] sm:$0xff]  ;;  %v2699_v59 = vld [vmem:[#allocation2 + $0x48] sm:$0xff]  ;;  %v2701_v2 = vld [vmem:[#allocation2 + $0x98] sm:$0xff] }
 0x479   :  { %7549 = vmatprep.mubr.msk.f32.mxu0 %vm211_vm0, %v1986_v36  ;;  %v8856_v47 = vunpack.i.h.bf16 %v10429_v63  ;;  %v8855_v9 = vunpack.i.l.bf16 %v10429_v63  ;;  %v8861_v42 = vunpack.i.h.bf16 %v10437_v51  ;;  %v8860_v5 = vunpack.i.l.bf16 %v10437_v51  ;;  %v2700_v51 = vld [vmem:[#allocation2 + $0x70] sm:$0xff] }
 0x47a   :  { %7550 = vmatmul.mubr.msk.f32.vlgmr.msra.gmra.mrb[88].mxu0 %vm211_vm0, %v1987_v32  ;;  %v8381_v40 = vpack.c.bf16 %v2699_v59, %v2698_v57  ;;  %v8385_v39 = vpack.c.bf16 %v2701_v2, %v2700_v51 }
 0x47b   :  { %8322 = vmatpush3.bf16.xpose.msk.msra.mxu0 %vm10047_vm2, %v8317_v43  ;;  %7552 = vmatprep.mubr.msk.f32.mxu0 %vm211_vm0, %v1988_v26  ;;  %v8329_v46 = vpack.c.bf16 %v8856_v47, %v8855_v9  ;;  %v8335_v63 = vpack.c.bf16 %v8861_v42, %v8860_v5 }
 0x47c   :  { %8325 = vmatprep.subr.msk.bf16.mxu0 %vm10047_vm2, %v8323_v55 }
 0x47e   :  { %7553 = vmatmul.mubr.msk.f32.gmra.mrb[90].mxu0 %vm211_vm0, %v1989_v28 }
 0x47f   :  { %7555 = vmatprep.mubr.msk.f32.mxu0 %vm211_vm0, %v1990_v0 }
 0x482   :  { %7556 = vmatmul.mubr.msk.f32.gmra.mrb[92].mxu0 %vm211_vm0, %v1991_v35 }
 0x483   :  { %8328 = vmatpush3.bf16.xpose.msk.msra.mxu0 %vm10047_vm2, %v8323_v55  ;;  %7558 = vmatprep.mubr.msk.f32.mxu0 %vm211_vm0, %v1992_v61 }
 0x484   :  { %8331 = vmatprep.subr.msk.bf16.mxu0 %vm10047_vm2, %v8329_v46 }
 0x486   :  { %7559 = vmatmul.mubr.msk.f32.gmra.mrb[94].mxu0 %vm211_vm0, %v1993_v21 }
 0x487   :  { %7577 = vmatprep.mubr.msk.f32.mxu0 %vm882_vm1, %v10431_v31  ;;  %v10712_v31 = vpop.permute.xlu0 %8893 }
 0x48b   :  { %8334 = vmatpush3.bf16.xpose.msk.msra.mxu0 %vm10047_vm2, %v8329_v46 }
 0x48c   :  { %8337 = vmatprep.subr.msk.bf16.mxu0 %vm10047_vm2, %v8335_v63 }
 0x493   :  { %8340 = vmatpush3.bf16.xpose.msk.msra.mxu0 %vm10047_vm2, %v8335_v63 }
 0x494   :  { %8382 = vmatprep.subr.bf16.mxu0 %v8381_v40 }
 0x49a   :  { %7578 = vmatmul.mubr.msk.f32.vlgmr.msra.gmra.mrb[96].mxu0 %vm882_vm1, %v10443_v56  ;;  %v8904_v56 = vpop.permute.xlu0 %8903 }
 0x49b   :  { %7580 = vmatprep.mubr.msk.f32.mxu0 %vm882_vm1, %v10439_v48  ;;  %8384 = vmatpush3.bf16.msra.mxu0 %v8381_v40  ;;  %v8906_v23 = vunpack.i.h.bf16 %v8904_v56  ;;  %v8905_v27 = vunpack.i.l.bf16 %v8904_v56 }
 0x49c   :  { %8386 = vmatprep.subr.bf16.mxu0 %v8385_v39 }
 0x49d   :  { %v10724_v48 = vpack.c.bf16 %v8906_v23, %v8905_v27 }
 0x49e   :  { %7581 = vmatmul.mubr.msk.f32.gmra.mrb[98].mxu0 %vm882_vm1, %v10457_v10  ;;  %v5843_v10 = vld [vmem:[#allocation2 + $0x250] sm:$0xff] }
 0x49f   :  { %7583 = vmatprep.mubr.msk.f32.mxu0 %vm882_vm1, %v10453_v60  ;;  %8388 = vmatpush3.bf16.msra.mxu0 %v8385_v39  ;;  %v10731_v60 = vpop.permute.xlu0 %8913 }
 0x4a0   :  { %8390 = vmatprep.subr.bf16.mxu0 %v8389_v4 }
 0x4a2   :  { %7584 = vmatmul.mubr.msk.f32.gmra.mrb[100].mxu0 %vm882_vm1, %v10471_v54  ;;  %v9117_v54 = vpack.i.bf16 %v5844_v12, %v5843_v10 }
 0x4a3   :  { %7586 = vmatprep.mubr.msk.f32.mxu0 %vm882_vm1, %v10467_v34  ;;  %8392 = vmatpush3.bf16.msra.mxu0 %v8389_v4  ;;  %v10734_v34 = vpop.permute.xlu0 %3119 }
 0x4a4   :  { %8394 = vmatprep.subr.bf16.mxu0 %v8393_v62  ;;  %9118 = vrot.lane.b32.xlu1 %v9117_v54, %s9442_s28 }
 0x4a6   :  { %7587 = vmatmul.mubr.msk.f32.gmra.mrb[102].mxu0 %vm882_vm1, %v10479_v19  ;;  %v10742_v19 = vpop.permute.xlu1 %8898 }
 0x4a7   :  { %8396 = vmatpush3.bf16.msra.mxu0 %v8393_v62  ;;  %v10736_v52 = vpop.permute.xlu0 %3123 }
 0x4a8   :  { %8399 = vmatprep.subr.msk.bf16.mxu0 %vm10047_vm2, %v10724_v48 }
 0x4aa   :  { %v10746_v16 = vpop.permute.xlu1 %8908 }
 0x4ab   :  { %v10740_v14 = vpop.permute.xlu0 %3127 }
 0x4ae   :  { %v10750_v50 = vpop.permute.xlu1 %8918 }
 0x4af   :  { %v10744_v30 = vpop.permute.xlu0 %3131 }
 0x4b2   :  { %v10754_v43 = vpop.permute.xlu1 %3121 }
 0x4b3   :  { %v10748_v7 = vpop.permute.xlu0 %8923 }
 0x4b6   :  { %v10758_v44 = vpop.permute.xlu1 %3125 }
 0x4b7   :  { %v10752_v3 = vpop.permute.xlu0 %8933 }
 0x4ba   :  { %v10762_v11 = vpop.permute.xlu1 %3129 }
 0x4bb   :  { %v10756_v58 = vpop.permute.xlu0 %8943 }
 0x4be   :  { %v10766_v13 = vpop.permute.xlu1 %3133 }
 0x4bf   :  { %v10760_v33 = vpop.permute.xlu0 %8953 }
 0x4c2   :  { %v10770_v36 = vpop.permute.xlu1 %8928 }
 0x4c3   :  { %v10764_v17 = vpop.permute.xlu0 %8963 }
 0x4c6   :  { %v10774_v26 = vpop.permute.xlu1 %8938 }
 0x4c7   :  { %v10768_v53 = vpop.permute.xlu0 %8973 }
 0x4c8   :  { %11831 = vst [vmem:[#allocation14_spill] sm:$0xff] %v10768_v53 }
 0x4ca   :  { %v10778_v0 = vpop.permute.xlu1 %8948 }
 0x4cb   :  { %v10772_v32 = vpop.permute.xlu0 %4009 }
 0x4cc   :  { %11832 = vst [vmem:[#allocation15_spill] sm:$0xff] %v10772_v32 }
 0x4ce   :  { %v10782_v61 = vpop.permute.xlu1 %8958 }
 0x4cf   :  { %v10776_v28 = vpop.permute.xlu0 %4013 }
 0x4d0   :  { %11833 = vst [vmem:[#allocation17_spill] sm:$0xff] %v10776_v28 }
 0x4d2   :  { %v10786_v55 = vpop.permute.xlu1 %8968 }
 0x4d3   :  { %v10780_v35 = vpop.permute.xlu0 %4017  ;;  %11836 = vst [vmem:[#allocation20_spill] sm:$0xff] %v10786_v55 }
 0x4d4   :  { %11834 = vst [vmem:[#allocation18_spill] sm:$0xff] %v10780_v35 }
 0x4d6   :  { %v10790_v9 = vpop.permute.xlu1 %8978 }
 0x4d7   :  { %v10784_v21 = vpop.permute.xlu0 %4021  ;;  %11837 = vst [vmem:[#allocation21_spill] sm:$0xff] %v10790_v9 }
 0x4d8   :  { %11835 = vst [vmem:[#allocation19_spill] sm:$0xff] %v10784_v21 }
 0x4da   :  { %v10794_v42 = vpop.permute.xlu1 %4011 }
 0x4db   :  { %v10788_v47 = vpop.permute.xlu0 %8983  ;;  %11838 = vst [vmem:[#allocation22_spill] sm:$0xff] %v10794_v42 }
 0x4de   :  { %v10798_v63 = vpop.permute.xlu1 %4015 }
 0x4df   :  { %v10792_v46 = vpop.permute.xlu0 %8993  ;;  %11840 = vst [vmem:[#allocation24_spill] sm:$0xff] %v10798_v63 }
 0x4e2   :  { %v10802_v59 = vpop.permute.xlu1 %4019 }
 0x4e3   :  { %v10796_v5 = vpop.permute.xlu0 %4494  ;;  %11842 = vst [vmem:[#allocation26_spill] sm:$0xff] %v10802_v59 }
 0x4e4   :  { %11839 = vst [vmem:[#allocation23_spill] sm:$0xff] %v10796_v5 }
 0x4e6   :  { %v10806_v2 = vpop.permute.xlu1 %4023 }
 0x4e7   :  { %v10800_v57 = vpop.permute.xlu0 %4498  ;;  %11844 = vst [vmem:[#allocation28_spill] sm:$0xff] %v10806_v2 }
 0x4e8   :  { %11841 = vst [vmem:[#allocation25_spill] sm:$0xff] %v10800_v57 }
 0x4ea   :  { %v10812_v1 = vpop.permute.xlu1 %8988 }
 0x4eb   :  { %v10804_v40 = vpop.permute.xlu0 %4502 }
 0x4ec   :  { %11843 = vst [vmem:[#allocation27_spill] sm:$0xff] %v10804_v40 }
 0x4ee   :  { %v10817_v27 = vpop.permute.xlu1 %8998 }
 0x4ef   :  { %v10809_v45 = vpop.permute.xlu0 %4506  ;;  %11847 = vst [vmem:[#allocation31_spill] sm:$0xff] %v10817_v27 }
 0x4f0   :  { %11845 = vst [vmem:[#allocation29_spill] sm:$0xff] %v10809_v45 }
 0x4f2   :  { %v10823_v54 = vpop.permute.xlu1 %4496 }
 0x4f3   :  { %v10814_v62 = vpop.permute.xlu0 %9003  ;;  %11849 = vst [vmem:[#allocation33_spill] sm:$0xff] %v10823_v54 }
 0x4f4   :  { %11846 = vst [vmem:[#allocation30_spill] sm:$0xff] %v10814_v62 }
 0x4f7   :  { %v10820_v12 = vpop.permute.xlu0 %9013 }
 0x4f8   :  { %11848 = vst [vmem:[#allocation32_spill] sm:$0xff] %v10820_v12 }
 0x52d   :  { %v7495_v51 = vpop.f32.mrb[80].mxu0 }
 0x52e   :  { %1695 = vrot.lane.b32.xlu0 %v7495_v51, %s9441_s27  ;;  %v1646_v39 = vpop.f32.mrb[81].mxu0  ;;  %v10825_v51 = vpop.permute.xlu0 %9023 }
 0x52f   :  { %11850 = vst [vmem:[#allocation34_spill] sm:$0xff] %v10825_v51 }
 0x531   :  { %v7498_v49 = vpop.f32.mrb[82].mxu0 }
 0x532   :  { %1693 = vrot.lane.b32.xlu0 %v1646_v39, %s9441_s27  ;;  %v1656_v4 = vpop.f32.mrb[83].mxu0  ;;  %v10828_v39 = vpop.permute.xlu1 %4500 }
 0x533   :  { %11851 = vst [vmem:[#allocation35_spill] sm:$0xff] %v10828_v39 }
 0x535   :  { %v7501_v22 = vpop.f32.mrb[84].mxu0 }
 0x536   :  { %1699 = vrot.lane.b32.xlu0 %v7498_v49, %s9441_s27  ;;  %v1666_v56 = vpop.f32.mrb[85].mxu0  ;;  %v10831_v49 = vpop.permute.xlu0 %9033 }
 0x537   :  { %11852 = vst [vmem:[#allocation36_spill] sm:$0xff] %v10831_v49 }
 0x539   :  { %v7504_v23 = vpop.f32.mrb[86].mxu0 }
 0x53a   :  { %1697 = vrot.lane.b32.xlu0 %v1656_v4, %s9441_s27  ;;  %v1676_v10 = vpop.f32.mrb[87].mxu0  ;;  %v10834_v4 = vpop.permute.xlu1 %4504 }
 0x53b   :  { %11853 = vst [vmem:[#allocation37_spill] sm:$0xff] %v10834_v4  ;;  %v10836_v40 = vpop.permute.xlu0 %4963 }
 0x53c   :  { %11854 = vst [vmem:[#allocation38_spill] sm:$0xff] %v10836_v40 }
 0x53e   :  { %1703 = vrot.lane.b32.xlu0 %v7501_v22, %s9441_s27  ;;  %v10839_v54 = vpop.permute.xlu1 %4508 }
 0x53f   :  { %11855 = vst [vmem:[#allocation39_spill] sm:$0xff] %v10839_v54  ;;  %v10842_v39 = vpop.permute.xlu0 %4967 }
 0x540   :  { %11856 = vst [vmem:[#allocation40_spill] sm:$0xff] %v10842_v39 }
 0x542   :  { %1701 = vrot.lane.b32.xlu0 %v1666_v56, %s9441_s27  ;;  %v10845_v49 = vpop.permute.xlu1 %9008 }
 0x543   :  { %11857 = vst [vmem:[#allocation41_spill] sm:$0xff] %v10845_v49  ;;  %v10847_v5 = vpop.permute.xlu0 %4971 }
 0x544   :  { %11858 = vst [vmem:[#allocation42_spill] sm:$0xff] %v10847_v5 }
 0x546   :  { %1707 = vrot.lane.b32.xlu0 %v7504_v23, %s9441_s27  ;;  %v10850_v40 = vpop.permute.xlu1 %9018 }
 0x547   :  { %11859 = vst [vmem:[#allocation43_spill] sm:$0xff] %v10850_v40 }
 0x54a   :  { %1705 = vrot.lane.b32.xlu0 %v1676_v10, %s9441_s27  ;;  %v10856_v39 = vpop.permute.xlu1 %9028 }
 0x54b   :  { %11861 = vst [vmem:[#allocation45_spill] sm:$0xff] %v10856_v39 }
 0x54d   :  { %v7551_v45 = vpop.f32.mrb[88].mxu0 }
 0x54e   :  { %2165 = vrot.lane.b32.xlu1 %v7551_v45, %s9440_s2  ;;  %v2116_v22 = vpop.f32.mrb[89].mxu0  ;;  %v10861_v54 = vpop.permute.xlu1 %9038 }
 0x54f   :  { %11863 = vst [vmem:[#allocation47_spill] sm:$0xff] %v10861_v54 }
 0x551   :  { %v7554_v57 = vpop.f32.mrb[90].mxu0 }
 0x552   :  { %2163 = vrot.lane.b32.xlu1 %v2116_v22, %s9440_s2  ;;  %v2126_v56 = vpop.f32.mrb[91].mxu0  ;;  %v10853_v22 = vpop.permute.xlu0 %4975 }
 0x553   :  { %11860 = vst [vmem:[#allocation44_spill] sm:$0xff] %v10853_v22  ;;  %v10866_v21 = vpop.permute.xlu1 %4965 }
 0x554   :  { %11865 = vst [vmem:[#allocation49_spill] sm:$0xff] %v10866_v21 }
 0x555   :  { %v7557_v23 = vpop.f32.mrb[92].mxu0 }
 0x556   :  { %2169 = vrot.lane.b32.xlu1 %v7554_v57, %s9440_s2  ;;  %v2136_v10 = vpop.f32.mrb[93].mxu0  ;;  %v10858_v57 = vpop.permute.xlu0 %9043 }
 0x557   :  { %11862 = vst [vmem:[#allocation46_spill] sm:$0xff] %v10858_v57 }
 0x559   :  { %v7560_v4 = vpop.f32.mrb[94].mxu0 }
 0x55a   :  { %2167 = vrot.lane.b32.xlu1 %v2126_v56, %s9440_s2  ;;  %v2146_v45 = vpop.f32.mrb[95].mxu0  ;;  %v10864_v56 = vpop.permute.xlu0 %9053 }
 0x55b   :  { %11864 = vst [vmem:[#allocation48_spill] sm:$0xff] %v10864_v56 }
 0x55e   :  { %2173 = vrot.lane.b32.xlu1 %v7557_v23, %s9440_s2  ;;  %v10868_v22 = vpop.permute.xlu0 %9063 }
 0x55f   :  { %11866 = vst [vmem:[#allocation50_spill] sm:$0xff] %v10868_v22 }
 0x562   :  { %2171 = vrot.lane.b32.xlu1 %v2136_v10, %s9440_s2  ;;  %v10876_v51 = vpop.permute.xlu0 %9073 }
 0x563   :  { %11868 = vst [vmem:[#allocation52_spill] sm:$0xff] %v10876_v51 }
 0x566   :  { %2177 = vrot.lane.b32.xlu1 %v7560_v4, %s9440_s2  ;;  %v10872_v4 = vpop.permute.xlu1 %4969 }
 0x567   :  { %11867 = vst [vmem:[#allocation51_spill] sm:$0xff] %v10872_v4 }
 0x56a   :  { %2175 = vrot.lane.b32.xlu1 %v2146_v45, %s9440_s2  ;;  %v10886_v42 = vpop.permute.xlu1 %4973 }
 0x56b   :  { %11869 = vst [vmem:[#allocation53_spill] sm:$0xff] %v10886_v42 }
 0x56d   :  { %v7579_v5 = vpop.f32.mrb[96].mxu0 }
 0x56e   :  { %v2366_v2 = vpop.f32.mrb[97].mxu0  ;;  %v2372_v39 = vadd.f32 %v7579_v5, %v10338_v18 }
 0x56f   :  { %v2367_v57 = vadd.f32 %v2366_v2, %v10341_v20 }
 0x570   :  { %v2406_v21 = vsel %vm211_vm0, %v2372_v39, -inf }
 0x571   :  { %v7582_v23 = vpop.f32.mrb[98].mxu0  ;;  %v2405_v5 = vsel %vm211_vm0, %v2367_v57, -inf }
 0x572   :  { %v2376_v10 = vpop.f32.mrb[99].mxu0  ;;  %v2382_v35 = vadd.f32 %v7582_v23, %v10351_v41 }
 0x573   :  { %v2377_v2 = vadd.f32 %v2376_v10, %v10353_v29 }
 0x574   :  { %v2408_v23 = vsel %vm211_vm0, %v2382_v35, -inf }
 0x575   :  { %v7585_v59 = vpop.f32.mrb[100].mxu0  ;;  %v2407_v62 = vsel %vm211_vm0, %v2377_v2, -inf }
 0x576   :  { %v2392_v54 = vadd.f32 %v7585_v59, %v10343_v25  ;;  %v2386_v45 = vpop.f32.mrb[101].mxu0 }
 0x577   :  { %v2387_v56 = vadd.f32 %v2386_v45, %v10348_v37 }
 0x578   :  { %v2411_v22 = vsel %vm211_vm0, %v2392_v54, -inf }
 0x579   :  { %v2412_v63 = vmax.f32 %v2406_v21, %v2411_v22  ;;  %v2409_v4 = vsel %vm211_vm0, %v2387_v56, -inf  ;;  %v7588_v40 = vpop.f32.mrb[102].mxu0  ;;  %v10892_v22 = vpop.permute.xlu0 %9083 }
 0x57a   :  { %v2410_v59 = vmax.f32 %v2405_v5, %v2409_v4  ;;  %v2402_v28 = vadd.f32 %v7588_v40, %v10359_v15  ;;  %v2396_v45 = vpop.f32.mrb[103].mxu0  ;;  %11870 = vst [vmem:[#allocation54_spill] sm:$0xff] %v10892_v22  ;;  %v10894_v40 = vpop.permute.xlu1 %4977 }
 0x57b   :  { %v2397_v51 = vadd.f32 %v2396_v45, %v10366_v24  ;;  %11871 = vst [vmem:[#allocation55_spill] sm:$0xff] %v10894_v40 }
 0x57c   :  { %v2417_v12 = vmax.f32 %v2410_v59, %v2412_v63  ;;  %v2415_v49 = vsel %vm211_vm0, %v2402_v28, -inf }
 0x57d   :  { %v2416_v10 = vmax.f32 %v2408_v23, %v2415_v49  ;;  %v2413_v21 = vsel %vm211_vm0, %v2397_v51, -inf  ;;  %v10896_v32 = vpop.permute.xlu0 %9093 }
 0x57e   :  { %v2414_v4 = vmax.f32 %v2407_v62, %v2413_v21  ;;  %11872 = vst [vmem:[#allocation56_spill] sm:$0xff] %v10896_v32  ;;  %v10900_v59 = vpop.permute.xlu1 %9048 }
 0x57f   :  { %11874 = vst [vmem:[#allocation58_spill] sm:$0xff] %v10900_v59 }
 0x580   :  { %v2418_v5 = vmax.f32 %v2414_v4, %v2416_v10 }
 0x581   :  { %v10898_v9 = vpop.permute.xlu0 %5853 }
 0x582   :  { %v2419_v45 = vmax.f32 %v2417_v12, %v2418_v5  ;;  %11873 = vst [vmem:[#allocation57_spill] sm:$0xff] %v10898_v9  ;;  %v10904_v27 = vpop.permute.xlu1 %9058 }
 0x584   :  { %v2420_v42 = vrot.slane %v2419_v45, 4 }
 0x585   :  { %v10902_v55 = vpop.permute.xlu0 %5857 }
 0x586   :  { %v2421_v63 = vmax.f32 %v2419_v45, %v2420_v42  ;;  %11875 = vst [vmem:[#allocation59_spill] sm:$0xff] %v10902_v55 }
 0x588   :  { %v2422_v53 = vrot.slane %v2421_v63, 2 }
 0x589   :  { %v10906_v62 = vpop.permute.xlu0 %5861 }
 0x58a   :  { %v2423_v49 = vmax.f32 %v2421_v63, %v2422_v53  ;;  %11876 = vst [vmem:[#allocation60_spill] sm:$0xff] %v10906_v62  ;;  %v10910_v63 = vpop.permute.xlu1 %9068 }
 0x58c   :  { %v2424_v23 = vrot.slane %v2423_v49, 1 }
 0x58d   :  { %v10908_v45 = vpop.permute.xlu0 %5865 }
 0x58e   :  { %v2425_v10 = vmax.f32 %v2423_v49, %v2424_v23  ;;  %11877 = vst [vmem:[#allocation61_spill] sm:$0xff] %v10908_v45 }
 0x590   :  { %v2426_v21 = vsub.f32 %v2367_v57, %v2425_v10  ;;  %v2427_v4 = vsub.f32 %v2372_v39, %v2425_v10  ;;  %v2428_v32 = vsub.f32 %v2377_v2, %v2425_v10  ;;  %v2429_v12 = vsub.f32 %v2382_v35, %v2425_v10 }
 0x591   :  { %v2430_v5 = vsub.f32 %v2387_v56, %v2425_v10  ;;  %v2431_v40 = vsub.f32 %v2392_v54, %v2425_v10  ;;  %v2432_v9 = vsub.f32 %v2397_v51, %v2425_v10  ;;  %v2433_v42 = vsub.f32 %v2402_v28, %v2425_v10  ;;  %v10912_v57 = vpop.permute.xlu0 %9103  ;;  %v10914_v51 = vpop.permute.xlu1 %9078 }
 0x592   :  { %v2434_v22 = vmul.f32 1.442695, %v2426_v21  ;;  %v2436_v59 = vmul.f32 1.442695, %v2427_v4  ;;  %v2438_v55 = vmul.f32 1.442695, %v2428_v32 }
 0x593   :  { %v2440_v53 = vmul.f32 1.442695, %v2429_v12  ;;  %v2442_v62 = vmul.f32 1.442695, %v2430_v5  ;;  %11878 = vst [vmem:[#allocation62_spill] sm:$0xff] %v10912_v57 }
 0x594   :  { %9176 = vpow2.f32 %v2434_v22  ;;  %v2444_v35 = vmul.f32 1.442695, %v2431_v40  ;;  %v2446_v54 = vmul.f32 1.442695, %v2432_v9  ;;  %v2448_v39 = vmul.f32 1.442695, %v2433_v42 }
 0x595   :  { %9178 = vpow2.f32 %v2436_v59  ;;  %v10916_v28 = vpop.permute.xlu0 %9113  ;;  %v10924_v22 = vpop.permute.xlu1 %9088 }
 0x596   :  { %9180 = vpow2.f32 %v2438_v55  ;;  %11879 = vst [vmem:[#allocation63_spill] sm:$0xff] %v10916_v28  ;;  %11880 = vst [vmem:[#allocation64_spill] sm:$0xff] %v10924_v22 }
 0x597   :  { %9182 = vpow2.f32 %v2440_v53 }
 0x598   :  { %9184 = vpow2.f32 %v2442_v62 }
 0x599   :  { %9186 = vpow2.f32 %v2444_v35  ;;  %v10930_v21 = vpop.permute.xlu1 %9098 }
 0x59a   :  { %9188 = vpow2.f32 %v2446_v54  ;;  %11881 = vst [vmem:[#allocation65_spill] sm:$0xff] %v10930_v21 }
 0x59b   :  { %9190 = vpow2.f32 %v2448_v39 }
 0x59d   :  { %v10935_v39 = vpop.permute.xlu1 %5855 }
 0x59e   :  { %v10918_v32 = vpop.eup %9176  ;;  %11882 = vst [vmem:[#allocation66_spill] sm:$0xff] %v10935_v39 }
 0x59f   :  { %v10920_v56 = vpop.eup %9178  ;;  %v2450_v55 = vsel %vm211_vm0, %v10918_v32, 0.0 }
 0x5a0   :  { %v9181_v2 = vpop.eup %9180  ;;  %v2451_v9 = vsel %vm211_vm0, %v10920_v56, 0.0  ;;  %v1696_v40 = vpop.permute.xlu0 %1695 }
 0x5a1   :  { %v9183_v59 = vpop.eup %9182  ;;  %v2452_v49 = vadd.f32 %v2451_v9, %v2450_v55  ;;  %1719 = vst.msk [vmem:[#allocation3 + $0x10] sm:$0xff] %vm1717_vm11, %v1696_v40  ;;  %v2453_v23 = vsel %vm211_vm0, %v9181_v2, 0.0  ;;  %v10940_v21 = vpop.permute.xlu1 %5859 }
 0x5a2   :  { %v9185_v62 = vpop.eup %9184  ;;  %v2455_v4 = vsel %vm211_vm0, %v9183_v59, 0.0  ;;  %11883 = vst [vmem:[#allocation67_spill] sm:$0xff] %v10940_v21 }
 0x5a3   :  { %v2454_v10 = vadd.f32 %v2453_v23, %v2452_v49  ;;  %v9187_v5 = vpop.eup %9186  ;;  %v2457_v53 = vsel %vm211_vm0, %v9185_v62, 0.0 }
 0x5a4   :  { %v1694_v12 = vpop.permute.xlu0 %1693  ;;  %v9189_v35 = vpop.eup %9188  ;;  %v2459_v55 = vsel %vm211_vm0, %v9187_v5, 0.0 }
 0x5a5   :  { %v2456_v42 = vadd.f32 %v2455_v4, %v2454_v10  ;;  %1718 = vst.msk [vmem:[#allocation3] sm:$0xff] %vm1717_vm11, %v1694_v12  ;;  %v9191_v40 = vpop.eup %9190  ;;  %v2461_v23 = vsel %vm211_vm0, %v9189_v35, 0.0 }
 0x5a6   :  { %v2463_v10 = vsel %vm211_vm0, %v9191_v40, 0.0 }
 0x5a7   :  { %v2458_v54 = vadd.f32 %v2457_v53, %v2456_v42  ;;  %v10944_v53 = vpop.permute.xlu1 %5863 }
 0x5a8   :  { %v1700_v9 = vpop.permute.xlu0 %1699  ;;  %11884 = vst [vmem:[#allocation68_spill] sm:$0xff] %v10944_v53 }
 0x5a9   :  { %v2460_v49 = vadd.f32 %v2459_v55, %v2458_v54  ;;  %1721 = vst.msk [vmem:[#allocation3 + $0x30] sm:$0xff] %vm1717_vm11, %v1700_v9 }
 0x5ab   :  { %v2462_v45 = vadd.f32 %v2461_v23, %v2460_v49  ;;  %v10947_v55 = vpop.permute.xlu1 %5867 }
 0x5ac   :  { %v1698_v4 = vpop.permute.xlu0 %1697  ;;  %11885 = vst [vmem:[#allocation69_spill] sm:$0xff] %v10947_v55 }
 0x5ad   :  { %v2464_v12 = vadd.f32 %v2463_v10, %v2462_v45  ;;  %1720 = vst.msk [vmem:[#allocation3 + $0x20] sm:$0xff] %vm1717_vm11, %v1698_v4 }
 0x5af   :  { %v2465_v42 = vrot.slane %v2464_v12, 4  ;;  %v10950_v21 = vpop.permute.xlu1 %9108 }
 0x5b0   :  { %v1704_v39 = vpop.permute.xlu0 %1703  ;;  %11886 = vst [vmem:[#allocation70_spill] sm:$0xff] %v10950_v21 }
 0x5b1   :  { %v2466_v22 = vadd.f32 %v2465_v42, %v2464_v12  ;;  %1723 = vst.msk [vmem:[#allocation3 + $0x50] sm:$0xff] %vm1717_vm11, %v1704_v39 }
 0x5b3   :  { %v2467_v54 = vrot.slane %v2466_v22, 2  ;;  %v10953_v4 = vpop.permute.xlu1 %9118  ;;  %v11944_v6 = vld [vmem:[#allocation69_spill] sm:$0xff] }
 0x5b4   :  { %v1702_v9 = vpop.permute.xlu0 %1701  ;;  %11887 = vst [vmem:[#allocation71_spill] sm:$0xff] %v10953_v4 }
 0x5b5   :  { %v2468_v49 = vadd.f32 %v2467_v54, %v2466_v22  ;;  %1722 = vst.msk [vmem:[#allocation3 + $0x40] sm:$0xff] %vm1717_vm11, %v1702_v9  ;;  %v8891_v54 = vunpack.i.h.bf16 %v10738_v8  ;;  %v8890_v9 = vunpack.i.l.bf16 %v10738_v8 }
 0x5b7   :  { %v2469_v23 = vrot.slane %v2468_v49, 1  ;;  %v8363_v28 = vpack.c.bf16 %v8891_v54, %v8890_v9  ;;  %v8936_v54 = vunpack.i.h.bf16 %v10752_v3  ;;  %v8935_v9 = vunpack.i.l.bf16 %v10752_v3  ;;  %v2687_v3 = vld [vmem:[#allocation2 + $0xd0] sm:$0xff] }
 0x5b8   :  { %v1708_v45 = vpop.permute.xlu0 %1707 }
 0x5b9   :  { %v2470_v10 = vadd.f32 %v2469_v23, %v2468_v49  ;;  %1725 = vst.msk [vmem:[#allocation3 + $0x70] sm:$0xff] %vm1717_vm11, %v1708_v45 }
 0x5bb   :  { %9192 = vrcp.f32 %v2470_v10 }
 0x5bc   :  { %v1706_v12 = vpop.permute.xlu0 %1705 }
 0x5bd   :  { %1724 = vst.msk [vmem:[#allocation3 + $0x60] sm:$0xff] %vm1717_vm11, %v1706_v12 }
 0x5c0   :  { %v2166_v39 = vpop.permute.xlu1 %2165 }
 0x5c1   :  { %2189 = vst.msk [vmem:[#allocation3 + $0x10] sm:$0xff] %vm2187_vm12, %v2166_v39 }
 0x5c4   :  { %v2164_v22 = vpop.permute.xlu1 %2163 }
 0x5c5   :  { %v9193_v42 = vpop.eup %9192  ;;  %2188 = vst.msk [vmem:[#allocation3] sm:$0xff] %vm2187_vm12, %v2164_v22  ;;  %v8930_v22 = vunpack.i.l.bf16 %v10770_v36 }
 0x5c6   :  { %v2472_v49 = vmul.f32 %v9193_v42, %v10918_v32  ;;  %v2473_v23 = vmul.f32 %v9193_v42, %v10920_v56  ;;  %v2474_v45 = vmul.f32 %v9193_v42, %v9181_v2  ;;  %v2475_v10 = vmul.f32 %v9193_v42, %v9183_v59 }
 0x5c7   :  { %v2476_v55 = vmul.f32 %v9193_v42, %v9185_v62  ;;  %v2477_v12 = vmul.f32 %v9193_v42, %v9187_v5  ;;  %v2478_v53 = vmul.f32 %v9193_v42, %v9189_v35  ;;  %v2479_v4 = vmul.f32 %v9193_v42, %v9191_v40  ;;  %v2682_v5 = vld [vmem:[#allocation2 + $0x8] sm:$0xff]  ;;  %v2683_v42 = vld [vmem:[#allocation2 + $0x30] sm:$0xff] }
 0x5c8   :  { %7605 = vmatprep.mubr.msk.f32.mxu1 %vm211_vm0, %v2472_v49  ;;  %v2170_v39 = vpop.permute.xlu1 %2169  ;;  %v8896_v32 = vunpack.i.h.bf16 %v10712_v31  ;;  %v8895_v56 = vunpack.i.l.bf16 %v10712_v31  ;;  %v8901_v31 = vunpack.i.h.bf16 %v10742_v19  ;;  %v8900_v62 = vunpack.i.l.bf16 %v10742_v19  ;;  %v2684_v49 = vld [vmem:[#allocation2 + $0x58] sm:$0xff] }
 0x5c9   :  { %7606 = vmatmul.mubr.msk.f32.vlgmr.msra.gmra.mrb[48].mxu1 %vm211_vm0, %v2473_v23  ;;  %2191 = vst.msk [vmem:[#allocation3 + $0x30] sm:$0xff] %vm2187_vm12, %v2170_v39  ;;  %v8926_v19 = vunpack.i.h.bf16 %v10748_v7  ;;  %v2685_v23 = vld [vmem:[#allocation2 + $0x80] sm:$0xff]  ;;  %v8946_v39 = vunpack.i.h.bf16 %v10756_v58 }
 0x5ca   :  { %8362 = vmatpush3.bf16.xpose.msk.msra.mxu1 %vm10047_vm2, %v10495_v38  ;;  %7608 = vmatprep.mubr.msk.f32.mxu1 %vm211_vm0, %v2474_v45  ;;  %v8369_v59 = vpack.c.bf16 %v8896_v32, %v8895_v56  ;;  %v8375_v40 = vpack.c.bf16 %v8901_v31, %v8900_v62  ;;  %v8941_v45 = vunpack.i.h.bf16 %v10774_v26  ;;  %v2688_v32 = vld [vmem:[#allocation2 + $0xf8] sm:$0xff] }
 0x5cb   :  { %8365 = vmatprep.subr.msk.bf16.mxu1 %vm10047_vm2, %v8363_v28 }
 0x5cc   :  { %v2168_v8 = vpop.permute.xlu1 %2167 }
 0x5cd   :  { %7609 = vmatmul.mubr.msk.f32.gmra.mrb[50].mxu1 %vm211_vm0, %v2475_v10  ;;  %2190 = vst.msk [vmem:[#allocation3 + $0x20] sm:$0xff] %vm2187_vm12, %v2168_v8  ;;  %v8940_v10 = vunpack.i.l.bf16 %v10774_v26  ;;  %v8945_v8 = vunpack.i.l.bf16 %v10756_v58  ;;  %v2689_v26 = vld [vmem:[#allocation2 + $0x120] sm:$0xff] }
 0x5ce   :  { %7611 = vmatprep.mubr.msk.f32.mxu1 %vm211_vm0, %v2476_v55 }
 0x5cf   :  { %v8433_v56 = vpack.c.bf16 %v8941_v45, %v8940_v10 }
 0x5d0   :  { %v2174_v2 = vpop.permute.xlu1 %2173 }
 0x5d1   :  { %7612 = vmatmul.mubr.msk.f32.gmra.mrb[52].mxu1 %vm211_vm0, %v2477_v12  ;;  %2193 = vst.msk [vmem:[#allocation3 + $0x50] sm:$0xff] %vm2187_vm12, %v2174_v2  ;;  %v8429_v12 = vpack.c.bf16 %v8936_v54, %v8935_v9  ;;  %v11012_v2 = vpack.c.bf16 %v8946_v39, %v8945_v8 }
 0x5d2   :  { %8368 = vmatpush3.bf16.xpose.msk.msra.mxu1 %vm10047_vm2, %v8363_v28  ;;  %7614 = vmatprep.mubr.msk.f32.mxu1 %vm211_vm0, %v2478_v53  ;;  %v8925_v53 = vunpack.i.l.bf16 %v10748_v7 }
 0x5d3   :  { %8371 = vmatprep.subr.msk.bf16.mxu1 %vm10047_vm2, %v8369_v59 }
 0x5d4   :  { %v2172_v38 = vpop.permute.xlu1 %2171  ;;  %v8421_v55 = vpack.c.bf16 %v8926_v19, %v8925_v53 }
 0x5d5   :  { %7615 = vmatmul.mubr.msk.f32.gmra.mrb[54].mxu1 %vm211_vm0, %v2479_v4  ;;  %2192 = vst.msk [vmem:[#allocation3 + $0x40] sm:$0xff] %vm2187_vm12, %v2172_v38  ;;  %v8931_v4 = vunpack.i.h.bf16 %v10770_v36  ;;  %v2686_v36 = vld [vmem:[#allocation2 + $0xa8] sm:$0xff] }
 0x5d6   :  { %7633 = vmatprep.mubr.msk.f32.mxu1 %vm882_vm1, %v2682_v5 }
 0x5d7   :  { %v8425_v7 = vpack.c.bf16 %v8931_v4, %v8930_v22 }
 0x5d8   :  { %v2178_v35 = vpop.permute.xlu1 %2177 }
 0x5d9   :  { %2195 = vst.msk [vmem:[#allocation3 + $0x70] sm:$0xff] %vm2187_vm12, %v2178_v35 }
 0x5da   :  { %8374 = vmatpush3.bf16.xpose.msk.msra.mxu1 %vm10047_vm2, %v8369_v59 }
 0x5db   :  { %8377 = vmatprep.subr.msk.bf16.mxu1 %vm10047_vm2, %v8375_v40 }
 0x5dc   :  { %v2176_v28 = vpop.permute.xlu1 %2175 }
 0x5dd   :  { %2194 = vst.msk [vmem:[#allocation3 + $0x60] sm:$0xff] %vm2187_vm12, %v2176_v28 }
 0x5e2   :  { %8380 = vmatpush3.bf16.xpose.msk.msra.mxu1 %vm10047_vm2, %v8375_v40 }
 0x5e3   :  { %8422 = vmatprep.subr.bf16.mxu1 %v8421_v55 }
 0x5e9   :  { %7634 = vmatmul.mubr.msk.f32.vlgmr.msra.gmra.mrb[56].mxu1 %vm882_vm1, %v2683_v42 }
 0x5ea   :  { %7636 = vmatprep.mubr.msk.f32.mxu1 %vm882_vm1, %v2684_v49  ;;  %8424 = vmatpush3.bf16.msra.mxu1 %v8421_v55 }
 0x5eb   :  { %8426 = vmatprep.subr.bf16.mxu1 %v8425_v7 }
 0x5ed   :  { %7637 = vmatmul.mubr.msk.f32.gmra.mrb[58].mxu1 %vm882_vm1, %v2685_v23 }
 0x5ee   :  { %7639 = vmatprep.mubr.msk.f32.mxu1 %vm882_vm1, %v2686_v36  ;;  %8428 = vmatpush3.bf16.msra.mxu1 %v8425_v7 }
 0x5ef   :  { %8430 = vmatprep.subr.bf16.mxu1 %v8429_v12 }
 0x5f1   :  { %7640 = vmatmul.mubr.msk.f32.gmra.mrb[60].mxu1 %vm882_vm1, %v2687_v3 }
 0x5f2   :  { %7642 = vmatprep.mubr.msk.f32.mxu1 %vm882_vm1, %v2688_v32  ;;  %8432 = vmatpush3.bf16.msra.mxu1 %v8429_v12 }
 0x5f3   :  { %8434 = vmatprep.subr.bf16.mxu1 %v8433_v56 }
 0x5f5   :  { %7643 = vmatmul.mubr.msk.f32.gmra.mrb[62].mxu1 %vm882_vm1, %v2689_v26 }
 0x5f6   :  { %8436 = vmatpush3.bf16.msra.mxu1 %v8433_v56 }
 0x5f7   :  { %8439 = vmatprep.subr.msk.bf16.mxu1 %vm10047_vm2, %v11012_v2 }
 0x69c   :  { %v7607_v59 = vpop.f32.mrb[48].mxu1 }
 0x69d   :  { %2651 = vrot.lane.b32.xlu1 %v7607_v59, %s9442_s28  ;;  %v2602_v58 = vpop.f32.mrb[49].mxu1 }
 0x6a0   :  { %v7610_v38 = vpop.f32.mrb[50].mxu1 }
 0x6a1   :  { %2649 = vrot.lane.b32.xlu1 %v2602_v58, %s9442_s28  ;;  %v2612_v31 = vpop.f32.mrb[51].mxu1 }
 0x6a4   :  { %v7613_v62 = vpop.f32.mrb[52].mxu1 }
 0x6a5   :  { %2655 = vrot.lane.b32.xlu1 %v7610_v38, %s9442_s28  ;;  %v2622_v5 = vpop.f32.mrb[53].mxu1 }
 0x6a8   :  { %v7616_v35 = vpop.f32.mrb[54].mxu1 }
 0x6a9   :  { %2653 = vrot.lane.b32.xlu1 %v2612_v31, %s9442_s28  ;;  %v2632_v40 = vpop.f32.mrb[55].mxu1 }
 0x6ad   :  { %2659 = vrot.lane.b32.xlu1 %v7613_v62, %s9442_s28 }
 0x6b1   :  { %2657 = vrot.lane.b32.xlu1 %v2622_v5, %s9442_s28 }
 0x6b5   :  { %2663 = vrot.lane.b32.xlu1 %v7616_v35, %s9442_s28 }
 0x6b9   :  { %2661 = vrot.lane.b32.xlu1 %v2632_v40, %s9442_s28 }
 0x6bc   :  { %v7635_v28 = vpop.f32.mrb[56].mxu1 }
 0x6bd   :  { %v2836_v19 = vpop.f32.mrb[57].mxu1  ;;  %v2842_v4 = vadd.f32 %v7635_v28, %v10338_v18 }
 0x6be   :  { %v2837_v22 = vadd.f32 %v2836_v19, %v10341_v20 }
 0x6bf   :  { %v2876_v7 = vsel %vm211_vm0, %v2842_v4, -inf }
 0x6c0   :  { %v7638_v53 = vpop.f32.mrb[58].mxu1  ;;  %v2875_v10 = vsel %vm211_vm0, %v2837_v22, -inf }
 0x6c1   :  { %v2846_v55 = vpop.f32.mrb[59].mxu1  ;;  %v2852_v23 = vadd.f32 %v7638_v53, %v10351_v41 }
 0x6c2   :  { %v2847_v36 = vadd.f32 %v2846_v55, %v10353_v29 }
 0x6c3   :  { %v2878_v59 = vsel %vm211_vm0, %v2852_v23, -inf }
 0x6c4   :  { %v7641_v42 = vpop.f32.mrb[60].mxu1  ;;  %v2877_v31 = vsel %vm211_vm0, %v2847_v36, -inf }
 0x6c5   :  { %v2862_v54 = vadd.f32 %v7641_v42, %v10343_v25  ;;  %v2856_v9 = vpop.f32.mrb[61].mxu1 }
 0x6c6   :  { %v2857_v49 = vadd.f32 %v2856_v9, %v10348_v37 }
 0x6c7   :  { %v2881_v45 = vsel %vm211_vm0, %v2862_v54, -inf }
 0x6c8   :  { %v2882_v12 = vmax.f32 %v2876_v7, %v2881_v45  ;;  %v2879_v3 = vsel %vm211_vm0, %v2857_v49, -inf  ;;  %v7644_v39 = vpop.f32.mrb[62].mxu1 }
 0x6c9   :  { %v2880_v8 = vmax.f32 %v2875_v10, %v2879_v3  ;;  %v2872_v32 = vadd.f32 %v7644_v39, %v10359_v15  ;;  %v2866_v56 = vpop.f32.mrb[63].mxu1 }
 0x6ca   :  { %v2867_v26 = vadd.f32 %v2866_v56, %v10366_v24 }
 0x6cb   :  { %v2887_v58 = vmax.f32 %v2880_v8, %v2882_v12  ;;  %v2885_v38 = vsel %vm211_vm0, %v2872_v32, -inf }
 0x6cc   :  { %v2886_v62 = vmax.f32 %v2878_v59, %v2885_v38  ;;  %v2883_v5 = vsel %vm211_vm0, %v2867_v26, -inf }
 0x6cd   :  { %v2884_v35 = vmax.f32 %v2877_v31, %v2883_v5 }
 0x6cf   :  { %v2888_v40 = vmax.f32 %v2884_v35, %v2886_v62 }
 0x6d1   :  { %v2889_v28 = vmax.f32 %v2887_v58, %v2888_v40 }
 0x6d3   :  { %v2890_v19 = vrot.slane %v2889_v28, 4 }
 0x6d5   :  { %v2891_v53 = vmax.f32 %v2889_v28, %v2890_v19 }
 0x6d7   :  { %v2892_v55 = vrot.slane %v2891_v53, 2 }
 0x6d9   :  { %v2893_v42 = vmax.f32 %v2891_v53, %v2892_v55 }
 0x6db   :  { %v2894_v9 = vrot.slane %v2893_v42, 1 }
 0x6dd   :  { %v2895_v7 = vmax.f32 %v2893_v42, %v2894_v9 }
 0x6df   :  { %v2896_v45 = vsub.f32 %v2837_v22, %v2895_v7  ;;  %v2897_v10 = vsub.f32 %v2842_v4, %v2895_v7  ;;  %v2898_v3 = vsub.f32 %v2847_v36, %v2895_v7  ;;  %v2899_v12 = vsub.f32 %v2852_v23, %v2895_v7 }
 0x6e0   :  { %v2900_v39 = vsub.f32 %v2857_v49, %v2895_v7  ;;  %v2901_v8 = vsub.f32 %v2862_v54, %v2895_v7  ;;  %v2902_v56 = vsub.f32 %v2867_v26, %v2895_v7  ;;  %v2903_v21 = vsub.f32 %v2872_v32, %v2895_v7 }
 0x6e1   :  { %v2904_v59 = vmul.f32 1.442695, %v2896_v45  ;;  %v2906_v38 = vmul.f32 1.442695, %v2897_v10  ;;  %v2908_v57 = vmul.f32 1.442695, %v2898_v3 }
 0x6e2   :  { %v2910_v31 = vmul.f32 1.442695, %v2899_v12  ;;  %v2912_v58 = vmul.f32 1.442695, %v2900_v39  ;;  %v2914_v62 = vmul.f32 1.442695, %v2901_v8 }
 0x6e3   :  { %9194 = vpow2.f32 %v2904_v59  ;;  %v2916_v5 = vmul.f32 1.442695, %v2902_v56  ;;  %v2918_v4 = vmul.f32 1.442695, %v2903_v21 }
 0x6e4   :  { %9196 = vpow2.f32 %v2906_v38 }
 0x6e5   :  { %9198 = vpow2.f32 %v2908_v57 }
 0x6e6   :  { %9200 = vpow2.f32 %v2910_v31 }
 0x6e7   :  { %9202 = vpow2.f32 %v2912_v58 }
 0x6e8   :  { %9204 = vpow2.f32 %v2914_v62 }
 0x6e9   :  { %9206 = vpow2.f32 %v2916_v5 }
 0x6ea   :  { %9208 = vpow2.f32 %v2918_v4 }
 0x6ed   :  { %v9195_v22 = vpop.eup %9194 }
 0x6ee   :  { %v9197_v49 = vpop.eup %9196  ;;  %v2920_v54 = vsel %vm211_vm0, %v9195_v22, 0.0 }
 0x6ef   :  { %v9199_v23 = vpop.eup %9198  ;;  %v2921_v36 = vsel %vm211_vm0, %v9197_v49, 0.0 }
 0x6f0   :  { %v9201_v32 = vpop.eup %9200  ;;  %v2922_v26 = vadd.f32 %v2921_v36, %v2920_v54  ;;  %v2923_v35 = vsel %vm211_vm0, %v9199_v23, 0.0  ;;  %v8911_v54 = vunpack.i.h.bf16 %v10746_v16  ;;  %v8910_v36 = vunpack.i.l.bf16 %v10746_v16 }
 0x6f1   :  { %v9203_v57 = vpop.eup %9202  ;;  %v2925_v28 = vsel %vm211_vm0, %v9201_v32, 0.0 }
 0x6f2   :  { %v2924_v40 = vadd.f32 %v2923_v35, %v2922_v26  ;;  %v9205_v19 = vpop.eup %9204  ;;  %v2927_v21 = vsel %vm211_vm0, %v9203_v57, 0.0 }
 0x6f3   :  { %v9207_v55 = vpop.eup %9206  ;;  %v2929_v9 = vsel %vm211_vm0, %v9205_v19, 0.0 }
 0x6f4   :  { %v2926_v53 = vadd.f32 %v2925_v28, %v2924_v40  ;;  %v9209_v7 = vpop.eup %9208  ;;  %v2931_v10 = vsel %vm211_vm0, %v9207_v55, 0.0 }
 0x6f5   :  { %v2933_v12 = vsel %vm211_vm0, %v9209_v7, 0.0 }
 0x6f6   :  { %v2928_v42 = vadd.f32 %v2927_v21, %v2926_v53 }
 0x6f8   :  { %v2930_v45 = vadd.f32 %v2929_v9, %v2928_v42 }
 0x6fa   :  { %v2932_v3 = vadd.f32 %v2931_v10, %v2930_v45  ;;  %v8403_v10 = vpack.c.bf16 %v8911_v54, %v8910_v36 }
 0x6fc   :  { %v2934_v39 = vadd.f32 %v2933_v12, %v2932_v3  ;;  %v3589_v3 = vld [vmem:[#allocation2 + $0x180] sm:$0xff] }
 0x6fe   :  { %v2935_v8 = vrot.slane %v2934_v39, 4 }
 0x700   :  { %v2936_v56 = vadd.f32 %v2935_v8, %v2934_v39  ;;  %v3591_v39 = vld [vmem:[#allocation2 + $0x1d0] sm:$0xff] }
 0x702   :  { %v2937_v59 = vrot.slane %v2936_v56, 2 }
 0x704   :  { %v2938_v38 = vadd.f32 %v2937_v59, %v2936_v56  ;;  %v3592_v56 = vld [vmem:[#allocation2 + $0x1f8] sm:$0xff]  ;;  %v3593_v59 = vld [vmem:[#allocation2 + $0x220] sm:$0xff] }
 0x706   :  { %v2939_v31 = vrot.slane %v2938_v38, 1 }
 0x708   :  { %v2940_v58 = vadd.f32 %v2939_v31, %v2938_v38  ;;  %v8469_v38 = vpack.c.bf16 %v3593_v59, %v3592_v56  ;;  %v3594_v31 = vld [vmem:[#allocation2 + $0x248] sm:$0xff] }
 0x70a   :  { %9210 = vrcp.f32 %v2940_v58  ;;  %v3595_v58 = vld [vmem:[#allocation2 + $0x270] sm:$0xff] }
 0x70f   :  { %v2652_v62 = vpop.permute.xlu1 %2651 }
 0x710   :  { %2675 = vst.msk [vmem:[#allocation3 + $0x10] sm:$0xff] %vm2673_vm13, %v2652_v62  ;;  %v8965_v62 = vunpack.i.l.bf16 %v10764_v17 }
 0x713   :  { %v2650_v5 = vpop.permute.xlu1 %2649 }
 0x714   :  { %v9211_v4 = vpop.eup %9210  ;;  %2674 = vst.msk [vmem:[#allocation3] sm:$0xff] %vm2673_vm13, %v2650_v5 }
 0x715   :  { %v2942_v26 = vmul.f32 %v9211_v4, %v9195_v22  ;;  %v2943_v35 = vmul.f32 %v9211_v4, %v9197_v49  ;;  %v2944_v40 = vmul.f32 %v9211_v4, %v9199_v23  ;;  %v2945_v28 = vmul.f32 %v9211_v4, %v9201_v32 }
 0x716   :  { %v2946_v53 = vmul.f32 %v9211_v4, %v9203_v57  ;;  %v2947_v21 = vmul.f32 %v9211_v4, %v9205_v19  ;;  %v2948_v42 = vmul.f32 %v9211_v4, %v9207_v55  ;;  %v2949_v9 = vmul.f32 %v9211_v4, %v9209_v7 }
 0x717   :  { %7661 = vmatprep.mubr.msk.f32.mxu0 %vm211_vm0, %v2942_v26  ;;  %v2656_v45 = vpop.permute.xlu1 %2655  ;;  %v8916_v22 = vunpack.i.h.bf16 %v10731_v60  ;;  %v8915_v49 = vunpack.i.l.bf16 %v10731_v60  ;;  %v8921_v60 = vunpack.i.h.bf16 %v10750_v50  ;;  %v8920_v57 = vunpack.i.l.bf16 %v10750_v50  ;;  %v3588_v50 = vld [vmem:[#allocation2 + $0x158] sm:$0xff] }
 0x718   :  { %7662 = vmatmul.mubr.msk.f32.vlgmr.msra.gmra.mrb[104].mxu0 %vm211_vm0, %v2943_v35  ;;  %2677 = vst.msk [vmem:[#allocation3 + $0x30] sm:$0xff] %vm2673_vm13, %v2656_v45  ;;  %v8461_v12 = vpack.c.bf16 %v3589_v3, %v3588_v50 }
 0x719   :  { %8402 = vmatpush3.bf16.xpose.msk.msra.mxu0 %vm10047_vm2, %v10724_v48  ;;  %7664 = vmatprep.mubr.msk.f32.mxu0 %vm211_vm0, %v2944_v40  ;;  %v8409_v32 = vpack.c.bf16 %v8916_v22, %v8915_v49  ;;  %v8415_v55 = vpack.c.bf16 %v8921_v60, %v8920_v57 }
 0x71a   :  { %8405 = vmatprep.subr.msk.bf16.mxu0 %vm10047_vm2, %v8403_v10 }
 0x71b   :  { %v2654_v16 = vpop.permute.xlu1 %2653 }
 0x71c   :  { %7665 = vmatmul.mubr.msk.f32.gmra.mrb[106].mxu0 %vm211_vm0, %v2945_v28  ;;  %2676 = vst.msk [vmem:[#allocation3 + $0x20] sm:$0xff] %vm2673_vm13, %v2654_v16 }
 0x71d   :  { %7667 = vmatprep.mubr.msk.f32.mxu0 %vm211_vm0, %v2946_v53 }
 0x71f   :  { %v2660_v23 = vpop.permute.xlu1 %2659 }
 0x720   :  { %7668 = vmatmul.mubr.msk.f32.gmra.mrb[108].mxu0 %vm211_vm0, %v2947_v21  ;;  %2679 = vst.msk [vmem:[#allocation3 + $0x50] sm:$0xff] %vm2673_vm13, %v2660_v23 }
 0x721   :  { %8408 = vmatpush3.bf16.xpose.msk.msra.mxu0 %vm10047_vm2, %v8403_v10  ;;  %7670 = vmatprep.mubr.msk.f32.mxu0 %vm211_vm0, %v2948_v42 }
 0x722   :  { %8411 = vmatprep.subr.msk.bf16.mxu0 %vm10047_vm2, %v8409_v32 }
 0x723   :  { %v2658_v48 = vpop.permute.xlu1 %2657 }
 0x724   :  { %7671 = vmatmul.mubr.msk.f32.gmra.mrb[110].mxu0 %vm211_vm0, %v2949_v9  ;;  %2678 = vst.msk [vmem:[#allocation3 + $0x40] sm:$0xff] %vm2673_vm13, %v2658_v48 }
 0x725   :  { %7689 = vmatprep.mubr.msk.f32.mxu0 %vm882_vm1, %v10734_v34  ;;  %v3590_v34 = vld [vmem:[#allocation2 + $0x1a8] sm:$0xff] }
 0x726   :  { %v8465_v8 = vpack.c.bf16 %v3591_v39, %v3590_v34 }
 0x727   :  { %v2664_v19 = vpop.permute.xlu1 %2663 }
 0x728   :  { %2681 = vst.msk [vmem:[#allocation3 + $0x70] sm:$0xff] %vm2673_vm13, %v2664_v19 }
 0x729   :  { %8414 = vmatpush3.bf16.xpose.msk.msra.mxu0 %vm10047_vm2, %v8409_v32 }
 0x72a   :  { %8417 = vmatprep.subr.msk.bf16.mxu0 %vm10047_vm2, %v8415_v55 }
 0x72b   :  { %v2662_v7 = vpop.permute.xlu1 %2661 }
 0x72c   :  { %2680 = vst.msk [vmem:[#allocation3 + $0x60] sm:$0xff] %vm2673_vm13, %v2662_v7 }
 0x731   :  { %8420 = vmatpush3.bf16.xpose.msk.msra.mxu0 %vm10047_vm2, %v8415_v55 }
 0x732   :  { %8462 = vmatprep.subr.bf16.mxu0 %v8461_v12 }
 0x738   :  { %7690 = vmatmul.mubr.msk.f32.vlgmr.msra.gmra.mrb[112].mxu0 %vm882_vm1, %v10754_v43  ;;  %v8966_v43 = vunpack.i.h.bf16 %v10764_v17 }
 0x739   :  { %7692 = vmatprep.mubr.msk.f32.mxu0 %vm882_vm1, %v10736_v52  ;;  %8464 = vmatpush3.bf16.msra.mxu0 %v8461_v12  ;;  %v8473_v52 = vpack.c.bf16 %v3595_v58, %v3594_v31 }
 0x73a   :  { %8466 = vmatprep.subr.bf16.mxu0 %v8465_v8 }
 0x73c   :  { %7693 = vmatmul.mubr.msk.f32.gmra.mrb[114].mxu0 %vm882_vm1, %v10758_v44  ;;  %v11103_v44 = vpack.c.bf16 %v8966_v43, %v8965_v62 }
 0x73d   :  { %7695 = vmatprep.mubr.msk.f32.mxu0 %vm882_vm1, %v10740_v14  ;;  %8468 = vmatpush3.bf16.msra.mxu0 %v8465_v8 }
 0x73e   :  { %8470 = vmatprep.subr.bf16.mxu0 %v8469_v38 }
 0x740   :  { %7696 = vmatmul.mubr.msk.f32.gmra.mrb[116].mxu0 %vm882_vm1, %v10762_v11 }
 0x741   :  { %7698 = vmatprep.mubr.msk.f32.mxu0 %vm882_vm1, %v10744_v30  ;;  %8472 = vmatpush3.bf16.msra.mxu0 %v8469_v38 }
 0x742   :  { %8474 = vmatprep.subr.bf16.mxu0 %v8473_v52 }
 0x744   :  { %7699 = vmatmul.mubr.msk.f32.gmra.mrb[118].mxu0 %vm882_vm1, %v10766_v13 }
 0x745   :  { %8476 = vmatpush3.bf16.msra.mxu0 %v8473_v52 }
 0x746   :  { %8479 = vmatprep.subr.msk.bf16.mxu0 %vm10047_vm2, %v11103_v44 }
 0x7eb   :  { %v7663_v14 = vpop.f32.mrb[104].mxu0 }
 0x7ec   :  { %3080 = vst.msk [vmem:[#allocation3 + $0x18] sm:$0xff] %vm882_vm1, %v7663_v14  ;;  %v3040_v11 = vpop.f32.mrb[105].mxu0 }
 0x7ed   :  { %3079 = vst.msk [vmem:[#allocation3 + $0x8] sm:$0xff] %vm882_vm1, %v3040_v11 }
 0x7ef   :  { %v7666_v17 = vpop.f32.mrb[106].mxu0 }
 0x7f0   :  { %3082 = vst.msk [vmem:[#allocation3 + $0x38] sm:$0xff] %vm882_vm1, %v7666_v17  ;;  %v3050_v30 = vpop.f32.mrb[107].mxu0 }
 0x7f1   :  { %3081 = vst.msk [vmem:[#allocation3 + $0x28] sm:$0xff] %vm882_vm1, %v3050_v30 }
 0x7f3   :  { %v7669_v5 = vpop.f32.mrb[108].mxu0 }
 0x7f4   :  { %3084 = vst.msk [vmem:[#allocation3 + $0x58] sm:$0xff] %vm882_vm1, %v7669_v5  ;;  %v3060_v13 = vpop.f32.mrb[109].mxu0 }
 0x7f5   :  { %3083 = vst.msk [vmem:[#allocation3 + $0x48] sm:$0xff] %vm882_vm1, %v3060_v13 }
 0x7f7   :  { %v7672_v4 = vpop.f32.mrb[110].mxu0 }
 0x7f8   :  { %3086 = vst.msk [vmem:[#allocation3 + $0x78] sm:$0xff] %vm882_vm1, %v7672_v4  ;;  %v3070_v54 = vpop.f32.mrb[111].mxu0 }
 0x7f9   :  { %3085 = vst.msk [vmem:[#allocation3 + $0x68] sm:$0xff] %vm882_vm1, %v3070_v54 }
 0x80b   :  { %v7691_v36 = vpop.f32.mrb[112].mxu0 }
 0x80c   :  { %v3257_v26 = vpop.f32.mrb[113].mxu0  ;;  %v3263_v28 = vadd.f32 %v7691_v36, %v10338_v18 }
 0x80d   :  { %v3258_v53 = vadd.f32 %v3257_v26, %v10341_v20 }
 0x80e   :  { %v3297_v10 = vsel %vm211_vm0, %v3263_v28, -inf }
 0x80f   :  { %v7694_v35 = vpop.f32.mrb[114].mxu0  ;;  %v3296_v49 = vsel %vm211_vm0, %v3258_v53, -inf }
 0x810   :  { %v3267_v40 = vpop.f32.mrb[115].mxu0  ;;  %v3273_v16 = vadd.f32 %v7694_v35, %v10351_v41 }
 0x811   :  { %v3268_v23 = vadd.f32 %v3267_v40, %v10353_v29 }
 0x812   :  { %v3299_v50 = vsel %vm211_vm0, %v3273_v16, -inf }
 0x813   :  { %v7697_v21 = vpop.f32.mrb[116].mxu0  ;;  %v3298_v34 = vsel %vm211_vm0, %v3268_v23, -inf }
 0x814   :  { %v3283_v42 = vadd.f32 %v7697_v21, %v10343_v25  ;;  %v3277_v9 = vpop.f32.mrb[117].mxu0 }
 0x815   :  { %v3278_v45 = vadd.f32 %v3277_v9, %v10348_v37 }
 0x816   :  { %v3302_v22 = vsel %vm211_vm0, %v3283_v42, -inf }
 0x817   :  { %v3303_v32 = vmax.f32 %v3297_v10, %v3302_v22  ;;  %v3300_v48 = vsel %vm211_vm0, %v3278_v45, -inf  ;;  %v7700_v60 = vpop.f32.mrb[118].mxu0 }
 0x818   :  { %v3301_v57 = vmax.f32 %v3296_v49, %v3300_v48  ;;  %v3293_v19 = vadd.f32 %v7700_v60, %v10359_v15  ;;  %v3287_v55 = vpop.f32.mrb[119].mxu0 }
 0x819   :  { %v3288_v7 = vadd.f32 %v3287_v55, %v10366_v24 }
 0x81a   :  { %v3308_v3 = vmax.f32 %v3301_v57, %v3303_v32  ;;  %v3306_v12 = vsel %vm211_vm0, %v3293_v19, -inf }
 0x81b   :  { %v3307_v39 = vmax.f32 %v3299_v50, %v3306_v12  ;;  %v3304_v8 = vsel %vm211_vm0, %v3288_v7, -inf }
 0x81c   :  { %v3305_v56 = vmax.f32 %v3298_v34, %v3304_v8 }
 0x81e   :  { %v3309_v59 = vmax.f32 %v3305_v56, %v3307_v39 }
 0x820   :  { %v3310_v38 = vmax.f32 %v3308_v3, %v3309_v59 }
 0x822   :  { %v3311_v31 = vrot.slane %v3310_v38, 4 }
 0x824   :  { %v3312_v58 = vmax.f32 %v3310_v38, %v3311_v31 }
 0x826   :  { %v3313_v43 = vrot.slane %v3312_v58, 2 }
 0x828   :  { %v3314_v62 = vmax.f32 %v3312_v58, %v3313_v43 }
 0x82a   :  { %v3315_v52 = vrot.slane %v3314_v62, 1 }
 0x82c   :  { %v3316_v14 = vmax.f32 %v3314_v62, %v3315_v52 }
 0x82e   :  { %v3317_v11 = vsub.f32 %v3258_v53, %v3316_v14  ;;  %v3318_v17 = vsub.f32 %v3263_v28, %v3316_v14  ;;  %v3319_v30 = vsub.f32 %v3268_v23, %v3316_v14  ;;  %v3320_v5 = vsub.f32 %v3273_v16, %v3316_v14 }
 0x82f   :  { %v3321_v13 = vsub.f32 %v3278_v45, %v3316_v14  ;;  %v3322_v4 = vsub.f32 %v3283_v42, %v3316_v14  ;;  %v3323_v54 = vsub.f32 %v3288_v7, %v3316_v14  ;;  %v3324_v36 = vsub.f32 %v3293_v19, %v3316_v14 }
 0x830   :  { %v3325_v26 = vmul.f32 1.442695, %v3317_v11  ;;  %v3327_v35 = vmul.f32 1.442695, %v3318_v17  ;;  %v3329_v40 = vmul.f32 1.442695, %v3319_v30  ;;  %v8951_v30 = vunpack.i.h.bf16 %v10778_v0 }
 0x831   :  { %v3331_v21 = vmul.f32 1.442695, %v3320_v5  ;;  %v3333_v9 = vmul.f32 1.442695, %v3321_v13  ;;  %v3335_v10 = vmul.f32 1.442695, %v3322_v4  ;;  %v8950_v5 = vunpack.i.l.bf16 %v10778_v0 }
 0x832   :  { %9212 = vpow2.f32 %v3325_v26  ;;  %v3337_v22 = vmul.f32 1.442695, %v3323_v54  ;;  %v3339_v28 = vmul.f32 1.442695, %v3324_v36  ;;  %v8956_v0 = vunpack.i.h.bf16 %v10760_v33 }
 0x833   :  { %9214 = vpow2.f32 %v3327_v35 }
 0x834   :  { %9216 = vpow2.f32 %v3329_v40 }
 0x835   :  { %9218 = vpow2.f32 %v3331_v21 }
 0x836   :  { %9220 = vpow2.f32 %v3333_v9  ;;  %v8443_v9 = vpack.c.bf16 %v8951_v30, %v8950_v5 }
 0x837   :  { %9222 = vpow2.f32 %v3335_v10  ;;  %v8955_v10 = vunpack.i.l.bf16 %v10760_v33  ;;  %v3572_v33 = vld [vmem:[#allocation2 + $0x140] sm:$0xff] }
 0x838   :  { %9224 = vpow2.f32 %v3337_v22 }
 0x839   :  { %9226 = vpow2.f32 %v3339_v28  ;;  %v8449_v22 = vpack.c.bf16 %v8956_v0, %v8955_v10  ;;  %v8960_v28 = vunpack.i.l.bf16 %v10782_v61 }
 0x83c   :  { %v9213_v53 = vpop.eup %9212 }
 0x83d   :  { %v9215_v45 = vpop.eup %9214  ;;  %v3341_v42 = vsel %vm211_vm0, %v9213_v53, 0.0 }
 0x83e   :  { %v9217_v16 = vpop.eup %9216  ;;  %v3342_v49 = vsel %vm211_vm0, %v9215_v45, 0.0 }
 0x83f   :  { %v9219_v23 = vpop.eup %9218  ;;  %v3343_v32 = vadd.f32 %v3342_v49, %v3341_v42  ;;  %v3344_v48 = vsel %vm211_vm0, %v9217_v16, 0.0  ;;  %v8985_v42 = vunpack.i.l.bf16 %v10788_v47  ;;  %v8990_v49 = vunpack.i.l.bf16 %v10812_v1 }
 0x840   :  { %v9221_v60 = vpop.eup %9220  ;;  %v3346_v19 = vsel %vm211_vm0, %v9219_v23, 0.0 }
 0x841   :  { %v3345_v57 = vadd.f32 %v3344_v48, %v3343_v32  ;;  %v9223_v55 = vpop.eup %9222  ;;  %v3348_v50 = vsel %vm211_vm0, %v9221_v60, 0.0  ;;  %v8996_v32 = vunpack.i.h.bf16 %v10792_v46  ;;  %v8995_v48 = vunpack.i.l.bf16 %v10792_v46  ;;  %v3577_v46 = vld [vmem:[#allocation2 + $0x208] sm:$0xff] }
 0x842   :  { %v9225_v3 = vpop.eup %9224  ;;  %v3350_v34 = vsel %vm211_vm0, %v9223_v55, 0.0 }
 0x843   :  { %v3347_v7 = vadd.f32 %v3346_v19, %v3345_v57  ;;  %v9227_v39 = vpop.eup %9226  ;;  %v3352_v56 = vsel %vm211_vm0, %v9225_v3, 0.0  ;;  %v11888_v19 = vld [vmem:[#allocation31_spill] sm:$0xff] }
 0x844   :  { %v3354_v38 = vsel %vm211_vm0, %v9227_v39, 0.0 }
 0x845   :  { %v3349_v12 = vadd.f32 %v3348_v50, %v3347_v7  ;;  %v9000_v7 = vunpack.i.l.bf16 %v11888_v19  ;;  %v8509_v50 = vpack.c.bf16 %v8996_v32, %v8995_v48 }
 0x847   :  { %v3351_v8 = vadd.f32 %v3350_v34, %v3349_v12  ;;  %v4470_v34 = vld [vmem:[#allocation2 + $0x150] sm:$0xff] }
 0x849   :  { %v3353_v59 = vadd.f32 %v3352_v56, %v3351_v8  ;;  %v3579_v8 = vld [vmem:[#allocation2 + $0x258] sm:$0xff] }
 0x84b   :  { %v3355_v31 = vadd.f32 %v3354_v38, %v3353_v59 }
 0x84d   :  { %v3356_v58 = vrot.slane %v3355_v31, 4 }
 0x84f   :  { %v3357_v43 = vadd.f32 %v3356_v58, %v3355_v31 }
 0x851   :  { %v3358_v62 = vrot.slane %v3357_v43, 2 }
 0x853   :  { %v3359_v52 = vadd.f32 %v3358_v62, %v3357_v43 }
 0x855   :  { %v3360_v14 = vrot.slane %v3359_v52, 1 }
 0x857   :  { %v3361_v11 = vadd.f32 %v3360_v14, %v3359_v52 }
 0x859   :  { %9228 = vrcp.f32 %v3361_v11 }
 0x863   :  { %v9229_v17 = vpop.eup %9228 }
 0x864   :  { %v3363_v13 = vmul.f32 %v9229_v17, %v9213_v53  ;;  %v3364_v4 = vmul.f32 %v9229_v17, %v9215_v45  ;;  %v3365_v54 = vmul.f32 %v9229_v17, %v9217_v16  ;;  %v3366_v36 = vmul.f32 %v9229_v17, %v9219_v23  ;;  %v3573_v23 = vld [vmem:[#allocation2 + $0x168] sm:$0xff] }
 0x865   :  { %v3367_v26 = vmul.f32 %v9229_v17, %v9221_v60  ;;  %v3368_v35 = vmul.f32 %v9229_v17, %v9223_v55  ;;  %v3369_v40 = vmul.f32 %v9229_v17, %v9225_v3  ;;  %v3370_v21 = vmul.f32 %v9229_v17, %v9227_v39  ;;  %v3574_v60 = vld [vmem:[#allocation2 + $0x190] sm:$0xff]  ;;  %v4471_v39 = vld [vmem:[#allocation2 + $0x178] sm:$0xff] }
 0x866   :  { %7717 = vmatprep.mubr.msk.f32.mxu1 %vm211_vm0, %v3363_v13  ;;  %v8986_v45 = vunpack.i.h.bf16 %v10788_v47  ;;  %v3575_v47 = vld [vmem:[#allocation2 + $0x1b8] sm:$0xff]  ;;  %v9001_v55 = vunpack.i.h.bf16 %v11888_v19  ;;  %v3578_v3 = vld [vmem:[#allocation2 + $0x230] sm:$0xff]  ;;  %v11187_v56 = vpack.c.bf16 %v4471_v39, %v4470_v34 }
 0x867   :  { %7718 = vmatmul.mubr.msk.f32.vlgmr.msra.gmra.mrb[64].mxu1 %vm211_vm0, %v3364_v4 }
 0x868   :  { %8442 = vmatpush3.bf16.xpose.msk.msra.mxu1 %vm10047_vm2, %v11012_v2  ;;  %7720 = vmatprep.mubr.msk.f32.mxu1 %vm211_vm0, %v3365_v54  ;;  %v8961_v2 = vunpack.i.h.bf16 %v10782_v61  ;;  %v8501_v16 = vpack.c.bf16 %v8986_v45, %v8985_v42  ;;  %v8991_v61 = vunpack.i.h.bf16 %v10812_v1  ;;  %v3576_v1 = vld [vmem:[#allocation2 + $0x1e0] sm:$0xff]  ;;  %v8513_v12 = vpack.c.bf16 %v9001_v55, %v9000_v7 }
 0x869   :  { %8445 = vmatprep.subr.msk.bf16.mxu1 %vm10047_vm2, %v8443_v9 }
 0x86a   :  { %v8455_v53 = vpack.c.bf16 %v8961_v2, %v8960_v28  ;;  %v8505_v57 = vpack.c.bf16 %v8991_v61, %v8990_v49 }
 0x86b   :  { %7721 = vmatmul.mubr.msk.f32.gmra.mrb[66].mxu1 %vm211_vm0, %v3366_v36 }
 0x86c   :  { %7723 = vmatprep.mubr.msk.f32.mxu1 %vm211_vm0, %v3367_v26 }
 0x86f   :  { %7724 = vmatmul.mubr.msk.f32.gmra.mrb[68].mxu1 %vm211_vm0, %v3368_v35 }
 0x870   :  { %8448 = vmatpush3.bf16.xpose.msk.msra.mxu1 %vm10047_vm2, %v8443_v9  ;;  %7726 = vmatprep.mubr.msk.f32.mxu1 %vm211_vm0, %v3369_v40 }
 0x871   :  { %8451 = vmatprep.subr.msk.bf16.mxu1 %vm10047_vm2, %v8449_v22 }
 0x873   :  { %7727 = vmatmul.mubr.msk.f32.gmra.mrb[70].mxu1 %vm211_vm0, %v3370_v21 }
 0x874   :  { %7745 = vmatprep.mubr.msk.f32.mxu1 %vm882_vm1, %v3572_v33 }
 0x878   :  { %8454 = vmatpush3.bf16.xpose.msk.msra.mxu1 %vm10047_vm2, %v8449_v22 }
 0x879   :  { %8457 = vmatprep.subr.msk.bf16.mxu1 %vm10047_vm2, %v8455_v53 }
 0x880   :  { %8460 = vmatpush3.bf16.xpose.msk.msra.mxu1 %vm10047_vm2, %v8455_v53 }
 0x881   :  { %8502 = vmatprep.subr.bf16.mxu1 %v8501_v16 }
 0x887   :  { %7746 = vmatmul.mubr.msk.f32.vlgmr.msra.gmra.mrb[72].mxu1 %vm882_vm1, %v3573_v23 }
 0x888   :  { %7748 = vmatprep.mubr.msk.f32.mxu1 %vm882_vm1, %v3574_v60  ;;  %8504 = vmatpush3.bf16.msra.mxu1 %v8501_v16 }
 0x889   :  { %8506 = vmatprep.subr.bf16.mxu1 %v8505_v57 }
 0x88b   :  { %7749 = vmatmul.mubr.msk.f32.gmra.mrb[74].mxu1 %vm882_vm1, %v3575_v47 }
 0x88c   :  { %7751 = vmatprep.mubr.msk.f32.mxu1 %vm882_vm1, %v3576_v1  ;;  %8508 = vmatpush3.bf16.msra.mxu1 %v8505_v57 }
 0x88d   :  { %8510 = vmatprep.subr.bf16.mxu1 %v8509_v50 }
 0x88f   :  { %7752 = vmatmul.mubr.msk.f32.gmra.mrb[76].mxu1 %vm882_vm1, %v3577_v46 }
 0x890   :  { %7754 = vmatprep.mubr.msk.f32.mxu1 %vm882_vm1, %v3578_v3  ;;  %8512 = vmatpush3.bf16.msra.mxu1 %v8509_v50 }
 0x891   :  { %8514 = vmatprep.subr.bf16.mxu1 %v8513_v12 }
 0x893   :  { %7755 = vmatmul.mubr.msk.f32.gmra.mrb[78].mxu1 %vm882_vm1, %v3579_v8 }
 0x894   :  { %8516 = vmatpush3.bf16.msra.mxu1 %v8513_v12 }
 0x895   :  { %8519 = vmatprep.subr.msk.bf16.mxu1 %vm10047_vm2, %v11187_v56 }
 0x93a   :  { %v7719_v59 = vpop.f32.mrb[64].mxu1 }
 0x93b   :  { %3542 = vrot.lane.b32.xlu0 %v7719_v59, %s9441_s27  ;;  %v3493_v38 = vpop.f32.mrb[65].mxu1 }
 0x93e   :  { %v7722_v31 = vpop.f32.mrb[66].mxu1 }
 0x93f   :  { %3540 = vrot.lane.b32.xlu0 %v3493_v38, %s9441_s27  ;;  %v3503_v58 = vpop.f32.mrb[67].mxu1 }
 0x942   :  { %v7725_v43 = vpop.f32.mrb[68].mxu1 }
 0x943   :  { %3546 = vrot.lane.b32.xlu0 %v7722_v31, %s9441_s27  ;;  %v3513_v62 = vpop.f32.mrb[69].mxu1 }
 0x946   :  { %v7728_v52 = vpop.f32.mrb[70].mxu1 }
 0x947   :  { %3544 = vrot.lane.b32.xlu0 %v3503_v58, %s9441_s27  ;;  %v3523_v14 = vpop.f32.mrb[71].mxu1 }
 0x94b   :  { %3550 = vrot.lane.b32.xlu0 %v7725_v43, %s9441_s27 }
 0x94f   :  { %3548 = vrot.lane.b32.xlu0 %v3513_v62, %s9441_s27 }
 0x953   :  { %3554 = vrot.lane.b32.xlu0 %v7728_v52, %s9441_s27 }
 0x957   :  { %3552 = vrot.lane.b32.xlu0 %v3523_v14, %s9441_s27 }
 0x95a   :  { %v7747_v11 = vpop.f32.mrb[72].mxu1 }
 0x95b   :  { %v3726_v17 = vpop.f32.mrb[73].mxu1  ;;  %v3732_v13 = vadd.f32 %v7747_v11, %v10338_v18 }
 0x95c   :  { %v3727_v4 = vadd.f32 %v3726_v17, %v10341_v20 }
 0x95d   :  { %v3766_v40 = vsel %vm211_vm0, %v3732_v13, -inf }
 0x95e   :  { %v7750_v30 = vpop.f32.mrb[74].mxu1  ;;  %v3765_v0 = vsel %vm211_vm0, %v3727_v4, -inf }
 0x95f   :  { %v3736_v5 = vpop.f32.mrb[75].mxu1  ;;  %v3742_v21 = vadd.f32 %v7750_v30, %v10351_v41 }
 0x960   :  { %v3737_v10 = vadd.f32 %v3736_v5, %v10353_v29 }
 0x961   :  { %v3768_v16 = vsel %vm211_vm0, %v3742_v21, -inf }
 0x962   :  { %v7753_v54 = vpop.f32.mrb[76].mxu1  ;;  %v3767_v23 = vsel %vm211_vm0, %v3737_v10, -inf }
 0x963   :  { %v3752_v36 = vadd.f32 %v7753_v54, %v10343_v25  ;;  %v3746_v26 = vpop.f32.mrb[77].mxu1 }
 0x964   :  { %v3747_v35 = vadd.f32 %v3746_v26, %v10348_v37 }
 0x965   :  { %v3771_v9 = vsel %vm211_vm0, %v3752_v36, -inf }
 0x966   :  { %v3772_v22 = vmax.f32 %v3766_v40, %v3771_v9  ;;  %v3769_v2 = vsel %vm211_vm0, %v3747_v35, -inf  ;;  %v7756_v28 = vpop.f32.mrb[78].mxu1 }
 0x967   :  { %v3770_v33 = vmax.f32 %v3765_v0, %v3769_v2  ;;  %v3762_v53 = vadd.f32 %v7756_v28, %v10359_v15  ;;  %v3756_v45 = vpop.f32.mrb[79].mxu1 }
 0x968   :  { %v3757_v42 = vadd.f32 %v3756_v45, %v10366_v24 }
 0x969   :  { %v3777_v61 = vmax.f32 %v3770_v33, %v3772_v22  ;;  %v3775_v49 = vsel %vm211_vm0, %v3762_v53, -inf }
 0x96a   :  { %v3776_v32 = vmax.f32 %v3768_v16, %v3775_v49  ;;  %v3773_v48 = vsel %vm211_vm0, %v3757_v42, -inf }
 0x96b   :  { %v3774_v60 = vmax.f32 %v3767_v23, %v3773_v48 }
 0x96d   :  { %v3778_v57 = vmax.f32 %v3774_v60, %v3776_v32 }
 0x96f   :  { %v3779_v47 = vmax.f32 %v3777_v61, %v3778_v57 }
 0x971   :  { %v3780_v19 = vrot.slane %v3779_v47, 4 }
 0x973   :  { %v3781_v55 = vmax.f32 %v3779_v47, %v3780_v19 }
 0x975   :  { %v3782_v7 = vrot.slane %v3781_v55, 2 }
 0x977   :  { %v3783_v1 = vmax.f32 %v3781_v55, %v3782_v7 }
 0x979   :  { %v3784_v50 = vrot.slane %v3783_v1, 1 }
 0x97b   :  { %v3785_v46 = vmax.f32 %v3783_v1, %v3784_v50  ;;  %v11889_v50 = vld [vmem:[#allocation20_spill] sm:$0xff] }
 0x97d   :  { %v3786_v3 = vsub.f32 %v3727_v4, %v3785_v46  ;;  %v3787_v12 = vsub.f32 %v3732_v13, %v3785_v46  ;;  %v3788_v34 = vsub.f32 %v3737_v10, %v3785_v46  ;;  %v3789_v39 = vsub.f32 %v3742_v21, %v3785_v46 }
 0x97e   :  { %v3790_v8 = vsub.f32 %v3747_v35, %v3785_v46  ;;  %v3791_v59 = vsub.f32 %v3752_v36, %v3785_v46  ;;  %v3792_v38 = vsub.f32 %v3757_v42, %v3785_v46  ;;  %v3793_v31 = vsub.f32 %v3762_v53, %v3785_v46 }
 0x97f   :  { %v3794_v58 = vmul.f32 1.442695, %v3786_v3  ;;  %v3796_v43 = vmul.f32 1.442695, %v3787_v12  ;;  %v3798_v62 = vmul.f32 1.442695, %v3788_v34  ;;  %v8971_v46 = vunpack.i.h.bf16 %v11889_v50 }
 0x980   :  { %v3800_v52 = vmul.f32 1.442695, %v3789_v39  ;;  %v3802_v14 = vmul.f32 1.442695, %v3790_v8  ;;  %v3804_v11 = vmul.f32 1.442695, %v3791_v59  ;;  %v8970_v3 = vunpack.i.l.bf16 %v11889_v50 }
 0x981   :  { %9230 = vpow2.f32 %v3794_v58  ;;  %v3806_v17 = vmul.f32 1.442695, %v3792_v38  ;;  %v3808_v30 = vmul.f32 1.442695, %v3793_v31  ;;  %v11903_v50 = vld [vmem:[#allocation19_spill] sm:$0xff] }
 0x982   :  { %9232 = vpow2.f32 %v3796_v43 }
 0x983   :  { %9234 = vpow2.f32 %v3798_v62  ;;  %v8483_v62 = vpack.c.bf16 %v8971_v46, %v8970_v3  ;;  %v11904_v3 = vld [vmem:[#allocation28_spill] sm:$0xff] }
 0x984   :  { %9236 = vpow2.f32 %v3800_v52 }
 0x985   :  { %9238 = vpow2.f32 %v3802_v14  ;;  %v11890_v14 = vld [vmem:[#allocation14_spill] sm:$0xff] }
 0x986   :  { %9240 = vpow2.f32 %v3804_v11  ;;  %v8976_v11 = vunpack.i.h.bf16 %v11890_v14 }
 0x987   :  { %9242 = vpow2.f32 %v3806_v17  ;;  %v8975_v17 = vunpack.i.l.bf16 %v11890_v14 }
 0x988   :  { %9244 = vpow2.f32 %v3808_v30 }
 0x98b   :  { %v9231_v5 = vpop.eup %9230 }
 0x98c   :  { %v9233_v13 = vpop.eup %9232  ;;  %v3810_v4 = vsel %vm211_vm0, %v9231_v5, 0.0 }
 0x98d   :  { %v9235_v54 = vpop.eup %9234  ;;  %v3811_v36 = vsel %vm211_vm0, %v9233_v13, 0.0 }
 0x98e   :  { %v9237_v26 = vpop.eup %9236  ;;  %v3812_v35 = vadd.f32 %v3811_v36, %v3810_v4  ;;  %v3813_v40 = vsel %vm211_vm0, %v9235_v54, 0.0  ;;  %v11892_v36 = vld [vmem:[#allocation15_spill] sm:$0xff] }
 0x98f   :  { %v9239_v21 = vpop.eup %9238  ;;  %v3815_v0 = vsel %vm211_vm0, %v9237_v26, 0.0 }
 0x990   :  { %v3814_v9 = vadd.f32 %v3813_v40, %v3812_v35  ;;  %v9241_v10 = vpop.eup %9240  ;;  %v3817_v2 = vsel %vm211_vm0, %v9239_v21, 0.0 }
 0x991   :  { %v9243_v28 = vpop.eup %9242  ;;  %v3819_v53 = vsel %vm211_vm0, %v9241_v10, 0.0 }
 0x992   :  { %v3816_v22 = vadd.f32 %v3815_v0, %v3814_v9  ;;  %v9245_v45 = vpop.eup %9244  ;;  %v3821_v16 = vsel %vm211_vm0, %v9243_v28, 0.0 }
 0x993   :  { %v3823_v49 = vsel %vm211_vm0, %v9245_v45, 0.0 }
 0x994   :  { %v3818_v33 = vadd.f32 %v3817_v2, %v3816_v22  ;;  %v11894_v22 = vld [vmem:[#allocation41_spill] sm:$0xff] }
 0x995   :  { %v9011_v2 = vunpack.i.h.bf16 %v11894_v22 }
 0x996   :  { %v3820_v42 = vadd.f32 %v3819_v53, %v3818_v33  ;;  %v11895_v33 = vld [vmem:[#allocation32_spill] sm:$0xff] }
 0x997   :  { %v9016_v53 = vunpack.i.h.bf16 %v11895_v33 }
 0x998   :  { %v3822_v61 = vadd.f32 %v3821_v16, %v3820_v42  ;;  %v11896_v42 = vld [vmem:[#allocation22_spill] sm:$0xff] }
 0x99a   :  { %v3824_v23 = vadd.f32 %v3823_v49, %v3822_v61  ;;  %v11897_v61 = vld [vmem:[#allocation17_spill] sm:$0xff]  ;;  %v11898_v49 = vld [vmem:[#allocation43_spill] sm:$0xff] }
 0x99c   :  { %v3825_v32 = vrot.slane %v3824_v23, 4 }
 0x99e   :  { %v3826_v48 = vadd.f32 %v3825_v32, %v3824_v23  ;;  %v9021_v23 = vunpack.i.h.bf16 %v11898_v49  ;;  %v9020_v32 = vunpack.i.l.bf16 %v11898_v49 }
 0x9a0   :  { %v3827_v60 = vrot.slane %v3826_v48, 2 }
 0x9a2   :  { %v3828_v57 = vadd.f32 %v3827_v60, %v3826_v48  ;;  %v11899_v48 = vld [vmem:[#allocation24_spill] sm:$0xff] }
 0x9a4   :  { %v3829_v47 = vrot.slane %v3828_v57, 1 }
 0x9a6   :  { %v3830_v19 = vadd.f32 %v3829_v47, %v3828_v57  ;;  %v11900_v57 = vld [vmem:[#allocation18_spill] sm:$0xff] }
 0x9a7   :  { %v11901_v47 = vld [vmem:[#allocation34_spill] sm:$0xff] }
 0x9a8   :  { %9246 = vrcp.f32 %v3830_v19  ;;  %v9026_v19 = vunpack.i.h.bf16 %v11901_v47 }
 0x9ad   :  { %v3543_v55 = vpop.permute.xlu0 %3542 }
 0x9ae   :  { %3565 = vst.msk [vmem:[#allocation3 + $0x18] sm:$0xff] %vm1717_vm11, %v3543_v55  ;;  %v9025_v55 = vunpack.i.l.bf16 %v11901_v47 }
 0x9b0   :  { %v11285_v46 = vpack.c.bf16 %v9026_v19, %v9025_v55 }
 0x9b1   :  { %v3541_v7 = vpop.permute.xlu0 %3540 }
 0x9b2   :  { %v9247_v1 = vpop.eup %9246  ;;  %3564 = vst.msk [vmem:[#allocation3 + $0x8] sm:$0xff] %vm1717_vm11, %v3541_v7  ;;  %v11902_v7 = vld [vmem:[#allocation26_spill] sm:$0xff] }
 0x9b3   :  { %v3832_v12 = vmul.f32 %v9247_v1, %v9231_v5  ;;  %v3833_v34 = vmul.f32 %v9247_v1, %v9233_v13  ;;  %v3834_v39 = vmul.f32 %v9247_v1, %v9235_v54  ;;  %v3835_v8 = vmul.f32 %v9247_v1, %v9237_v26  ;;  %v11891_v13 = vld [vmem:[#allocation21_spill] sm:$0xff] }
 0x9b4   :  { %v3836_v59 = vmul.f32 %v9247_v1, %v9239_v21  ;;  %v3837_v38 = vmul.f32 %v9247_v1, %v9241_v10  ;;  %v3838_v31 = vmul.f32 %v9247_v1, %v9243_v28  ;;  %v3839_v58 = vmul.f32 %v9247_v1, %v9245_v45  ;;  %v11893_v21 = vld [vmem:[#allocation30_spill] sm:$0xff] }
 0x9b5   :  { %7773 = vmatprep.mubr.msk.f32.mxu0 %vm211_vm0, %v3832_v12  ;;  %v3547_v43 = vpop.permute.xlu0 %3546  ;;  %v8489_v5 = vpack.c.bf16 %v8976_v11, %v8975_v17  ;;  %v8981_v4 = vunpack.i.h.bf16 %v11891_v13  ;;  %v8980_v54 = vunpack.i.l.bf16 %v11891_v13  ;;  %v9006_v9 = vunpack.i.h.bf16 %v11893_v21 }
 0x9b6   :  { %7774 = vmatmul.mubr.msk.f32.vlgmr.msra.gmra.mrb[120].mxu0 %vm211_vm0, %v3833_v34  ;;  %3567 = vst.msk [vmem:[#allocation3 + $0x38] sm:$0xff] %vm1717_vm11, %v3547_v43  ;;  %v9005_v0 = vunpack.i.l.bf16 %v11893_v21  ;;  %v9010_v28 = vunpack.i.l.bf16 %v11894_v22  ;;  %v9015_v45 = vunpack.i.l.bf16 %v11895_v33  ;;  %v8553_v1 = vpack.c.bf16 %v9021_v23, %v9020_v32 }
 0x9b7   :  { %8482 = vmatpush3.bf16.xpose.msk.msra.mxu0 %vm10047_vm2, %v11103_v44  ;;  %7776 = vmatprep.mubr.msk.f32.mxu0 %vm211_vm0, %v3834_v39  ;;  %v8495_v35 = vpack.c.bf16 %v8981_v4, %v8980_v54 }
 0x9b8   :  { %8485 = vmatprep.subr.msk.bf16.mxu0 %vm10047_vm2, %v8483_v62  ;;  %v8541_v10 = vpack.c.bf16 %v9006_v9, %v9005_v0  ;;  %v8545_v16 = vpack.c.bf16 %v9011_v2, %v9010_v28  ;;  %v8549_v60 = vpack.c.bf16 %v9016_v53, %v9015_v45 }
 0x9b9   :  { %v3545_v52 = vpop.permute.xlu0 %3544 }
 0x9ba   :  { %7777 = vmatmul.mubr.msk.f32.gmra.mrb[122].mxu0 %vm211_vm0, %v3835_v8  ;;  %3566 = vst.msk [vmem:[#allocation3 + $0x28] sm:$0xff] %vm1717_vm11, %v3545_v52 }
 0x9bb   :  { %7779 = vmatprep.mubr.msk.f32.mxu0 %vm211_vm0, %v3836_v59 }
 0x9bd   :  { %v3551_v30 = vpop.permute.xlu0 %3550 }
 0x9be   :  { %7780 = vmatmul.mubr.msk.f32.gmra.mrb[124].mxu0 %vm211_vm0, %v3837_v38  ;;  %3569 = vst.msk [vmem:[#allocation3 + $0x58] sm:$0xff] %vm1717_vm11, %v3551_v30 }
 0x9bf   :  { %8488 = vmatpush3.bf16.xpose.msk.msra.mxu0 %vm10047_vm2, %v8483_v62  ;;  %7782 = vmatprep.mubr.msk.f32.mxu0 %vm211_vm0, %v3838_v31 }
 0x9c0   :  { %8491 = vmatprep.subr.msk.bf16.mxu0 %vm10047_vm2, %v8489_v5 }
 0x9c1   :  { %v3549_v44 = vpop.permute.xlu0 %3548 }
 0x9c2   :  { %7783 = vmatmul.mubr.msk.f32.gmra.mrb[126].mxu0 %vm211_vm0, %v3839_v58  ;;  %3568 = vst.msk [vmem:[#allocation3 + $0x48] sm:$0xff] %vm1717_vm11, %v3549_v44 }
 0x9c3   :  { %7801 = vmatprep.mubr.msk.f32.mxu0 %vm882_vm1, %v11892_v36 }
 0x9c5   :  { %v3555_v26 = vpop.permute.xlu0 %3554 }
 0x9c6   :  { %3571 = vst.msk [vmem:[#allocation3 + $0x78] sm:$0xff] %vm1717_vm11, %v3555_v26 }
 0x9c7   :  { %8494 = vmatpush3.bf16.xpose.msk.msra.mxu0 %vm10047_vm2, %v8489_v5 }
 0x9c8   :  { %8497 = vmatprep.subr.msk.bf16.mxu0 %vm10047_vm2, %v8495_v35 }
 0x9c9   :  { %v3553_v40 = vpop.permute.xlu0 %3552 }
 0x9ca   :  { %3570 = vst.msk [vmem:[#allocation3 + $0x68] sm:$0xff] %vm1717_vm11, %v3553_v40 }
 0x9cf   :  { %8500 = vmatpush3.bf16.xpose.msk.msra.mxu0 %vm10047_vm2, %v8495_v35 }
 0x9d0   :  { %8542 = vmatprep.subr.bf16.mxu0 %v8541_v10 }
 0x9d6   :  { %7802 = vmatmul.mubr.msk.f32.vlgmr.msra.gmra.mrb[128].mxu0 %vm882_vm1, %v11896_v42 }
 0x9d7   :  { %7804 = vmatprep.mubr.msk.f32.mxu0 %vm882_vm1, %v11897_v61  ;;  %8544 = vmatpush3.bf16.msra.mxu0 %v8541_v10 }
 0x9d8   :  { %8546 = vmatprep.subr.bf16.mxu0 %v8545_v16 }
 0x9da   :  { %7805 = vmatmul.mubr.msk.f32.gmra.mrb[130].mxu0 %vm882_vm1, %v11899_v48 }
 0x9db   :  { %7807 = vmatprep.mubr.msk.f32.mxu0 %vm882_vm1, %v11900_v57  ;;  %8548 = vmatpush3.bf16.msra.mxu0 %v8545_v16 }
 0x9dc   :  { %8550 = vmatprep.subr.bf16.mxu0 %v8549_v60 }
 0x9de   :  { %7808 = vmatmul.mubr.msk.f32.gmra.mrb[132].mxu0 %vm882_vm1, %v11902_v7 }
 0x9df   :  { %7810 = vmatprep.mubr.msk.f32.mxu0 %vm882_vm1, %v11903_v50  ;;  %8552 = vmatpush3.bf16.msra.mxu0 %v8549_v60 }
 0x9e0   :  { %8554 = vmatprep.subr.bf16.mxu0 %v8553_v1 }
 0x9e2   :  { %7811 = vmatmul.mubr.msk.f32.gmra.mrb[134].mxu0 %vm882_vm1, %v11904_v3 }
 0x9e3   :  { %8556 = vmatpush3.bf16.msra.mxu0 %v8553_v1 }
 0x9e4   :  { %8559 = vmatprep.subr.msk.bf16.mxu0 %vm10047_vm2, %v11285_v46 }
 0xa89   :  { %v7775_v12 = vpop.f32.mrb[120].mxu0 }
 0xa8a   :  { %3970 = vst.msk [vmem:[#allocation3 + $0x90] sm:$0xff] %vm882_vm1, %v7775_v12  ;;  %v3930_v34 = vpop.f32.mrb[121].mxu0 }
 0xa8b   :  { %3969 = vst.msk [vmem:[#allocation3 + $0x80] sm:$0xff] %vm882_vm1, %v3930_v34 }
 0xa8d   :  { %v7778_v39 = vpop.f32.mrb[122].mxu0 }
 0xa8e   :  { %3972 = vst.msk [vmem:[#allocation3 + $0xb0] sm:$0xff] %vm882_vm1, %v7778_v39  ;;  %v3940_v8 = vpop.f32.mrb[123].mxu0 }
 0xa8f   :  { %3971 = vst.msk [vmem:[#allocation3 + $0xa0] sm:$0xff] %vm882_vm1, %v3940_v8 }
 0xa91   :  { %v7781_v59 = vpop.f32.mrb[124].mxu0 }
 0xa92   :  { %3974 = vst.msk [vmem:[#allocation3 + $0xd0] sm:$0xff] %vm882_vm1, %v7781_v59  ;;  %v3950_v38 = vpop.f32.mrb[125].mxu0 }
 0xa93   :  { %3973 = vst.msk [vmem:[#allocation3 + $0xc0] sm:$0xff] %vm882_vm1, %v3950_v38 }
 0xa95   :  { %v7784_v31 = vpop.f32.mrb[126].mxu0 }
 0xa96   :  { %3976 = vst.msk [vmem:[#allocation3 + $0xf0] sm:$0xff] %vm882_vm1, %v7784_v31  ;;  %v3960_v58 = vpop.f32.mrb[127].mxu0 }
 0xa97   :  { %3975 = vst.msk [vmem:[#allocation3 + $0xe0] sm:$0xff] %vm882_vm1, %v3960_v58 }
 0xaa9   :  { %v7803_v43 = vpop.f32.mrb[128].mxu0 }
 0xaaa   :  { %v4147_v62 = vpop.f32.mrb[129].mxu0  ;;  %v4153_v11 = vadd.f32 %v7803_v43, %v10338_v18 }
 0xaab   :  { %v4148_v17 = vadd.f32 %v4147_v62, %v10341_v20 }
 0xaac   :  { %v4187_v4 = vsel %vm211_vm0, %v4153_v11, -inf }
 0xaad   :  { %v7806_v52 = vpop.f32.mrb[130].mxu0  ;;  %v4186_v26 = vsel %vm211_vm0, %v4148_v17, -inf }
 0xaae   :  { %v4157_v14 = vpop.f32.mrb[131].mxu0  ;;  %v4163_v54 = vadd.f32 %v7806_v52, %v10351_v41 }
 0xaaf   :  { %v4158_v35 = vadd.f32 %v4157_v14, %v10353_v29 }
 0xab0   :  { %v4189_v28 = vsel %vm211_vm0, %v4163_v54, -inf }
 0xab1   :  { %v7809_v30 = vpop.f32.mrb[132].mxu0  ;;  %v4188_v45 = vsel %vm211_vm0, %v4158_v35, -inf }
 0xab2   :  { %v4173_v5 = vadd.f32 %v7809_v30, %v10343_v25  ;;  %v4167_v44 = vpop.f32.mrb[133].mxu0 }
 0xab3   :  { %v4168_v13 = vadd.f32 %v4167_v44, %v10348_v37 }
 0xab4   :  { %v4192_v36 = vsel %vm211_vm0, %v4173_v5, -inf }
 0xab5   :  { %v4193_v40 = vmax.f32 %v4187_v4, %v4192_v36  ;;  %v4190_v21 = vsel %vm211_vm0, %v4168_v13, -inf  ;;  %v7812_v9 = vpop.f32.mrb[134].mxu0 }
 0xab6   :  { %v4191_v0 = vmax.f32 %v4186_v26, %v4190_v21  ;;  %v4183_v10 = vadd.f32 %v7812_v9, %v10359_v15  ;;  %v4177_v22 = vpop.f32.mrb[135].mxu0 }
 0xab7   :  { %v4178_v2 = vadd.f32 %v4177_v22, %v10366_v24 }
 0xab8   :  { %v4198_v33 = vmax.f32 %v4191_v0, %v4193_v40  ;;  %v4196_v53 = vsel %vm211_vm0, %v4183_v10, -inf }
 0xab9   :  { %v4197_v42 = vmax.f32 %v4189_v28, %v4196_v53  ;;  %v4194_v16 = vsel %vm211_vm0, %v4178_v2, -inf }
 0xaba   :  { %v4195_v61 = vmax.f32 %v4188_v45, %v4194_v16 }
 0xabc   :  { %v4199_v49 = vmax.f32 %v4195_v61, %v4197_v42 }
 0xabe   :  { %v4200_v23 = vmax.f32 %v4198_v33, %v4199_v49 }
 0xac0   :  { %v4201_v32 = vrot.slane %v4200_v23, 4 }
 0xac2   :  { %v4202_v48 = vmax.f32 %v4200_v23, %v4201_v32 }
 0xac4   :  { %v4203_v60 = vrot.slane %v4202_v48, 2 }
 0xac6   :  { %v4204_v57 = vmax.f32 %v4202_v48, %v4203_v60 }
 0xac8   :  { %v4205_v47 = vrot.slane %v4204_v57, 1 }
 0xaca   :  { %v4206_v19 = vmax.f32 %v4204_v57, %v4205_v47 }
 0xacc   :  { %v4207_v55 = vsub.f32 %v4148_v17, %v4206_v19  ;;  %v4208_v7 = vsub.f32 %v4153_v11, %v4206_v19  ;;  %v4209_v1 = vsub.f32 %v4158_v35, %v4206_v19  ;;  %v4210_v50 = vsub.f32 %v4163_v54, %v4206_v19 }
 0xacd   :  { %v4211_v3 = vsub.f32 %v4168_v13, %v4206_v19  ;;  %v4212_v12 = vsub.f32 %v4173_v5, %v4206_v19  ;;  %v4213_v34 = vsub.f32 %v4178_v2, %v4206_v19  ;;  %v4214_v39 = vsub.f32 %v4183_v10, %v4206_v19  ;;  %v4472_v19 = vld [vmem:[#allocation2 + $0x1a0] sm:$0xff] }
 0xace   :  { %v4215_v8 = vmul.f32 1.442695, %v4207_v55  ;;  %v4217_v59 = vmul.f32 1.442695, %v4208_v7  ;;  %v4219_v38 = vmul.f32 1.442695, %v4209_v1 }
 0xacf   :  { %v4221_v31 = vmul.f32 1.442695, %v4210_v50  ;;  %v4223_v58 = vmul.f32 1.442695, %v4211_v3  ;;  %v4225_v43 = vmul.f32 1.442695, %v4212_v12 }
 0xad0   :  { %9248 = vpow2.f32 %v4215_v8  ;;  %v4227_v62 = vmul.f32 1.442695, %v4213_v34  ;;  %v4229_v52 = vmul.f32 1.442695, %v4214_v39  ;;  %v4473_v55 = vld [vmem:[#allocation2 + $0x1c8] sm:$0xff]  ;;  %v4474_v39 = vld [vmem:[#allocation2 + $0x1f0] sm:$0xff] }
 0xad1   :  { %9250 = vpow2.f32 %v4217_v59  ;;  %v8523_v34 = vpack.c.bf16 %v4473_v55, %v4472_v19  ;;  %v4475_v8 = vld [vmem:[#allocation2 + $0x218] sm:$0xff] }
 0xad2   :  { %9252 = vpow2.f32 %v4219_v38  ;;  %v8529_v59 = vpack.c.bf16 %v4475_v8, %v4474_v39  ;;  %v4476_v38 = vld [vmem:[#allocation2 + $0x240] sm:$0xff] }
 0xad3   :  { %9254 = vpow2.f32 %v4221_v31  ;;  %v4477_v31 = vld [vmem:[#allocation2 + $0x268] sm:$0xff] }
 0xad4   :  { %9256 = vpow2.f32 %v4223_v58  ;;  %v8535_v58 = vpack.c.bf16 %v4477_v31, %v4476_v38 }
 0xad5   :  { %9258 = vpow2.f32 %v4225_v43  ;;  %v11906_v43 = vld [vmem:[#allocation46_spill] sm:$0xff] }
 0xad6   :  { %9260 = vpow2.f32 %v4227_v62  ;;  %v9046_v62 = vunpack.i.h.bf16 %v11906_v43 }
 0xad7   :  { %9262 = vpow2.f32 %v4229_v52  ;;  %v9045_v52 = vunpack.i.l.bf16 %v11906_v43 }
 0xada   :  { %v9249_v14 = vpop.eup %9248 }
 0xadb   :  { %v9251_v11 = vpop.eup %9250  ;;  %v4231_v17 = vsel %vm211_vm0, %v9249_v14, 0.0 }
 0xadc   :  { %v9253_v30 = vpop.eup %9252  ;;  %v4232_v5 = vsel %vm211_vm0, %v9251_v11, 0.0 }
 0xadd   :  { %v9255_v44 = vpop.eup %9254  ;;  %v4233_v13 = vadd.f32 %v4232_v5, %v4231_v17  ;;  %v4234_v4 = vsel %vm211_vm0, %v9253_v30, 0.0  ;;  %v11908_v5 = vld [vmem:[#allocation48_spill] sm:$0xff] }
 0xade   :  { %v9257_v54 = vpop.eup %9256  ;;  %v4236_v26 = vsel %vm211_vm0, %v9255_v44, 0.0 }
 0xadf   :  { %v4235_v36 = vadd.f32 %v4234_v4, %v4233_v13  ;;  %v9259_v35 = vpop.eup %9258  ;;  %v4238_v21 = vsel %vm211_vm0, %v9257_v54, 0.0  ;;  %v9055_v13 = vunpack.i.l.bf16 %v11908_v5 }
 0xae0   :  { %v9261_v9 = vpop.eup %9260  ;;  %v4240_v10 = vsel %vm211_vm0, %v9259_v35, 0.0 }
 0xae1   :  { %v4237_v40 = vadd.f32 %v4236_v26, %v4235_v36  ;;  %v9263_v22 = vpop.eup %9262  ;;  %v4242_v28 = vsel %vm211_vm0, %v9261_v9, 0.0  ;;  %v11910_v36 = vld [vmem:[#allocation25_spill] sm:$0xff] }
 0xae2   :  { %v4244_v53 = vsel %vm211_vm0, %v9263_v22, 0.0 }
 0xae3   :  { %v4239_v0 = vadd.f32 %v4238_v21, %v4237_v40  ;;  %v9060_v40 = vunpack.i.l.bf16 %v10904_v27  ;;  %v11911_v21 = vld [vmem:[#allocation35_spill] sm:$0xff] }
 0xae5   :  { %v4241_v2 = vadd.f32 %v4240_v10, %v4239_v0  ;;  %v11913_v0 = vld [vmem:[#allocation50_spill] sm:$0xff] }
 0xae6   :  { %v9066_v10 = vunpack.i.h.bf16 %v11913_v0 }
 0xae7   :  { %v4243_v33 = vadd.f32 %v4242_v28, %v4241_v2  ;;  %v11914_v28 = vld [vmem:[#allocation37_spill] sm:$0xff] }
 0xae9   :  { %v4245_v45 = vadd.f32 %v4244_v53, %v4243_v33  ;;  %v11915_v33 = vld [vmem:[#allocation29_spill] sm:$0xff]  ;;  %v11916_v53 = vld [vmem:[#allocation39_spill] sm:$0xff] }
 0xaeb   :  { %v4246_v42 = vrot.slane %v4245_v45, 4 }
 0xaed   :  { %v4247_v16 = vadd.f32 %v4246_v42, %v4245_v45 }
 0xaef   :  { %v4248_v61 = vrot.slane %v4247_v16, 2 }
 0xaf1   :  { %v4249_v49 = vadd.f32 %v4248_v61, %v4247_v16 }
 0xaf3   :  { %v4250_v23 = vrot.slane %v4249_v49, 1 }
 0xaf5   :  { %v4251_v32 = vadd.f32 %v4250_v23, %v4249_v49 }
 0xaf7   :  { %9264 = vrcp.f32 %v4251_v32 }
 0xb01   :  { %v9265_v48 = vpop.eup %9264 }
 0xb02   :  { %v4253_v60 = vmul.f32 %v9265_v48, %v9249_v14  ;;  %v4254_v57 = vmul.f32 %v9265_v48, %v9251_v11  ;;  %v4255_v47 = vmul.f32 %v9265_v48, %v9253_v30  ;;  %v4256_v7 = vmul.f32 %v9265_v48, %v9255_v44  ;;  %v11907_v11 = vld [vmem:[#allocation58_spill] sm:$0xff] }
 0xb03   :  { %v4257_v1 = vmul.f32 %v9265_v48, %v9257_v54  ;;  %v4258_v50 = vmul.f32 %v9265_v48, %v9259_v35  ;;  %v4259_v3 = vmul.f32 %v9265_v48, %v9261_v9  ;;  %v4260_v12 = vmul.f32 %v9265_v48, %v9263_v22  ;;  %v11909_v54 = vld [vmem:[#allocation33_spill] sm:$0xff]  ;;  %v11912_v9 = vld [vmem:[#allocation27_spill] sm:$0xff] }
 0xb04   :  { %7829 = vmatprep.mubr.msk.f32.mxu1 %vm211_vm0, %v4253_v60  ;;  %v8581_v14 = vpack.c.bf16 %v9046_v62, %v9045_v52  ;;  %v9051_v17 = vunpack.i.h.bf16 %v11907_v11  ;;  %v9050_v30 = vunpack.i.l.bf16 %v11907_v11  ;;  %v9056_v44 = vunpack.i.h.bf16 %v11908_v5 }
 0xb05   :  { %7830 = vmatmul.mubr.msk.f32.vlgmr.msra.gmra.mrb[80].mxu1 %vm211_vm0, %v4254_v57  ;;  %v9061_v35 = vunpack.i.h.bf16 %v10904_v27  ;;  %v9065_v22 = vunpack.i.l.bf16 %v11913_v0 }
 0xb06   :  { %8522 = vmatpush3.bf16.xpose.msk.msra.mxu1 %vm10047_vm2, %v11187_v56  ;;  %7832 = vmatprep.mubr.msk.f32.mxu1 %vm211_vm0, %v4255_v47  ;;  %v11905_v56 = vld [vmem:[#allocation23_spill] sm:$0xff]  ;;  %v8585_v4 = vpack.c.bf16 %v9051_v17, %v9050_v30  ;;  %v8589_v26 = vpack.c.bf16 %v9056_v44, %v9055_v13 }
 0xb07   :  { %8525 = vmatprep.subr.msk.bf16.mxu1 %vm10047_vm2, %v8523_v34  ;;  %v8593_v2 = vpack.c.bf16 %v9061_v35, %v9060_v40  ;;  %v11371_v27 = vpack.c.bf16 %v9066_v10, %v9065_v22 }
 0xb09   :  { %7833 = vmatmul.mubr.msk.f32.gmra.mrb[82].mxu1 %vm211_vm0, %v4256_v7 }
 0xb0a   :  { %7835 = vmatprep.mubr.msk.f32.mxu1 %vm211_vm0, %v4257_v1 }
 0xb0d   :  { %7836 = vmatmul.mubr.msk.f32.gmra.mrb[84].mxu1 %vm211_vm0, %v4258_v50 }
 0xb0e   :  { %8528 = vmatpush3.bf16.xpose.msk.msra.mxu1 %vm10047_vm2, %v8523_v34  ;;  %7838 = vmatprep.mubr.msk.f32.mxu1 %vm211_vm0, %v4259_v3 }
 0xb0f   :  { %8531 = vmatprep.subr.msk.bf16.mxu1 %vm10047_vm2, %v8529_v59 }
 0xb11   :  { %7839 = vmatmul.mubr.msk.f32.gmra.mrb[86].mxu1 %vm211_vm0, %v4260_v12 }
 0xb12   :  { %7857 = vmatprep.mubr.msk.f32.mxu1 %vm882_vm1, %v11905_v56 }
 0xb16   :  { %8534 = vmatpush3.bf16.xpose.msk.msra.mxu1 %vm10047_vm2, %v8529_v59 }
 0xb17   :  { %8537 = vmatprep.subr.msk.bf16.mxu1 %vm10047_vm2, %v8535_v58 }
 0xb1e   :  { %8540 = vmatpush3.bf16.xpose.msk.msra.mxu1 %vm10047_vm2, %v8535_v58 }
 0xb1f   :  { %8582 = vmatprep.subr.bf16.mxu1 %v8581_v14 }
 0xb25   :  { %7858 = vmatmul.mubr.msk.f32.vlgmr.msra.gmra.mrb[88].mxu1 %vm882_vm1, %v11909_v54 }
 0xb26   :  { %7860 = vmatprep.mubr.msk.f32.mxu1 %vm882_vm1, %v11910_v36  ;;  %8584 = vmatpush3.bf16.msra.mxu1 %v8581_v14 }
 0xb27   :  { %8586 = vmatprep.subr.bf16.mxu1 %v8585_v4 }
 0xb29   :  { %7861 = vmatmul.mubr.msk.f32.gmra.mrb[90].mxu1 %vm882_vm1, %v11911_v21 }
 0xb2a   :  { %7863 = vmatprep.mubr.msk.f32.mxu1 %vm882_vm1, %v11912_v9  ;;  %8588 = vmatpush3.bf16.msra.mxu1 %v8585_v4 }
 0xb2b   :  { %8590 = vmatprep.subr.bf16.mxu1 %v8589_v26 }
 0xb2d   :  { %7864 = vmatmul.mubr.msk.f32.gmra.mrb[92].mxu1 %vm882_vm1, %v11914_v28 }
 0xb2e   :  { %7866 = vmatprep.mubr.msk.f32.mxu1 %vm882_vm1, %v11915_v33  ;;  %8592 = vmatpush3.bf16.msra.mxu1 %v8589_v26 }
 0xb2f   :  { %8594 = vmatprep.subr.bf16.mxu1 %v8593_v2 }
 0xb31   :  { %7867 = vmatmul.mubr.msk.f32.gmra.mrb[94].mxu1 %vm882_vm1, %v11916_v53 }
 0xb32   :  { %8596 = vmatpush3.bf16.msra.mxu1 %v8593_v2 }
 0xb33   :  { %8599 = vmatprep.subr.msk.bf16.mxu1 %vm10047_vm2, %v11371_v27 }
 0xbd8   :  { %v7831_v45 = vpop.f32.mrb[80].mxu1 }
 0xbd9   :  { %4432 = vrot.lane.b32.xlu0 %v7831_v45, %s9441_s27  ;;  %v4383_v42 = vpop.f32.mrb[81].mxu1 }
 0xbdc   :  { %v7834_v16 = vpop.f32.mrb[82].mxu1 }
 0xbdd   :  { %4430 = vrot.lane.b32.xlu0 %v4383_v42, %s9441_s27  ;;  %v4393_v61 = vpop.f32.mrb[83].mxu1 }
 0xbe0   :  { %v7837_v49 = vpop.f32.mrb[84].mxu1 }
 0xbe1   :  { %4436 = vrot.lane.b32.xlu0 %v7834_v16, %s9441_s27  ;;  %v4403_v23 = vpop.f32.mrb[85].mxu1 }
 0xbe4   :  { %v11381_v32 = vpop.f32.mrb[86].mxu1 }
 0xbe5   :  { %4434 = vrot.lane.b32.xlu0 %v4393_v61, %s9441_s27  ;;  %v4413_v48 = vpop.f32.mrb[87].mxu1 }
 0xbe9   :  { %4440 = vrot.lane.b32.xlu0 %v7837_v49, %s9441_s27 }
 0xbed   :  { %4438 = vrot.lane.b32.xlu0 %v4403_v23, %s9441_s27 }
 0xbf1   :  { %4442 = vrot.lane.b32.xlu0 %v4413_v48, %s9441_s27 }
 0xbf8   :  { %v7859_v60 = vpop.f32.mrb[88].mxu1 }
 0xbf9   :  { %v4616_v57 = vpop.f32.mrb[89].mxu1  ;;  %v4622_v55 = vadd.f32 %v7859_v60, %v10338_v18 }
 0xbfa   :  { %v4617_v7 = vadd.f32 %v4616_v57, %v10341_v20 }
 0xbfb   :  { %v4656_v34 = vsel %vm211_vm0, %v4622_v55, -inf }
 0xbfc   :  { %v7862_v47 = vpop.f32.mrb[90].mxu1  ;;  %v4655_v59 = vsel %vm211_vm0, %v4617_v7, -inf }
 0xbfd   :  { %v4626_v19 = vpop.f32.mrb[91].mxu1  ;;  %v4632_v39 = vadd.f32 %v7862_v47, %v10351_v41 }
 0xbfe   :  { %v4627_v56 = vadd.f32 %v4626_v19, %v10353_v29 }
 0xbff   :  { %v4658_v11 = vsel %vm211_vm0, %v4632_v39, -inf }
 0xc00   :  { %v7865_v1 = vpop.f32.mrb[92].mxu1  ;;  %v4657_v5 = vsel %vm211_vm0, %v4627_v56, -inf }
 0xc01   :  { %v4642_v50 = vadd.f32 %v7865_v1, %v10343_v25  ;;  %v4636_v3 = vpop.f32.mrb[93].mxu1 }
 0xc02   :  { %v4637_v12 = vadd.f32 %v4636_v3, %v10348_v37 }
 0xc03   :  { %v4661_v8 = vsel %vm211_vm0, %v4642_v50, -inf }
 0xc04   :  { %v4662_v38 = vmax.f32 %v4656_v34, %v4661_v8  ;;  %v4659_v31 = vsel %vm211_vm0, %v4637_v12, -inf  ;;  %v7868_v58 = vpop.f32.mrb[94].mxu1 }
 0xc05   :  { %v4660_v43 = vmax.f32 %v4655_v59, %v4659_v31  ;;  %v4652_v62 = vadd.f32 %v7868_v58, %v10359_v15  ;;  %v4646_v52 = vpop.f32.mrb[95].mxu1 }
 0xc06   :  { %v4647_v14 = vadd.f32 %v4646_v52, %v10366_v24 }
 0xc07   :  { %v4667_v17 = vmax.f32 %v4660_v43, %v4662_v38  ;;  %v4665_v30 = vsel %vm211_vm0, %v4652_v62, -inf }
 0xc08   :  { %v4666_v44 = vmax.f32 %v4658_v11, %v4665_v30  ;;  %v4663_v13 = vsel %vm211_vm0, %v4647_v14, -inf }
 0xc09   :  { %v4664_v4 = vmax.f32 %v4657_v5, %v4663_v13 }
 0xc0b   :  { %v4668_v54 = vmax.f32 %v4664_v4, %v4666_v44 }
 0xc0d   :  { %v4669_v36 = vmax.f32 %v4667_v17, %v4668_v54 }
 0xc0f   :  { %v4670_v26 = vrot.slane %v4669_v36, 4 }
 0xc11   :  { %v4671_v35 = vmax.f32 %v4669_v36, %v4670_v26 }
 0xc13   :  { %v4672_v40 = vrot.slane %v4671_v35, 2 }
 0xc15   :  { %v4673_v21 = vmax.f32 %v4671_v35, %v4672_v40 }
 0xc17   :  { %v4674_v9 = vrot.slane %v4673_v21, 1 }
 0xc19   :  { %v4675_v0 = vmax.f32 %v4673_v21, %v4674_v9  ;;  %v11917_v9 = vld [vmem:[#allocation45_spill] sm:$0xff] }
 0xc1b   :  { %v4676_v10 = vsub.f32 %v4617_v7, %v4675_v0  ;;  %v4677_v22 = vsub.f32 %v4622_v55, %v4675_v0  ;;  %v4678_v2 = vsub.f32 %v4627_v56, %v4675_v0  ;;  %v4679_v28 = vsub.f32 %v4632_v39, %v4675_v0 }
 0xc1c   :  { %v4680_v33 = vsub.f32 %v4637_v12, %v4675_v0  ;;  %v4681_v53 = vsub.f32 %v4642_v50, %v4675_v0  ;;  %v4682_v45 = vsub.f32 %v4647_v14, %v4675_v0  ;;  %v4683_v42 = vsub.f32 %v4652_v62, %v4675_v0 }
 0xc1d   :  { %v4684_v16 = vmul.f32 1.442695, %v4676_v10  ;;  %v4686_v61 = vmul.f32 1.442695, %v4677_v22  ;;  %v4688_v49 = vmul.f32 1.442695, %v4678_v2  ;;  %v9031_v0 = vunpack.i.h.bf16 %v11917_v9 }
 0xc1e   :  { %v4690_v23 = vmul.f32 1.442695, %v4679_v28  ;;  %v4692_v48 = vmul.f32 1.442695, %v4680_v33  ;;  %v4694_v60 = vmul.f32 1.442695, %v4681_v53  ;;  %v9030_v10 = vunpack.i.l.bf16 %v11917_v9 }
 0xc1f   :  { %9266 = vpow2.f32 %v4684_v16  ;;  %v4696_v57 = vmul.f32 1.442695, %v4682_v45  ;;  %v4698_v47 = vmul.f32 1.442695, %v4683_v42 }
 0xc20   :  { %9268 = vpow2.f32 %v4686_v61 }
 0xc21   :  { %9270 = vpow2.f32 %v4688_v49  ;;  %v8563_v49 = vpack.c.bf16 %v9031_v0, %v9030_v10 }
 0xc22   :  { %9272 = vpow2.f32 %v4690_v23 }
 0xc23   :  { %9274 = vpow2.f32 %v4692_v48  ;;  %v11918_v48 = vld [vmem:[#allocation36_spill] sm:$0xff] }
 0xc24   :  { %9276 = vpow2.f32 %v4694_v60  ;;  %v9036_v60 = vunpack.i.h.bf16 %v11918_v48 }
 0xc25   :  { %9278 = vpow2.f32 %v4696_v57  ;;  %v9035_v57 = vunpack.i.l.bf16 %v11918_v48 }
 0xc26   :  { %9280 = vpow2.f32 %v4698_v47 }
 0xc29   :  { %v9267_v19 = vpop.eup %9266 }
 0xc2a   :  { %v9269_v55 = vpop.eup %9268  ;;  %v4700_v7 = vsel %vm211_vm0, %v9267_v19, 0.0 }
 0xc2b   :  { %v9271_v1 = vpop.eup %9270  ;;  %v4701_v50 = vsel %vm211_vm0, %v9269_v55, 0.0 }
 0xc2c   :  { %v9273_v3 = vpop.eup %9272  ;;  %v4702_v12 = vadd.f32 %v4701_v50, %v4700_v7  ;;  %v4703_v34 = vsel %vm211_vm0, %v9271_v1, 0.0  ;;  %v11920_v50 = vld [vmem:[#allocation38_spill] sm:$0xff] }
 0xc2d   :  { %v9275_v39 = vpop.eup %9274  ;;  %v4705_v59 = vsel %vm211_vm0, %v9273_v3, 0.0 }
 0xc2e   :  { %v4704_v8 = vadd.f32 %v4703_v34, %v4702_v12  ;;  %v9277_v56 = vpop.eup %9276  ;;  %v4707_v31 = vsel %vm211_vm0, %v9275_v39, 0.0  ;;  %v5432_v34 = vld [vmem:[#allocation2 + $0x160] sm:$0xff] }
 0xc2f   :  { %v9279_v58 = vpop.eup %9278  ;;  %v4709_v62 = vsel %vm211_vm0, %v9277_v56, 0.0 }
 0xc30   :  { %v4706_v38 = vadd.f32 %v4705_v59, %v4704_v8  ;;  %v9281_v52 = vpop.eup %9280  ;;  %v4711_v11 = vsel %vm211_vm0, %v9279_v58, 0.0  ;;  %v5434_v59 = vld [vmem:[#allocation2 + $0x1b0] sm:$0xff] }
 0xc31   :  { %v4713_v30 = vsel %vm211_vm0, %v9281_v52, 0.0 }
 0xc32   :  { %v4708_v43 = vadd.f32 %v4707_v31, %v4706_v38  ;;  %v11921_v38 = vld [vmem:[#allocation49_spill] sm:$0xff] }
 0xc34   :  { %v4710_v14 = vadd.f32 %v4709_v62, %v4708_v43  ;;  %v5436_v43 = vld [vmem:[#allocation2 + $0x200] sm:$0xff]  ;;  %v5437_v62 = vld [vmem:[#allocation2 + $0x228] sm:$0xff] }
 0xc36   :  { %v4712_v17 = vadd.f32 %v4711_v11, %v4710_v14  ;;  %v8629_v14 = vpack.c.bf16 %v5437_v62, %v5436_v43  ;;  %v11924_v11 = vld [vmem:[#allocation42_spill] sm:$0xff] }
 0xc38   :  { %v4714_v5 = vadd.f32 %v4713_v30, %v4712_v17  ;;  %v5438_v17 = vld [vmem:[#allocation2 + $0x250] sm:$0xff]  ;;  %v5439_v30 = vld [vmem:[#allocation2 + $0x278] sm:$0xff] }
 0xc3a   :  { %v4715_v44 = vrot.slane %v4714_v5, 4 }
 0xc3c   :  { %v4716_v13 = vadd.f32 %v4715_v44, %v4714_v5  ;;  %v11925_v5 = vld [vmem:[#allocation54_spill] sm:$0xff] }
 0xc3d   :  { %v9086_v44 = vunpack.i.h.bf16 %v11925_v5 }
 0xc3e   :  { %v4717_v4 = vrot.slane %v4716_v13, 2 }
 0xc40   :  { %v4718_v54 = vadd.f32 %v4717_v4, %v4716_v13  ;;  %v9085_v13 = vunpack.i.l.bf16 %v11925_v5  ;;  %v11926_v4 = vld [vmem:[#allocation53_spill] sm:$0xff] }
 0xc42   :  { %v4719_v36 = vrot.slane %v4718_v54, 1 }
 0xc44   :  { %v4720_v26 = vadd.f32 %v4719_v36, %v4718_v54  ;;  %v8633_v54 = vpack.c.bf16 %v5439_v30, %v5438_v17  ;;  %v11927_v36 = vld [vmem:[#allocation44_spill] sm:$0xff] }
 0xc46   :  { %9282 = vrcp.f32 %v4720_v26  ;;  %v11463_v26 = vpack.c.bf16 %v9086_v44, %v9085_v13 }
 0xc4b   :  { %v4433_v35 = vpop.permute.xlu0 %4432 }
 0xc4c   :  { %4455 = vst.msk [vmem:[#allocation3 + $0x90] sm:$0xff] %vm1717_vm11, %v4433_v35  ;;  %v11928_v35 = vld [vmem:[#allocation55_spill] sm:$0xff] }
 0xc4f   :  { %v4431_v40 = vpop.permute.xlu0 %4430 }
 0xc50   :  { %v9283_v21 = vpop.eup %9282  ;;  %4454 = vst.msk [vmem:[#allocation3 + $0x80] sm:$0xff] %vm1717_vm11, %v4431_v40 }
 0xc51   :  { %v4722_v22 = vmul.f32 %v9283_v21, %v9267_v19  ;;  %v4723_v2 = vmul.f32 %v9283_v21, %v9269_v55  ;;  %v4724_v28 = vmul.f32 %v9283_v21, %v9271_v1  ;;  %v4725_v33 = vmul.f32 %v9283_v21, %v9273_v3  ;;  %v11919_v55 = vld [vmem:[#allocation47_spill] sm:$0xff] }
 0xc52   :  { %v4726_v53 = vmul.f32 %v9283_v21, %v9275_v39  ;;  %v4727_v45 = vmul.f32 %v9283_v21, %v9277_v56  ;;  %v4728_v42 = vmul.f32 %v9283_v21, %v9279_v58  ;;  %v4729_v16 = vmul.f32 %v9283_v21, %v9281_v52  ;;  %v5433_v39 = vld [vmem:[#allocation2 + $0x188] sm:$0xff]  ;;  %v5435_v56 = vld [vmem:[#allocation2 + $0x1d8] sm:$0xff]  ;;  %v11922_v58 = vld [vmem:[#allocation40_spill] sm:$0xff] }
 0xc53   :  { %7885 = vmatprep.mubr.msk.f32.mxu0 %vm211_vm0, %v4722_v22  ;;  %v4437_v61 = vpop.permute.xlu0 %4436  ;;  %v8569_v19 = vpack.c.bf16 %v9036_v60, %v9035_v57  ;;  %v9041_v7 = vunpack.i.h.bf16 %v11919_v55  ;;  %v9040_v1 = vunpack.i.l.bf16 %v11919_v55  ;;  %v8621_v8 = vpack.c.bf16 %v5433_v39, %v5432_v34  ;;  %v11923_v52 = vld [vmem:[#allocation51_spill] sm:$0xff] }
 0xc54   :  { %7886 = vmatmul.mubr.msk.f32.vlgmr.msra.gmra.mrb[136].mxu0 %vm211_vm0, %v4723_v2  ;;  %4457 = vst.msk [vmem:[#allocation3 + $0xb0] sm:$0xff] %vm1717_vm11, %v4437_v61  ;;  %v8625_v31 = vpack.c.bf16 %v5435_v56, %v5434_v59 }
 0xc55   :  { %8562 = vmatpush3.bf16.xpose.msk.msra.mxu0 %vm10047_vm2, %v11285_v46  ;;  %7888 = vmatprep.mubr.msk.f32.mxu0 %vm211_vm0, %v4724_v28  ;;  %v8575_v12 = vpack.c.bf16 %v9041_v7, %v9040_v1 }
 0xc56   :  { %8565 = vmatprep.subr.msk.bf16.mxu0 %vm10047_vm2, %v8563_v49 }
 0xc57   :  { %v4435_v23 = vpop.permute.xlu0 %4434 }
 0xc58   :  { %7889 = vmatmul.mubr.msk.f32.gmra.mrb[138].mxu0 %vm211_vm0, %v4725_v33  ;;  %4456 = vst.msk [vmem:[#allocation3 + $0xa0] sm:$0xff] %vm1717_vm11, %v4435_v23 }
 0xc59   :  { %7891 = vmatprep.mubr.msk.f32.mxu0 %vm211_vm0, %v4726_v53 }
 0xc5b   :  { %v4441_v47 = vpop.permute.xlu0 %4440 }
 0xc5c   :  { %7892 = vmatmul.mubr.msk.f32.gmra.mrb[140].mxu0 %vm211_vm0, %v4727_v45  ;;  %4459 = vst.msk [vmem:[#allocation3 + $0xd0] sm:$0xff] %vm1717_vm11, %v4441_v47 }
 0xc5d   :  { %8568 = vmatpush3.bf16.xpose.msk.msra.mxu0 %vm10047_vm2, %v8563_v49  ;;  %7894 = vmatprep.mubr.msk.f32.mxu0 %vm211_vm0, %v4728_v42 }
 0xc5e   :  { %8571 = vmatprep.subr.msk.bf16.mxu0 %vm10047_vm2, %v8569_v19 }
 0xc5f   :  { %v4439_v46 = vpop.permute.xlu0 %4438 }
 0xc60   :  { %7895 = vmatmul.mubr.msk.f32.gmra.mrb[142].mxu0 %vm211_vm0, %v4729_v16  ;;  %4458 = vst.msk [vmem:[#allocation3 + $0xc0] sm:$0xff] %vm1717_vm11, %v4439_v46 }
 0xc61   :  { %7913 = vmatprep.mubr.msk.f32.mxu0 %vm882_vm1, %v11920_v50 }
 0xc63   :  { %v4443_v3 = vpop.permute.xlu0 %4442 }
 0xc64   :  { %4460 = vst.msk [vmem:[#allocation3 + $0xe0] sm:$0xff] %vm1717_vm11, %v4443_v3 }
 0xc65   :  { %8574 = vmatpush3.bf16.xpose.msk.msra.mxu0 %vm10047_vm2, %v8569_v19 }
 0xc66   :  { %8577 = vmatprep.subr.msk.bf16.mxu0 %vm10047_vm2, %v8575_v12 }
 0xc6d   :  { %8580 = vmatpush3.bf16.xpose.msk.msra.mxu0 %vm10047_vm2, %v8575_v12 }
 0xc6e   :  { %8622 = vmatprep.subr.bf16.mxu0 %v8621_v8 }
 0xc74   :  { %7914 = vmatmul.mubr.msk.f32.vlgmr.msra.gmra.mrb[144].mxu0 %vm882_vm1, %v11921_v38 }
 0xc75   :  { %7916 = vmatprep.mubr.msk.f32.mxu0 %vm882_vm1, %v11922_v58  ;;  %8624 = vmatpush3.bf16.msra.mxu0 %v8621_v8 }
 0xc76   :  { %8626 = vmatprep.subr.bf16.mxu0 %v8625_v31 }
 0xc78   :  { %7917 = vmatmul.mubr.msk.f32.gmra.mrb[146].mxu0 %vm882_vm1, %v11923_v52 }
 0xc79   :  { %7919 = vmatprep.mubr.msk.f32.mxu0 %vm882_vm1, %v11924_v11  ;;  %8628 = vmatpush3.bf16.msra.mxu0 %v8625_v31 }
 0xc7a   :  { %8630 = vmatprep.subr.bf16.mxu0 %v8629_v14 }
 0xc7c   :  { %7920 = vmatmul.mubr.msk.f32.gmra.mrb[148].mxu0 %vm882_vm1, %v11926_v4 }
 0xc7d   :  { %7922 = vmatprep.mubr.msk.f32.mxu0 %vm882_vm1, %v11927_v36  ;;  %8632 = vmatpush3.bf16.msra.mxu0 %v8629_v14 }
 0xc7e   :  { %8634 = vmatprep.subr.bf16.mxu0 %v8633_v54 }
 0xc80   :  { %7923 = vmatmul.mubr.msk.f32.gmra.mrb[150].mxu0 %vm882_vm1, %v11928_v35 }
 0xc81   :  { %8636 = vmatpush3.bf16.msra.mxu0 %v8633_v54 }
 0xc82   :  { %8639 = vmatprep.subr.msk.bf16.mxu0 %vm10047_vm2, %v11463_v26 }
 0xd27   :  { %v7887_v40 = vpop.f32.mrb[136].mxu0 }
 0xd28   :  { %4901 = vrot.lane.b32.xlu1 %v7887_v40, %s9440_s2  ;;  %v4852_v21 = vpop.f32.mrb[137].mxu0 }
 0xd2b   :  { %v7890_v9 = vpop.f32.mrb[138].mxu0 }
 0xd2c   :  { %4899 = vrot.lane.b32.xlu1 %v4852_v21, %s9440_s2  ;;  %v4862_v0 = vpop.f32.mrb[139].mxu0 }
 0xd2f   :  { %v7893_v10 = vpop.f32.mrb[140].mxu0 }
 0xd30   :  { %4905 = vrot.lane.b32.xlu1 %v7890_v9, %s9440_s2  ;;  %v4872_v22 = vpop.f32.mrb[141].mxu0 }
 0xd33   :  { %v11473_v2 = vpop.f32.mrb[142].mxu0 }
 0xd34   :  { %4903 = vrot.lane.b32.xlu1 %v4862_v0, %s9440_s2  ;;  %v4882_v28 = vpop.f32.mrb[143].mxu0 }
 0xd38   :  { %4909 = vrot.lane.b32.xlu1 %v7893_v10, %s9440_s2 }
 0xd3c   :  { %4907 = vrot.lane.b32.xlu1 %v4872_v22, %s9440_s2 }
 0xd40   :  { %4911 = vrot.lane.b32.xlu1 %v4882_v28, %s9440_s2 }
 0xd47   :  { %v7915_v33 = vpop.f32.mrb[144].mxu0 }
 0xd48   :  { %v5101_v53 = vpop.f32.mrb[145].mxu0  ;;  %v5107_v16 = vadd.f32 %v7915_v33, %v10338_v18 }
 0xd49   :  { %v5102_v61 = vadd.f32 %v5101_v53, %v10341_v20 }
 0xd4a   :  { %v5141_v57 = vsel %vm211_vm0, %v5107_v16, -inf }
 0xd4b   :  { %v7918_v45 = vpop.f32.mrb[146].mxu0  ;;  %v5140_v46 = vsel %vm211_vm0, %v5102_v61, -inf }
 0xd4c   :  { %v5111_v42 = vpop.f32.mrb[147].mxu0  ;;  %v5117_v47 = vadd.f32 %v7918_v45, %v10351_v41 }
 0xd4d   :  { %v5112_v55 = vadd.f32 %v5111_v42, %v10353_v29 }
 0xd4e   :  { %v5143_v8 = vsel %vm211_vm0, %v5117_v47, -inf }
 0xd4f   :  { %v7921_v49 = vpop.f32.mrb[148].mxu0  ;;  %v5142_v38 = vsel %vm211_vm0, %v5112_v55, -inf }
 0xd50   :  { %v5127_v23 = vadd.f32 %v7921_v49, %v10343_v25  ;;  %v5121_v48 = vpop.f32.mrb[149].mxu0 }
 0xd51   :  { %v5122_v60 = vadd.f32 %v5121_v48, %v10348_v37 }
 0xd52   :  { %v5146_v19 = vsel %vm211_vm0, %v5127_v23, -inf }
 0xd53   :  { %v5147_v7 = vmax.f32 %v5141_v57, %v5146_v19  ;;  %v5144_v1 = vsel %vm211_vm0, %v5122_v60, -inf  ;;  %v7924_v50 = vpop.f32.mrb[150].mxu0 }
 0xd54   :  { %v5145_v3 = vmax.f32 %v5140_v46, %v5144_v1  ;;  %v5137_v12 = vadd.f32 %v7924_v50, %v10359_v15  ;;  %v5131_v34 = vpop.f32.mrb[151].mxu0 }
 0xd55   :  { %v5132_v39 = vadd.f32 %v5131_v34, %v10366_v24 }
 0xd56   :  { %v5152_v59 = vmax.f32 %v5145_v3, %v5147_v7  ;;  %v5150_v56 = vsel %vm211_vm0, %v5137_v12, -inf }
 0xd57   :  { %v5151_v31 = vmax.f32 %v5143_v8, %v5150_v56  ;;  %v5148_v58 = vsel %vm211_vm0, %v5132_v39, -inf }
 0xd58   :  { %v5149_v43 = vmax.f32 %v5142_v38, %v5148_v58 }
 0xd5a   :  { %v5153_v62 = vmax.f32 %v5149_v43, %v5151_v31 }
 0xd5c   :  { %v5154_v52 = vmax.f32 %v5152_v59, %v5153_v62 }
 0xd5e   :  { %v5155_v14 = vrot.slane %v5154_v52, 4 }
 0xd60   :  { %v5156_v11 = vmax.f32 %v5154_v52, %v5155_v14 }
 0xd62   :  { %v5157_v17 = vrot.slane %v5156_v11, 2 }
 0xd64   :  { %v5158_v30 = vmax.f32 %v5156_v11, %v5157_v17 }
 0xd66   :  { %v5159_v5 = vrot.slane %v5158_v30, 1 }
 0xd68   :  { %v5160_v44 = vmax.f32 %v5158_v30, %v5159_v5 }
 0xd6a   :  { %v5161_v13 = vsub.f32 %v5102_v61, %v5160_v44  ;;  %v5162_v4 = vsub.f32 %v5107_v16, %v5160_v44  ;;  %v5163_v54 = vsub.f32 %v5112_v55, %v5160_v44  ;;  %v5164_v36 = vsub.f32 %v5117_v47, %v5160_v44 }
 0xd6b   :  { %v5165_v35 = vsub.f32 %v5122_v60, %v5160_v44  ;;  %v5166_v40 = vsub.f32 %v5127_v23, %v5160_v44  ;;  %v5167_v21 = vsub.f32 %v5132_v39, %v5160_v44  ;;  %v5168_v9 = vsub.f32 %v5137_v12, %v5160_v44 }
 0xd6c   :  { %v5169_v0 = vmul.f32 1.442695, %v5161_v13  ;;  %v5171_v10 = vmul.f32 1.442695, %v5162_v4  ;;  %v5173_v22 = vmul.f32 1.442695, %v5163_v54  ;;  %v9071_v44 = vunpack.i.h.bf16 %v10910_v63 }
 0xd6d   :  { %v5175_v28 = vmul.f32 1.442695, %v5164_v36  ;;  %v5177_v33 = vmul.f32 1.442695, %v5165_v35  ;;  %v5179_v53 = vmul.f32 1.442695, %v5166_v40  ;;  %v9070_v13 = vunpack.i.l.bf16 %v10910_v63 }
 0xd6e   :  { %9284 = vpow2.f32 %v5169_v0  ;;  %v5181_v45 = vmul.f32 1.442695, %v5167_v21  ;;  %v5183_v42 = vmul.f32 1.442695, %v5168_v9 }
 0xd6f   :  { %9286 = vpow2.f32 %v5171_v10 }
 0xd70   :  { %9288 = vpow2.f32 %v5173_v22  ;;  %v8603_v22 = vpack.c.bf16 %v9071_v44, %v9070_v13 }
 0xd71   :  { %9290 = vpow2.f32 %v5175_v28  ;;  %v11929_v28 = vld [vmem:[#allocation52_spill] sm:$0xff] }
 0xd72   :  { %9292 = vpow2.f32 %v5177_v33  ;;  %v9076_v33 = vunpack.i.h.bf16 %v11929_v28 }
 0xd73   :  { %9294 = vpow2.f32 %v5179_v53  ;;  %v9075_v53 = vunpack.i.l.bf16 %v11929_v28 }
 0xd74   :  { %9296 = vpow2.f32 %v5181_v45 }
 0xd75   :  { %9298 = vpow2.f32 %v5183_v42  ;;  %v8609_v42 = vpack.c.bf16 %v9076_v33, %v9075_v53 }
 0xd78   :  { %v9285_v16 = vpop.eup %9284 }
 0xd79   :  { %v9287_v61 = vpop.eup %9286  ;;  %v5185_v49 = vsel %vm211_vm0, %v9285_v16, 0.0 }
 0xd7a   :  { %v9289_v23 = vpop.eup %9288  ;;  %v5186_v48 = vsel %vm211_vm0, %v9287_v61, 0.0 }
 0xd7b   :  { %v9291_v60 = vpop.eup %9290  ;;  %v5187_v57 = vadd.f32 %v5186_v48, %v5185_v49  ;;  %v5188_v47 = vsel %vm211_vm0, %v9289_v23, 0.0  ;;  %v5416_v49 = vld [vmem:[#allocation2 + $0x148] sm:$0xff] }
 0xd7c   :  { %v9293_v19 = vpop.eup %9292  ;;  %v5190_v55 = vsel %vm211_vm0, %v9291_v60, 0.0 }
 0xd7d   :  { %v5189_v46 = vadd.f32 %v5188_v47, %v5187_v57  ;;  %v9295_v7 = vpop.eup %9294  ;;  %v5192_v50 = vsel %vm211_vm0, %v9293_v19, 0.0 }
 0xd7e   :  { %v9297_v3 = vpop.eup %9296  ;;  %v5194_v34 = vsel %vm211_vm0, %v9295_v7, 0.0 }
 0xd7f   :  { %v5191_v1 = vadd.f32 %v5190_v55, %v5189_v46  ;;  %v9299_v39 = vpop.eup %9298  ;;  %v5196_v59 = vsel %vm211_vm0, %v9297_v3, 0.0 }
 0xd80   :  { %v5198_v38 = vsel %vm211_vm0, %v9299_v39, 0.0 }
 0xd81   :  { %v5193_v12 = vadd.f32 %v5192_v50, %v5191_v1  ;;  %v11932_v1 = vld [vmem:[#allocation63_spill] sm:$0xff] }
 0xd82   :  { %v9116_v50 = vunpack.i.h.bf16 %v11932_v1 }
 0xd83   :  { %v5195_v8 = vadd.f32 %v5194_v34, %v5193_v12  ;;  %v5418_v34 = vld [vmem:[#allocation2 + $0x198] sm:$0xff] }
 0xd85   :  { %v5197_v56 = vadd.f32 %v5196_v59, %v5195_v8  ;;  %v11933_v59 = vld [vmem:[#allocation71_spill] sm:$0xff] }
 0xd87   :  { %v5199_v31 = vadd.f32 %v5198_v38, %v5197_v56  ;;  %v9121_v56 = vunpack.i.h.bf16 %v11933_v59  ;;  %v9120_v38 = vunpack.i.l.bf16 %v11933_v59 }
 0xd89   :  { %v5200_v58 = vrot.slane %v5199_v31, 4 }
 0xd8b   :  { %v5201_v43 = vadd.f32 %v5200_v58, %v5199_v31  ;;  %v5420_v31 = vld [vmem:[#allocation2 + $0x1e8] sm:$0xff]  ;;  %v5421_v58 = vld [vmem:[#allocation2 + $0x210] sm:$0xff] }
 0xd8d   :  { %v5202_v62 = vrot.slane %v5201_v43, 2 }
 0xd8f   :  { %v5203_v52 = vadd.f32 %v5202_v62, %v5201_v43  ;;  %v8673_v43 = vpack.c.bf16 %v9121_v56, %v9120_v38  ;;  %v5422_v62 = vld [vmem:[#allocation2 + $0x238] sm:$0xff] }
 0xd91   :  { %v5204_v14 = vrot.slane %v5203_v52, 1 }
 0xd93   :  { %v5205_v11 = vadd.f32 %v5204_v14, %v5203_v52  ;;  %v5423_v52 = vld [vmem:[#allocation2 + $0x260] sm:$0xff] }
 0xd95   :  { %9300 = vrcp.f32 %v5205_v11 }
 0xd9a   :  { %v4902_v17 = vpop.permute.xlu1 %4901 }
 0xd9b   :  { %4924 = vst.msk [vmem:[#allocation3 + $0x90] sm:$0xff] %vm2187_vm12, %v4902_v17 }
 0xd9e   :  { %v4900_v30 = vpop.permute.xlu1 %4899 }
 0xd9f   :  { %v9301_v5 = vpop.eup %9300  ;;  %4923 = vst.msk [vmem:[#allocation3 + $0x80] sm:$0xff] %vm2187_vm12, %v4900_v30 }
 0xda0   :  { %v5207_v4 = vmul.f32 %v9301_v5, %v9285_v16  ;;  %v5208_v54 = vmul.f32 %v9301_v5, %v9287_v61  ;;  %v5209_v36 = vmul.f32 %v9301_v5, %v9289_v23  ;;  %v5210_v35 = vmul.f32 %v9301_v5, %v9291_v60  ;;  %v11930_v60 = vld [vmem:[#allocation62_spill] sm:$0xff] }
 0xda1   :  { %v5211_v40 = vmul.f32 %v9301_v5, %v9293_v19  ;;  %v5212_v21 = vmul.f32 %v9301_v5, %v9295_v7  ;;  %v5213_v9 = vmul.f32 %v9301_v5, %v9297_v3  ;;  %v5214_v0 = vmul.f32 %v9301_v5, %v9299_v39  ;;  %v11931_v19 = vld [vmem:[#allocation70_spill] sm:$0xff]  ;;  %v5417_v7 = vld [vmem:[#allocation2 + $0x170] sm:$0xff] }
 0xda2   :  { %7941 = vmatprep.mubr.msk.f32.mxu1 %vm211_vm0, %v5207_v4  ;;  %v4906_v10 = vpop.permute.xlu1 %4905  ;;  %v9081_v16 = vunpack.i.h.bf16 %v10914_v51  ;;  %v9080_v61 = vunpack.i.l.bf16 %v10914_v51  ;;  %v9106_v57 = vunpack.i.h.bf16 %v11930_v60  ;;  %v9105_v51 = vunpack.i.l.bf16 %v11930_v60  ;;  %v5419_v39 = vld [vmem:[#allocation2 + $0x1c0] sm:$0xff] }
 0xda3   :  { %7942 = vmatmul.mubr.msk.f32.vlgmr.msra.gmra.mrb[96].mxu1 %vm211_vm0, %v5208_v54  ;;  %4926 = vst.msk [vmem:[#allocation3 + $0xb0] sm:$0xff] %vm2187_vm12, %v4906_v10  ;;  %v9111_v46 = vunpack.i.h.bf16 %v11931_v19  ;;  %v9110_v55 = vunpack.i.l.bf16 %v11931_v19  ;;  %v9115_v3 = vunpack.i.l.bf16 %v11932_v1 }
 0xda4   :  { %8602 = vmatpush3.bf16.xpose.msk.msra.mxu1 %vm10047_vm2, %v11371_v27  ;;  %7944 = vmatprep.mubr.msk.f32.mxu1 %vm211_vm0, %v5209_v36  ;;  %v8615_v48 = vpack.c.bf16 %v9081_v16, %v9080_v61  ;;  %v8661_v47 = vpack.c.bf16 %v9106_v57, %v9105_v51 }
 0xda5   :  { %8605 = vmatprep.subr.msk.bf16.mxu1 %vm10047_vm2, %v8603_v22  ;;  %v8665_v12 = vpack.c.bf16 %v9111_v46, %v9110_v55  ;;  %v8669_v8 = vpack.c.bf16 %v9116_v50, %v9115_v3 }
 0xda6   :  { %v4904_v63 = vpop.permute.xlu1 %4903 }
 0xda7   :  { %7945 = vmatmul.mubr.msk.f32.gmra.mrb[98].mxu1 %vm211_vm0, %v5210_v35  ;;  %4925 = vst.msk [vmem:[#allocation3 + $0xa0] sm:$0xff] %vm2187_vm12, %v4904_v63 }
 0xda8   :  { %7947 = vmatprep.mubr.msk.f32.mxu1 %vm211_vm0, %v5211_v40 }
 0xdaa   :  { %v4910_v45 = vpop.permute.xlu1 %4909 }
 0xdab   :  { %7948 = vmatmul.mubr.msk.f32.gmra.mrb[100].mxu1 %vm211_vm0, %v5212_v21  ;;  %4928 = vst.msk [vmem:[#allocation3 + $0xd0] sm:$0xff] %vm2187_vm12, %v4910_v45 }
 0xdac   :  { %8608 = vmatpush3.bf16.xpose.msk.msra.mxu1 %vm10047_vm2, %v8603_v22  ;;  %7950 = vmatprep.mubr.msk.f32.mxu1 %vm211_vm0, %v5213_v9 }
 0xdad   :  { %8611 = vmatprep.subr.msk.bf16.mxu1 %vm10047_vm2, %v8609_v42 }
 0xdae   :  { %v4908_v27 = vpop.permute.xlu1 %4907 }
 0xdaf   :  { %7951 = vmatmul.mubr.msk.f32.gmra.mrb[102].mxu1 %vm211_vm0, %v5214_v0  ;;  %4927 = vst.msk [vmem:[#allocation3 + $0xc0] sm:$0xff] %vm2187_vm12, %v4908_v27 }
 0xdb0   :  { %7969 = vmatprep.mubr.msk.f32.mxu1 %vm882_vm1, %v5416_v49 }
 0xdb2   :  { %v4912_v23 = vpop.permute.xlu1 %4911 }
 0xdb3   :  { %4929 = vst.msk [vmem:[#allocation3 + $0xe0] sm:$0xff] %vm2187_vm12, %v4912_v23 }
 0xdb4   :  { %8614 = vmatpush3.bf16.xpose.msk.msra.mxu1 %vm10047_vm2, %v8609_v42 }
 0xdb5   :  { %8617 = vmatprep.subr.msk.bf16.mxu1 %vm10047_vm2, %v8615_v48 }
 0xdbc   :  { %8620 = vmatpush3.bf16.xpose.msk.msra.mxu1 %vm10047_vm2, %v8615_v48 }
 0xdbd   :  { %8662 = vmatprep.subr.bf16.mxu1 %v8661_v47 }
 0xdc3   :  { %7970 = vmatmul.mubr.msk.f32.vlgmr.msra.gmra.mrb[104].mxu1 %vm882_vm1, %v5417_v7 }
 0xdc4   :  { %7972 = vmatprep.mubr.msk.f32.mxu1 %vm882_vm1, %v5418_v34  ;;  %8664 = vmatpush3.bf16.msra.mxu1 %v8661_v47 }
 0xdc5   :  { %8666 = vmatprep.subr.bf16.mxu1 %v8665_v12 }
 0xdc7   :  { %7973 = vmatmul.mubr.msk.f32.gmra.mrb[106].mxu1 %vm882_vm1, %v5419_v39 }
 0xdc8   :  { %7975 = vmatprep.mubr.msk.f32.mxu1 %vm882_vm1, %v5420_v31  ;;  %8668 = vmatpush3.bf16.msra.mxu1 %v8665_v12 }
 0xdc9   :  { %8670 = vmatprep.subr.bf16.mxu1 %v8669_v8 }
 0xdcb   :  { %7976 = vmatmul.mubr.msk.f32.gmra.mrb[108].mxu1 %vm882_vm1, %v5421_v58 }
 0xdcc   :  { %7978 = vmatprep.mubr.msk.f32.mxu1 %vm882_vm1, %v5422_v62  ;;  %8672 = vmatpush3.bf16.msra.mxu1 %v8669_v8 }
 0xdcd   :  { %8674 = vmatprep.subr.bf16.mxu1 %v8673_v43 }
 0xdcf   :  { %7979 = vmatmul.mubr.msk.f32.gmra.mrb[110].mxu1 %vm882_vm1, %v5423_v52 }
 0xdd0   :  { %8676 = vmatpush3.bf16.msra.mxu1 %v8673_v43 }
 0xe76   :  { %v7943_v14 = vpop.f32.mrb[96].mxu1 }
 0xe77   :  { %5386 = vrot.lane.b32.xlu1 %v7943_v14, %s9442_s28  ;;  %v5337_v11 = vpop.f32.mrb[97].mxu1 }
 0xe7a   :  { %v7946_v17 = vpop.f32.mrb[98].mxu1 }
 0xe7b   :  { %5384 = vrot.lane.b32.xlu1 %v5337_v11, %s9442_s28  ;;  %v5347_v30 = vpop.f32.mrb[99].mxu1 }
 0xe7e   :  { %v7949_v5 = vpop.f32.mrb[100].mxu1 }
 0xe7f   :  { %5390 = vrot.lane.b32.xlu1 %v7946_v17, %s9442_s28  ;;  %v5357_v44 = vpop.f32.mrb[101].mxu1 }
 0xe82   :  { %v7952_v13 = vpop.f32.mrb[102].mxu1 }
 0xe83   :  { %5388 = vrot.lane.b32.xlu1 %v5347_v30, %s9442_s28  ;;  %v5367_v4 = vpop.f32.mrb[103].mxu1 }
 0xe87   :  { %5394 = vrot.lane.b32.xlu1 %v7949_v5, %s9442_s28 }
 0xe8b   :  { %5392 = vrot.lane.b32.xlu1 %v5357_v44, %s9442_s28 }
 0xe8f   :  { %5396 = vrot.lane.b32.xlu1 %v5367_v4, %s9442_s28 }
 0xe93   :  { %4913 = vrot.lane.b32.xlu1 %v11473_v2, %s9440_s2 }
 0xe96   :  { %v7971_v54 = vpop.f32.mrb[104].mxu1 }
 0xe97   :  { %v5570_v36 = vpop.f32.mrb[105].mxu1  ;;  %5398 = vrot.lane.b32.xlu1 %v7952_v13, %s9442_s28  ;;  %v5576_v21 = vadd.f32 %v7971_v54, %v10338_v18 }
 0xe98   :  { %v5571_v9 = vadd.f32 %v5570_v36, %v10341_v20 }
 0xe99   :  { %v5610_v28 = vsel %vm211_vm0, %v5576_v21, -inf }
 0xe9a   :  { %v7974_v35 = vpop.f32.mrb[106].mxu1  ;;  %v5609_v53 = vsel %vm211_vm0, %v5571_v9, -inf }
 0xe9b   :  { %v5580_v40 = vpop.f32.mrb[107].mxu1  ;;  %v5586_v2 = vadd.f32 %v7974_v35, %v10351_v41 }
 0xe9c   :  { %v5581_v45 = vadd.f32 %v5580_v40, %v10353_v29 }
 0xe9d   :  { %v5612_v60 = vsel %vm211_vm0, %v5586_v2, -inf }
 0xe9e   :  { %v7977_v0 = vpop.f32.mrb[108].mxu1  ;;  %v5611_v47 = vsel %vm211_vm0, %v5581_v45, -inf }
 0xe9f   :  { %v5596_v10 = vadd.f32 %v7977_v0, %v10343_v25  ;;  %v5590_v22 = vpop.f32.mrb[109].mxu1 }
 0xea0   :  { %v5591_v63 = vadd.f32 %v5590_v22, %v10348_v37 }
 0xea1   :  { %v5615_v33 = vsel %vm211_vm0, %v5596_v10, -inf }
 0xea2   :  { %v5616_v42 = vmax.f32 %v5610_v28, %v5615_v33  ;;  %v5613_v27 = vsel %vm211_vm0, %v5591_v63, -inf  ;;  %v7980_v16 = vpop.f32.mrb[110].mxu1 }
 0xea3   :  { %v5614_v61 = vmax.f32 %v5609_v53, %v5613_v27  ;;  %v5606_v49 = vadd.f32 %v7980_v16, %v10359_v15  ;;  %v5600_v23 = vpop.f32.mrb[111].mxu1 }
 0xea4   :  { %v5601_v48 = vadd.f32 %v5600_v23, %v10366_v24 }
 0xea5   :  { %v5621_v57 = vmax.f32 %v5614_v61, %v5616_v42  ;;  %v5619_v51 = vsel %vm211_vm0, %v5606_v49, -inf }
 0xea6   :  { %v5620_v19 = vmax.f32 %v5612_v60, %v5619_v51  ;;  %v5617_v46 = vsel %vm211_vm0, %v5601_v48, -inf }
 0xea7   :  { %v5618_v55 = vmax.f32 %v5611_v47, %v5617_v46 }
 0xea9   :  { %v5622_v7 = vmax.f32 %v5618_v55, %v5620_v19 }
 0xeab   :  { %v5623_v1 = vmax.f32 %v5621_v57, %v5622_v7 }
 0xead   :  { %v5624_v50 = vrot.slane %v5623_v1, 4 }
 0xeaf   :  { %v5625_v3 = vmax.f32 %v5623_v1, %v5624_v50 }
 0xeb1   :  { %v5626_v12 = vrot.slane %v5625_v3, 2 }
 0xeb3   :  { %v5627_v34 = vmax.f32 %v5625_v3, %v5626_v12  ;;  %v11934_v3 = vld [vmem:[#allocation64_spill] sm:$0xff] }
 0xeb4   :  { %v9091_v12 = vunpack.i.h.bf16 %v11934_v3 }
 0xeb5   :  { %v5628_v39 = vrot.slane %v5627_v34, 1 }
 0xeb7   :  { %v5629_v8 = vmax.f32 %v5627_v34, %v5628_v39  ;;  %v9090_v34 = vunpack.i.l.bf16 %v11934_v3 }
 0xeb9   :  { %v5630_v59 = vsub.f32 %v5571_v9, %v5629_v8  ;;  %v5631_v56 = vsub.f32 %v5576_v21, %v5629_v8  ;;  %v5632_v38 = vsub.f32 %v5581_v45, %v5629_v8  ;;  %v5633_v31 = vsub.f32 %v5586_v2, %v5629_v8 }
 0xeba   :  { %v5634_v58 = vsub.f32 %v5591_v63, %v5629_v8  ;;  %v5635_v43 = vsub.f32 %v5596_v10, %v5629_v8  ;;  %v5636_v62 = vsub.f32 %v5601_v48, %v5629_v8  ;;  %v5637_v52 = vsub.f32 %v5606_v49, %v5629_v8 }
 0xebb   :  { %v5638_v14 = vmul.f32 1.442695, %v5630_v59  ;;  %v5640_v11 = vmul.f32 1.442695, %v5631_v56  ;;  %v5642_v17 = vmul.f32 1.442695, %v5632_v38 }
 0xebc   :  { %v5644_v30 = vmul.f32 1.442695, %v5633_v31  ;;  %v5646_v5 = vmul.f32 1.442695, %v5634_v58  ;;  %v5648_v44 = vmul.f32 1.442695, %v5635_v43 }
 0xebd   :  { %9302 = vpow2.f32 %v5638_v14  ;;  %v5650_v13 = vmul.f32 1.442695, %v5636_v62  ;;  %v5652_v4 = vmul.f32 1.442695, %v5637_v52  ;;  %v8643_v52 = vpack.c.bf16 %v9091_v12, %v9090_v34 }
 0xebe   :  { %9304 = vpow2.f32 %v5640_v11  ;;  %v11935_v11 = vld [vmem:[#allocation56_spill] sm:$0xff] }
 0xebf   :  { %9306 = vpow2.f32 %v5642_v17  ;;  %v9096_v17 = vunpack.i.h.bf16 %v11935_v11 }
 0xec0   :  { %9308 = vpow2.f32 %v5644_v30  ;;  %v9095_v30 = vunpack.i.l.bf16 %v11935_v11 }
 0xec1   :  { %9310 = vpow2.f32 %v5646_v5 }
 0xec2   :  { %9312 = vpow2.f32 %v5648_v44  ;;  %v8649_v44 = vpack.c.bf16 %v9096_v17, %v9095_v30 }
 0xec3   :  { %9314 = vpow2.f32 %v5650_v13  ;;  %v11936_v13 = vld [vmem:[#allocation65_spill] sm:$0xff] }
 0xec4   :  { %9316 = vpow2.f32 %v5652_v4  ;;  %v9101_v4 = vunpack.i.h.bf16 %v11936_v13 }
 0xec7   :  { %v9303_v54 = vpop.eup %9302 }
 0xec8   :  { %v9305_v36 = vpop.eup %9304  ;;  %v5654_v35 = vsel %vm211_vm0, %v9303_v54, 0.0 }
 0xec9   :  { %v9307_v40 = vpop.eup %9306  ;;  %v5655_v21 = vsel %vm211_vm0, %v9305_v36, 0.0 }
 0xeca   :  { %v9309_v9 = vpop.eup %9308  ;;  %v5656_v0 = vadd.f32 %v5655_v21, %v5654_v35  ;;  %v5657_v10 = vsel %vm211_vm0, %v9307_v40, 0.0  ;;  %v11938_v21 = vld [vmem:[#allocation66_spill] sm:$0xff] }
 0xecb   :  { %v9311_v22 = vpop.eup %9310  ;;  %v5659_v28 = vsel %vm211_vm0, %v9309_v9, 0.0 }
 0xecc   :  { %v5658_v63 = vadd.f32 %v5657_v10, %v5656_v0  ;;  %v9313_v2 = vpop.eup %9312  ;;  %v5661_v53 = vsel %vm211_vm0, %v9311_v22, 0.0  ;;  %v11940_v0 = vld [vmem:[#allocation67_spill] sm:$0xff]  ;;  %v11941_v10 = vld [vmem:[#allocation60_spill] sm:$0xff] }
 0xecd   :  { %v9315_v45 = vpop.eup %9314  ;;  %v5663_v27 = vsel %vm211_vm0, %v9313_v2, 0.0 }
 0xece   :  { %v5660_v33 = vadd.f32 %v5659_v28, %v5658_v63  ;;  %v9317_v16 = vpop.eup %9316  ;;  %v5665_v49 = vsel %vm211_vm0, %v9315_v45, 0.0  ;;  %v11943_v63 = vld [vmem:[#allocation61_spill] sm:$0xff]  ;;  %v6339_v28 = vld [vmem:[#allocation9 + $0x8] sm:$0xff] }
 0xecf   :  { %v5667_v48 = vsel %vm211_vm0, %v9317_v16, 0.0 }
 0xed0   :  { %v5662_v42 = vadd.f32 %v5661_v53, %v5660_v33 }
 0xed2   :  { %v5664_v61 = vadd.f32 %v5663_v27, %v5662_v42 }
 0xed4   :  { %v5666_v23 = vadd.f32 %v5665_v49, %v5664_v61 }
 0xed6   :  { %v5668_v60 = vadd.f32 %v5667_v48, %v5666_v23 }
 0xed8   :  { %v5669_v57 = vrot.slane %v5668_v60, 4 }
 0xeda   :  { %v5670_v51 = vadd.f32 %v5669_v57, %v5668_v60 }
 0xedc   :  { %v5671_v47 = vrot.slane %v5670_v51, 2 }
 0xede   :  { %v5672_v19 = vadd.f32 %v5671_v47, %v5670_v51 }
 0xee0   :  { %v5673_v46 = vrot.slane %v5672_v19, 1 }
 0xee2   :  { %v5674_v55 = vadd.f32 %v5673_v46, %v5672_v19 }
 0xee4   :  { %9318 = vrcp.f32 %v5674_v55 }
 0xee9   :  { %v5387_v7 = vpop.permute.xlu1 %5386 }
 0xeea   :  { %5409 = vst.msk [vmem:[#allocation3 + $0x90] sm:$0xff] %vm2673_vm13, %v5387_v7 }
 0xeed   :  { %v5385_v1 = vpop.permute.xlu1 %5384 }
 0xeee   :  { %v9319_v50 = vpop.eup %9318  ;;  %5408 = vst.msk [vmem:[#allocation3 + $0x80] sm:$0xff] %vm2673_vm13, %v5385_v1 }
 0xeef   :  { %v5676_v39 = vmul.f32 %v9319_v50, %v9303_v54  ;;  %v5677_v8 = vmul.f32 %v9319_v50, %v9305_v36  ;;  %v5678_v59 = vmul.f32 %v9319_v50, %v9307_v40  ;;  %v5679_v56 = vmul.f32 %v9319_v50, %v9309_v9  ;;  %v11937_v36 = vld [vmem:[#allocation57_spill] sm:$0xff]  ;;  %v11939_v9 = vld [vmem:[#allocation59_spill] sm:$0xff] }
 0xef0   :  { %v5680_v38 = vmul.f32 %v9319_v50, %v9311_v22  ;;  %v5681_v31 = vmul.f32 %v9319_v50, %v9313_v2  ;;  %v5682_v58 = vmul.f32 %v9319_v50, %v9315_v45  ;;  %v5683_v43 = vmul.f32 %v9319_v50, %v9317_v16  ;;  %v11942_v22 = vld [vmem:[#allocation68_spill] sm:$0xff]  ;;  %v6341_v2 = vld [vmem:[#allocation9 + $0x18] sm:$0xff] }
 0xef1   :  { %7997 = vmatprep.mubr.msk.f32.mxu0 %vm211_vm0, %v5676_v39  ;;  %v5391_v62 = vpop.permute.xlu1 %5390  ;;  %v9100_v54 = vunpack.i.l.bf16 %v11936_v13  ;;  %v8677_v33 = vpack.c.bf16 %v6341_v2, %v6339_v28 }
 0xef2   :  { %7998 = vmatmul.mubr.msk.f32.vlgmr.msra.gmra.mrb[152].mxu0 %vm211_vm0, %v5677_v8  ;;  %5411 = vst.msk [vmem:[#allocation3 + $0xb0] sm:$0xff] %vm2673_vm13, %v5391_v62 }
 0xef3   :  { %8642 = vmatpush3.bf16.xpose.msk.msra.mxu0 %vm10047_vm2, %v11463_v26  ;;  %8000 = vmatprep.mubr.msk.f32.mxu0 %vm211_vm0, %v5678_v59  ;;  %v8655_v40 = vpack.c.bf16 %v9101_v4, %v9100_v54 }
 0xef4   :  { %8645 = vmatprep.subr.msk.bf16.mxu0 %vm10047_vm2, %v8643_v52  ;;  %8678 = vmatprep.subr.bf16.mxu1 %v8677_v33 }
 0xef5   :  { %v5389_v14 = vpop.permute.xlu1 %5388 }
 0xef6   :  { %8001 = vmatmul.mubr.msk.f32.gmra.mrb[154].mxu0 %vm211_vm0, %v5679_v56  ;;  %5410 = vst.msk [vmem:[#allocation3 + $0xa0] sm:$0xff] %vm2673_vm13, %v5389_v14 }
 0xef7   :  { %8003 = vmatprep.mubr.msk.f32.mxu0 %vm211_vm0, %v5680_v38 }
 0xef9   :  { %v5395_v5 = vpop.permute.xlu1 %5394 }
 0xefa   :  { %8004 = vmatmul.mubr.msk.f32.gmra.mrb[156].mxu0 %vm211_vm0, %v5681_v31  ;;  %5413 = vst.msk [vmem:[#allocation3 + $0xd0] sm:$0xff] %vm2673_vm13, %v5395_v5 }
 0xefb   :  { %8648 = vmatpush3.bf16.xpose.msk.msra.mxu0 %vm10047_vm2, %v8643_v52  ;;  %8006 = vmatprep.mubr.msk.f32.mxu0 %vm211_vm0, %v5682_v58 }
 0xefc   :  { %8651 = vmatprep.subr.msk.bf16.mxu0 %vm10047_vm2, %v8649_v44 }
 0xefd   :  { %v5393_v26 = vpop.permute.xlu1 %5392 }
 0xefe   :  { %8007 = vmatmul.mubr.msk.f32.gmra.mrb[158].mxu0 %vm211_vm0, %v5683_v43  ;;  %5412 = vst.msk [vmem:[#allocation3 + $0xc0] sm:$0xff] %vm2673_vm13, %v5393_v26 }
 0xeff   :  { %8025 = vmatprep.mubr.msk.f32.mxu0 %vm882_vm1, %v11937_v36 }
 0xf01   :  { %v5397_v35 = vpop.permute.xlu1 %5396 }
 0xf02   :  { %5414 = vst.msk [vmem:[#allocation3 + $0xe0] sm:$0xff] %vm2673_vm13, %v5397_v35 }
 0xf03   :  { %8654 = vmatpush3.bf16.xpose.msk.msra.mxu0 %vm10047_vm2, %v8649_v44 }
 0xf04   :  { %8657 = vmatprep.subr.msk.bf16.mxu0 %vm10047_vm2, %v8655_v40 }
 0xf0b   :  { %8660 = vmatpush3.bf16.xpose.msk.msra.mxu0 %vm10047_vm2, %v8655_v40 }
 0xf12   :  { %8026 = vmatmul.mubr.msk.f32.vlgmr.msra.gmra.mrb[160].mxu0 %vm882_vm1, %v11938_v21 }
 0xf13   :  { %8028 = vmatprep.mubr.msk.f32.mxu0 %vm882_vm1, %v11939_v9 }
 0xf16   :  { %8029 = vmatmul.mubr.msk.f32.gmra.mrb[162].mxu0 %vm882_vm1, %v11940_v0 }
 0xf17   :  { %8031 = vmatprep.mubr.msk.f32.mxu0 %vm882_vm1, %v11941_v10 }
 0xf1a   :  { %8032 = vmatmul.mubr.msk.f32.gmra.mrb[164].mxu0 %vm882_vm1, %v11942_v22 }
 0xf1b   :  { %8034 = vmatprep.mubr.msk.f32.mxu0 %vm882_vm1, %v11943_v63 }
 0xf1e   :  { %8035 = vmatmul.mubr.msk.f32.gmra.mrb[166].mxu0 %vm882_vm1, %v11944_v6 }
 0xfc5   :  { %v7999_v53 = vpop.f32.mrb[152].mxu0 }
 0xfc6   :  { %5814 = vst.msk [vmem:[#allocation3 + $0x98] sm:$0xff] %vm882_vm1, %v7999_v53  ;;  %v5774_v45 = vpop.f32.mrb[153].mxu0 }
 0xfc7   :  { %5813 = vst.msk [vmem:[#allocation3 + $0x88] sm:$0xff] %vm882_vm1, %v5774_v45 }
 0xfc9   :  { %v8002_v42 = vpop.f32.mrb[154].mxu0 }
 0xfca   :  { %5816 = vst.msk [vmem:[#allocation3 + $0xb8] sm:$0xff] %vm882_vm1, %v8002_v42  ;;  %v5784_v27 = vpop.f32.mrb[155].mxu0 }
 0xfcb   :  { %5815 = vst.msk [vmem:[#allocation3 + $0xa8] sm:$0xff] %vm882_vm1, %v5784_v27 }
 0xfcd   :  { %v8005_v16 = vpop.f32.mrb[156].mxu0 }
 0xfce   :  { %5818 = vst.msk [vmem:[#allocation3 + $0xd8] sm:$0xff] %vm882_vm1, %v8005_v16  ;;  %v5794_v61 = vpop.f32.mrb[157].mxu0 }
 0xfcf   :  { %5817 = vst.msk [vmem:[#allocation3 + $0xc8] sm:$0xff] %vm882_vm1, %v5794_v61 }
 0xfd1   :  { %v8008_v49 = vpop.f32.mrb[158].mxu0 }
 0xfd2   :  { %5820 = vst.msk [vmem:[#allocation3 + $0xf8] sm:$0xff] %vm882_vm1, %v8008_v49  ;;  %v5804_v23 = vpop.f32.mrb[159].mxu0 }
 0xfd3   :  { %5819 = vst.msk [vmem:[#allocation3 + $0xe8] sm:$0xff] %vm882_vm1, %v5804_v23 }
 0xfe5   :  { %v8027_v48 = vpop.f32.mrb[160].mxu0 }
 0xfe6   :  { %v5991_v60 = vpop.f32.mrb[161].mxu0  ;;  %v5997_v47 = vadd.f32 %v8027_v48, %v10338_v18 }
 0xfe7   :  { %v5992_v19 = vadd.f32 %v5991_v60, %v10341_v20 }
 0xfe8   :  { %v6031_v50 = vsel %vm211_vm0, %v5997_v47, -inf }
 0xfe9   :  { %v8030_v57 = vpop.f32.mrb[162].mxu0  ;;  %v6030_v34 = vsel %vm211_vm0, %v5992_v19, -inf }
 0xfea   :  { %v6001_v51 = vpop.f32.mrb[163].mxu0  ;;  %v6007_v3 = vadd.f32 %v8030_v57, %v10351_v41 }
 0xfeb   :  { %v6002_v39 = vadd.f32 %v6001_v51, %v10353_v29 }
 0xfec   :  { %v6033_v38 = vsel %vm211_vm0, %v6007_v3, -inf }
 0xfed   :  { %v8033_v46 = vpop.f32.mrb[164].mxu0  ;;  %v6032_v58 = vsel %vm211_vm0, %v6002_v39, -inf }
 0xfee   :  { %v6017_v55 = vadd.f32 %v8033_v46, %v10343_v25  ;;  %v6011_v7 = vpop.f32.mrb[165].mxu0 }
 0xfef   :  { %v6012_v1 = vadd.f32 %v6011_v7, %v10348_v37 }
 0xff0   :  { %v6036_v12 = vsel %vm211_vm0, %v6017_v55, -inf }
 0xff1   :  { %v6037_v8 = vmax.f32 %v6031_v50, %v6036_v12  ;;  %v6034_v18 = vsel %vm211_vm0, %v6012_v1, -inf  ;;  %v8036_v20 = vpop.f32.mrb[166].mxu0 }
 0xff2   :  { %v6035_v59 = vmax.f32 %v6030_v34, %v6034_v18  ;;  %v6027_v25 = vadd.f32 %v8036_v20, %v10359_v15  ;;  %v6021_v56 = vpop.f32.mrb[167].mxu0 }
 0xff3   :  { %v6022_v37 = vadd.f32 %v6021_v56, %v10366_v24  ;;  %v6340_v56 = vld [vmem:[#allocation9 + $0x10] sm:$0xff] }
 0xff4   :  { %v6042_v31 = vmax.f32 %v6035_v59, %v6037_v8  ;;  %v6040_v41 = vsel %vm211_vm0, %v6027_v25, -inf }
 0xff5   :  { %v6041_v43 = vmax.f32 %v6033_v38, %v6040_v41  ;;  %v6038_v29 = vsel %vm211_vm0, %v6022_v37, -inf  ;;  %v6345_v38 = vld [vmem:[#allocation9 + $0x38] sm:$0xff] }
 0xff6   :  { %v6039_v62 = vmax.f32 %v6032_v58, %v6038_v29 }
 0xff8   :  { %v6043_v52 = vmax.f32 %v6039_v62, %v6041_v43 }
 0xffa   :  { %v6044_v14 = vmax.f32 %v6042_v31, %v6043_v52 }
 0xffc   :  { %v6045_v11 = vrot.slane %v6044_v14, 4 }
 0xffe   :  { %v6046_v17 = vmax.f32 %v6044_v14, %v6045_v11  ;;  %v6342_v14 = vld [vmem:[#allocation9 + $0x20] sm:$0xff]  ;;  %v6344_v11 = vld [vmem:[#allocation9 + $0x30] sm:$0xff] }
0x1000   :  { %v6047_v30 = vrot.slane %v6046_v17, 2 }
0x1002   :  { %v6048_v15 = vmax.f32 %v6046_v17, %v6047_v30 }
0x1004   :  { %v6049_v5 = vrot.slane %v6048_v15, 1 }
0x1006   :  { %v6050_v44 = vmax.f32 %v6048_v15, %v6049_v5 }
0x1008   :  { %v6051_v24 = vsub.f32 %v5992_v19, %v6050_v44  ;;  %v6052_v26 = vsub.f32 %v5997_v47, %v6050_v44  ;;  %v6053_v13 = vsub.f32 %v6002_v39, %v6050_v44  ;;  %v6054_v4 = vsub.f32 %v6007_v3, %v6050_v44 }
0x1009   :  { %v6055_v54 = vsub.f32 %v6012_v1, %v6050_v44  ;;  %v6056_v36 = vsub.f32 %v6017_v55, %v6050_v44  ;;  %v6057_v35 = vsub.f32 %v6022_v37, %v6050_v44  ;;  %v6058_v40 = vsub.f32 %v6027_v25, %v6050_v44  ;;  %v6338_v25 = vld [vmem:[#allocation9] sm:$0xff]  ;;  %v6343_v37 = vld [vmem:[#allocation9 + $0x28] sm:$0xff] }
0x100a   :  { %v6059_v21 = vmul.f32 1.442695, %v6051_v24  ;;  %v6061_v9 = vmul.f32 1.442695, %v6052_v26  ;;  %v6063_v0 = vmul.f32 1.442695, %v6053_v13  ;;  %v8679_v41 = vpack.c.bf16 %v6340_v56, %v6338_v25 }
0x100b   :  { %v6065_v10 = vmul.f32 1.442695, %v6054_v4  ;;  %v6067_v22 = vmul.f32 1.442695, %v6055_v54  ;;  %v6069_v63 = vmul.f32 1.442695, %v6056_v36  ;;  %v8681_v58 = vpack.c.bf16 %v6345_v38, %v6343_v37 }
0x100c   :  { %9320 = vpow2.f32 %v6059_v21  ;;  %v6071_v6 = vmul.f32 1.442695, %v6057_v35  ;;  %v6073_v28 = vmul.f32 1.442695, %v6058_v40  ;;  %v6347_v44 = vld [vmem:[#allocation9 + $0x48] sm:$0xff]  ;;  %v6349_v24 = vld [vmem:[#allocation9 + $0x58] sm:$0xff]  ;;  %v8683_v26 = vpack.c.bf16 %v6344_v11, %v6342_v14 }
0x100d   :  { %9322 = vpow2.f32 %v6061_v9  ;;  %v8685_v13 = vpack.c.bf16 %v6349_v24, %v6347_v44  ;;  %v6346_v4 = vld [vmem:[#allocation9 + $0x40] sm:$0xff]  ;;  %v6348_v54 = vld [vmem:[#allocation9 + $0x50] sm:$0xff]  ;;  %v6351_v36 = vld [vmem:[#allocation9 + $0x68] sm:$0xff] }
0x100e   :  { %9324 = vpow2.f32 %v6063_v0  ;;  %v6353_v35 = vld [vmem:[#allocation9 + $0x78] sm:$0xff]  ;;  %v8687_v40 = vpack.c.bf16 %v6348_v54, %v6346_v4  ;;  %v6350_v9 = vld [vmem:[#allocation9 + $0x60] sm:$0xff]  ;;  %v6352_v0 = vld [vmem:[#allocation9 + $0x70] sm:$0xff] }
0x100f   :  { %9326 = vpow2.f32 %v6065_v10  ;;  %v8689_v21 = vpack.c.bf16 %v6353_v35, %v6351_v36  ;;  %v6355_v10 = vld [vmem:[#allocation9 + $0x88] sm:$0xff]  ;;  %v6374_v56 = vld [vmem:[#allocation9 + $0x120] sm:$0xff]  ;;  %v6376_v37 = vld [vmem:[#allocation9 + $0x130] sm:$0xff] }
0x1010   :  { %9328 = vpow2.f32 %v6067_v22  ;;  %v6357_v22 = vld [vmem:[#allocation9 + $0x98] sm:$0xff]  ;;  %v6379_v38 = vld [vmem:[#allocation9 + $0x148] sm:$0xff]  ;;  %v6308_v24 = vld [vmem:[#allocation3 + $0x10] sm:$0xff] }
0x1011   :  { %9330 = vpow2.f32 %v6069_v63  ;;  %v8691_v63 = vpack.c.bf16 %v6352_v0, %v6350_v9  ;;  %v6309_v44 = vld [vmem:[#allocation3 + $0x18] sm:$0xff]  ;;  %v6312_v54 = vld [vmem:[#allocation3 + $0x30] sm:$0xff]  ;;  %v6315_v36 = vld [vmem:[#allocation3 + $0x48] sm:$0xff] }
0x1012   :  { %9332 = vpow2.f32 %v6071_v6  ;;  %v8693_v6 = vpack.c.bf16 %v6357_v22, %v6355_v10  ;;  %v6313_v4 = vld [vmem:[#allocation3 + $0x38] sm:$0xff]  ;;  %v6314_v35 = vld [vmem:[#allocation3 + $0x40] sm:$0xff]  ;;  %v6319_v9 = vld [vmem:[#allocation3 + $0x68] sm:$0xff] }
0x1013   :  { %9334 = vpow2.f32 %v6073_v28  ;;  %v6354_v28 = vld [vmem:[#allocation9 + $0x80] sm:$0xff]  ;;  %v6321_v10 = vld [vmem:[#allocation3 + $0x78] sm:$0xff]  ;;  %v6320_v22 = vld [vmem:[#allocation3 + $0x70] sm:$0xff] }
0x1014   :  { %v6318_v0 = vld [vmem:[#allocation3 + $0x60] sm:$0xff] }
0x1016   :  { %v9321_v2 = vpop.eup %9320 }
0x1017   :  { %v9323_v33 = vpop.eup %9322  ;;  %v6075_v53 = vsel %vm211_vm0, %v9321_v2, 0.0 }
0x1018   :  { %v9325_v45 = vpop.eup %9324  ;;  %v6076_v42 = vsel %vm211_vm0, %v9323_v33, 0.0 }
0x1019   :  { %v9327_v27 = vpop.eup %9326  ;;  %v6077_v16 = vadd.f32 %v6076_v42, %v6075_v53  ;;  %v6078_v61 = vsel %vm211_vm0, %v9325_v45, 0.0  ;;  %v6361_v53 = vld [vmem:[#allocation9 + $0xb8] sm:$0xff] }
0x101a   :  { %v9329_v49 = vpop.eup %9328  ;;  %v6080_v48 = vsel %vm211_vm0, %v9327_v27, 0.0 }
0x101b   :  { %v6079_v23 = vadd.f32 %v6078_v61, %v6077_v16  ;;  %v9331_v60 = vpop.eup %9330  ;;  %v6082_v51 = vsel %vm211_vm0, %v9329_v49, 0.0  ;;  %v6358_v16 = vld [vmem:[#allocation9 + $0xa0] sm:$0xff]  ;;  %v6360_v61 = vld [vmem:[#allocation9 + $0xb0] sm:$0xff] }
0x101c   :  { %v9333_v47 = vpop.eup %9332  ;;  %v6084_v46 = vsel %vm211_vm0, %v9331_v60, 0.0 }
0x101d   :  { %v6081_v57 = vadd.f32 %v6080_v48, %v6079_v23  ;;  %v9335_v55 = vpop.eup %9334  ;;  %v6086_v1 = vsel %vm211_vm0, %v9333_v47, 0.0  ;;  %v6365_v23 = vld [vmem:[#allocation9 + $0xd8] sm:$0xff]  ;;  %v8699_v48 = vpack.c.bf16 %v6360_v61, %v6358_v16  ;;  %v6386_v61 = vld [vmem:[%s11793_s3] sm:$0x3]  ;;  %s9444_s3 = smov [#allocation10]  }
0x101e   :  { %v6088_v3 = vsel %vm211_vm0, %v9335_v55, 0.0  ;;  %s6644_s5 = sshll.u32 %s9444_s3, 4  ;;  %s6645_s5 = int_to_ptr.vmem [resolvable:$true] %s6644_s5 }
0x101f   :  { %v6083_v19 = vadd.f32 %v6082_v51, %v6081_v57  ;;  %v6362_v57 = vld [vmem:[#allocation9 + $0xc0] sm:$0xff]  ;;  %v6364_v51 = vld [vmem:[#allocation9 + $0xd0] sm:$0xff]  ;;  %s9404_s6 = scalar_lea.vmem %s6645_s5, 4096  ;;  %p9409_p11 = scmp.lt.s32.totalorder %s6645_s5, %s6645_s5 }
0x1020   :  { %p9405_p10 = scmp.ne.s32.totalorder %s6645_s5, %s9404_s6  ;;  %p9410_p12 = scmp.lt.s32.totalorder %s9404_s6, %s9404_s6 }
0x1021   :  { %v6085_v7 = vadd.f32 %v6084_v46, %v6083_v19  ;;  %v6369_v19 = vld [vmem:[#allocation9 + $0xf8] sm:$0xff]  ;;  %v8703_v46 = vpack.c.bf16 %v6364_v51, %v6362_v57 }
0x1022   :  { %p9411_p13 = por %p9410_p12, %p9409_p11 }
0x1023   :  { %v6087_v50 = vadd.f32 %v6086_v1, %v6085_v7  ;;  %v6366_v7 = vld [vmem:[#allocation9 + $0xe0] sm:$0xff]  ;;  %v6368_v1 = vld [vmem:[#allocation9 + $0xf0] sm:$0xff] }
0x1024   :  { %p9412_p0 = pnand %p9411_p13, %p9405_p10 }
0x1025   :  { %v6089_v12 = vadd.f32 %v6088_v3, %v6087_v50  ;;  %v6371_v50 = vld [vmem:[#allocation9 + $0x108] sm:$0xff]  ;;  %v6373_v3 = vld [vmem:[#allocation9 + $0x118] sm:$0xff] }
0x1027   :  { %v6090_v34 = vrot.slane %v6089_v12, 4 }
0x1029   :  { %v6091_v39 = vadd.f32 %v6090_v34, %v6089_v12  ;;  %v8707_v12 = vpack.c.bf16 %v6368_v1, %v6366_v7  ;;  %v8709_v34 = vpack.c.bf16 %v6373_v3, %v6371_v50 }
0x102b   :  { %v6092_v8 = vrot.slane %v6091_v39, 2 }
0x102d   :  { %v6093_v18 = vadd.f32 %v6092_v8, %v6091_v39  ;;  %v6370_v39 = vld [vmem:[#allocation9 + $0x100] sm:$0xff]  ;;  %v6372_v8 = vld [vmem:[#allocation9 + $0x110] sm:$0xff] }
0x102f   :  { %v6094_v20 = vrot.slane %v6093_v18, 1 }
0x1031   :  { %v6095_v59 = vadd.f32 %v6094_v20, %v6093_v18  ;;  %v6375_v18 = vld [vmem:[#allocation9 + $0x128] sm:$0xff]  ;;  %v6377_v20 = vld [vmem:[#allocation9 + $0x138] sm:$0xff] }
0x1032   :  { %v8713_v25 = vpack.c.bf16 %v6377_v20, %v6375_v18 }
0x1033   :  { %9336 = vrcp.f32 %v6095_v59  ;;  %v8711_v59 = vpack.c.bf16 %v6372_v8, %v6370_v39 }
0x103d   :  { %v9337_v31 = vpop.eup %9336 }
0x103e   :  { %v6097_v43 = vmul.f32 %v9337_v31, %v9321_v2  ;;  %v6098_v29 = vmul.f32 %v9337_v31, %v9323_v33  ;;  %v6099_v62 = vmul.f32 %v9337_v31, %v9325_v45  ;;  %v6100_v52 = vmul.f32 %v9337_v31, %v9327_v27  ;;  %v6356_v2 = vld [vmem:[#allocation9 + $0x90] sm:$0xff]  ;;  %v6359_v33 = vld [vmem:[#allocation9 + $0xa8] sm:$0xff] }
0x103f   :  { %v6101_v17 = vmul.f32 %v9337_v31, %v9329_v49  ;;  %v6102_v30 = vmul.f32 %v9337_v31, %v9331_v60  ;;  %v6103_v15 = vmul.f32 %v9337_v31, %v9333_v47  ;;  %v6104_v5 = vmul.f32 %v9337_v31, %v9335_v55  ;;  %v6307_v45 = vld [vmem:[#allocation3 + $0x8] sm:$0xff]  ;;  %v6381_v31 = vld [vmem:[#allocation9 + $0x158] sm:$0xff] }
0x1040   :  { %8053 = vmatprep.mubr.msk.f32.mxu1 %vm211_vm0, %v6097_v43  ;;  %v8695_v42 = vpack.c.bf16 %v6356_v2, %v6354_v28  ;;  %v8697_v27 = vpack.c.bf16 %v6361_v53, %v6359_v33  ;;  %v6363_v49 = vld [vmem:[#allocation9 + $0xc8] sm:$0xff]  ;;  %v6378_v43 = vld [vmem:[#allocation9 + $0x140] sm:$0xff] }
0x1041   :  { %8054 = vmatmul.mubr.msk.f32.vlgmr.msra.gmra.mrb[112].mxu1 %vm211_vm0, %v6098_v29  ;;  %v8701_v60 = vpack.c.bf16 %v6365_v23, %v6363_v49  ;;  %v6367_v47 = vld [vmem:[#allocation9 + $0xe8] sm:$0xff]  ;;  %v6380_v29 = vld [vmem:[#allocation9 + $0x150] sm:$0xff] }
0x1042   :  { %8680 = vmatpush1.bf16.msra.mxu1 %v8679_v41  ;;  %8056 = vmatprep.mubr.msk.f32.mxu1 %vm211_vm0, %v6099_v62  ;;  %v8705_v55 = vpack.c.bf16 %v6369_v19, %v6367_v47  ;;  %v8715_v41 = vpack.c.bf16 %v6376_v37, %v6374_v56  ;;  %v6383_v62 = vld [vmem:[#allocation9 + $0x168] sm:$0xff]  ;;  %v8719_v14 = vpack.c.bf16 %v6380_v29, %v6378_v43 }
0x1043   :  { %8682 = vmatprep.subr.bf16.mxu1 %v8681_v58  ;;  %v8717_v58 = vpack.c.bf16 %v6381_v31, %v6379_v38 }
0x1045   :  { %8057 = vmatmul.mubr.msk.f32.gmra.mrb[114].mxu1 %vm211_vm0, %v6100_v52  ;;  %v6385_v52 = vld [vmem:[#allocation9 + $0x178] sm:$0xff] }
0x1046   :  { %8684 = vmatpush1.bf16.msra.mxu1 %v8683_v26  ;;  %8059 = vmatprep.mubr.msk.f32.mxu1 %vm211_vm0, %v6101_v17  ;;  %v8721_v11 = vpack.c.bf16 %v6385_v52, %v6383_v62  ;;  %v6382_v17 = vld [vmem:[#allocation9 + $0x160] sm:$0xff]  ;;  %v6311_v26 = vld [vmem:[#allocation3 + $0x28] sm:$0xff] }
0x1047   :  { %8686 = vmatprep.subr.bf16.mxu1 %v8685_v13  ;;  %v6310_v13 = vld [vmem:[#allocation3 + $0x20] sm:$0xff] }
0x1049   :  { %8060 = vmatmul.mubr.msk.f32.gmra.mrb[116].mxu1 %vm211_vm0, %v6102_v30  ;;  %v6384_v30 = vld [vmem:[#allocation9 + $0x170] sm:$0xff] }
0x104a   :  { %8688 = vmatpush1.bf16.msra.mxu1 %v8687_v40  ;;  %8062 = vmatprep.mubr.msk.f32.mxu1 %vm211_vm0, %v6103_v15  ;;  %v8723_v15 = vpack.c.bf16 %v6384_v30, %v6382_v17  ;;  %v6317_v40 = vld [vmem:[#allocation3 + $0x58] sm:$0xff] }
0x104b   :  { %8690 = vmatprep.subr.bf16.mxu1 %v8689_v21  ;;  %v6316_v21 = vld [vmem:[#allocation3 + $0x50] sm:$0xff] }
0x104d   :  { %8063 = vmatmul.mubr.msk.f32.gmra.mrb[118].mxu1 %vm211_vm0, %v6104_v5  ;;  %v6306_v5 = vld [vmem:[#allocation3] sm:$0xff] }
0x104e   :  { %8692 = vmatpush1.bf16.msra.mxu1 %v8691_v63  ;;  %6993 = vmatprep.mubr.msk.f32.mxu1 %vm211_vm0, %v6307_v45 }
0x104f   :  { %8694 = vmatprep.subr.bf16.mxu1 %v8693_v6 }
0x1052   :  { %8696 = vmatpush1.bf16.msra.mxu1 %v8695_v42 }
0x1053   :  { %8698 = vmatprep.subr.bf16.mxu1 %v8697_v27  ;;  %v11945_v27 = vld [vmem:[#allocation16_spill] sm:$0xff] }
0x1054   :  { %v6390_v16 = vsub.s32 0, %v11945_v27  ;;  %v6394_v49 = vsub.s32 1, %v11945_v27 }
0x1056   :  { %8700 = vmatpush1.bf16.msra.mxu1 %v8699_v48  ;;  %v11704_v23 = vrot.slane %v6386_v61, %v6390_v16  ;;  %v11706_v48 = vrot.slane %v6386_v61, %v6394_v49 }
0x1057   :  { %8702 = vmatprep.subr.bf16.mxu1 %v8701_v60 }
0x105a   :  { %8704 = vmatpush1.bf16.msra.mxu1 %v8703_v46 }
0x105b   :  { %8706 = vmatprep.subr.bf16.mxu1 %v8705_v55 }
0x105e   :  { %8708 = vmatpush1.bf16.msra.mxu1 %v8707_v12 }
0x105f   :  { %8710 = vmatprep.subr.bf16.mxu1 %v8709_v34 }
0x1062   :  { %8712 = vmatpush1.bf16.msra.mxu1 %v8711_v59 }
0x1063   :  { %8714 = vmatprep.subr.bf16.mxu1 %v8713_v25 }
0x1066   :  { %8716 = vmatpush1.bf16.msra.mxu1 %v8715_v41 }
0x1067   :  { %8718 = vmatprep.subr.bf16.mxu1 %v8717_v58 }
0x106a   :  { %8720 = vmatpush1.bf16.msra.mxu1 %v8719_v14 }
0x106b   :  { %8722 = vmatprep.subr.bf16.mxu1 %v8721_v11 }
0x106e   :  { %8724 = vmatpush1.bf16.msra.mxu1 %v8723_v15 }
0x1071   :  { %6511 = vmatmul.mubr.f32.vlgmr.msra.gmra.mrb[120].mxu1 %v6306_v5 }
0x1072   :  { %6994 = vmatprep.mubr.msk.f32.mxu1 %vm211_vm0, %v6309_v44 }
0x1075   :  { %6517 = vmatmul.mubr.f32.gmra.mrb[122].mxu1 %v6308_v24  ;;  %v6322_v24 = vld [vmem:[#allocation3 + $0x80] sm:$0xff] }
0x1076   :  { %6995 = vmatprep.mubr.msk.f32.mxu1 %vm211_vm0, %v6311_v26 }
0x1079   :  { %6523 = vmatmul.mubr.f32.gmra.mrb[124].mxu1 %v6310_v13 }
0x107a   :  { %6996 = vmatprep.mubr.msk.f32.mxu1 %vm211_vm0, %v6313_v4  ;;  %v6324_v4 = vld [vmem:[#allocation3 + $0x90] sm:$0xff] }
0x107d   :  { %6529 = vmatmul.mubr.f32.gmra.mrb[126].mxu1 %v6312_v54  ;;  %v4914_v54 = vpop.permute.xlu1 %4913 }
0x107e   :  { %6997 = vmatprep.mubr.msk.f32.mxu1 %vm211_vm0, %v6315_v36 }
0x1081   :  { %6535 = vmatmul.mubr.f32.gmra.mrb[128].mxu1 %v6314_v35 }
0x1082   :  { %6998 = vmatprep.mubr.msk.f32.mxu1 %vm211_vm0, %v6317_v40  ;;  %v6326_v40 = vld [vmem:[#allocation3 + $0xa0] sm:$0xff] }
0x1085   :  { %6541 = vmatmul.mubr.f32.gmra.mrb[130].mxu1 %v6316_v21 }
0x1086   :  { %6999 = vmatprep.mubr.msk.f32.mxu1 %vm211_vm0, %v6319_v9 }
0x1089   :  { %6547 = vmatmul.mubr.f32.gmra.mrb[132].mxu1 %v6318_v0  ;;  %v6328_v0 = vld [vmem:[#allocation3 + $0xb0] sm:$0xff] }
0x108a   :  { %7000 = vmatprep.mubr.msk.f32.mxu1 %vm211_vm0, %v6321_v10  ;;  %v5399_v10 = vpop.permute.xlu1 %5398 }
0x108d   :  { %6553 = vmatmul.mubr.f32.gmra.mrb[134].mxu1 %v6320_v22 }
0x1114   :  { %v8055_v63 = vpop.f32.mrb[112].mxu1 }
0x1115   :  { %6276 = vrot.lane.b32.xlu0 %v8055_v63, %s9441_s27  ;;  %v6227_v6 = vpop.f32.mrb[113].mxu1 }
0x1118   :  { %v8058_v28 = vpop.f32.mrb[114].mxu1 }
0x1119   :  { %6274 = vrot.lane.b32.xlu0 %v6227_v6, %s9441_s27  ;;  %v6237_v2 = vpop.f32.mrb[115].mxu1  ;;  %v6330_v6 = vld [vmem:[#allocation3 + $0xc0] sm:$0xff] }
0x111c   :  { %v8061_v33 = vpop.f32.mrb[116].mxu1 }
0x111d   :  { %6280 = vrot.lane.b32.xlu0 %v8058_v28, %s9441_s27  ;;  %v6247_v53 = vpop.f32.mrb[117].mxu1 }
0x1120   :  { %v8064_v45 = vpop.f32.mrb[118].mxu1 }
0x1121   :  { %6278 = vrot.lane.b32.xlu0 %v6237_v2, %s9441_s27  ;;  %v6257_v42 = vpop.f32.mrb[119].mxu1 }
0x1125   :  { %6284 = vrot.lane.b32.xlu0 %v8061_v33, %s9441_s27  ;;  %v6332_v33 = vld [vmem:[#allocation3 + $0xd0] sm:$0xff] }
0x1129   :  { %6282 = vrot.lane.b32.xlu0 %v6247_v53, %s9441_s27 }
0x112d   :  { %4444 = vrot.lane.b32.xlu0 %v11381_v32, %s9441_s27 }
0x1131   :  { %6286 = vrot.lane.b32.xlu0 %v6257_v42, %s9441_s27 }
0x1135   :  { %6288 = vrot.lane.b32.xlu0 %v8064_v45, %s9441_s27  ;;  %v6334_v45 = vld [vmem:[#allocation3 + $0xe0] sm:$0xff] }
0x1144   :  { %v6512_v60 = vpop.f32.mrb[120].mxu1 }
0x1145   :  { %v6513_v57 = vadd.f32 %v6512_v60, %v11704_v23  ;;  %v6514_v32 = vpop.f32.mrb[121].mxu1 }
0x1146   :  { %v6515_v51 = vadd.f32 %v6514_v32, %v11706_v48 }
0x1147   :  { %6607 = vst [vmem:[#allocation10] sm:$0xff] %v6513_v57 }
0x1148   :  { %6608 = vst.msk [vmem:[#allocation10 + $0x8] sm:$0xff] %vm211_vm0, %v6515_v51  ;;  %v6518_v47 = vpop.f32.mrb[122].mxu1 }
0x1149   :  { %v6519_v19 = vadd.f32 %v6518_v47, %v11704_v23  ;;  %v6520_v46 = vpop.f32.mrb[123].mxu1 }
0x114a   :  { %v6521_v55 = vadd.f32 %v6520_v46, %v11706_v48 }
0x114b   :  { %6609 = vst [vmem:[#allocation10 + $0x10] sm:$0xff] %v6519_v19 }
0x114c   :  { %6610 = vst.msk [vmem:[#allocation10 + $0x18] sm:$0xff] %vm211_vm0, %v6521_v55  ;;  %v6524_v7 = vpop.f32.mrb[124].mxu1 }
0x114d   :  { %v6525_v1 = vadd.f32 %v6524_v7, %v11704_v23  ;;  %v6526_v50 = vpop.f32.mrb[125].mxu1 }
0x114e   :  { %v6527_v3 = vadd.f32 %v6526_v50, %v11706_v48 }
0x114f   :  { %6611 = vst [vmem:[#allocation10 + $0x20] sm:$0xff] %v6525_v1 }
0x1150   :  { %6612 = vst.msk [vmem:[#allocation10 + $0x28] sm:$0xff] %vm211_vm0, %v6527_v3  ;;  %v6530_v12 = vpop.f32.mrb[126].mxu1 }
0x1151   :  { %v6531_v34 = vadd.f32 %v6530_v12, %v11704_v23  ;;  %v6532_v39 = vpop.f32.mrb[127].mxu1 }
0x1152   :  { %v6533_v8 = vadd.f32 %v6532_v39, %v11706_v48 }
0x1153   :  { %6613 = vst [vmem:[#allocation10 + $0x30] sm:$0xff] %v6531_v34 }
0x1154   :  { %6614 = vst.msk [vmem:[#allocation10 + $0x38] sm:$0xff] %vm211_vm0, %v6533_v8  ;;  %v6536_v18 = vpop.f32.mrb[128].mxu1 }
0x1155   :  { %v6537_v20 = vadd.f32 %v6536_v18, %v11704_v23  ;;  %v6538_v59 = vpop.f32.mrb[129].mxu1 }
0x1156   :  { %v6539_v25 = vadd.f32 %v6538_v59, %v11706_v48 }
0x1157   :  { %6615 = vst [vmem:[#allocation10 + $0x40] sm:$0xff] %v6537_v20 }
0x1158   :  { %6616 = vst.msk [vmem:[#allocation10 + $0x48] sm:$0xff] %vm211_vm0, %v6539_v25  ;;  %v6542_v56 = vpop.f32.mrb[130].mxu1 }
0x1159   :  { %v6543_v37 = vadd.f32 %v6542_v56, %v11704_v23  ;;  %v6544_v38 = vpop.f32.mrb[131].mxu1 }
0x115a   :  { %v6545_v31 = vadd.f32 %v6544_v38, %v11706_v48 }
0x115b   :  { %6617 = vst [vmem:[#allocation10 + $0x50] sm:$0xff] %v6543_v37 }
0x115c   :  { %6618 = vst.msk [vmem:[#allocation10 + $0x58] sm:$0xff] %vm211_vm0, %v6545_v31  ;;  %v6548_v41 = vpop.f32.mrb[132].mxu1 }
0x115d   :  { %v6549_v58 = vadd.f32 %v6548_v41, %v11704_v23  ;;  %v6550_v43 = vpop.f32.mrb[133].mxu1 }
0x115e   :  { %v6551_v29 = vadd.f32 %v6550_v43, %v11706_v48 }
0x115f   :  { %6619 = vst [vmem:[#allocation10 + $0x60] sm:$0xff] %v6549_v58 }
0x1160   :  { %6620 = vst.msk [vmem:[#allocation10 + $0x68] sm:$0xff] %vm211_vm0, %v6551_v29  ;;  %v6554_v62 = vpop.f32.mrb[134].mxu1 }
0x1161   :  { %v6555_v52 = vadd.f32 %v6554_v62, %v11704_v23  ;;  %v6556_v14 = vpop.f32.mrb[135].mxu1 }
0x1162   :  { %v6557_v11 = vadd.f32 %v6556_v14, %v11706_v48 }
0x1163   :  { %6621 = vst [vmem:[#allocation10 + $0x70] sm:$0xff] %v6555_v52 }
0x1164   :  { %6622 = vst.msk [vmem:[#allocation10 + $0x78] sm:$0xff] %vm211_vm0, %v6557_v11 }
0x1187   :  { %v6277_v17 = vpop.permute.xlu0 %6276 }
0x1188   :  { %6299 = vst.msk [vmem:[#allocation3 + $0x98] sm:$0xff] %vm1717_vm11, %v6277_v17 }
0x118b   :  { %v6275_v30 = vpop.permute.xlu0 %6274 }
0x118c   :  { %6298 = vst.msk [vmem:[#allocation3 + $0x88] sm:$0xff] %vm1717_vm11, %v6275_v30 }
0x118f   :  { %v6281_v15 = vpop.permute.xlu0 %6280  ;;  %v6325_v26 = vld [vmem:[#allocation3 + $0x98] sm:$0xff] }
0x1190   :  { %6301 = vst.msk [vmem:[#allocation3 + $0xb8] sm:$0xff] %vm1717_vm11, %v6281_v15 }
0x1193   :  { %v6279_v5 = vpop.permute.xlu0 %6278  ;;  %v6323_v44 = vld [vmem:[#allocation3 + $0x88] sm:$0xff] }
0x1194   :  { %6300 = vst.msk [vmem:[#allocation3 + $0xa8] sm:$0xff] %vm1717_vm11, %v6279_v5  ;;  %7001 = vmatprep.mubr.msk.f32.mxu1 %vm211_vm0, %v6323_v44 }
0x1195   :  { %6559 = vmatmul.mubr.f32.gmra.mrb[136].mxu1 %v6322_v24 }
0x1196   :  { %7002 = vmatprep.mubr.msk.f32.mxu1 %vm211_vm0, %v6325_v26 }
0x1197   :  { %v6285_v13 = vpop.permute.xlu0 %6284  ;;  %v6329_v21 = vld [vmem:[#allocation3 + $0xb8] sm:$0xff] }
0x1198   :  { %6303 = vst.msk [vmem:[#allocation3 + $0xd8] sm:$0xff] %vm1717_vm11, %v6285_v13 }
0x1199   :  { %6565 = vmatmul.mubr.f32.gmra.mrb[138].mxu1 %v6324_v4 }
0x119b   :  { %v6283_v36 = vpop.permute.xlu0 %6282  ;;  %v6327_v35 = vld [vmem:[#allocation3 + $0xa8] sm:$0xff] }
0x119c   :  { %6302 = vst.msk [vmem:[#allocation3 + $0xc8] sm:$0xff] %vm1717_vm11, %v6283_v36  ;;  %7003 = vmatprep.mubr.msk.f32.mxu1 %vm211_vm0, %v6327_v35 }
0x119d   :  { %6571 = vmatmul.mubr.f32.gmra.mrb[140].mxu1 %v6326_v40 }
0x119e   :  { %7004 = vmatprep.mubr.msk.f32.mxu1 %vm211_vm0, %v6329_v21 }
0x119f   :  { %v4445_v9 = vpop.permute.xlu0 %4444  ;;  %v6333_v28 = vld [vmem:[#allocation3 + $0xd8] sm:$0xff] }
0x11a0   :  { %4461 = vst.msk [vmem:[#allocation3 + $0xf0] sm:$0xff] %vm1717_vm11, %v4445_v9 }
0x11a1   :  { %4930 = vst.msk [vmem:[#allocation3 + $0xf0] sm:$0xff] %vm2187_vm12, %v4914_v54  ;;  %6577 = vmatmul.mubr.f32.gmra.mrb[142].mxu1 %v6328_v0 }
0x11a2   :  { %5415 = vst.msk [vmem:[#allocation3 + $0xf0] sm:$0xff] %vm2673_vm13, %v5399_v10 }
0x11a3   :  { %v6287_v22 = vpop.permute.xlu0 %6286  ;;  %v6331_v63 = vld [vmem:[#allocation3 + $0xc8] sm:$0xff] }
0x11a4   :  { %6304 = vst.msk [vmem:[#allocation3 + $0xe8] sm:$0xff] %vm1717_vm11, %v6287_v22  ;;  %7005 = vmatprep.mubr.msk.f32.mxu1 %vm211_vm0, %v6331_v63 }
0x11a5   :  { %6583 = vmatmul.mubr.f32.gmra.mrb[144].mxu1 %v6330_v6 }
0x11a6   :  { %7006 = vmatprep.mubr.msk.f32.mxu1 %vm211_vm0, %v6333_v28 }
0x11a7   :  { %v6289_v2 = vpop.permute.xlu0 %6288 }
0x11a8   :  { %6305 = vst.msk [vmem:[#allocation3 + $0xf8] sm:$0xff] %vm1717_vm11, %v6289_v2 }
0x11a9   :  { %6589 = vmatmul.mubr.f32.gmra.mrb[146].mxu1 %v6332_v33  ;;  %v6336_v27 = vld [vmem:[#allocation3 + $0xf0] sm:$0xff] }
0x11ab   :  { %v6335_v53 = vld [vmem:[#allocation3 + $0xe8] sm:$0xff] }
0x11ac   :  { %7007 = vmatprep.mubr.msk.f32.mxu1 %vm211_vm0, %v6335_v53 }
0x11ad   :  { %6595 = vmatmul.mubr.f32.gmra.mrb[148].mxu1 %v6334_v45 }
0x11af   :  { %v6337_v42 = vld [vmem:[#allocation3 + $0xf8] sm:$0xff] }
0x11b0   :  { %7008 = vmatprep.mubr.msk.f32.mxu1 %vm211_vm0, %v6337_v42 }
0x11b1   :  { %6601 = vmatmul.mubr.f32.gmra.mrb[150].mxu1 %v6336_v27 }
0x1268   :  { %v6560_v16 = vpop.f32.mrb[136].mxu1 }
0x1269   :  { %v6561_v61 = vadd.f32 %v6560_v16, %v11704_v23  ;;  %v6562_v49 = vpop.f32.mrb[137].mxu1 }
0x126a   :  { %v6563_v60 = vadd.f32 %v6562_v49, %v11706_v48 }
0x126b   :  { %6623 = vst [vmem:[#allocation10 + $0x80] sm:$0xff] %v6561_v61 }
0x126c   :  { %6624 = vst.msk [vmem:[#allocation10 + $0x88] sm:$0xff] %vm211_vm0, %v6563_v60  ;;  %v6566_v57 = vpop.f32.mrb[138].mxu1 }
0x126d   :  { %v6567_v32 = vadd.f32 %v6566_v57, %v11704_v23  ;;  %v6568_v51 = vpop.f32.mrb[139].mxu1 }
0x126e   :  { %v6569_v47 = vadd.f32 %v6568_v51, %v11706_v48 }
0x126f   :  { %6625 = vst [vmem:[#allocation10 + $0x90] sm:$0xff] %v6567_v32 }
0x1270   :  { %6626 = vst.msk [vmem:[#allocation10 + $0x98] sm:$0xff] %vm211_vm0, %v6569_v47  ;;  %v6572_v19 = vpop.f32.mrb[140].mxu1 }
0x1271   :  { %v6573_v46 = vadd.f32 %v6572_v19, %v11704_v23  ;;  %v6574_v55 = vpop.f32.mrb[141].mxu1 }
0x1272   :  { %v6575_v7 = vadd.f32 %v6574_v55, %v11706_v48 }
0x1273   :  { %6627 = vst [vmem:[#allocation10 + $0xa0] sm:$0xff] %v6573_v46 }
0x1274   :  { %6628 = vst.msk [vmem:[#allocation10 + $0xa8] sm:$0xff] %vm211_vm0, %v6575_v7  ;;  %v6578_v1 = vpop.f32.mrb[142].mxu1 }
0x1275   :  { %v6579_v50 = vadd.f32 %v6578_v1, %v11704_v23  ;;  %v6580_v3 = vpop.f32.mrb[143].mxu1 }
0x1276   :  { %v6581_v12 = vadd.f32 %v6580_v3, %v11706_v48 }
0x1277   :  { %6629 = vst [vmem:[#allocation10 + $0xb0] sm:$0xff] %v6579_v50 }
0x1278   :  { %6630 = vst.msk [vmem:[#allocation10 + $0xb8] sm:$0xff] %vm211_vm0, %v6581_v12  ;;  %v6584_v34 = vpop.f32.mrb[144].mxu1 }
0x1279   :  { %v6585_v39 = vadd.f32 %v6584_v34, %v11704_v23  ;;  %v6586_v8 = vpop.f32.mrb[145].mxu1 }
0x127a   :  { %v6587_v18 = vadd.f32 %v6586_v8, %v11706_v48 }
0x127b   :  { %6631 = vst [vmem:[#allocation10 + $0xc0] sm:$0xff] %v6585_v39 }
0x127c   :  { %6632 = vst.msk [vmem:[#allocation10 + $0xc8] sm:$0xff] %vm211_vm0, %v6587_v18  ;;  %v6590_v20 = vpop.f32.mrb[146].mxu1 }
0x127d   :  { %v6591_v59 = vadd.f32 %v6590_v20, %v11704_v23  ;;  %v6592_v25 = vpop.f32.mrb[147].mxu1 }
0x127e   :  { %v6593_v56 = vadd.f32 %v6592_v25, %v11706_v48 }
0x127f   :  { %6633 = vst [vmem:[#allocation10 + $0xd0] sm:$0xff] %v6591_v59 }
0x1280   :  { %6634 = vst.msk [vmem:[#allocation10 + $0xd8] sm:$0xff] %vm211_vm0, %v6593_v56  ;;  %v6596_v37 = vpop.f32.mrb[148].mxu1 }
0x1281   :  { %v6597_v38 = vadd.f32 %v6596_v37, %v11704_v23  ;;  %v6598_v31 = vpop.f32.mrb[149].mxu1 }
0x1282   :  { %v6599_v41 = vadd.f32 %v6598_v31, %v11706_v48 }
0x1283   :  { %6635 = vst [vmem:[#allocation10 + $0xe0] sm:$0xff] %v6597_v38 }
0x1284   :  { %6636 = vst.msk [vmem:[#allocation10 + $0xe8] sm:$0xff] %vm211_vm0, %v6599_v41  ;;  %v6602_v58 = vpop.f32.mrb[150].mxu1 }
0x1285   :  { %v6603_v43 = vadd.f32 %v6602_v58, %v11704_v23  ;;  %v6604_v29 = vpop.f32.mrb[151].mxu1 }
0x1286   :  { %v6605_v62 = vadd.f32 %v6604_v29, %v11706_v48 }
0x1287   :  { %6637 = vst [vmem:[#allocation10 + $0xf0] sm:$0xff] %v6603_v43 }
0x1288   :  { %6638 = vst.msk [vmem:[#allocation10 + $0xf8] sm:$0xff] %vm211_vm0, %v6605_v62 }
0x1289   :  { %9415 = shalt.err (!%p9412_p0)
}
0x128a   :  { %s9416_s9 = scalar_lea.hbm %s11794_s4, 4096 }
0x128b   :  { %p9417_p1 = scmp.ne.s32.totalorder %s11794_s4, %s9416_s9  ;;  %p9420_p2 = scmp.lt.u32.totalorder %s9416_s9, %s11794_s4 }
0x128d   :  { %p9422_p3 = pnand %p9420_p2, %p9417_p1 }
0x128f   :  { %9425 = shalt.err (!%p9422_p3)
}
0x1290   :  { %6650 = dma.vmem_to_hbm [thread:$0]  %s6645_s5, 4096, %s11794_s4, [#allocation6], %s9436_s1, %s9436_s1, %s9437_s13  }
0x1291   :  { %9430 = dma.done.wait [#allocation6], 4096  }
0x1292   :  { %9431 = vsyncadd [#allocation6], 4294963200 }
0x1293   :  { %6654 = vsyncpa [#allocation5], 1 }
0x1294   :  { %6655 = vsyncpa [#allocation8], 1 }
0x1295   :  { %6656 = vsyncpa [#allocation6], 1 }

</bundles_post_ra>
